<compile_context>
chip_gen: v5e
topology: v5e:2x2
jax: 0.10.0
libtpu: 0.0.40
codegen_flags: <defaults>
</compile_context>

<pallas_src>
from functools import partial

import jax
import jax.numpy as jnp
from jax.experimental import pallas as pl
from jax.experimental.pallas import tpu as pltpu

_BN_EPS = 1e-5
_LANE = 128


def _ceil_to(v, m):
    return ((v + m - 1) // m) * m


# -----------------------------------------------------------------------------
# The fused whole-network kernel (one grid step = block_b images)
# -----------------------------------------------------------------------------

def _make_kernel(bb):
    """Build the kernel closure for a given per-step batch size bb."""

    def kernel(
        x_ref,                                   # (32*bb, 128) image rows, bf16
        cw1, ep1, cw2, ep2, cs2,                 # conv1, conv2, pool2 params
        cw3, ep3, cw4, ep4, cs4,                 # conv3, conv4, pool4 params
        cw5, ep5,                                # conv5 params
        fw1, fb1, fw2, fb2,                      # FC head params
        o_ref,                                   # (bb, 128) probabilities, f32
        a1, a2, p2, a3, a4, p4, a5,              # VMEM activation scratch
    ):
        f32 = jnp.float32

        def conv(in_ref, w_ref, ep_ref, out_ref):
            """3x3 valid conv = ONE merged-band matmul, + bias, ReLU, folded BN."""
            m = out_ref.shape[0]                            # ho * bb
            # Three shifted row-block slices concatenated along lanes (each
            # slice's lane width is a multiple of 128, so the concat is free).
            lhs = jnp.concatenate(
                [in_ref[dy * bb: dy * bb + m, :] for dy in range(3)], axis=-1)
            acc = jnp.dot(lhs, w_ref[...], preferred_element_type=f32)
            acc = jnp.maximum(acc + ep_ref[0:1, :], 0.0)            # bias + ReLU
            acc = acc * ep_ref[1:2, :] + ep_ref[2:3, :]             # eval-mode BN
            out_ref[...] = acc.astype(out_ref.dtype)

        def pool(in_ref, cs_ref, out_ref):
            """MaxPool2d(2,2): VPU max over row pairs + 0/1 column-select matmuls."""
            ho = out_ref.shape[0] // bb
            rmax = jnp.concatenate(
                [jnp.maximum(in_ref[(2 * i) * bb:(2 * i + 1) * bb, :],
                             in_ref[(2 * i + 1) * bb:(2 * i + 2) * bb, :])
                 for i in range(ho)],
                axis=0)
            even = jnp.dot(rmax, cs_ref[0], preferred_element_type=f32)
            odd = jnp.dot(rmax, cs_ref[1], preferred_element_type=f32)
            out_ref[...] = jnp.maximum(even, odd).astype(out_ref.dtype)

        conv(x_ref, cw1, ep1, a1)     # conv1 + relu + bn1   -> (30*bb, 128)
        conv(a1, cw2, ep2, a2)        # conv2 + relu + bn2   -> (28*bb, 128)
        pool(a2, cs2, p2)             # maxpool2             -> (14*bb, 128)
        # dropout2: identity (inference)
        conv(p2, cw3, ep3, a3)        # conv3 + relu + bn3   -> (12*bb, 256)
        conv(a3, cw4, ep4, a4)        # conv4 + relu + bn4   -> (10*bb, 384)
        pool(a4, cs4, p4)             # maxpool4             -> ( 5*bb, 256)
        # dropout4: identity (inference)
        conv(p4, cw5, ep5, a5)        # conv5 + relu + bn5   -> ( 3*bb, 128)

        # FC head.  The torch (C,H,W) flatten order is baked into fw1's rows.
        lhs = jnp.concatenate(
            [a5[0:bb, :], a5[bb:2 * bb, :], a5[2 * bb:3 * bb, :]], axis=-1)
        h = jnp.dot(lhs, fw1[...], preferred_element_type=f32)
        h = jnp.maximum(h + fb1[...], 0.0)                          # fc1 + ReLU
        logits = jnp.dot(h.astype(fw2.dtype), fw2[...],
                         preferred_element_type=f32) + fb2[...]     # fc2 (padded
        # lanes of fb2 are -1e30, so the padded columns vanish in the softmax)
        mx = jnp.max(logits, axis=-1, keepdims=True)
        e = jnp.exp(logits - mx)
        o_ref[...] = (e / jnp.sum(e, axis=-1, keepdims=True)).astype(o_ref.dtype)

    return kernel


# -----------------------------------------------------------------------------
# One-time parameter preprocessing (merged banded conv weights, pool selectors,
# BN folds, lane padding to multiples of 128)
# -----------------------------------------------------------------------------

def _merged_conv_weight(w_hwio, win, lin_pad, lout_pad):
    """(k,k,cin,cout) conv weights -> one (k*lin_pad, lout_pad) merged band matrix."""
    k, _, cin, cout = w_hwio.shape
    wo = win - k + 1
    xin = jnp.arange(win)
    xo = jnp.arange(wo)
    dx = xin[:, None] - xo[None, :]                       # (win, wo)
    valid = (dx >= 0) & (dx < k)
    dxc = jnp.clip(dx, 0, k - 1)
    g = w_hwio[:, dxc, :, :]                              # (k, win, wo, cin, cout)
    g = jnp.where(valid[None, :, :, None, None], g, 0.0)
    g = jnp.transpose(g, (0, 1, 3, 2, 4)).reshape(k, win * cin, wo * cout)
    g = jnp.pad(g, ((0, 0), (0, lin_pad - win * cin), (0, lout_pad - wo * cout)))
    return g.reshape(k * lin_pad, lout_pad)


def _col_selectors(win, c, lin_pad, lout_pad):
    """0/1 matrices selecting (2x, c) / (2x+1, c) input lanes for each output lane."""
    wout = win // 2
    ii = jnp.arange(win * c)
    jj = jnp.arange(wout * c)
    xi, ci = ii // c, ii % c
    xo, co = jj // c, jj % c
    even = ((xi[:, None] == 2 * xo[None, :]) & (ci[:, None] == co[None, :])).astype(jnp.float32)
    odd = ((xi[:, None] == 2 * xo[None, :] + 1) & (ci[:, None] == co[None, :])).astype(jnp.float32)
    sel = jnp.stack([even, odd])
    return jnp.pad(sel, ((0, 0), (0, lin_pad - win * c), (0, lout_pad - wout * c)))


def prepare_params(p):
    """Build the flat tuple of kernel operands (matmul operands in bf16)."""
    prep = []

    def add_conv(name, win, cin, cout):
        w, b = p[f"{name}_w"], p[f"{name}_b"]
        i = name[-1]
        gamma, beta = p[f"bn{i}_gamma"], p[f"bn{i}_beta"]
        mean, var = p[f"bn{i}_mean"], p[f"bn{i}_var"]
        k = w.shape[0]
        wo = win - k + 1
        lin_pad = _ceil_to(win * cin, _LANE)
        lout_pad = _ceil_to(wo * cout, _LANE)
        prep.append(_merged_conv_weight(w, win, lin_pad, lout_pad).astype(jnp.bfloat16))
        scale = gamma * jax.lax.rsqrt(var + _BN_EPS)      # general eval-mode fold
        shift = beta - mean * scale
        ep = jnp.stack([jnp.tile(b, wo), jnp.tile(scale, wo), jnp.tile(shift, wo)])
        ep = jnp.pad(ep, ((0, 0), (0, lout_pad - wo * cout)))
        prep.append(ep.astype(jnp.float32))

    def add_pool(win, c):
        lin_pad = _ceil_to(win * c, _LANE)
        lout_pad = _ceil_to((win // 2) * c, _LANE)
        prep.append(_col_selectors(win, c, lin_pad, lout_pad).astype(jnp.bfloat16))

    add_conv("conv1", 32, 3, 4)      # 32x32x3  -> 30x30x4
    add_conv("conv2", 30, 4, 4)      # 30x30x4  -> 28x28x4
    add_pool(28, 4)                  # 28x28x4  -> 14x14x4
    add_conv("conv3", 14, 4, 16)     # 14x14x4  -> 12x12x16
    add_conv("conv4", 12, 16, 32)    # 12x12x16 -> 10x10x32
    add_pool(10, 32)                 # 10x10x32 -> 5x5x32
    add_conv("conv5", 5, 32, 32)     # 5x5x32   -> 3x3x32

    # fc1: permute rows so the torch (C,H,W) flatten maps onto the kernel's
    # (y, x*32 + c) activation layout; stack the 3 y-blocks and zero-pad lanes.
    d_hid = p["fc1_w"].shape[1]      # 45
    d_out = p["fc2_w"].shape[1]      # 2
    yy = jnp.arange(3)[:, None, None]
    xx = jnp.arange(3)[None, :, None]
    cc = jnp.arange(32)[None, None, :]
    src = (cc * 9 + yy * 3 + xx).reshape(3, 96)
    blk = p["fc1_w"][src]                                          # (3, 96, 45)
    fw1 = jnp.zeros((3, _LANE, _LANE), jnp.float32).at[:, :96, :d_hid].set(blk)
    prep.append(fw1.reshape(3 * _LANE, _LANE).astype(jnp.bfloat16))          # (384, 128)
    prep.append(jnp.zeros((1, _LANE), jnp.float32).at[0, :d_hid].set(p["fc1_b"]))
    fw2 = jnp.zeros((_LANE, _LANE), jnp.float32).at[:d_hid, :d_out].set(p["fc2_w"])
    prep.append(fw2.astype(jnp.bfloat16))                                    # (128, 128)
    # Padded logit lanes get a huge negative bias so softmax gives them 0 mass.
    fb2 = jnp.full((1, _LANE), -1e30, jnp.float32).at[0, :d_out].set(p["fc2_b"])
    prep.append(fb2)
    return tuple(prep)


# -----------------------------------------------------------------------------
# Parameter construction (shapes from CifarWeakLabeler.__init__, fresh BN stats)
# -----------------------------------------------------------------------------

def init_params(key, in_c=3, out_dim=2):
    ks = jax.random.split(key, 14)

    def conv(kw, k, cin, cout):
        return 0.1 * jax.random.normal(kw, (k, k, cin, cout), jnp.float32)

    def vec(kw, n):
        return 0.05 * jax.random.normal(kw, (n,), jnp.float32)

    def lin(kw, din, dout):
        return 0.1 * jax.random.normal(kw, (din, dout), jnp.float32)

    d_fc1 = 32 * 3 * 3   # out_c_conv5 * h_conv5 * w_conv5 = 288
    d_fc2 = 45

    p = {
        "conv1_w": conv(ks[0], 3, in_c, 4), "conv1_b": vec(ks[1], 4),
        "conv2_w": conv(ks[2], 3, 4, 4),    "conv2_b": vec(ks[3], 4),
        "conv3_w": conv(ks[4], 3, 4, 16),   "conv3_b": vec(ks[5], 16),
        "conv4_w": conv(ks[6], 3, 16, 32),  "conv4_b": vec(ks[7], 32),
        "conv5_w": conv(ks[8], 3, 32, 32),  "conv5_b": vec(ks[9], 32),
        "fc1_w": lin(ks[10], d_fc1, d_fc2), "fc1_b": vec(ks[11], d_fc2),
        "fc2_w": lin(ks[12], d_fc2, out_dim), "fc2_b": vec(ks[13], out_dim),
    }
    for i, c in zip(range(1, 6), (4, 4, 16, 32, 32)):
        p[f"bn{i}_gamma"] = jnp.ones((c,), jnp.float32)
        p[f"bn{i}_beta"] = jnp.zeros((c,), jnp.float32)
        p[f"bn{i}_mean"] = jnp.zeros((c,), jnp.float32)
        p[f"bn{i}_var"] = jnp.ones((c,), jnp.float32)
    return p


# -----------------------------------------------------------------------------
# Forward pass: one fused pallas_call, grid over batch blocks of block_b images
# -----------------------------------------------------------------------------

@partial(jax.jit, static_argnames=("block_b", "out_dim"))
def cifar_weak_labeler_forward(x_nchw, prep, block_b=16, out_dim=2):
    n, c, h, w = x_nchw.shape
    assert (c, h, w) == (3, 32, 32), "default CifarWeakLabeler expects 3x32x32"
    assert block_b % 8 == 0, "block_b must be a multiple of 8 (sublane tile)"
    bb = block_b
    g = -(-n // bb)                  # grid steps (>=2 keeps both v7x TCs busy)
    n_pad = g * bb

    # NCHW -> (N, H, W*C) channels-last, zero-pad lanes to 128 and batch to a
    # multiple of bb, then interleave so each block's rows are ordered h*bb + b.
    x = jnp.transpose(x_nchw, (0, 2, 3, 1)).reshape(n, h, w * c)
    x = jnp.pad(x, ((0, n_pad - n), (0, 0), (0, _LANE - w * c)))
    x = x.reshape(g, bb, h, _LANE).transpose(0, 2, 1, 3).reshape(g, h * bb, _LANE)
    x = x.astype(jnp.bfloat16)

    in_specs = [pl.BlockSpec((None, h * bb, _LANE), lambda i: (i, 0, 0))]
    for a in prep:  # weights: full block, constant index -> stay resident in VMEM
        nd = a.ndim
        in_specs.append(pl.BlockSpec(a.shape, lambda i, _nd=nd: (0,) * _nd))

    scratch = [
        pltpu.VMEM((30 * bb, 128), jnp.bfloat16),   # a1: conv1 out
        pltpu.VMEM((28 * bb, 128), jnp.bfloat16),   # a2: conv2 out
        pltpu.VMEM((14 * bb, 128), jnp.bfloat16),   # p2: pool2 out
        pltpu.VMEM((12 * bb, 256), jnp.bfloat16),   # a3: conv3 out
        pltpu.VMEM((10 * bb, 384), jnp.bfloat16),   # a4: conv4 out
        pltpu.VMEM((5 * bb, 256), jnp.bfloat16),    # p4: pool4 out
        pltpu.VMEM((3 * bb, 128), jnp.bfloat16),    # a5: conv5 out
    ]

    out = pl.pallas_call(
        _make_kernel(bb),
        grid=(g,),
        in_specs=in_specs,
        out_specs=pl.BlockSpec((None, bb, _LANE), lambda i: (i, 0, 0)),
        out_shape=jax.ShapeDtypeStruct((g, bb, _LANE), jnp.float32),
        scratch_shapes=scratch,
        compiler_params=pltpu.CompilerParams(
            dimension_semantics=("parallel",),      # megacore split over batch blocks
        ),
    )(x, *prep)

    # Lane-dense slab -> (N, out_dim) probabilities.
    return out.reshape(g * bb, _LANE)[:n, :out_dim]


# -----------------------------------------------------------------------------

if __name__ == "__main__":
    key = jax.random.PRNGKey(0)
    k_param, k_input = jax.random.split(key)

    params = init_params(k_param, in_c=3, out_dim=2)
    prep = prepare_params(params)                       # one-time preprocessing

    batch = 32                                          # 2 grid steps of 16 images
    x = jax.random.normal(k_input, (batch, 3, 32, 32), jnp.float32)   # NCHW like torch

    probs = cifar_weak_labeler_forward(x, prep, block_b=16)
    probs = jax.block_until_ready(probs)

    assert probs.shape == (batch, 2)
    assert bool(jnp.all(jnp.isfinite(probs)))
    assert bool(jnp.all(probs >= 0.0))
    # softmax rows sum to ~1 (f32 softmax, exact division)
    assert bool(jnp.allclose(jnp.sum(probs, axis=-1), 1.0, atol=1e-3))

    print("KERNEL_OK")
</pallas_src>

<mosaic_0001>
module attributes {stable_mosaic.version = 11 : i64} {
  func.func @kernel(%arg0: i32, %arg1: memref<1x512x128xbf16, #tpu.memory_space<vmem>>, %arg2: memref<384x128xbf16, #tpu.memory_space<vmem>>, %arg3: memref<3x128xf32, #tpu.memory_space<vmem>>, %arg4: memref<384x128xbf16, #tpu.memory_space<vmem>>, %arg5: memref<3x128xf32, #tpu.memory_space<vmem>>, %arg6: memref<2x128x128xbf16, #tpu.memory_space<vmem>>, %arg7: memref<384x256xbf16, #tpu.memory_space<vmem>>, %arg8: memref<3x256xf32, #tpu.memory_space<vmem>>, %arg9: memref<768x384xbf16, #tpu.memory_space<vmem>>, %arg10: memref<3x384xf32, #tpu.memory_space<vmem>>, %arg11: memref<2x384x256xbf16, #tpu.memory_space<vmem>>, %arg12: memref<768x128xbf16, #tpu.memory_space<vmem>>, %arg13: memref<3x128xf32, #tpu.memory_space<vmem>>, %arg14: memref<384x128xbf16, #tpu.memory_space<vmem>>, %arg15: memref<1x128xf32, #tpu.memory_space<vmem>>, %arg16: memref<128x128xbf16, #tpu.memory_space<vmem>>, %arg17: memref<1x128xf32, #tpu.memory_space<vmem>>, %arg18: memref<1x16x128xf32, #tpu.memory_space<vmem>>, %arg19: memref<480x128xbf16, #tpu.memory_space<vmem>>, %arg20: memref<448x128xbf16, #tpu.memory_space<vmem>>, %arg21: memref<224x128xbf16, #tpu.memory_space<vmem>>, %arg22: memref<192x256xbf16, #tpu.memory_space<vmem>>, %arg23: memref<160x384xbf16, #tpu.memory_space<vmem>>, %arg24: memref<80x256xbf16, #tpu.memory_space<vmem>>, %arg25: memref<48x128xbf16, #tpu.memory_space<vmem>>) attributes {dimension_semantics = [#tpu.dimension_semantics<parallel>], iteration_bounds = array<i64: 2>, scalar_prefetch = 0 : i64, scratch_operands = 7 : i64, tpu.core_type = #tpu.core_type<tc>, window_params = [{transform_indices = @transform_0, window_bounds = array<i64: 1, 512, 128>}, {pipeline_mode = #tpu.pipeline_mode<synchronous>, transform_indices = @transform_1, window_bounds = array<i64: 384, 128>}, {pipeline_mode = #tpu.pipeline_mode<synchronous>, transform_indices = @transform_2, window_bounds = array<i64: 3, 128>}, {pipeline_mode = #tpu.pipeline_mode<synchronous>, transform_indices = @transform_3, window_bounds = array<i64: 384, 128>}, {pipeline_mode = #tpu.pipeline_mode<synchronous>, transform_indices = @transform_4, window_bounds = array<i64: 3, 128>}, {pipeline_mode = #tpu.pipeline_mode<synchronous>, transform_indices = @transform_5, window_bounds = array<i64: 2, 128, 128>}, {pipeline_mode = #tpu.pipeline_mode<synchronous>, transform_indices = @transform_6, window_bounds = array<i64: 384, 256>}, {pipeline_mode = #tpu.pipeline_mode<synchronous>, transform_indices = @transform_7, window_bounds = array<i64: 3, 256>}, {pipeline_mode = #tpu.pipeline_mode<synchronous>, transform_indices = @transform_8, window_bounds = array<i64: 768, 384>}, {pipeline_mode = #tpu.pipeline_mode<synchronous>, transform_indices = @transform_9, window_bounds = array<i64: 3, 384>}, {pipeline_mode = #tpu.pipeline_mode<synchronous>, transform_indices = @transform_10, window_bounds = array<i64: 2, 384, 256>}, {pipeline_mode = #tpu.pipeline_mode<synchronous>, transform_indices = @transform_11, window_bounds = array<i64: 768, 128>}, {pipeline_mode = #tpu.pipeline_mode<synchronous>, transform_indices = @transform_12, window_bounds = array<i64: 3, 128>}, {pipeline_mode = #tpu.pipeline_mode<synchronous>, transform_indices = @transform_13, window_bounds = array<i64: 384, 128>}, {pipeline_mode = #tpu.pipeline_mode<synchronous>, transform_indices = @transform_14, window_bounds = array<i64: 1, 128>}, {pipeline_mode = #tpu.pipeline_mode<synchronous>, transform_indices = @transform_15, window_bounds = array<i64: 128, 128>}, {pipeline_mode = #tpu.pipeline_mode<synchronous>, transform_indices = @transform_16, window_bounds = array<i64: 1, 128>}, {transform_indices = @transform_17, window_bounds = array<i64: 1, 16, 128>}]} {
    %c0 = arith.constant 0 : index
    %c0_0 = arith.constant 0 : index
    %c0_1 = arith.constant 0 : index
    %0 = vector.load %arg1[%c0, %c0_0, %c0_1] : memref<1x512x128xbf16, #tpu.memory_space<vmem>>, vector<1x480x128xbf16>
    %1 = vector.shape_cast %0 : vector<1x480x128xbf16> to vector<480x128xbf16>
    %c0_2 = arith.constant 0 : index
    %c16 = arith.constant 16 : index
    %c0_3 = arith.constant 0 : index
    %2 = vector.load %arg1[%c0_2, %c16, %c0_3] : memref<1x512x128xbf16, #tpu.memory_space<vmem>>, vector<1x480x128xbf16>
    %3 = vector.shape_cast %2 : vector<1x480x128xbf16> to vector<480x128xbf16>
    %c0_4 = arith.constant 0 : index
    %c32 = arith.constant 32 : index
    %c0_5 = arith.constant 0 : index
    %4 = vector.load %arg1[%c0_4, %c32, %c0_5] : memref<1x512x128xbf16, #tpu.memory_space<vmem>>, vector<1x480x128xbf16>
    %5 = vector.shape_cast %4 : vector<1x480x128xbf16> to vector<480x128xbf16>
    %6 = tpu.concatenate %1, %3, %5 in 1 : vector<480x128xbf16>, vector<480x128xbf16>, vector<480x128xbf16> -> vector<480x384xbf16>
    %c0_6 = arith.constant 0 : index
    %c0_7 = arith.constant 0 : index
    %7 = vector.load %arg2[%c0_6, %c0_7] : memref<384x128xbf16, #tpu.memory_space<vmem>>, vector<384x128xbf16>
    %cst = arith.constant dense<0.000000e+00> : vector<480x128xf32>
    %8 = tpu.matmul %6, %7, %cst {dimension_numbers = #tpu.dot_dimension_numbers<[1], [0], [0], [1], [0, 0, 1, 1], [], []>} : vector<480x384xbf16>, vector<384x128xbf16>, vector<480x128xf32> -> vector<480x128xf32>
    %c0_8 = arith.constant 0 : index
    %c0_9 = arith.constant 0 : index
    %9 = vector.load %arg3[%c0_8, %c0_9] : memref<3x128xf32, #tpu.memory_space<vmem>>, vector<1x128xf32>
    %10 = vector.broadcast %9 : vector<1x128xf32> to vector<480x128xf32>
    %11 = arith.addf %8, %10 : vector<480x128xf32>
    %cst_10 = arith.constant 0.000000e+00 : f32
    %12 = vector.broadcast %cst_10 : f32 to vector<480x128xf32>
    %13 = arith.maximumf %11, %12 : vector<480x128xf32>
    %c1 = arith.constant 1 : index
    %c0_11 = arith.constant 0 : index
    %14 = vector.load %arg3[%c1, %c0_11] : memref<3x128xf32, #tpu.memory_space<vmem>>, vector<1x128xf32>
    %15 = vector.broadcast %14 : vector<1x128xf32> to vector<480x128xf32>
    %16 = arith.mulf %13, %15 : vector<480x128xf32>
    %c2 = arith.constant 2 : index
    %c0_12 = arith.constant 0 : index
    %17 = vector.load %arg3[%c2, %c0_12] : memref<3x128xf32, #tpu.memory_space<vmem>>, vector<1x128xf32>
    %18 = vector.broadcast %17 : vector<1x128xf32> to vector<480x128xf32>
    %19 = arith.addf %16, %18 : vector<480x128xf32>
    %20 = arith.truncf %19 : vector<480x128xf32> to vector<480x128xbf16>
    %c0_13 = arith.constant 0 : index
    %c0_14 = arith.constant 0 : index
    %21 = vector.load %arg19[%c0_13, %c0_14] : memref<480x128xbf16, #tpu.memory_space<vmem>>, vector<480x128xbf16>
    tpu.vector_store %arg19[%c0_13, %c0_14], %20 {strides = array<i32>} : memref<480x128xbf16, #tpu.memory_space<vmem>>, vector<480x128xbf16>,
    %c0_15 = arith.constant 0 : index
    %c0_16 = arith.constant 0 : index
    %22 = vector.load %arg19[%c0_15, %c0_16] : memref<480x128xbf16, #tpu.memory_space<vmem>>, vector<448x128xbf16>
    %c16_17 = arith.constant 16 : index
    %c0_18 = arith.constant 0 : index
    %23 = vector.load %arg19[%c16_17, %c0_18] : memref<480x128xbf16, #tpu.memory_space<vmem>>, vector<448x128xbf16>
    %c32_19 = arith.constant 32 : index
    %c0_20 = arith.constant 0 : index
    %24 = vector.load %arg19[%c32_19, %c0_20] : memref<480x128xbf16, #tpu.memory_space<vmem>>, vector<448x128xbf16>
    %25 = tpu.concatenate %22, %23, %24 in 1 : vector<448x128xbf16>, vector<448x128xbf16>, vector<448x128xbf16> -> vector<448x384xbf16>
    %c0_21 = arith.constant 0 : index
    %c0_22 = arith.constant 0 : index
    %26 = vector.load %arg4[%c0_21, %c0_22] : memref<384x128xbf16, #tpu.memory_space<vmem>>, vector<384x128xbf16>
    %cst_23 = arith.constant dense<0.000000e+00> : vector<448x128xf32>
    %27 = tpu.matmul %25, %26, %cst_23 {dimension_numbers = #tpu.dot_dimension_numbers<[1], [0], [0], [1], [0, 0, 1, 1], [], []>} : vector<448x384xbf16>, vector<384x128xbf16>, vector<448x128xf32> -> vector<448x128xf32>
    %c0_24 = arith.constant 0 : index
    %c0_25 = arith.constant 0 : index
    %28 = vector.load %arg5[%c0_24, %c0_25] : memref<3x128xf32, #tpu.memory_space<vmem>>, vector<1x128xf32>
    %29 = vector.broadcast %28 : vector<1x128xf32> to vector<448x128xf32>
    %30 = arith.addf %27, %29 : vector<448x128xf32>
    %cst_26 = arith.constant 0.000000e+00 : f32
    %31 = vector.broadcast %cst_26 : f32 to vector<448x128xf32>
    %32 = arith.maximumf %30, %31 : vector<448x128xf32>
    %c1_27 = arith.constant 1 : index
    %c0_28 = arith.constant 0 : index
    %33 = vector.load %arg5[%c1_27, %c0_28] : memref<3x128xf32, #tpu.memory_space<vmem>>, vector<1x128xf32>
    %34 = vector.broadcast %33 : vector<1x128xf32> to vector<448x128xf32>
    %35 = arith.mulf %32, %34 : vector<448x128xf32>
    %c2_29 = arith.constant 2 : index
    %c0_30 = arith.constant 0 : index
    %36 = vector.load %arg5[%c2_29, %c0_30] : memref<3x128xf32, #tpu.memory_space<vmem>>, vector<1x128xf32>
    %37 = vector.broadcast %36 : vector<1x128xf32> to vector<448x128xf32>
    %38 = arith.addf %35, %37 : vector<448x128xf32>
    %39 = arith.truncf %38 : vector<448x128xf32> to vector<448x128xbf16>
    %c0_31 = arith.constant 0 : index
    %c0_32 = arith.constant 0 : index
    %40 = vector.load %arg20[%c0_31, %c0_32] : memref<448x128xbf16, #tpu.memory_space<vmem>>, vector<448x128xbf16>
    tpu.vector_store %arg20[%c0_31, %c0_32], %39 {strides = array<i32>} : memref<448x128xbf16, #tpu.memory_space<vmem>>, vector<448x128xbf16>,
    %c0_33 = arith.constant 0 : index
    %c0_34 = arith.constant 0 : index
    %41 = vector.load %arg20[%c0_33, %c0_34] : memref<448x128xbf16, #tpu.memory_space<vmem>>, vector<16x128xbf16>
    %c16_35 = arith.constant 16 : index
    %c0_36 = arith.constant 0 : index
    %42 = vector.load %arg20[%c16_35, %c0_36] : memref<448x128xbf16, #tpu.memory_space<vmem>>, vector<16x128xbf16>
    %43 = arith.maximumf %41, %42 : vector<16x128xbf16>
    %c32_37 = arith.constant 32 : index
    %c0_38 = arith.constant 0 : index
    %44 = vector.load %arg20[%c32_37, %c0_38] : memref<448x128xbf16, #tpu.memory_space<vmem>>, vector<16x128xbf16>
    %c48 = arith.constant 48 : index
    %c0_39 = arith.constant 0 : index
    %45 = vector.load %arg20[%c48, %c0_39] : memref<448x128xbf16, #tpu.memory_space<vmem>>, vector<16x128xbf16>
    %46 = arith.maximumf %44, %45 : vector<16x128xbf16>
    %c64 = arith.constant 64 : index
    %c0_40 = arith.constant 0 : index
    %47 = vector.load %arg20[%c64, %c0_40] : memref<448x128xbf16, #tpu.memory_space<vmem>>, vector<16x128xbf16>
    %c80 = arith.constant 80 : index
    %c0_41 = arith.constant 0 : index
    %48 = vector.load %arg20[%c80, %c0_41] : memref<448x128xbf16, #tpu.memory_space<vmem>>, vector<16x128xbf16>
    %49 = arith.maximumf %47, %48 : vector<16x128xbf16>
    %c96 = arith.constant 96 : index
    %c0_42 = arith.constant 0 : index
    %50 = vector.load %arg20[%c96, %c0_42] : memref<448x128xbf16, #tpu.memory_space<vmem>>, vector<16x128xbf16>
    %c112 = arith.constant 112 : index
    %c0_43 = arith.constant 0 : index
    %51 = vector.load %arg20[%c112, %c0_43] : memref<448x128xbf16, #tpu.memory_space<vmem>>, vector<16x128xbf16>
    %52 = arith.maximumf %50, %51 : vector<16x128xbf16>
    %c128 = arith.constant 128 : index
    %c0_44 = arith.constant 0 : index
    %53 = vector.load %arg20[%c128, %c0_44] : memref<448x128xbf16, #tpu.memory_space<vmem>>, vector<16x128xbf16>
    %c144 = arith.constant 144 : index
    %c0_45 = arith.constant 0 : index
    %54 = vector.load %arg20[%c144, %c0_45] : memref<448x128xbf16, #tpu.memory_space<vmem>>, vector<16x128xbf16>
    %55 = arith.maximumf %53, %54 : vector<16x128xbf16>
    %c160 = arith.constant 160 : index
    %c0_46 = arith.constant 0 : index
    %56 = vector.load %arg20[%c160, %c0_46] : memref<448x128xbf16, #tpu.memory_space<vmem>>, vector<16x128xbf16>
    %c176 = arith.constant 176 : index
    %c0_47 = arith.constant 0 : index
    %57 = vector.load %arg20[%c176, %c0_47] : memref<448x128xbf16, #tpu.memory_space<vmem>>, vector<16x128xbf16>
    %58 = arith.maximumf %56, %57 : vector<16x128xbf16>
    %c192 = arith.constant 192 : index
    %c0_48 = arith.constant 0 : index
    %59 = vector.load %arg20[%c192, %c0_48] : memref<448x128xbf16, #tpu.memory_space<vmem>>, vector<16x128xbf16>
    %c208 = arith.constant 208 : index
    %c0_49 = arith.constant 0 : index
    %60 = vector.load %arg20[%c208, %c0_49] : memref<448x128xbf16, #tpu.memory_space<vmem>>, vector<16x128xbf16>
    %61 = arith.maximumf %59, %60 : vector<16x128xbf16>
    %c224 = arith.constant 224 : index
    %c0_50 = arith.constant 0 : index
    %62 = vector.load %arg20[%c224, %c0_50] : memref<448x128xbf16, #tpu.memory_space<vmem>>, vector<16x128xbf16>
    %c240 = arith.constant 240 : index
    %c0_51 = arith.constant 0 : index
    %63 = vector.load %arg20[%c240, %c0_51] : memref<448x128xbf16, #tpu.memory_space<vmem>>, vector<16x128xbf16>
    %64 = arith.maximumf %62, %63 : vector<16x128xbf16>
    %c256 = arith.constant 256 : index
    %c0_52 = arith.constant 0 : index
    %65 = vector.load %arg20[%c256, %c0_52] : memref<448x128xbf16, #tpu.memory_space<vmem>>, vector<16x128xbf16>
    %c272 = arith.constant 272 : index
    %c0_53 = arith.constant 0 : index
    %66 = vector.load %arg20[%c272, %c0_53] : memref<448x128xbf16, #tpu.memory_space<vmem>>, vector<16x128xbf16>
    %67 = arith.maximumf %65, %66 : vector<16x128xbf16>
    %c288 = arith.constant 288 : index
    %c0_54 = arith.constant 0 : index
    %68 = vector.load %arg20[%c288, %c0_54] : memref<448x128xbf16, #tpu.memory_space<vmem>>, vector<16x128xbf16>
    %c304 = arith.constant 304 : index
    %c0_55 = arith.constant 0 : index
    %69 = vector.load %arg20[%c304, %c0_55] : memref<448x128xbf16, #tpu.memory_space<vmem>>, vector<16x128xbf16>
    %70 = arith.maximumf %68, %69 : vector<16x128xbf16>
    %c320 = arith.constant 320 : index
    %c0_56 = arith.constant 0 : index
    %71 = vector.load %arg20[%c320, %c0_56] : memref<448x128xbf16, #tpu.memory_space<vmem>>, vector<16x128xbf16>
    %c336 = arith.constant 336 : index
    %c0_57 = arith.constant 0 : index
    %72 = vector.load %arg20[%c336, %c0_57] : memref<448x128xbf16, #tpu.memory_space<vmem>>, vector<16x128xbf16>
    %73 = arith.maximumf %71, %72 : vector<16x128xbf16>
    %c352 = arith.constant 352 : index
    %c0_58 = arith.constant 0 : index
    %74 = vector.load %arg20[%c352, %c0_58] : memref<448x128xbf16, #tpu.memory_space<vmem>>, vector<16x128xbf16>
    %c368 = arith.constant 368 : index
    %c0_59 = arith.constant 0 : index
    %75 = vector.load %arg20[%c368, %c0_59] : memref<448x128xbf16, #tpu.memory_space<vmem>>, vector<16x128xbf16>
    %76 = arith.maximumf %74, %75 : vector<16x128xbf16>
    %c384 = arith.constant 384 : index
    %c0_60 = arith.constant 0 : index
    %77 = vector.load %arg20[%c384, %c0_60] : memref<448x128xbf16, #tpu.memory_space<vmem>>, vector<16x128xbf16>
    %c400 = arith.constant 400 : index
    %c0_61 = arith.constant 0 : index
    %78 = vector.load %arg20[%c400, %c0_61] : memref<448x128xbf16, #tpu.memory_space<vmem>>, vector<16x128xbf16>
    %79 = arith.maximumf %77, %78 : vector<16x128xbf16>
    %c416 = arith.constant 416 : index
    %c0_62 = arith.constant 0 : index
    %80 = vector.load %arg20[%c416, %c0_62] : memref<448x128xbf16, #tpu.memory_space<vmem>>, vector<16x128xbf16>
    %c432 = arith.constant 432 : index
    %c0_63 = arith.constant 0 : index
    %81 = vector.load %arg20[%c432, %c0_63] : memref<448x128xbf16, #tpu.memory_space<vmem>>, vector<16x128xbf16>
    %82 = arith.maximumf %80, %81 : vector<16x128xbf16>
    %83 = tpu.concatenate %43, %46, %49, %52, %55, %58, %61, %64, %67, %70, %73, %76, %79, %82 in 0 : vector<16x128xbf16>, vector<16x128xbf16>, vector<16x128xbf16>, vector<16x128xbf16>, vector<16x128xbf16>, vector<16x128xbf16>, vector<16x128xbf16>, vector<16x128xbf16>, vector<16x128xbf16>, vector<16x128xbf16>, vector<16x128xbf16>, vector<16x128xbf16>, vector<16x128xbf16>, vector<16x128xbf16> -> vector<224x128xbf16>
    %c0_64 = arith.constant 0 : index
    %c0_65 = arith.constant 0 : index
    %c0_66 = arith.constant 0 : index
    %84 = vector.load %arg6[%c0_64, %c0_65, %c0_66] : memref<2x128x128xbf16, #tpu.memory_space<vmem>>, vector<1x128x128xbf16>
    %85 = vector.shape_cast %84 : vector<1x128x128xbf16> to vector<128x128xbf16>
    %cst_67 = arith.constant dense<0.000000e+00> : vector<224x128xf32>
    %86 = tpu.matmul %83, %85, %cst_67 {dimension_numbers = #tpu.dot_dimension_numbers<[1], [0], [0], [1], [0, 0, 1, 1], [], []>} : vector<224x128xbf16>, vector<128x128xbf16>, vector<224x128xf32> -> vector<224x128xf32>
    %c1_68 = arith.constant 1 : index
    %c0_69 = arith.constant 0 : index
    %c0_70 = arith.constant 0 : index
    %87 = vector.load %arg6[%c1_68, %c0_69, %c0_70] : memref<2x128x128xbf16, #tpu.memory_space<vmem>>, vector<1x128x128xbf16>
    %88 = vector.shape_cast %87 : vector<1x128x128xbf16> to vector<128x128xbf16>
    %cst_71 = arith.constant dense<0.000000e+00> : vector<224x128xf32>
    %89 = tpu.matmul %83, %88, %cst_71 {dimension_numbers = #tpu.dot_dimension_numbers<[1], [0], [0], [1], [0, 0, 1, 1], [], []>} : vector<224x128xbf16>, vector<128x128xbf16>, vector<224x128xf32> -> vector<224x128xf32>
    %90 = arith.maximumf %86, %89 : vector<224x128xf32>
    %91 = arith.truncf %90 : vector<224x128xf32> to vector<224x128xbf16>
    %c0_72 = arith.constant 0 : index
    %c0_73 = arith.constant 0 : index
    %92 = vector.load %arg21[%c0_72, %c0_73] : memref<224x128xbf16, #tpu.memory_space<vmem>>, vector<224x128xbf16>
    tpu.vector_store %arg21[%c0_72, %c0_73], %91 {strides = array<i32>} : memref<224x128xbf16, #tpu.memory_space<vmem>>, vector<224x128xbf16>,
    %c0_74 = arith.constant 0 : index
    %c0_75 = arith.constant 0 : index
    %93 = vector.load %arg21[%c0_74, %c0_75] : memref<224x128xbf16, #tpu.memory_space<vmem>>, vector<192x128xbf16>
    %c16_76 = arith.constant 16 : index
    %c0_77 = arith.constant 0 : index
    %94 = vector.load %arg21[%c16_76, %c0_77] : memref<224x128xbf16, #tpu.memory_space<vmem>>, vector<192x128xbf16>
    %c32_78 = arith.constant 32 : index
    %c0_79 = arith.constant 0 : index
    %95 = vector.load %arg21[%c32_78, %c0_79] : memref<224x128xbf16, #tpu.memory_space<vmem>>, vector<192x128xbf16>
    %96 = tpu.concatenate %93, %94, %95 in 1 : vector<192x128xbf16>, vector<192x128xbf16>, vector<192x128xbf16> -> vector<192x384xbf16>
    %c0_80 = arith.constant 0 : index
    %c0_81 = arith.constant 0 : index
    %97 = vector.load %arg7[%c0_80, %c0_81] : memref<384x256xbf16, #tpu.memory_space<vmem>>, vector<384x256xbf16>
    %cst_82 = arith.constant dense<0.000000e+00> : vector<192x256xf32>
    %98 = tpu.matmul %96, %97, %cst_82 {dimension_numbers = #tpu.dot_dimension_numbers<[1], [0], [0], [1], [0, 0, 1, 1], [], []>} : vector<192x384xbf16>, vector<384x256xbf16>, vector<192x256xf32> -> vector<192x256xf32>
    %c0_83 = arith.constant 0 : index
    %c0_84 = arith.constant 0 : index
    %99 = vector.load %arg8[%c0_83, %c0_84] : memref<3x256xf32, #tpu.memory_space<vmem>>, vector<1x256xf32>
    %100 = vector.broadcast %99 : vector<1x256xf32> to vector<192x256xf32>
    %101 = arith.addf %98, %100 : vector<192x256xf32>
    %cst_85 = arith.constant 0.000000e+00 : f32
    %102 = vector.broadcast %cst_85 : f32 to vector<192x256xf32>
    %103 = arith.maximumf %101, %102 : vector<192x256xf32>
    %c1_86 = arith.constant 1 : index
    %c0_87 = arith.constant 0 : index
    %104 = vector.load %arg8[%c1_86, %c0_87] : memref<3x256xf32, #tpu.memory_space<vmem>>, vector<1x256xf32>
    %105 = vector.broadcast %104 : vector<1x256xf32> to vector<192x256xf32>
    %106 = arith.mulf %103, %105 : vector<192x256xf32>
    %c2_88 = arith.constant 2 : index
    %c0_89 = arith.constant 0 : index
    %107 = vector.load %arg8[%c2_88, %c0_89] : memref<3x256xf32, #tpu.memory_space<vmem>>, vector<1x256xf32>
    %108 = vector.broadcast %107 : vector<1x256xf32> to vector<192x256xf32>
    %109 = arith.addf %106, %108 : vector<192x256xf32>
    %110 = arith.truncf %109 : vector<192x256xf32> to vector<192x256xbf16>
    %c0_90 = arith.constant 0 : index
    %c0_91 = arith.constant 0 : index
    %111 = vector.load %arg22[%c0_90, %c0_91] : memref<192x256xbf16, #tpu.memory_space<vmem>>, vector<192x256xbf16>
    tpu.vector_store %arg22[%c0_90, %c0_91], %110 {strides = array<i32>} : memref<192x256xbf16, #tpu.memory_space<vmem>>, vector<192x256xbf16>,
    %c0_92 = arith.constant 0 : index
    %c0_93 = arith.constant 0 : index
    %112 = vector.load %arg22[%c0_92, %c0_93] : memref<192x256xbf16, #tpu.memory_space<vmem>>, vector<160x256xbf16>
    %c16_94 = arith.constant 16 : index
    %c0_95 = arith.constant 0 : index
    %113 = vector.load %arg22[%c16_94, %c0_95] : memref<192x256xbf16, #tpu.memory_space<vmem>>, vector<160x256xbf16>
    %c32_96 = arith.constant 32 : index
    %c0_97 = arith.constant 0 : index
    %114 = vector.load %arg22[%c32_96, %c0_97] : memref<192x256xbf16, #tpu.memory_space<vmem>>, vector<160x256xbf16>
    %115 = tpu.concatenate %112, %113, %114 in 1 : vector<160x256xbf16>, vector<160x256xbf16>, vector<160x256xbf16> -> vector<160x768xbf16>
    %c0_98 = arith.constant 0 : index
    %c0_99 = arith.constant 0 : index
    %116 = vector.load %arg9[%c0_98, %c0_99] : memref<768x384xbf16, #tpu.memory_space<vmem>>, vector<768x384xbf16>
    %cst_100 = arith.constant dense<0.000000e+00> : vector<160x384xf32>
    %117 = tpu.matmul %115, %116, %cst_100 {dimension_numbers = #tpu.dot_dimension_numbers<[1], [0], [0], [1], [0, 0, 1, 1], [], []>} : vector<160x768xbf16>, vector<768x384xbf16>, vector<160x384xf32> -> vector<160x384xf32>
    %c0_101 = arith.constant 0 : index
    %c0_102 = arith.constant 0 : index
    %118 = vector.load %arg10[%c0_101, %c0_102] : memref<3x384xf32, #tpu.memory_space<vmem>>, vector<1x384xf32>
    %119 = vector.broadcast %118 : vector<1x384xf32> to vector<160x384xf32>
    %120 = arith.addf %117, %119 : vector<160x384xf32>
    %cst_103 = arith.constant 0.000000e+00 : f32
    %121 = vector.broadcast %cst_103 : f32 to vector<160x384xf32>
    %122 = arith.maximumf %120, %121 : vector<160x384xf32>
    %c1_104 = arith.constant 1 : index
    %c0_105 = arith.constant 0 : index
    %123 = vector.load %arg10[%c1_104, %c0_105] : memref<3x384xf32, #tpu.memory_space<vmem>>, vector<1x384xf32>
    %124 = vector.broadcast %123 : vector<1x384xf32> to vector<160x384xf32>
    %125 = arith.mulf %122, %124 : vector<160x384xf32>
    %c2_106 = arith.constant 2 : index
    %c0_107 = arith.constant 0 : index
    %126 = vector.load %arg10[%c2_106, %c0_107] : memref<3x384xf32, #tpu.memory_space<vmem>>, vector<1x384xf32>
    %127 = vector.broadcast %126 : vector<1x384xf32> to vector<160x384xf32>
    %128 = arith.addf %125, %127 : vector<160x384xf32>
    %129 = arith.truncf %128 : vector<160x384xf32> to vector<160x384xbf16>
    %c0_108 = arith.constant 0 : index
    %c0_109 = arith.constant 0 : index
    %130 = vector.load %arg23[%c0_108, %c0_109] : memref<160x384xbf16, #tpu.memory_space<vmem>>, vector<160x384xbf16>
    tpu.vector_store %arg23[%c0_108, %c0_109], %129 {strides = array<i32>} : memref<160x384xbf16, #tpu.memory_space<vmem>>, vector<160x384xbf16>,
    %c0_110 = arith.constant 0 : index
    %c0_111 = arith.constant 0 : index
    %131 = vector.load %arg23[%c0_110, %c0_111] : memref<160x384xbf16, #tpu.memory_space<vmem>>, vector<16x384xbf16>
    %c16_112 = arith.constant 16 : index
    %c0_113 = arith.constant 0 : index
    %132 = vector.load %arg23[%c16_112, %c0_113] : memref<160x384xbf16, #tpu.memory_space<vmem>>, vector<16x384xbf16>
    %133 = arith.maximumf %131, %132 : vector<16x384xbf16>
    %c32_114 = arith.constant 32 : index
    %c0_115 = arith.constant 0 : index
    %134 = vector.load %arg23[%c32_114, %c0_115] : memref<160x384xbf16, #tpu.memory_space<vmem>>, vector<16x384xbf16>
    %c48_116 = arith.constant 48 : index
    %c0_117 = arith.constant 0 : index
    %135 = vector.load %arg23[%c48_116, %c0_117] : memref<160x384xbf16, #tpu.memory_space<vmem>>, vector<16x384xbf16>
    %136 = arith.maximumf %134, %135 : vector<16x384xbf16>
    %c64_118 = arith.constant 64 : index
    %c0_119 = arith.constant 0 : index
    %137 = vector.load %arg23[%c64_118, %c0_119] : memref<160x384xbf16, #tpu.memory_space<vmem>>, vector<16x384xbf16>
    %c80_120 = arith.constant 80 : index
    %c0_121 = arith.constant 0 : index
    %138 = vector.load %arg23[%c80_120, %c0_121] : memref<160x384xbf16, #tpu.memory_space<vmem>>, vector<16x384xbf16>
    %139 = arith.maximumf %137, %138 : vector<16x384xbf16>
    %c96_122 = arith.constant 96 : index
    %c0_123 = arith.constant 0 : index
    %140 = vector.load %arg23[%c96_122, %c0_123] : memref<160x384xbf16, #tpu.memory_space<vmem>>, vector<16x384xbf16>
    %c112_124 = arith.constant 112 : index
    %c0_125 = arith.constant 0 : index
    %141 = vector.load %arg23[%c112_124, %c0_125] : memref<160x384xbf16, #tpu.memory_space<vmem>>, vector<16x384xbf16>
    %142 = arith.maximumf %140, %141 : vector<16x384xbf16>
    %c128_126 = arith.constant 128 : index
    %c0_127 = arith.constant 0 : index
    %143 = vector.load %arg23[%c128_126, %c0_127] : memref<160x384xbf16, #tpu.memory_space<vmem>>, vector<16x384xbf16>
    %c144_128 = arith.constant 144 : index
    %c0_129 = arith.constant 0 : index
    %144 = vector.load %arg23[%c144_128, %c0_129] : memref<160x384xbf16, #tpu.memory_space<vmem>>, vector<16x384xbf16>
    %145 = arith.maximumf %143, %144 : vector<16x384xbf16>
    %146 = tpu.concatenate %133, %136, %139, %142, %145 in 0 : vector<16x384xbf16>, vector<16x384xbf16>, vector<16x384xbf16>, vector<16x384xbf16>, vector<16x384xbf16> -> vector<80x384xbf16>
    %c0_130 = arith.constant 0 : index
    %c0_131 = arith.constant 0 : index
    %c0_132 = arith.constant 0 : index
    %147 = vector.load %arg11[%c0_130, %c0_131, %c0_132] : memref<2x384x256xbf16, #tpu.memory_space<vmem>>, vector<1x384x256xbf16>
    %148 = vector.shape_cast %147 : vector<1x384x256xbf16> to vector<384x256xbf16>
    %cst_133 = arith.constant dense<0.000000e+00> : vector<80x256xf32>
    %149 = tpu.matmul %146, %148, %cst_133 {dimension_numbers = #tpu.dot_dimension_numbers<[1], [0], [0], [1], [0, 0, 1, 1], [], []>} : vector<80x384xbf16>, vector<384x256xbf16>, vector<80x256xf32> -> vector<80x256xf32>
    %c1_134 = arith.constant 1 : index
    %c0_135 = arith.constant 0 : index
    %c0_136 = arith.constant 0 : index
    %150 = vector.load %arg11[%c1_134, %c0_135, %c0_136] : memref<2x384x256xbf16, #tpu.memory_space<vmem>>, vector<1x384x256xbf16>
    %151 = vector.shape_cast %150 : vector<1x384x256xbf16> to vector<384x256xbf16>
    %cst_137 = arith.constant dense<0.000000e+00> : vector<80x256xf32>
    %152 = tpu.matmul %146, %151, %cst_137 {dimension_numbers = #tpu.dot_dimension_numbers<[1], [0], [0], [1], [0, 0, 1, 1], [], []>} : vector<80x384xbf16>, vector<384x256xbf16>, vector<80x256xf32> -> vector<80x256xf32>
    %153 = arith.maximumf %149, %152 : vector<80x256xf32>
    %154 = arith.truncf %153 : vector<80x256xf32> to vector<80x256xbf16>
    %c0_138 = arith.constant 0 : index
    %c0_139 = arith.constant 0 : index
    %155 = vector.load %arg24[%c0_138, %c0_139] : memref<80x256xbf16, #tpu.memory_space<vmem>>, vector<80x256xbf16>
    tpu.vector_store %arg24[%c0_138, %c0_139], %154 {strides = array<i32>} : memref<80x256xbf16, #tpu.memory_space<vmem>>, vector<80x256xbf16>,
    %c0_140 = arith.constant 0 : index
    %c0_141 = arith.constant 0 : index
    %156 = vector.load %arg24[%c0_140, %c0_141] : memref<80x256xbf16, #tpu.memory_space<vmem>>, vector<48x256xbf16>
    %c16_142 = arith.constant 16 : index
    %c0_143 = arith.constant 0 : index
    %157 = vector.load %arg24[%c16_142, %c0_143] : memref<80x256xbf16, #tpu.memory_space<vmem>>, vector<48x256xbf16>
    %c32_144 = arith.constant 32 : index
    %c0_145 = arith.constant 0 : index
    %158 = vector.load %arg24[%c32_144, %c0_145] : memref<80x256xbf16, #tpu.memory_space<vmem>>, vector<48x256xbf16>
    %159 = tpu.concatenate %156, %157, %158 in 1 : vector<48x256xbf16>, vector<48x256xbf16>, vector<48x256xbf16> -> vector<48x768xbf16>
    %c0_146 = arith.constant 0 : index
    %c0_147 = arith.constant 0 : index
    %160 = vector.load %arg12[%c0_146, %c0_147] : memref<768x128xbf16, #tpu.memory_space<vmem>>, vector<768x128xbf16>
    %cst_148 = arith.constant dense<0.000000e+00> : vector<48x128xf32>
    %161 = tpu.matmul %159, %160, %cst_148 {dimension_numbers = #tpu.dot_dimension_numbers<[1], [0], [0], [1], [0, 0, 1, 1], [], []>} : vector<48x768xbf16>, vector<768x128xbf16>, vector<48x128xf32> -> vector<48x128xf32>
    %c0_149 = arith.constant 0 : index
    %c0_150 = arith.constant 0 : index
    %162 = vector.load %arg13[%c0_149, %c0_150] : memref<3x128xf32, #tpu.memory_space<vmem>>, vector<1x128xf32>
    %163 = vector.broadcast %162 : vector<1x128xf32> to vector<48x128xf32>
    %164 = arith.addf %161, %163 : vector<48x128xf32>
    %cst_151 = arith.constant 0.000000e+00 : f32
    %165 = vector.broadcast %cst_151 : f32 to vector<48x128xf32>
    %166 = arith.maximumf %164, %165 : vector<48x128xf32>
    %c1_152 = arith.constant 1 : index
    %c0_153 = arith.constant 0 : index
    %167 = vector.load %arg13[%c1_152, %c0_153] : memref<3x128xf32, #tpu.memory_space<vmem>>, vector<1x128xf32>
    %168 = vector.broadcast %167 : vector<1x128xf32> to vector<48x128xf32>
    %169 = arith.mulf %166, %168 : vector<48x128xf32>
    %c2_154 = arith.constant 2 : index
    %c0_155 = arith.constant 0 : index
    %170 = vector.load %arg13[%c2_154, %c0_155] : memref<3x128xf32, #tpu.memory_space<vmem>>, vector<1x128xf32>
    %171 = vector.broadcast %170 : vector<1x128xf32> to vector<48x128xf32>
    %172 = arith.addf %169, %171 : vector<48x128xf32>
    %173 = arith.truncf %172 : vector<48x128xf32> to vector<48x128xbf16>
    %c0_156 = arith.constant 0 : index
    %c0_157 = arith.constant 0 : index
    %174 = vector.load %arg25[%c0_156, %c0_157] : memref<48x128xbf16, #tpu.memory_space<vmem>>, vector<48x128xbf16>
    tpu.vector_store %arg25[%c0_156, %c0_157], %173 {strides = array<i32>} : memref<48x128xbf16, #tpu.memory_space<vmem>>, vector<48x128xbf16>,
    %c0_158 = arith.constant 0 : index
    %c0_159 = arith.constant 0 : index
    %175 = vector.load %arg25[%c0_158, %c0_159] : memref<48x128xbf16, #tpu.memory_space<vmem>>, vector<16x128xbf16>
    %c16_160 = arith.constant 16 : index
    %c0_161 = arith.constant 0 : index
    %176 = vector.load %arg25[%c16_160, %c0_161] : memref<48x128xbf16, #tpu.memory_space<vmem>>, vector<16x128xbf16>
    %c32_162 = arith.constant 32 : index
    %c0_163 = arith.constant 0 : index
    %177 = vector.load %arg25[%c32_162, %c0_163] : memref<48x128xbf16, #tpu.memory_space<vmem>>, vector<16x128xbf16>
    %178 = tpu.concatenate %175, %176, %177 in 1 : vector<16x128xbf16>, vector<16x128xbf16>, vector<16x128xbf16> -> vector<16x384xbf16>
    %c0_164 = arith.constant 0 : index
    %c0_165 = arith.constant 0 : index
    %179 = vector.load %arg14[%c0_164, %c0_165] : memref<384x128xbf16, #tpu.memory_space<vmem>>, vector<384x128xbf16>
    %cst_166 = arith.constant dense<0.000000e+00> : vector<16x128xf32>
    %180 = tpu.matmul %178, %179, %cst_166 {dimension_numbers = #tpu.dot_dimension_numbers<[1], [0], [0], [1], [0, 0, 1, 1], [], []>} : vector<16x384xbf16>, vector<384x128xbf16>, vector<16x128xf32> -> vector<16x128xf32>
    %c0_167 = arith.constant 0 : index
    %c0_168 = arith.constant 0 : index
    %181 = vector.load %arg15[%c0_167, %c0_168] : memref<1x128xf32, #tpu.memory_space<vmem>>, vector<1x128xf32>
    %182 = vector.broadcast %181 : vector<1x128xf32> to vector<16x128xf32>
    %183 = arith.addf %180, %182 : vector<16x128xf32>
    %cst_169 = arith.constant 0.000000e+00 : f32
    %184 = vector.broadcast %cst_169 : f32 to vector<16x128xf32>
    %185 = arith.maximumf %183, %184 : vector<16x128xf32>
    %186 = arith.truncf %185 : vector<16x128xf32> to vector<16x128xbf16>
    %c0_170 = arith.constant 0 : index
    %c0_171 = arith.constant 0 : index
    %187 = vector.load %arg16[%c0_170, %c0_171] : memref<128x128xbf16, #tpu.memory_space<vmem>>, vector<128x128xbf16>
    %cst_172 = arith.constant dense<0.000000e+00> : vector<16x128xf32>
    %188 = tpu.matmul %186, %187, %cst_172 {dimension_numbers = #tpu.dot_dimension_numbers<[1], [0], [0], [1], [0, 0, 1, 1], [], []>} : vector<16x128xbf16>, vector<128x128xbf16>, vector<16x128xf32> -> vector<16x128xf32>
    %c0_173 = arith.constant 0 : index
    %c0_174 = arith.constant 0 : index
    %189 = vector.load %arg17[%c0_173, %c0_174] : memref<1x128xf32, #tpu.memory_space<vmem>>, vector<1x128xf32>
    %190 = vector.broadcast %189 : vector<1x128xf32> to vector<16x128xf32>
    %191 = arith.addf %188, %190 : vector<16x128xf32>
    %cst_175 = arith.constant dense<0xFF800000> : vector<16xf32>
    %192 = vector.multi_reduction <maximumf>, %191, %cst_175 [1] : vector<16x128xf32> to vector<16xf32>
    %193 = vector.shape_cast %192 : vector<16xf32> to vector<16x1xf32>
    %194 = vector.broadcast %193 : vector<16x1xf32> to vector<16x128xf32>
    %195 = arith.subf %191, %194 : vector<16x128xf32>
    %196 = math.exp %195 : vector<16x128xf32>
    %cst_176 = arith.constant dense<0.000000e+00> : vector<16xf32>
    %197 = vector.multi_reduction <add>, %196, %cst_176 [1] : vector<16x128xf32> to vector<16xf32>
    %198 = vector.shape_cast %197 : vector<16xf32> to vector<16x1xf32>
    %199 = vector.broadcast %198 : vector<16x1xf32> to vector<16x128xf32>
    %200 = arith.divf %196, %199 : vector<16x128xf32>
    %c0_177 = arith.constant 0 : index
    %c0_178 = arith.constant 0 : index
    %c0_179 = arith.constant 0 : index
    %201 = vector.load %arg18[%c0_177, %c0_178, %c0_179] : memref<1x16x128xf32, #tpu.memory_space<vmem>>, vector<1x16x128xf32>
    %202 = vector.shape_cast %201 : vector<1x16x128xf32> to vector<16x128xf32>
    %203 = vector.shape_cast %200 : vector<16x128xf32> to vector<1x16x128xf32>
    tpu.vector_store %arg18[%c0_177, %c0_178, %c0_179], %203 {strides = array<i32>} : memref<1x16x128xf32, #tpu.memory_space<vmem>>, vector<1x16x128xf32>,
    return
  }
  func.func @transform_0(%arg0: i32) -> (i32, i32, i32) {
    %c0_i32 = arith.constant 0 : i32
    %c0_i32_0 = arith.constant 0 : i32
    %c0_i32_1 = arith.constant 0 : i32
    return %arg0, %c0_i32, %c0_i32_0 : i32, i32, i32
  }
  func.func @transform_1(%arg0: i32) -> (i32, i32) {
    %c0_i32 = arith.constant 0 : i32
    %c0_i32_0 = arith.constant 0 : i32
    %c0_i32_1 = arith.constant 0 : i32
    return %c0_i32, %c0_i32_0 : i32, i32
  }
  func.func @transform_2(%arg0: i32) -> (i32, i32) {
    %c0_i32 = arith.constant 0 : i32
    %c0_i32_0 = arith.constant 0 : i32
    %c0_i32_1 = arith.constant 0 : i32
    return %c0_i32, %c0_i32_0 : i32, i32
  }
  func.func @transform_3(%arg0: i32) -> (i32, i32) {
    %c0_i32 = arith.constant 0 : i32
    %c0_i32_0 = arith.constant 0 : i32
    %c0_i32_1 = arith.constant 0 : i32
    return %c0_i32, %c0_i32_0 : i32, i32
  }
  func.func @transform_4(%arg0: i32) -> (i32, i32) {
    %c0_i32 = arith.constant 0 : i32
    %c0_i32_0 = arith.constant 0 : i32
    %c0_i32_1 = arith.constant 0 : i32
    return %c0_i32, %c0_i32_0 : i32, i32
  }
  func.func @transform_5(%arg0: i32) -> (i32, i32, i32) {
    %c0_i32 = arith.constant 0 : i32
    %c0_i32_0 = arith.constant 0 : i32
    %c0_i32_1 = arith.constant 0 : i32
    %c0_i32_2 = arith.constant 0 : i32
    return %c0_i32, %c0_i32_0, %c0_i32_1 : i32, i32, i32
  }
  func.func @transform_6(%arg0: i32) -> (i32, i32) {
    %c0_i32 = arith.constant 0 : i32
    %c0_i32_0 = arith.constant 0 : i32
    %c0_i32_1 = arith.constant 0 : i32
    return %c0_i32, %c0_i32_0 : i32, i32
  }
  func.func @transform_7(%arg0: i32) -> (i32, i32) {
    %c0_i32 = arith.constant 0 : i32
    %c0_i32_0 = arith.constant 0 : i32
    %c0_i32_1 = arith.constant 0 : i32
    return %c0_i32, %c0_i32_0 : i32, i32
  }
  func.func @transform_8(%arg0: i32) -> (i32, i32) {
    %c0_i32 = arith.constant 0 : i32
    %c0_i32_0 = arith.constant 0 : i32
    %c0_i32_1 = arith.constant 0 : i32
    return %c0_i32, %c0_i32_0 : i32, i32
  }
  func.func @transform_9(%arg0: i32) -> (i32, i32) {
    %c0_i32 = arith.constant 0 : i32
    %c0_i32_0 = arith.constant 0 : i32
    %c0_i32_1 = arith.constant 0 : i32
    return %c0_i32, %c0_i32_0 : i32, i32
  }
  func.func @transform_10(%arg0: i32) -> (i32, i32, i32) {
    %c0_i32 = arith.constant 0 : i32
    %c0_i32_0 = arith.constant 0 : i32
    %c0_i32_1 = arith.constant 0 : i32
    %c0_i32_2 = arith.constant 0 : i32
    return %c0_i32, %c0_i32_0, %c0_i32_1 : i32, i32, i32
  }
  func.func @transform_11(%arg0: i32) -> (i32, i32) {
    %c0_i32 = arith.constant 0 : i32
    %c0_i32_0 = arith.constant 0 : i32
    %c0_i32_1 = arith.constant 0 : i32
    return %c0_i32, %c0_i32_0 : i32, i32
  }
  func.func @transform_12(%arg0: i32) -> (i32, i32) {
    %c0_i32 = arith.constant 0 : i32
    %c0_i32_0 = arith.constant 0 : i32
    %c0_i32_1 = arith.constant 0 : i32
    return %c0_i32, %c0_i32_0 : i32, i32
  }
  func.func @transform_13(%arg0: i32) -> (i32, i32) {
    %c0_i32 = arith.constant 0 : i32
    %c0_i32_0 = arith.constant 0 : i32
    %c0_i32_1 = arith.constant 0 : i32
    return %c0_i32, %c0_i32_0 : i32, i32
  }
  func.func @transform_14(%arg0: i32) -> (i32, i32) {
    %c0_i32 = arith.constant 0 : i32
    %c0_i32_0 = arith.constant 0 : i32
    %c0_i32_1 = arith.constant 0 : i32
    return %c0_i32, %c0_i32_0 : i32, i32
  }
  func.func @transform_15(%arg0: i32) -> (i32, i32) {
    %c0_i32 = arith.constant 0 : i32
    %c0_i32_0 = arith.constant 0 : i32
    %c0_i32_1 = arith.constant 0 : i32
    return %c0_i32, %c0_i32_0 : i32, i32
  }
  func.func @transform_16(%arg0: i32) -> (i32, i32) {
    %c0_i32 = arith.constant 0 : i32
    %c0_i32_0 = arith.constant 0 : i32
    %c0_i32_1 = arith.constant 0 : i32
    return %c0_i32, %c0_i32_0 : i32, i32
  }
  func.func @transform_17(%arg0: i32) -> (i32, i32, i32) {
    %c0_i32 = arith.constant 0 : i32
    %c0_i32_0 = arith.constant 0 : i32
    %c0_i32_1 = arith.constant 0 : i32
    return %arg0, %c0_i32, %c0_i32_0 : i32, i32, i32
  }
}

</mosaic_0001>

<bundles_post_ra>
// kernel: cifar_weak_labeler_forward.1
= control target key start
LH: loop header
LB: loop body
LE: loop exit
PB: predicated region body
PF: predicated region fallthrough
CT: control target
= control target key end

     0   :  { %s14040_s24 = smov 0   ;;  %s18703_s0 = inlined_call_operand.vmem [shape: bf16[2,512,128], index: 0, kind: input, shape index: {}]   ;;  %s18704_s1 = inlined_call_operand.vmem [shape: bf16[384,128], index: 1, kind: input, shape index: {}]   ;;  %s18705_s2 = inlined_call_operand.vmem [shape: f32[3,128], index: 2, kind: input, shape index: {}]   ;;  %s18706_s3 = inlined_call_operand.vmem [shape: bf16[384,128], index: 3, kind: input, shape index: {}]   ;;  %s18707_s4 = inlined_call_operand.vmem [shape: f32[3,128], index: 4, kind: input, shape index: {}]   ;;  %s18708_s5 = inlined_call_operand.vmem [shape: bf16[2,128,128], index: 5, kind: input, shape index: {}]   ;;  %s18709_s6 = inlined_call_operand.vmem [shape: bf16[384,256], index: 6, kind: input, shape index: {}]   ;;  %s18710_s7 = inlined_call_operand.vmem [shape: f32[3,256], index: 7, kind: input, shape index: {}]   ;;  %s18711_s8 = inlined_call_operand.vmem [shape: bf16[768,384], index: 8, kind: input, shape index: {}]   ;;  %s18712_s9 = inlined_call_operand.vmem [shape: f32[3,384], index: 9, kind: input, shape index: {}]   ;;  %s18713_s10 = inlined_call_operand.vmem [shape: bf16[2,384,256], index: 10, kind: input, shape index: {}]   ;;  %s18714_s11 = inlined_call_operand.vmem [shape: bf16[768,128], index: 11, kind: input, shape index: {}]   ;;  %s18715_s12 = inlined_call_operand.vmem [shape: f32[3,128], index: 12, kind: input, shape index: {}]   ;;  %s18716_s13 = inlined_call_operand.vmem [shape: bf16[384,128], index: 13, kind: input, shape index: {}]   ;;  %s18717_s14 = inlined_call_operand.vmem [shape: f32[1,128], index: 14, kind: input, shape index: {}]   ;;  %s18718_s15 = inlined_call_operand.vmem [shape: bf16[128,128], index: 15, kind: input, shape index: {}]   ;;  %s18719_s16 = inlined_call_operand.vmem [shape: f32[1,128], index: 16, kind: input, shape index: {}]   ;;  %s18720_s17 = inlined_call_operand.vmem [shape: f32[2,16,128], index: 17, kind: output, shape index: {}]  }
   0x1   :  { %18769 = sst [smem:[#allocation51_spill]] %s18703_s0 }
   0x2   :  { %18770 = sst [smem:[#allocation52_spill]] %s18704_s1 }
   0x3 LB: > { %s10041_s25 = sadd.s32 4294967295, %s13948_s24   ;;  %p10045_p0 = scmp.ge.s32.totalorder %s13948_s24, 1  ;;  %s13948_s24 = sphi %s14040_s24, %s27_s24  }
   0x4   : > { %p487_p1 = scmp.lt.s32.totalorder %s13948_s24, 3 }
   0x6   : > { %p488_p2 = pnand %p10045_p0, %p487_p1 }
   0x8   : > { %491 = sbr.rel (%p488_p2) target bundleno = 3638 (0xe36), region = 88 }
   0xd   : > { %s18771_s28 = sld [smem:[#allocation52_spill]]  ;;  %p539_p3 = scmp.lt.s32.totalorder %s10041_s25, 1  ;;  %v12807_v39 = vld [vmem:[%s18706_s3 + $0x38] sm:$0xff]  ;;  %v12806_v40 = vld [vmem:[%s18706_s3 + $0x30] sm:$0xff]  ;;  %v12805_v41 = vld [vmem:[%s18706_s3 + $0x28] sm:$0xff] }
   0xe   : > { %s18772_s27 = sld [smem:[#allocation51_spill]]  ;;  %2662 = vmatpush.bf16.msra.mxu3 %v12807_v39  ;;  %v12823_v42 = vld [vmem:[%s18706_s3 + $0xb8] sm:$0xff]  ;;  %v12804_v43 = vld [vmem:[%s18706_s3 + $0x20] sm:$0xff]  ;;  %v12802_v47 = vld [vmem:[%s18706_s3 + $0x10] sm:$0xff] }
   0xf   : > { %s18943_s25 = smov (!%p539_p3, %s10041_s25), 1  ;;  %v12803_v46 = vld [vmem:[%s18706_s3 + $0x18] sm:$0xff]  ;;  %v12801_v48 = vld [vmem:[%s18706_s3 + $0x8] sm:$0xff]  ;;  %v14176_v49 = vld [vmem:[%s18705_s2] ss:$0 sm:$0xff] }
  0x10   : > { %s12656_s19 = sshll.u32 %s18943_s25, 8  ;;  %v12800_v50 = vld [vmem:[%s18706_s3] sm:$0xff]  ;;  %v12815_v62 = vld [vmem:[%s18706_s3 + $0x78] sm:$0xff]  ;;  %s12657_s0 = sshll.u32 %s18943_s25, 4 }
  0x12   : > { %2663 = vmatpush.bf16.msra.mxu3 %v12806_v40 }
  0x13   : > { %v12726_v0 = vld [vmem:[%s18771_s28 + $0x38] sm:$0xff]  ;;  %v12725_v3 = vld [vmem:[%s18771_s28 + $0x30] sm:$0xff]  ;;  %v12724_v6 = vld [vmem:[%s18771_s28 + $0x28] sm:$0xff] }
  0x14   : > { %v12734_v1 = vld [vmem:[%s18771_s28 + $0x78] sm:$0xff]  ;;  %1231 = vmatpush.bf16.msra.mxu0 %v12726_v0  ;;  %v12733_v4 = vld [vmem:[%s18771_s28 + $0x70] sm:$0xff]  ;;  %v12732_v7 = vld [vmem:[%s18771_s28 + $0x68] sm:$0xff]  ;;  %s14127_s29 = scalar_lea.vmem %s18772_s27, %s12656_s19  ;;  %s548_s19 = scalar_lea.vmem %s18720_s17, %s12657_s0 }
  0x15   : > { %v12742_v2 = vld [vmem:[%s18771_s28 + $0xb8] sm:$0xff]  ;;  %1390 = vmatpush.bf16.msra.mxu1 %v12734_v1  ;;  %v12741_v5 = vld [vmem:[%s18771_s28 + $0xb0] sm:$0xff]  ;;  %v12740_v8 = vld [vmem:[%s18771_s28 + $0xa8] sm:$0xff] }
  0x16   : > { %1549 = vmatpush.bf16.msra.mxu2 %v12742_v2  ;;  %v12723_v9 = vld [vmem:[%s18771_s28 + $0x20] sm:$0xff]  ;;  %v12722_v12 = vld [vmem:[%s18771_s28 + $0x18] sm:$0xff]  ;;  %v12721_v15 = vld [vmem:[%s18771_s28 + $0x10] sm:$0xff]  ;;  %2664 = vmatpush.bf16.msra.mxu3 %v12805_v41 }
  0x17   : > { %v12731_v10 = vld [vmem:[%s18771_s28 + $0x60] sm:$0xff]  ;;  %v12730_v13 = vld [vmem:[%s18771_s28 + $0x58] sm:$0xff]  ;;  %v12729_v16 = vld [vmem:[%s18771_s28 + $0x50] sm:$0xff] }
  0x18   : > { %1232 = vmatpush.bf16.msra.mxu0 %v12725_v3  ;;  %v12739_v11 = vld [vmem:[%s18771_s28 + $0xa0] sm:$0xff]  ;;  %v12738_v14 = vld [vmem:[%s18771_s28 + $0x98] sm:$0xff]  ;;  %v12737_v17 = vld [vmem:[%s18771_s28 + $0x90] sm:$0xff] }
  0x19   : > { %1391 = vmatpush.bf16.msra.mxu1 %v12733_v4  ;;  %v12720_v18 = vld [vmem:[%s18771_s28 + $0x8] sm:$0xff]  ;;  %v12719_v21 = vld [vmem:[%s18771_s28] sm:$0xff]  ;;  %v12689_v26 = vld [vmem:[%s14127_s29 + $0x10] sm:$0xff] }
  0x1a   : > { %1550 = vmatpush.bf16.msra.mxu2 %v12741_v5  ;;  %v12728_v19 = vld [vmem:[%s18771_s28 + $0x48] sm:$0xff]  ;;  %v12727_v22 = vld [vmem:[%s18771_s28 + $0x40] sm:$0xff]  ;;  %v12660_v27 = vld [vmem:[%s14127_s29 + $0x10] sm:$0xff]  ;;  %2665 = vmatpush.bf16.msra.mxu3 %v12804_v43 }
  0x1b   : > { %v12736_v20 = vld [vmem:[%s18771_s28 + $0x88] sm:$0xff]  ;;  %v12735_v23 = vld [vmem:[%s18771_s28 + $0x80] sm:$0xff]  ;;  %v12690_v28 = vld [vmem:[%s14127_s29 + $0x18] sm:$0xff] }
  0x1c   : > { %1233 = vmatpush.bf16.msra.mxu0 %v12724_v6  ;;  %v12658_v24 = vld [vmem:[%s14127_s29] sm:$0xff]  ;;  %v12659_v25 = vld [vmem:[%s14127_s29 + $0x8] sm:$0xff]  ;;  %v12661_v29 = vld [vmem:[%s14127_s29 + $0x18] sm:$0xff] }
  0x1d   : > { %1392 = vmatpush.bf16.msra.mxu1 %v12732_v7  ;;  %v12691_v30 = vld [vmem:[%s14127_s29 + $0x20] sm:$0xff]  ;;  %v12692_v32 = vld [vmem:[%s14127_s29 + $0x28] sm:$0xff]  ;;  %v12693_v34 = vld [vmem:[%s14127_s29 + $0x30] sm:$0xff] }
  0x1e   : > { %1551 = vmatpush.bf16.msra.mxu2 %v12740_v8  ;;  %v12662_v31 = vld [vmem:[%s14127_s29 + $0x20] sm:$0xff]  ;;  %v12663_v33 = vld [vmem:[%s14127_s29 + $0x28] sm:$0xff]  ;;  %v12664_v35 = vld [vmem:[%s14127_s29 + $0x30] sm:$0xff]  ;;  %2666 = vmatpush.bf16.msra.mxu3 %v12803_v46 }
  0x1f   : > { %v12694_v36 = vld [vmem:[%s14127_s29 + $0x38] sm:$0xff]  ;;  %v12695_v38 = vld [vmem:[%s14127_s29 + $0x40] sm:$0xff]  ;;  %v12696_v45 = vld [vmem:[%s14127_s29 + $0x48] sm:$0xff] }
  0x20   : > { %1234 = vmatpush.bf16.msra.mxu0 %v12723_v9  ;;  %v12665_v37 = vld [vmem:[%s14127_s29 + $0x38] sm:$0xff]  ;;  %v12666_v44 = vld [vmem:[%s14127_s29 + $0x40] sm:$0xff]  ;;  %v12667_v51 = vld [vmem:[%s14127_s29 + $0x48] sm:$0xff] }
  0x21   : > { %1393 = vmatpush.bf16.msra.mxu1 %v12731_v10  ;;  %v12697_v54 = vld [vmem:[%s14127_s29 + $0x50] sm:$0xff]  ;;  %v14191_v0 = vld [vmem:[%s18705_s2 + $0x1] ss:$0 sm:$0xff]  ;;  %v12698_v7 = vld [vmem:[%s14127_s29 + $0x58] sm:$0xff] }
  0x22   : > { %1552 = vmatpush.bf16.msra.mxu2 %v12739_v11  ;;  %2667 = vmatpush.bf16.msra.mxu3 %v12802_v47  ;;  %v12668_v3 = vld [vmem:[%s14127_s29 + $0x50] sm:$0xff]  ;;  %v14199_v9 = vld [vmem:[%s18705_s2 + $0x2] ss:$0 sm:$0xff] }
  0x23   : > { %v12822_v46 = vld [vmem:[%s18706_s3 + $0xb0] sm:$0xff] }
  0x24   : > { %1235 = vmatpush.bf16.msra.mxu0 %v12722_v12 }
  0x25   : > { %1394 = vmatpush.bf16.msra.mxu1 %v12730_v13 }
  0x26   : > { %1553 = vmatpush.bf16.msra.mxu2 %v12738_v14  ;;  %2668 = vmatpush.bf16.msra.mxu3 %v12801_v48  ;;  %v12670_v48 = vld [vmem:[%s14127_s29 + $0x60] sm:$0xff] }
  0x28   : > { %1236 = vmatpush.bf16.msra.mxu0 %v12721_v15 }
  0x29   : > { %1395 = vmatpush.bf16.msra.mxu1 %v12729_v16 }
  0x2a   : > { %1554 = vmatpush.bf16.msra.mxu2 %v12737_v17  ;;  %2669 = vmatpush.bf16.msra.mxu3 %v12800_v50 }
  0x2c   : > { %1237 = vmatpush.bf16.msra.mxu0 %v12720_v18 }
  0x2d   : > { %1396 = vmatpush.bf16.msra.mxu1 %v12728_v19 }
  0x2e   : > { %1555 = vmatpush.bf16.msra.mxu2 %v12736_v20  ;;  %2811 = vmatpush.bf16.msrb.mxu3 %v12815_v62 }
  0x30   : > { %1238 = vmatpush.bf16.msra.mxu0 %v12719_v21 }
  0x31   : > { %1397 = vmatpush.bf16.msra.mxu1 %v12727_v22 }
  0x32   : > { %1556 = vmatpush.bf16.msra.mxu2 %v12735_v23 }
  0x33   : > { %1239 = vmatmul.bf16.vlgmr.msra.gmra.mxu0 %v12658_v24 }
  0x34   : > { %1398 = vmatmul.bf16.vlgmr.msra.gmra.mxu1 %v12659_v25  ;;  %2960 = vmatpush.bf16.msrb.mxu0 %v12823_v42 }
  0x35   : > { %1557 = vmatmul.bf16.vlgmr.msra.gmra.mxu2 %v12689_v26 }
  0x38   : > { %2961 = vmatpush.bf16.msrb.mxu0 %v12822_v46 }
  0x43   : > { %1244 = vmatmul.bf16.gmra.mxu0 %v12659_v25  ;;  %v12669_v25 = vld [vmem:[%s14127_s29 + $0x58] sm:$0xff] }
  0x44   : > { %1403 = vmatmul.bf16.gmra.mxu1 %v12660_v27 }
  0x45   : > { %1562 = vmatmul.bf16.gmra.mxu2 %v12690_v28 }
  0x53   : > { %1249 = vmatmul.bf16.gmra.mxu0 %v12660_v27 }
  0x54   : > { %1408 = vmatmul.bf16.gmra.mxu1 %v12661_v29 }
  0x55   : > { %1567 = vmatmul.bf16.gmra.mxu2 %v12691_v30 }
  0x63   : > { %1254 = vmatmul.bf16.gmra.mxu0 %v12661_v29  ;;  %v12699_v29 = vld [vmem:[%s14127_s29 + $0x60] sm:$0xff] }
  0x64   : > { %1413 = vmatmul.bf16.gmra.mxu1 %v12662_v31 }
  0x65   : > { %1572 = vmatmul.bf16.gmra.mxu2 %v12692_v32 }
  0x73   : > { %1259 = vmatmul.bf16.gmra.mxu0 %v12662_v31 }
  0x74   : > { %1418 = vmatmul.bf16.gmra.mxu1 %v12663_v33 }
  0x75   : > { %1577 = vmatmul.bf16.gmra.mxu2 %v12693_v34 }
  0x83   : > { %1264 = vmatmul.bf16.gmra.mxu0 %v12663_v33 }
  0x84   : > { %1423 = vmatmul.bf16.gmra.mxu1 %v12664_v35 }
  0x85   : > { %1582 = vmatmul.bf16.gmra.mxu2 %v12694_v36 }
  0x93   : > { %1269 = vmatmul.bf16.gmra.mxu0 %v12664_v35 }
  0x94   : > { %1428 = vmatmul.bf16.gmra.mxu1 %v12665_v37 }
  0x95   : > { %1587 = vmatmul.bf16.gmra.mxu2 %v12695_v38 }
  0xa3   : > { %1274 = vmatmul.bf16.gmra.mxu0 %v12665_v37 }
  0xa4   : > { %1433 = vmatmul.bf16.gmra.mxu1 %v12666_v44 }
  0xa5   : > { %1592 = vmatmul.bf16.gmra.mxu2 %v12696_v45 }
  0xb0   : > { %v1240_v52 = vpop.f32.mrf.mxu0 }
  0xb1   : > { %v1399_v53 = vpop.f32.mrf.mxu1  ;;  %v1241_v55 = vadd.f32 %v14176_v49, %v1240_v52 }
  0xb3   : > { %1279 = vmatmul.bf16.gmra.mxu0 %v12666_v44  ;;  %v1400_v56 = vadd.f32 %v1399_v53, %v1241_v55  ;;  %v12700_v53 = vld [vmem:[%s14127_s29 + $0x68] sm:$0xff] }
  0xb4   : > { %1438 = vmatmul.bf16.gmra.mxu1 %v12667_v51 }
  0xb5   : > { %1597 = vmatmul.bf16.gmra.mxu2 %v12697_v54 }
  0xb8   : > { %v1558_v57 = vpop.f32.mrf.mxu2  ;;  %v1242_v58 = vpop.f32.mrf.mxu0 }
  0xb9   : > { %v1401_v59 = vpop.f32.mrf.mxu1  ;;  %v1559_v60 = vadd.f32 %v1558_v57, %v1400_v56  ;;  %v1243_v61 = vadd.f32 %v14176_v49, %v1242_v58 }
  0xbb   : > { %v1708_v63 = vmax.f32 %v1559_v60, 0.0  ;;  %v1402_v1 = vadd.f32 %v1401_v59, %v1243_v61 }
  0xbd   : > { %v1770_v8 = vmul.f32 %v14191_v0, %v1708_v63 }
  0xbf   : > { %v1832_v13 = vadd.f32 %v14199_v9, %v1770_v8 }
  0xc0   : > { %v1560_v2 = vpop.f32.mrf.mxu2  ;;  %v1245_v5 = vpop.f32.mrf.mxu0 }
  0xc1   : > { %v1561_v4 = vadd.f32 %v1560_v2, %v1402_v1  ;;  %v1404_v6 = vpop.f32.mrf.mxu1  ;;  %v1246_v11 = vadd.f32 %v14176_v49, %v1245_v5 }
  0xc3   : > { %v1709_v10 = vmax.f32 %v1561_v4, 0.0  ;;  %1284 = vmatmul.bf16.gmra.mxu0 %v12667_v51  ;;  %v1405_v15 = vadd.f32 %v1404_v6, %v1246_v11 }
  0xc4   : > { %1443 = vmatmul.bf16.gmra.mxu1 %v12668_v3 }
  0xc5   : > { %v1771_v12 = vmul.f32 %v14191_v0, %v1709_v10  ;;  %1602 = vmatmul.bf16.gmra.mxu2 %v12698_v7  ;;  %v12814_v7 = vld [vmem:[%s18706_s3 + $0x70] sm:$0xff]  ;;  %v12671_v10 = vld [vmem:[%s14127_s29 + $0x68] sm:$0xff] }
  0xc6   : > { %2812 = vmatpush.bf16.msrb.mxu3 %v12814_v7 }
  0xc7   : > { %v1833_v14 = vadd.f32 %v14199_v9, %v1771_v12 }
  0xc8   : > { %v1563_v16 = vpop.f32.mrf.mxu2  ;;  %v1247_v18 = vpop.f32.mrf.mxu0 }
  0xc9   : > { %v13295_v17 = vpack.c.bf16 %v1833_v14, %v1832_v13  ;;  %v1406_v19 = vpop.f32.mrf.mxu1  ;;  %v1564_v20 = vadd.f32 %v1563_v16, %v1405_v15  ;;  %v1248_v21 = vadd.f32 %v14176_v49, %v1247_v18  ;;  %v12701_v14 = vld [vmem:[%s14127_s29 + $0x70] sm:$0xff] }
  0xcb   : > { %13296 = vst [vmem:[#allocation2 + $0xb0] sm:$0xff] %v13295_v17   ;;  %v1710_v22 = vmax.f32 %v1564_v20, 0.0  ;;  %v1407_v23 = vadd.f32 %v1406_v19, %v1248_v21 }
  0xcd   : > { %v1772_v31 = vmul.f32 %v14191_v0, %v1710_v22 }
  0xcf   : > { %v1834_v35 = vadd.f32 %v14199_v9, %v1772_v31 }
  0xd0   : > { %v1565_v24 = vpop.f32.mrf.mxu2  ;;  %v1250_v27 = vpop.f32.mrf.mxu0 }
  0xd1   : > { %v1566_v26 = vadd.f32 %v1565_v24, %v1407_v23  ;;  %v1409_v28 = vpop.f32.mrf.mxu1  ;;  %v1251_v33 = vadd.f32 %v14176_v49, %v1250_v27 }
  0xd2   : > { %v12743_v30 = vld [vmem:[#allocation2 + $0xb0] sm:$0xff] }
  0xd3   : > { %v1711_v32 = vmax.f32 %v1566_v26, 0.0  ;;  %1289 = vmatmul.bf16.gmra.mxu0 %v12668_v3  ;;  %2670 = vmatmul.bf16.vlgmr.msra.gmra.mxu3 %v12743_v30  ;;  %v1410_v37 = vadd.f32 %v1409_v28, %v1251_v33 }
  0xd4   : > { %1448 = vmatmul.bf16.gmra.mxu1 %v12669_v25 }
  0xd5   : > { %v1773_v34 = vmul.f32 %v14191_v0, %v1711_v32  ;;  %1607 = vmatmul.bf16.gmra.mxu2 %v12699_v29  ;;  %v12672_v32 = vld [vmem:[%s14127_s29 + $0x70] sm:$0xff] }
  0xd7   : > { %v1835_v36 = vadd.f32 %v14199_v9, %v1773_v34 }
  0xd8   : > { %v1568_v38 = vpop.f32.mrf.mxu2  ;;  %v1252_v40 = vpop.f32.mrf.mxu0 }
  0xd9   : > { %v13300_v39 = vpack.c.bf16 %v1835_v36, %v1834_v35  ;;  %v1411_v41 = vpop.f32.mrf.mxu1  ;;  %v1569_v42 = vadd.f32 %v1568_v38, %v1410_v37  ;;  %v1253_v43 = vadd.f32 %v14176_v49, %v1252_v40  ;;  %v12702_v36 = vld [vmem:[%s14127_s29 + $0x78] sm:$0xff] }
  0xdb   : > { %13779 = vst [vmem:[#allocation2] sm:$0xff] %v13300_v39   ;;  %v1712_v44 = vmax.f32 %v1569_v42, 0.0  ;;  %v1412_v45 = vadd.f32 %v1411_v41, %v1253_v43 }
  0xdd   : > { %v1774_v55 = vmul.f32 %v14191_v0, %v1712_v44 }
  0xdf   : > { %v1836_v59 = vadd.f32 %v14199_v9, %v1774_v55  ;;  %v12673_v55 = vld [vmem:[%s14127_s29 + $0x78] sm:$0xff] }
  0xe0   : > { %v1570_v47 = vpop.f32.mrf.mxu2  ;;  %v1255_v51 = vpop.f32.mrf.mxu0 }
  0xe1   : > { %v1571_v50 = vadd.f32 %v1570_v47, %v1412_v45  ;;  %v1414_v52 = vpop.f32.mrf.mxu1  ;;  %v1256_v57 = vadd.f32 %v14176_v49, %v1255_v51 }
  0xe2   : > { %v12744_v54 = vld [vmem:[#allocation2] sm:$0xff] }
  0xe3   : > { %v1713_v56 = vmax.f32 %v1571_v50, 0.0  ;;  %1294 = vmatmul.bf16.gmra.mxu0 %v12669_v25  ;;  %2675 = vmatmul.bf16.gmra.mxu3 %v12744_v54  ;;  %v1415_v61 = vadd.f32 %v1414_v52, %v1256_v57 }
  0xe4   : > { %1453 = vmatmul.bf16.gmra.mxu1 %v12670_v48 }
  0xe5   : > { %v1775_v58 = vmul.f32 %v14191_v0, %v1713_v56  ;;  %1612 = vmatmul.bf16.gmra.mxu2 %v12700_v53 }
  0xe7   : > { %v1837_v60 = vadd.f32 %v14199_v9, %v1775_v58 }
  0xe8   : > { %v1573_v62 = vpop.f32.mrf.mxu2  ;;  %v1257_v1 = vpop.f32.mrf.mxu0 }
  0xe9   : > { %v13305_v63 = vpack.c.bf16 %v1837_v60, %v1836_v59  ;;  %v1416_v2 = vpop.f32.mrf.mxu1  ;;  %v1574_v3 = vadd.f32 %v1573_v62, %v1415_v61  ;;  %v1258_v4 = vadd.f32 %v14176_v49, %v1257_v1  ;;  %v12703_v59 = vld [vmem:[%s14127_s29 + $0x80] sm:$0xff] }
  0xeb   : > { %13780 = vst [vmem:[#allocation2 + $0xd8] sm:$0xff] %v13305_v63   ;;  %v1714_v5 = vmax.f32 %v1574_v3, 0.0  ;;  %v1417_v6 = vadd.f32 %v1416_v2, %v1258_v4 }
  0xed   : > { %v1776_v16 = vmul.f32 %v14191_v0, %v1714_v5 }
  0xef   : > { %v1838_v20 = vadd.f32 %v14199_v9, %v1776_v16  ;;  %v12674_v16 = vld [vmem:[%s14127_s29 + $0x80] sm:$0xff] }
  0xf0   : > { %v1575_v8 = vpop.f32.mrf.mxu2  ;;  %v1260_v12 = vpop.f32.mrf.mxu0 }
  0xf1   : > { %v1576_v11 = vadd.f32 %v1575_v8, %v1417_v6  ;;  %v1419_v13 = vpop.f32.mrf.mxu1  ;;  %v1261_v18 = vadd.f32 %v14176_v49, %v1260_v12  ;;  %v12821_v12 = vld [vmem:[%s18706_s3 + $0xa8] sm:$0xff] }
  0xf2   : > { %v12745_v15 = vld [vmem:[#allocation2 + $0xd8] sm:$0xff]  ;;  %2962 = vmatpush.bf16.msrb.mxu0 %v12821_v12 }
  0xf3   : > { %v1715_v17 = vmax.f32 %v1576_v11, 0.0  ;;  %1299 = vmatmul.bf16.gmra.mxu0 %v12670_v48  ;;  %2680 = vmatmul.bf16.gmra.mxu3 %v12745_v15  ;;  %v1420_v22 = vadd.f32 %v1419_v13, %v1261_v18 }
  0xf4   : > { %1458 = vmatmul.bf16.gmra.mxu1 %v12671_v10 }
  0xf5   : > { %v1777_v19 = vmul.f32 %v14191_v0, %v1715_v17  ;;  %1617 = vmatmul.bf16.gmra.mxu2 %v12701_v14 }
  0xf7   : > { %v1839_v21 = vadd.f32 %v14199_v9, %v1777_v19 }
  0xf8   : > { %v1578_v23 = vpop.f32.mrf.mxu2  ;;  %v1262_v25 = vpop.f32.mrf.mxu0 }
  0xf9   : > { %v13310_v24 = vpack.c.bf16 %v1839_v21, %v1838_v20  ;;  %v1421_v26 = vpop.f32.mrf.mxu1  ;;  %v1579_v27 = vadd.f32 %v1578_v23, %v1420_v22  ;;  %v1263_v28 = vadd.f32 %v14176_v49, %v1262_v25  ;;  %v12704_v20 = vld [vmem:[%s14127_s29 + $0x88] sm:$0xff] }
  0xfb   : > { %13781 = vst [vmem:[#allocation2 + $0x18] sm:$0xff] %v13310_v24   ;;  %v1716_v29 = vmax.f32 %v1579_v27, 0.0  ;;  %v1422_v30 = vadd.f32 %v1421_v26, %v1263_v28 }
  0xfd   : > { %v1778_v38 = vmul.f32 %v14191_v0, %v1716_v29 }
  0xff   : > { %v1840_v42 = vadd.f32 %v14199_v9, %v1778_v38 }
 0x100   : > { %v1580_v31 = vpop.f32.mrf.mxu2  ;;  %v1265_v34 = vpop.f32.mrf.mxu0 }
 0x101   : > { %v1581_v33 = vadd.f32 %v1580_v31, %v1422_v30  ;;  %v1424_v35 = vpop.f32.mrf.mxu1  ;;  %v1266_v40 = vadd.f32 %v14176_v49, %v1265_v34 }
 0x102   : > { %v12746_v37 = vld [vmem:[#allocation2 + $0x18] sm:$0xff] }
 0x103   : > { %v1717_v39 = vmax.f32 %v1581_v33, 0.0  ;;  %1304 = vmatmul.bf16.gmra.mxu0 %v12671_v10  ;;  %2685 = vmatmul.bf16.gmra.mxu3 %v12746_v37  ;;  %v1425_v44 = vadd.f32 %v1424_v35, %v1266_v40  ;;  %v12813_v35 = vld [vmem:[%s18706_s3 + $0x68] sm:$0xff] }
 0x104   : > { %1463 = vmatmul.bf16.gmra.mxu1 %v12672_v32  ;;  %2813 = vmatpush.bf16.msrb.mxu3 %v12813_v35 }
 0x105   : > { %v1779_v41 = vmul.f32 %v14191_v0, %v1717_v39  ;;  %1622 = vmatmul.bf16.gmra.mxu2 %v12702_v36  ;;  %v12675_v39 = vld [vmem:[%s14127_s29 + $0x88] sm:$0xff] }
 0x107   : > { %v1841_v43 = vadd.f32 %v14199_v9, %v1779_v41 }
 0x108   : > { %v1583_v45 = vpop.f32.mrf.mxu2  ;;  %v1267_v47 = vpop.f32.mrf.mxu0 }
 0x109   : > { %v13315_v46 = vpack.c.bf16 %v1841_v43, %v1840_v42  ;;  %v1426_v48 = vpop.f32.mrf.mxu1  ;;  %v1584_v50 = vadd.f32 %v1583_v45, %v1425_v44  ;;  %v1268_v51 = vadd.f32 %v14176_v49, %v1267_v47  ;;  %v12705_v43 = vld [vmem:[%s14127_s29 + $0x90] sm:$0xff] }
 0x10b   : > { %13782 = vst [vmem:[#allocation2 + $0x50] sm:$0xff] %v13315_v46   ;;  %v1718_v52 = vmax.f32 %v1584_v50, 0.0  ;;  %v1427_v53 = vadd.f32 %v1426_v48, %v1268_v51 }
 0x10d   : > { %v1780_v61 = vmul.f32 %v14191_v0, %v1718_v52 }
 0x10f   : > { %v1842_v2 = vadd.f32 %v14199_v9, %v1780_v61 }
 0x110   : > { %v1585_v54 = vpop.f32.mrf.mxu2  ;;  %v1270_v57 = vpop.f32.mrf.mxu0 }
 0x111   : > { %v1586_v56 = vadd.f32 %v1585_v54, %v1427_v53  ;;  %v1429_v58 = vpop.f32.mrf.mxu1  ;;  %v1271_v63 = vadd.f32 %v14176_v49, %v1270_v57 }
 0x112   : > { %v12747_v60 = vld [vmem:[#allocation2 + $0x50] sm:$0xff] }
 0x113   : > { %v1719_v62 = vmax.f32 %v1586_v56, 0.0  ;;  %1309 = vmatmul.bf16.gmra.mxu0 %v12672_v32  ;;  %2690 = vmatmul.bf16.gmra.mxu3 %v12747_v60  ;;  %v1430_v4 = vadd.f32 %v1429_v58, %v1271_v63 }
 0x114   : > { %1468 = vmatmul.bf16.gmra.mxu1 %v12673_v55 }
 0x115   : > { %v1781_v1 = vmul.f32 %v14191_v0, %v1719_v62  ;;  %1627 = vmatmul.bf16.gmra.mxu2 %v12703_v59  ;;  %v12676_v62 = vld [vmem:[%s14127_s29 + $0x90] sm:$0xff] }
 0x117   : > { %v1843_v3 = vadd.f32 %v14199_v9, %v1781_v1 }
 0x118   : > { %v1588_v5 = vpop.f32.mrf.mxu2  ;;  %v1272_v7 = vpop.f32.mrf.mxu0 }
 0x119   : > { %v13320_v6 = vpack.c.bf16 %v1843_v3, %v1842_v2  ;;  %v1431_v8 = vpop.f32.mrf.mxu1  ;;  %v1589_v10 = vadd.f32 %v1588_v5, %v1430_v4  ;;  %v1273_v11 = vadd.f32 %v14176_v49, %v1272_v7  ;;  %v12706_v3 = vld [vmem:[%s14127_s29 + $0x98] sm:$0xff] }
 0x11b   : > { %13783 = vst [vmem:[#allocation2 + $0x68] sm:$0xff] %v13320_v6   ;;  %v1720_v13 = vmax.f32 %v1589_v10, 0.0  ;;  %v1432_v14 = vadd.f32 %v1431_v8, %v1273_v11 }
 0x11d   : > { %v1782_v22 = vmul.f32 %v14191_v0, %v1720_v13 }
 0x11f   : > { %v1844_v26 = vadd.f32 %v14199_v9, %v1782_v22  ;;  %v12677_v22 = vld [vmem:[%s14127_s29 + $0x98] sm:$0xff] }
 0x120   : > { %v1590_v15 = vpop.f32.mrf.mxu2  ;;  %v1275_v18 = vpop.f32.mrf.mxu0 }
 0x121   : > { %v1591_v17 = vadd.f32 %v1590_v15, %v1432_v14  ;;  %v1434_v19 = vpop.f32.mrf.mxu1  ;;  %v1276_v24 = vadd.f32 %v14176_v49, %v1275_v18 }
 0x122   : > { %v12748_v21 = vld [vmem:[#allocation2 + $0x68] sm:$0xff] }
 0x123   : > { %v1721_v23 = vmax.f32 %v1591_v17, 0.0  ;;  %1314 = vmatmul.bf16.gmra.mxu0 %v12673_v55  ;;  %2695 = vmatmul.bf16.gmra.mxu3 %v12748_v21  ;;  %v1435_v28 = vadd.f32 %v1434_v19, %v1276_v24 }
 0x124   : > { %1473 = vmatmul.bf16.gmra.mxu1 %v12674_v16 }
 0x125   : > { %v1783_v25 = vmul.f32 %v14191_v0, %v1721_v23  ;;  %1632 = vmatmul.bf16.gmra.mxu2 %v12704_v20 }
 0x127   : > { %v1845_v27 = vadd.f32 %v14199_v9, %v1783_v25 }
 0x128   : > { %v1593_v29 = vpop.f32.mrf.mxu2  ;;  %v1277_v31 = vpop.f32.mrf.mxu0 }
 0x129   : > { %v13325_v30 = vpack.c.bf16 %v1845_v27, %v1844_v26  ;;  %v1436_v32 = vpop.f32.mrf.mxu1  ;;  %v1594_v33 = vadd.f32 %v1593_v29, %v1435_v28  ;;  %v1278_v34 = vadd.f32 %v14176_v49, %v1277_v31  ;;  %v12707_v26 = vld [vmem:[%s14127_s29 + $0xa0] sm:$0xff] }
 0x12b   : > { %13784 = vst [vmem:[#allocation2 + $0x30] sm:$0xff] %v13325_v30   ;;  %v1722_v36 = vmax.f32 %v1594_v33, 0.0  ;;  %v1437_v37 = vadd.f32 %v1436_v32, %v1278_v34 }
 0x12d   : > { %v1784_v45 = vmul.f32 %v14191_v0, %v1722_v36 }
 0x12f   : > { %v1846_v50 = vadd.f32 %v14199_v9, %v1784_v45  ;;  %v12812_v45 = vld [vmem:[%s18706_s3 + $0x60] sm:$0xff] }
 0x130   : > { %v1595_v38 = vpop.f32.mrf.mxu2  ;;  %v1280_v41 = vpop.f32.mrf.mxu0  ;;  %2814 = vmatpush.bf16.msrb.mxu3 %v12812_v45 }
 0x131   : > { %v1596_v40 = vadd.f32 %v1595_v38, %v1437_v37  ;;  %v1439_v42 = vpop.f32.mrf.mxu1  ;;  %v1281_v47 = vadd.f32 %v14176_v49, %v1280_v41 }
 0x132   : > { %v12749_v44 = vld [vmem:[#allocation2 + $0x30] sm:$0xff] }
 0x133   : > { %v1723_v46 = vmax.f32 %v1596_v40, 0.0  ;;  %1319 = vmatmul.bf16.gmra.mxu0 %v12674_v16  ;;  %2700 = vmatmul.bf16.gmra.mxu3 %v12749_v44  ;;  %v1440_v52 = vadd.f32 %v1439_v42, %v1281_v47  ;;  %v12820_v42 = vld [vmem:[%s18706_s3 + $0xa0] sm:$0xff] }
 0x134   : > { %1478 = vmatmul.bf16.gmra.mxu1 %v12675_v39  ;;  %2963 = vmatpush.bf16.msrb.mxu0 %v12820_v42 }
 0x135   : > { %v1785_v48 = vmul.f32 %v14191_v0, %v1723_v46  ;;  %1637 = vmatmul.bf16.gmra.mxu2 %v12705_v43 }
 0x137   : > { %v1847_v51 = vadd.f32 %v14199_v9, %v1785_v48  ;;  %v12678_v48 = vld [vmem:[%s14127_s29 + $0xa0] sm:$0xff] }
 0x138   : > { %v1598_v53 = vpop.f32.mrf.mxu2  ;;  %v1282_v55 = vpop.f32.mrf.mxu0 }
 0x139   : > { %v13330_v54 = vpack.c.bf16 %v1847_v51, %v1846_v50  ;;  %v1441_v56 = vpop.f32.mrf.mxu1  ;;  %v1599_v57 = vadd.f32 %v1598_v53, %v1440_v52  ;;  %v1283_v58 = vadd.f32 %v14176_v49, %v1282_v55  ;;  %v12708_v53 = vld [vmem:[%s14127_s29 + $0xa8] sm:$0xff] }
 0x13b   : > { %13785 = vst [vmem:[#allocation2 + $0x48] sm:$0xff] %v13330_v54   ;;  %v1724_v59 = vmax.f32 %v1599_v57, 0.0  ;;  %v1442_v60 = vadd.f32 %v1441_v56, %v1283_v58 }
 0x13d   : > { %v1786_v5 = vmul.f32 %v14191_v0, %v1724_v59 }
 0x13f   : > { %v1848_v10 = vadd.f32 %v14199_v9, %v1786_v5 }
 0x140   : > { %v1600_v61 = vpop.f32.mrf.mxu2  ;;  %v1285_v1 = vpop.f32.mrf.mxu0 }
 0x141   : > { %v1601_v63 = vadd.f32 %v1600_v61, %v1442_v60  ;;  %v1444_v2 = vpop.f32.mrf.mxu1  ;;  %v1286_v7 = vadd.f32 %v14176_v49, %v1285_v1 }
 0x142   : > { %v12750_v4 = vld [vmem:[#allocation2 + $0x48] sm:$0xff] }
 0x143   : > { %v1725_v6 = vmax.f32 %v1601_v63, 0.0  ;;  %1324 = vmatmul.bf16.gmra.mxu0 %v12675_v39  ;;  %2705 = vmatmul.bf16.gmra.mxu3 %v12750_v4  ;;  %v1445_v12 = vadd.f32 %v1444_v2, %v1286_v7 }
 0x144   : > { %1483 = vmatmul.bf16.gmra.mxu1 %v12676_v62 }
 0x145   : > { %v1787_v8 = vmul.f32 %v14191_v0, %v1725_v6  ;;  %1642 = vmatmul.bf16.gmra.mxu2 %v12706_v3 }
 0x147   : > { %v1849_v11 = vadd.f32 %v14199_v9, %v1787_v8 }
 0x148   : > { %v1603_v13 = vpop.f32.mrf.mxu2  ;;  %v1287_v15 = vpop.f32.mrf.mxu0 }
 0x149   : > { %v13335_v14 = vpack.c.bf16 %v1849_v11, %v1848_v10  ;;  %v1446_v16 = vpop.f32.mrf.mxu1  ;;  %v1604_v17 = vadd.f32 %v1603_v13, %v1445_v12  ;;  %v1288_v18 = vadd.f32 %v14176_v49, %v1287_v15  ;;  %v12679_v11 = vld [vmem:[%s14127_s29 + $0xa8] sm:$0xff]  ;;  %v12709_v15 = vld [vmem:[%s14127_s29 + $0xb0] sm:$0xff] }
 0x14b   : > { %13786 = vst [vmem:[#allocation2 + $0x80] sm:$0xff] %v13335_v14   ;;  %v1726_v19 = vmax.f32 %v1604_v17, 0.0  ;;  %v1447_v20 = vadd.f32 %v1446_v16, %v1288_v18 }
 0x14d   : > { %v1788_v28 = vmul.f32 %v14191_v0, %v1726_v19 }
 0x14f   : > { %v1850_v32 = vadd.f32 %v14199_v9, %v1788_v28 }
 0x150   : > { %v1605_v21 = vpop.f32.mrf.mxu2  ;;  %v1290_v24 = vpop.f32.mrf.mxu0 }
 0x151   : > { %v1606_v23 = vadd.f32 %v1605_v21, %v1447_v20  ;;  %v1449_v25 = vpop.f32.mrf.mxu1  ;;  %v1291_v30 = vadd.f32 %v14176_v49, %v1290_v24 }
 0x152   : > { %v12751_v27 = vld [vmem:[#allocation2 + $0x80] sm:$0xff] }
 0x153   : > { %v1727_v29 = vmax.f32 %v1606_v23, 0.0  ;;  %1329 = vmatmul.bf16.gmra.mxu0 %v12676_v62  ;;  %2710 = vmatmul.bf16.gmra.mxu3 %v12751_v27  ;;  %v1450_v34 = vadd.f32 %v1449_v25, %v1291_v30 }
 0x154   : > { %1488 = vmatmul.bf16.gmra.mxu1 %v12677_v22 }
 0x155   : > { %v1789_v31 = vmul.f32 %v14191_v0, %v1727_v29  ;;  %1647 = vmatmul.bf16.gmra.mxu2 %v12707_v26 }
 0x156   : > { %v14289_v36 = vpop.f32.mrf.mxu3 }
 0x157   : > { %v1851_v33 = vadd.f32 %v14199_v9, %v1789_v31 }
 0x158   : > { %v1608_v35 = vpop.f32.mrf.mxu2  ;;  %v1292_v38 = vpop.f32.mrf.mxu0 }
 0x159   : > { %v13340_v37 = vpack.c.bf16 %v1851_v33, %v1850_v32  ;;  %v1451_v39 = vpop.f32.mrf.mxu1  ;;  %v1609_v40 = vadd.f32 %v1608_v35, %v1450_v34  ;;  %v1293_v41 = vadd.f32 %v14176_v49, %v1292_v38  ;;  %v12680_v35 = vld [vmem:[%s14127_s29 + $0xb0] sm:$0xff] }
 0x15b   : > { %13787 = vst [vmem:[#allocation2 + $0x88] sm:$0xff] %v13340_v37   ;;  %v1728_v43 = vmax.f32 %v1609_v40, 0.0  ;;  %v1452_v44 = vadd.f32 %v1451_v39, %v1293_v41  ;;  %v12710_v40 = vld [vmem:[%s14127_s29 + $0xb8] sm:$0xff] }
 0x15d   : > { %v1790_v55 = vmul.f32 %v14191_v0, %v1728_v43 }
 0x15e   : > { %v14298_v47 = vpop.f32.mrf.mxu3 }
 0x15f   : > { %v1852_v59 = vadd.f32 %v14199_v9, %v1790_v55 }
 0x160   : > { %v1610_v46 = vpop.f32.mrf.mxu2  ;;  %v1295_v51 = vpop.f32.mrf.mxu0 }
 0x161   : > { %v1611_v50 = vadd.f32 %v1610_v46, %v1452_v44  ;;  %v1454_v52 = vpop.f32.mrf.mxu1  ;;  %v1296_v57 = vadd.f32 %v14176_v49, %v1295_v51 }
 0x162   : > { %v12752_v54 = vld [vmem:[#allocation2 + $0x88] sm:$0xff] }
 0x163   : > { %v1729_v56 = vmax.f32 %v1611_v50, 0.0  ;;  %1334 = vmatmul.bf16.gmra.mxu0 %v12677_v22  ;;  %2715 = vmatmul.bf16.gmra.mxu3 %v12752_v54  ;;  %v1455_v61 = vadd.f32 %v1454_v52, %v1296_v57 }
 0x164   : > { %1493 = vmatmul.bf16.gmra.mxu1 %v12678_v48 }
 0x165   : > { %v1791_v58 = vmul.f32 %v14191_v0, %v1729_v56  ;;  %1652 = vmatmul.bf16.gmra.mxu2 %v12708_v53 }
 0x166   : > { %v14307_v63 = vpop.f32.mrf.mxu3 }
 0x167   : > { %v1853_v60 = vadd.f32 %v14199_v9, %v1791_v58 }
 0x168   : > { %v1613_v62 = vpop.f32.mrf.mxu2  ;;  %v1297_v2 = vpop.f32.mrf.mxu0 }
 0x169   : > { %v13345_v1 = vpack.c.bf16 %v1853_v60, %v1852_v59  ;;  %v1456_v3 = vpop.f32.mrf.mxu1  ;;  %v1614_v4 = vadd.f32 %v1613_v62, %v1455_v61  ;;  %v1298_v5 = vadd.f32 %v14176_v49, %v1297_v2  ;;  %v12819_v60 = vld [vmem:[%s18706_s3 + $0x98] sm:$0xff] }
 0x16a   : > { %2964 = vmatpush.bf16.msrb.mxu0 %v12819_v60 }
 0x16b   : > { %13788 = vst [vmem:[#allocation2 + $0xe8] sm:$0xff] %v13345_v1   ;;  %v1730_v6 = vmax.f32 %v1614_v4, 0.0  ;;  %v1457_v7 = vadd.f32 %v1456_v3, %v1298_v5  ;;  %v12681_v1 = vld [vmem:[%s14127_s29 + $0xb8] sm:$0xff]  ;;  %v12711_v5 = vld [vmem:[%s14127_s29 + $0xc0] sm:$0xff] }
 0x16d   : > { %v1792_v17 = vmul.f32 %v14191_v0, %v1730_v6 }
 0x16e   : > { %v14310_v10 = vpop.f32.mrf.mxu3 }
 0x16f   : > { %v1854_v21 = vadd.f32 %v14199_v9, %v1792_v17 }
 0x170   : > { %v1615_v8 = vpop.f32.mrf.mxu2  ;;  %v1300_v13 = vpop.f32.mrf.mxu0 }
 0x171   : > { %v1616_v12 = vadd.f32 %v1615_v8, %v1457_v7  ;;  %v1459_v14 = vpop.f32.mrf.mxu1  ;;  %v1301_v19 = vadd.f32 %v14176_v49, %v1300_v13 }
 0x172   : > { %v12753_v16 = vld [vmem:[#allocation2 + $0xe8] sm:$0xff] }
 0x173   : > { %v1731_v18 = vmax.f32 %v1616_v12, 0.0  ;;  %1339 = vmatmul.bf16.gmra.mxu0 %v12678_v48  ;;  %2720 = vmatmul.bf16.gmra.mxu3 %v12753_v16  ;;  %v1460_v23 = vadd.f32 %v1459_v14, %v1301_v19 }
 0x174   : > { %1498 = vmatmul.bf16.gmra.mxu1 %v12679_v11 }
 0x175   : > { %v1793_v20 = vmul.f32 %v14191_v0, %v1731_v18  ;;  %1657 = vmatmul.bf16.gmra.mxu2 %v12709_v15 }
 0x176   : > { %v14319_v25 = vpop.f32.mrf.mxu3 }
 0x177   : > { %v1855_v22 = vadd.f32 %v14199_v9, %v1793_v20 }
 0x178   : > { %v1618_v24 = vpop.f32.mrf.mxu2  ;;  %v1302_v27 = vpop.f32.mrf.mxu0 }
 0x179   : > { %v13350_v26 = vpack.c.bf16 %v1855_v22, %v1854_v21  ;;  %v1461_v28 = vpop.f32.mrf.mxu1  ;;  %v1619_v29 = vadd.f32 %v1618_v24, %v1460_v23  ;;  %v1303_v30 = vadd.f32 %v14176_v49, %v1302_v27  ;;  %v12811_v23 = vld [vmem:[%s18706_s3 + $0x58] sm:$0xff] }
 0x17a   : > { %2815 = vmatpush.bf16.msrb.mxu3 %v12811_v23 }
 0x17b   : > { %13789 = vst [vmem:[#allocation2 + $0xb8] sm:$0xff] %v13350_v26   ;;  %v1732_v31 = vmax.f32 %v1619_v29, 0.0  ;;  %v1462_v32 = vadd.f32 %v1461_v28, %v1303_v30  ;;  %v12682_v29 = vld [vmem:[%s14127_s29 + $0xc0] sm:$0xff] }
 0x17d   : > { %v1794_v42 = vmul.f32 %v14191_v0, %v1732_v31 }
 0x17e   : > { %v14322_v34 = vpop.f32.mrf.mxu3 }
 0x17f   : > { %v1856_v46 = vadd.f32 %v14199_v9, %v1794_v42 }
 0x180   : > { %v1620_v33 = vpop.f32.mrf.mxu2  ;;  %v1305_v38 = vpop.f32.mrf.mxu0 }
 0x181   : > { %v1621_v37 = vadd.f32 %v1620_v33, %v1462_v32  ;;  %v1464_v39 = vpop.f32.mrf.mxu1  ;;  %v1306_v44 = vadd.f32 %v14176_v49, %v1305_v38  ;;  %v12712_v33 = vld [vmem:[%s14127_s29 + $0xc8] sm:$0xff] }
 0x182   : > { %v12754_v41 = vld [vmem:[#allocation2 + $0xb8] sm:$0xff] }
 0x183   : > { %v1733_v43 = vmax.f32 %v1621_v37, 0.0  ;;  %1344 = vmatmul.bf16.gmra.mxu0 %v12679_v11  ;;  %2725 = vmatmul.bf16.gmra.mxu3 %v12754_v41  ;;  %v1465_v50 = vadd.f32 %v1464_v39, %v1306_v44 }
 0x184   : > { %1503 = vmatmul.bf16.gmra.mxu1 %v12680_v35 }
 0x185   : > { %v1795_v45 = vmul.f32 %v14191_v0, %v1733_v43  ;;  %1662 = vmatmul.bf16.gmra.mxu2 %v12710_v40 }
 0x186   : > { %v14331_v52 = vpop.f32.mrf.mxu3 }
 0x187   : > { %v1857_v48 = vadd.f32 %v14199_v9, %v1795_v45 }
 0x188   : > { %v1623_v51 = vpop.f32.mrf.mxu2  ;;  %v1307_v54 = vpop.f32.mrf.mxu0 }
 0x189   : > { %v13355_v53 = vpack.c.bf16 %v1857_v48, %v1856_v46  ;;  %v1466_v55 = vpop.f32.mrf.mxu1  ;;  %v1624_v56 = vadd.f32 %v1623_v51, %v1465_v50  ;;  %v1308_v57 = vadd.f32 %v14176_v49, %v1307_v54 }
 0x18b   : > { %13790 = vst [vmem:[#allocation2 + $0x60] sm:$0xff] %v13355_v53   ;;  %v1734_v58 = vmax.f32 %v1624_v56, 0.0  ;;  %v1467_v59 = vadd.f32 %v1466_v55, %v1308_v57 }
 0x18d   : > { %v1796_v7 = vmul.f32 %v14191_v0, %v1734_v58  ;;  %v12683_v58 = vld [vmem:[%s14127_s29 + $0xc8] sm:$0xff] }
 0x18e   : > { %v14337_v62 = vpop.f32.mrf.mxu3 }
 0x18f   : > { %v1858_v13 = vadd.f32 %v14199_v9, %v1796_v7 }
 0x190   : > { %v1625_v61 = vpop.f32.mrf.mxu2  ;;  %v1310_v3 = vpop.f32.mrf.mxu0 }
 0x191   : > { %v1626_v2 = vadd.f32 %v1625_v61, %v1467_v59  ;;  %v1469_v4 = vpop.f32.mrf.mxu1  ;;  %v1311_v11 = vadd.f32 %v14176_v49, %v1310_v3 }
 0x192   : > { %v12755_v6 = vld [vmem:[#allocation2 + $0x60] sm:$0xff] }
 0x193   : > { %v1735_v8 = vmax.f32 %v1626_v2, 0.0  ;;  %1349 = vmatmul.bf16.gmra.mxu0 %v12680_v35  ;;  %2730 = vmatmul.bf16.gmra.mxu3 %v12755_v6  ;;  %v1470_v15 = vadd.f32 %v1469_v4, %v1311_v11 }
 0x194   : > { %1508 = vmatmul.bf16.gmra.mxu1 %v12681_v1 }
 0x195   : > { %v1797_v12 = vmul.f32 %v14191_v0, %v1735_v8  ;;  %1667 = vmatmul.bf16.gmra.mxu2 %v12711_v5 }
 0x196   : > { %v14346_v17 = vpop.f32.mrf.mxu3 }
 0x197   : > { %v1859_v14 = vadd.f32 %v14199_v9, %v1797_v12 }
 0x198   : > { %v1628_v16 = vpop.f32.mrf.mxu2  ;;  %v1312_v19 = vpop.f32.mrf.mxu0 }
 0x199   : > { %v13360_v18 = vpack.c.bf16 %v1859_v14, %v1858_v13  ;;  %v1471_v20 = vpop.f32.mrf.mxu1  ;;  %v1629_v21 = vadd.f32 %v1628_v16, %v1470_v15  ;;  %v1313_v22 = vadd.f32 %v14176_v49, %v1312_v19 }
 0x19b   : > { %13791 = vst [vmem:[#allocation2 + $0xa8] sm:$0xff] %v13360_v18   ;;  %v1736_v24 = vmax.f32 %v1629_v21, 0.0  ;;  %v1472_v26 = vadd.f32 %v1471_v20, %v1313_v22 }
 0x19d   : > { %v1798_v37 = vmul.f32 %v14191_v0, %v1736_v24  ;;  %v12684_v24 = vld [vmem:[%s14127_s29 + $0xd0] sm:$0xff] }
 0x19e   : > { %v14352_v28 = vpop.f32.mrf.mxu3 }
 0x19f   : > { %v1860_v41 = vadd.f32 %v14199_v9, %v1798_v37 }
 0x1a0   : > { %v1630_v27 = vpop.f32.mrf.mxu2  ;;  %v1315_v31 = vpop.f32.mrf.mxu0 }
 0x1a1   : > { %v1631_v30 = vadd.f32 %v1630_v27, %v1472_v26  ;;  %v1474_v32 = vpop.f32.mrf.mxu1  ;;  %v1316_v39 = vadd.f32 %v14176_v49, %v1315_v31 }
 0x1a2   : > { %v12756_v35 = vld [vmem:[#allocation2 + $0xa8] sm:$0xff] }
 0x1a3   : > { %v1737_v38 = vmax.f32 %v1631_v30, 0.0  ;;  %1354 = vmatmul.bf16.gmra.mxu0 %v12681_v1  ;;  %2735 = vmatmul.bf16.gmra.mxu3 %v12756_v35  ;;  %v1475_v43 = vadd.f32 %v1474_v32, %v1316_v39  ;;  %v12713_v1 = vld [vmem:[%s14127_s29 + $0xd0] sm:$0xff]  ;;  %v12714_v30 = vld [vmem:[%s14127_s29 + $0xd8] sm:$0xff] }
 0x1a4   : > { %1513 = vmatmul.bf16.gmra.mxu1 %v12682_v29 }
 0x1a5   : > { %v1799_v40 = vmul.f32 %v14191_v0, %v1737_v38  ;;  %1672 = vmatmul.bf16.gmra.mxu2 %v12712_v33 }
 0x1a6   : > { %v14361_v45 = vpop.f32.mrf.mxu3 }
 0x1a7   : > { %v1861_v42 = vadd.f32 %v14199_v9, %v1799_v40 }
 0x1a8   : > { %v1633_v44 = vpop.f32.mrf.mxu2  ;;  %v1317_v48 = vpop.f32.mrf.mxu0 }
 0x1a9   : > { %v13365_v46 = vpack.c.bf16 %v1861_v42, %v1860_v41  ;;  %v1476_v50 = vpop.f32.mrf.mxu1  ;;  %v1634_v51 = vadd.f32 %v1633_v44, %v1475_v43  ;;  %v1318_v53 = vadd.f32 %v14176_v49, %v1317_v48 }
 0x1ab   : > { %13792 = vst [vmem:[#allocation2 + $0x70] sm:$0xff] %v13365_v46   ;;  %v1738_v54 = vmax.f32 %v1634_v51, 0.0  ;;  %v1477_v55 = vadd.f32 %v1476_v50, %v1318_v53 }
 0x1ad   : > { %v1800_v3 = vmul.f32 %v14191_v0, %v1738_v54  ;;  %v12818_v54 = vld [vmem:[%s18706_s3 + $0x90] sm:$0xff] }
 0x1ae   : > { %v14364_v57 = vpop.f32.mrf.mxu3  ;;  %2965 = vmatpush.bf16.msrb.mxu0 %v12818_v54 }
 0x1af   : > { %v1862_v7 = vadd.f32 %v14199_v9, %v1800_v3 }
 0x1b0   : > { %v1635_v56 = vpop.f32.mrf.mxu2  ;;  %v1320_v60 = vpop.f32.mrf.mxu0 }
 0x1b1   : > { %v1636_v59 = vadd.f32 %v1635_v56, %v1477_v55  ;;  %v1479_v61 = vpop.f32.mrf.mxu1  ;;  %v1321_v5 = vadd.f32 %v14176_v49, %v1320_v60  ;;  %v12810_v55 = vld [vmem:[%s18706_s3 + $0x50] sm:$0xff] }
 0x1b2   : > { %v12757_v2 = vld [vmem:[#allocation2 + $0x70] sm:$0xff]  ;;  %2816 = vmatpush.bf16.msrb.mxu3 %v12810_v55 }
 0x1b3   : > { %v1739_v4 = vmax.f32 %v1636_v59, 0.0  ;;  %1359 = vmatmul.bf16.gmra.mxu0 %v12682_v29  ;;  %2740 = vmatmul.bf16.gmra.mxu3 %v12757_v2  ;;  %v1480_v11 = vadd.f32 %v1479_v61, %v1321_v5  ;;  %v12685_v59 = vld [vmem:[%s14127_s29 + $0xd8] sm:$0xff]  ;;  %v12715_v2 = vld [vmem:[%s14127_s29 + $0xe0] sm:$0xff] }
 0x1b4   : > { %1518 = vmatmul.bf16.gmra.mxu1 %v12683_v58  ;;  %v14402_v5 = vld [vmem:[%s18705_s2] ss:$0 sm:$0xff] }
 0x1b5   : > { %v1801_v6 = vmul.f32 %v14191_v0, %v1739_v4  ;;  %1677 = vmatmul.bf16.gmra.mxu2 %v12713_v1 }
 0x1b6   : > { %v14373_v13 = vpop.f32.mrf.mxu3 }
 0x1b7   : > { %v1863_v8 = vadd.f32 %v14199_v9, %v1801_v6 }
 0x1b8   : > { %v1638_v12 = vpop.f32.mrf.mxu2  ;;  %v1322_v15 = vpop.f32.mrf.mxu0 }
 0x1b9   : > { %v13370_v14 = vpack.c.bf16 %v1863_v8, %v1862_v7  ;;  %v1481_v16 = vpop.f32.mrf.mxu1  ;;  %v1639_v18 = vadd.f32 %v1638_v12, %v1480_v11  ;;  %v1323_v19 = vadd.f32 %v14176_v49, %v1322_v15 }
 0x1bb   : > { %13793 = vst [vmem:[#allocation2 + $0x40] sm:$0xff] %v13370_v14   ;;  %v1740_v20 = vmax.f32 %v1639_v18, 0.0  ;;  %v1482_v21 = vadd.f32 %v1481_v16, %v1323_v19 }
 0x1bd   : > { %v1802_v32 = vmul.f32 %v14191_v0, %v1740_v20 }
 0x1be   : > { %v14376_v23 = vpop.f32.mrf.mxu3 }
 0x1bf   : > { %v1864_v38 = vadd.f32 %v14199_v9, %v1802_v32 }
 0x1c0   : > { %v1640_v22 = vpop.f32.mrf.mxu2  ;;  %v1325_v27 = vpop.f32.mrf.mxu0 }
 0x1c1   : > { %v1641_v26 = vadd.f32 %v1640_v22, %v1482_v21  ;;  %v1484_v29 = vpop.f32.mrf.mxu1  ;;  %v1326_v35 = vadd.f32 %v14176_v49, %v1325_v27  ;;  %v12686_v27 = vld [vmem:[%s14127_s29 + $0xe0] sm:$0xff] }
 0x1c2   : > { %v12758_v31 = vld [vmem:[#allocation2 + $0x40] sm:$0xff] }
 0x1c3   : > { %v1741_v33 = vmax.f32 %v1641_v26, 0.0  ;;  %1364 = vmatmul.bf16.gmra.mxu0 %v12683_v58  ;;  %2745 = vmatmul.bf16.gmra.mxu3 %v12758_v31  ;;  %v1485_v40 = vadd.f32 %v1484_v29, %v1326_v35  ;;  %v12716_v31 = vld [vmem:[%s14127_s29 + $0xe8] sm:$0xff] }
 0x1c4   : > { %1523 = vmatmul.bf16.gmra.mxu1 %v12684_v24 }
 0x1c5   : > { %v1803_v37 = vmul.f32 %v14191_v0, %v1741_v33  ;;  %1682 = vmatmul.bf16.gmra.mxu2 %v12714_v30  ;;  %v14418_v33 = vld [vmem:[%s18705_s2 + $0x1] ss:$0 sm:$0xff] }
 0x1c6   : > { %v14385_v42 = vpop.f32.mrf.mxu3 }
 0x1c7   : > { %v1865_v39 = vadd.f32 %v14199_v9, %v1803_v37 }
 0x1c8   : > { %v1643_v41 = vpop.f32.mrf.mxu2  ;;  %v1327_v44 = vpop.f32.mrf.mxu0 }
 0x1c9   : > { %v13375_v43 = vpack.c.bf16 %v1865_v39, %v1864_v38  ;;  %v1486_v46 = vpop.f32.mrf.mxu1  ;;  %v1644_v48 = vadd.f32 %v1643_v41, %v1485_v40  ;;  %v1328_v50 = vadd.f32 %v14176_v49, %v1327_v44  ;;  %v14426_v40 = vld [vmem:[%s18705_s2 + $0x2] ss:$0 sm:$0xff] }
 0x1cb   : > { %13794 = vst [vmem:[#allocation2 + $0x8] sm:$0xff] %v13375_v43   ;;  %v1742_v51 = vmax.f32 %v1644_v48, 0.0  ;;  %v1487_v53 = vadd.f32 %v1486_v46, %v1328_v50 }
 0x1cd   : > { %v1804_v3 = vmul.f32 %v14191_v0, %v1742_v51 }
 0x1ce   : > { %v14394_v58 = vpop.f32.mrf.mxu3 }
 0x1cf   : > { %v1866_v8 = vadd.f32 %v14199_v9, %v1804_v3 }
 0x1d0   : > { %v1645_v56 = vpop.f32.mrf.mxu2  ;;  %v1330_v61 = vpop.f32.mrf.mxu0 }
 0x1d1   : > { %v1646_v60 = vadd.f32 %v1645_v56, %v1487_v53  ;;  %v1489_v1 = vpop.f32.mrf.mxu1  ;;  %v1331_v6 = vadd.f32 %v14402_v5, %v1330_v61  ;;  %v12817_v56 = vld [vmem:[%s18706_s3 + $0x88] sm:$0xff] }
 0x1d2   : > { %v12759_v49 = vld [vmem:[#allocation2 + $0x8] sm:$0xff]  ;;  %2966 = vmatpush.bf16.msrb.mxu0 %v12817_v56 }
 0x1d3   : > { %v1743_v4 = vmax.f32 %v1646_v60, 0.0  ;;  %1369 = vmatmul.bf16.gmra.mxu0 %v12684_v24  ;;  %2750 = vmatmul.bf16.gmra.mxu3 %v12759_v49  ;;  %v1490_v12 = vadd.f32 %v1489_v1, %v1331_v6 }
 0x1d4   : > { %1528 = vmatmul.bf16.gmra.mxu1 %v12685_v59 }
 0x1d5   : > { %v1805_v7 = vmul.f32 %v14191_v0, %v1743_v4  ;;  %1687 = vmatmul.bf16.gmra.mxu2 %v12715_v2  ;;  %v12816_v4 = vld [vmem:[%s18706_s3 + $0x80] sm:$0xff] }
 0x1d6   : > { %v14408_v15 = vpop.f32.mrf.mxu3  ;;  %2967 = vmatpush.bf16.msrb.mxu0 %v12816_v4 }
 0x1d7   : > { %v1867_v11 = vadd.f32 %v14199_v9, %v1805_v7  ;;  %v12687_v7 = vld [vmem:[%s14127_s29 + $0xe8] sm:$0xff] }
 0x1d8   : > { %v1648_v14 = vpop.f32.mrf.mxu2  ;;  %v1332_v18 = vpop.f32.mrf.mxu0 }
 0x1d9   : > { %v13380_v16 = vpack.c.bf16 %v1867_v11, %v1866_v8  ;;  %v1491_v19 = vpop.f32.mrf.mxu1  ;;  %v1649_v20 = vadd.f32 %v1648_v14, %v1490_v12  ;;  %v1333_v21 = vadd.f32 %v14402_v5, %v1332_v18 }
 0x1db   : > { %13795 = vst [vmem:[#allocation2 + $0x78] sm:$0xff] %v13380_v16   ;;  %v1744_v0 = vmax.f32 %v1649_v20, 0.0  ;;  %v1492_v22 = vadd.f32 %v1491_v19, %v1333_v21 }
 0x1dd   : > { %v1806_v35 = vmul.f32 %v14418_v33, %v1744_v0 }
 0x1de   : > { %v14411_v26 = vpop.f32.mrf.mxu3 }
 0x1df   : > { %v1868_v41 = vadd.f32 %v14426_v40, %v1806_v35 }
 0x1e0   : > { %v1650_v24 = vpop.f32.mrf.mxu2  ;;  %v1335_v9 = vpop.f32.mrf.mxu0 }
 0x1e1   : > { %v1651_v29 = vadd.f32 %v1650_v24, %v1492_v22  ;;  %v1494_v30 = vpop.f32.mrf.mxu1  ;;  %v1336_v38 = vadd.f32 %v14402_v5, %v1335_v9 }
 0x1e2   : > { %v12760_v32 = vld [vmem:[#allocation2 + $0x78] sm:$0xff] }
 0x1e3   : > { %v1745_v37 = vmax.f32 %v1651_v29, 0.0  ;;  %1374 = vmatmul.bf16.gmra.mxu0 %v12685_v59  ;;  %2755 = vmatmul.bf16.gmra.mxu3 %v12760_v32  ;;  %v1495_v44 = vadd.f32 %v1494_v30, %v1336_v38 }
 0x1e4   : > { %1533 = vmatmul.bf16.gmra.mxu1 %v12686_v27 }
 0x1e5   : > { %v1807_v39 = vmul.f32 %v14418_v33, %v1745_v37  ;;  %1692 = vmatmul.bf16.gmra.mxu2 %v12716_v31 }
 0x1e6   : > { %v14430_v48 = vpop.f32.mrf.mxu3 }
 0x1e7   : > { %v1869_v43 = vadd.f32 %v14426_v40, %v1807_v39 }
 0x1e8   : > { %v1653_v46 = vpop.f32.mrf.mxu2  ;;  %v1337_v51 = vpop.f32.mrf.mxu0 }
 0x1e9   : > { %v13385_v50 = vpack.c.bf16 %v1869_v43, %v1868_v41  ;;  %v1496_v53 = vpop.f32.mrf.mxu1  ;;  %v1654_v54 = vadd.f32 %v1653_v46, %v1495_v44  ;;  %v1338_v55 = vadd.f32 %v14402_v5, %v1337_v51 }
 0x1eb   : > { %13796 = vst [vmem:[#allocation2 + $0xc0] sm:$0xff] %v13385_v50   ;;  %v1746_v59 = vmax.f32 %v1654_v54, 0.0  ;;  %v1497_v60 = vadd.f32 %v1496_v53, %v1338_v55 }
 0x1ed   : > { %v1808_v8 = vmul.f32 %v14418_v33, %v1746_v59 }
 0x1ee   : > { %v14436_v1 = vpop.f32.mrf.mxu3 }
 0x1ef   : > { %v1870_v16 = vadd.f32 %v14426_v40, %v1808_v8 }
 0x1f0   : > { %v1655_v61 = vpop.f32.mrf.mxu2  ;;  %v1340_v49 = vpop.f32.mrf.mxu0 }
 0x1f1   : > { %v1656_v2 = vadd.f32 %v1655_v61, %v1497_v60  ;;  %v1499_v3 = vpop.f32.mrf.mxu1  ;;  %v1341_v12 = vadd.f32 %v14402_v5, %v1340_v49  ;;  %v12809_v49 = vld [vmem:[%s18706_s3 + $0x48] sm:$0xff] }
 0x1f2   : > { %v12761_v6 = vld [vmem:[#allocation2 + $0xc0] sm:$0xff]  ;;  %2817 = vmatpush.bf16.msrb.mxu3 %v12809_v49 }
 0x1f3   : > { %v1747_v11 = vmax.f32 %v1656_v2, 0.0  ;;  %1379 = vmatmul.bf16.gmra.mxu0 %v12686_v27  ;;  %2760 = vmatmul.bf16.gmra.mxu3 %v12761_v6  ;;  %v1500_v19 = vadd.f32 %v1499_v3, %v1341_v12 }
 0x1f4   : > { %1538 = vmatmul.bf16.gmra.mxu1 %v12687_v7 }
 0x1f5   : > { %v1809_v14 = vmul.f32 %v14418_v33, %v1747_v11 }
 0x1f6   : > { %v14447_v21 = vpop.f32.mrf.mxu3 }
 0x1f7   : > { %v1871_v18 = vadd.f32 %v14426_v40, %v1809_v14 }
 0x1f8   : > { %v1658_v20 = vpop.f32.mrf.mxu2  ;;  %v1342_v22 = vpop.f32.mrf.mxu0 }
 0x1f9   : > { %v13390_v0 = vpack.c.bf16 %v1871_v18, %v1870_v16  ;;  %v1501_v24 = vpop.f32.mrf.mxu1  ;;  %v1659_v29 = vadd.f32 %v1658_v20, %v1500_v19  ;;  %v1343_v9 = vadd.f32 %v14402_v5, %v1342_v22  ;;  %v12772_v16 = vld [vmem:[#allocation2 + $0xd8] sm:$0xff] }
 0x1fb   : > { %13797 = vst [vmem:[#allocation2 + $0x10] sm:$0xff] %v13390_v0   ;;  %v1748_v27 = vmax.f32 %v1659_v29, 0.0  ;;  %v1502_v30 = vadd.f32 %v1501_v24, %v1343_v9 }
 0x1fd   : > { %v1810_v41 = vmul.f32 %v14418_v33, %v1748_v27 }
 0x1fe   : > { %v14450_v32 = vpop.f32.mrf.mxu3 }
 0x1ff   : > { %v1872_v50 = vadd.f32 %v14426_v40, %v1810_v41  ;;  %v12831_v41 = vld [vmem:[%s18708_s5 + $0x38] sm:$0xff] }
 0x200   : > { %v1660_v31 = vpop.f32.mrf.mxu2  ;;  %v1345_v37 = vpop.f32.mrf.mxu0  ;;  %3709 = vmatpush.bf16.msrb.mxu1 %v12831_v41 }
 0x201   : > { %v1661_v35 = vadd.f32 %v1660_v31, %v1502_v30  ;;  %v1504_v38 = vpop.f32.mrf.mxu1  ;;  %v1346_v44 = vadd.f32 %v14402_v5, %v1345_v37 }
 0x202   : > { %v12762_v39 = vld [vmem:[#allocation2 + $0x10] sm:$0xff] }
 0x203   : > { %v1749_v43 = vmax.f32 %v1661_v35, 0.0  ;;  %1384 = vmatmul.bf16.gmra.mxu0 %v12687_v7  ;;  %2765 = vmatmul.bf16.gmra.mxu3 %v12762_v39  ;;  %v1505_v53 = vadd.f32 %v1504_v38, %v1346_v44  ;;  %v12839_v39 = vld [vmem:[%s18708_s5 + $0x78] sm:$0xff] }
 0x204   : > { %3853 = vmatpush.bf16.msrb.mxu2 %v12839_v39 }
 0x205   : > { %v1811_v46 = vmul.f32 %v14418_v33, %v1749_v43 }
 0x206   : > { %v14457_v55 = vpop.f32.mrf.mxu3 }
 0x207   : > { %v1873_v51 = vadd.f32 %v14426_v40, %v1811_v46 }
 0x208   : > { %v1663_v54 = vpop.f32.mrf.mxu2  ;;  %v1347_v59 = vpop.f32.mrf.mxu0 }
 0x209   : > { %v13395_v56 = vpack.c.bf16 %v1873_v51, %v1872_v50  ;;  %v1506_v60 = vpop.f32.mrf.mxu1  ;;  %v1664_v61 = vadd.f32 %v1663_v54, %v1505_v53  ;;  %v1348_v2 = vadd.f32 %v14402_v5, %v1347_v59  ;;  %v12773_v59 = vld [vmem:[#allocation2 + $0x18] sm:$0xff] }
 0x20b   : > { %13798 = vst [vmem:[#allocation2 + $0x38] sm:$0xff] %v13395_v56   ;;  %v1750_v3 = vmax.f32 %v1664_v61, 0.0  ;;  %v1507_v4 = vadd.f32 %v1506_v60, %v1348_v2 }
 0x20d   : > { %v1812_v18 = vmul.f32 %v14418_v33, %v1750_v3 }
 0x20e   : > { %v14463_v7 = vpop.f32.mrf.mxu3 }
 0x20f   : > { %v1874_v22 = vadd.f32 %v14426_v40, %v1812_v18 }
 0x210   : > { %v1665_v6 = vpop.f32.mrf.mxu2  ;;  %v1350_v11 = vpop.f32.mrf.mxu0 }
 0x211   : > { %v1666_v8 = vadd.f32 %v1665_v6, %v1507_v4  ;;  %v1509_v12 = vpop.f32.mrf.mxu1  ;;  %v1351_v20 = vadd.f32 %v14402_v5, %v1350_v11 }
 0x212   : > { %v12763_v14 = vld [vmem:[#allocation2 + $0x38] sm:$0xff] }
 0x213   : > { %v1751_v19 = vmax.f32 %v1666_v8, 0.0  ;;  %2968 = vmatmul.bf16.vlgmr.msrb.gmra.mxu0 %v12772_v16  ;;  %2770 = vmatmul.bf16.gmra.mxu3 %v12763_v14  ;;  %v1510_v29 = vadd.f32 %v1509_v12, %v1351_v20 }
 0x215   : > { %v1813_v0 = vmul.f32 %v14418_v33, %v1751_v19 }
 0x216   : > { %v14470_v27 = vpop.f32.mrf.mxu3 }
 0x217   : > { %v1875_v24 = vadd.f32 %v14426_v40, %v1813_v0 }
 0x218   : > { %v1668_v9 = vpop.f32.mrf.mxu2  ;;  %v1352_v31 = vpop.f32.mrf.mxu0 }
 0x219   : > { %v13400_v30 = vpack.c.bf16 %v1875_v24, %v1874_v22  ;;  %v1511_v35 = vpop.f32.mrf.mxu1  ;;  %v1669_v37 = vadd.f32 %v1668_v9, %v1510_v29  ;;  %v1353_v38 = vadd.f32 %v14402_v5, %v1352_v31 }
 0x21b   : > { %13799 = vst [vmem:[#allocation2 + $0x28] sm:$0xff] %v13400_v30   ;;  %v1752_v43 = vmax.f32 %v1669_v37, 0.0  ;;  %v1512_v44 = vadd.f32 %v1511_v35, %v1353_v38  ;;  %v12774_v35 = vld [vmem:[#allocation2 + $0x50] sm:$0xff] }
 0x21d   : > { %v1814_v60 = vmul.f32 %v14418_v33, %v1752_v43 }
 0x21e   : > { %v14479_v50 = vpop.f32.mrf.mxu3 }
 0x21f   : > { %v1876_v3 = vadd.f32 %v14426_v40, %v1814_v60 }
 0x220   : > { %v1670_v46 = vpop.f32.mrf.mxu2  ;;  %v1355_v53 = vpop.f32.mrf.mxu0 }
 0x221   : > { %v1671_v51 = vadd.f32 %v1670_v46, %v1512_v44  ;;  %v1514_v54 = vpop.f32.mrf.mxu1  ;;  %v1356_v2 = vadd.f32 %v14402_v5, %v1355_v53 }
 0x222   : > { %v12764_v56 = vld [vmem:[#allocation2 + $0x28] sm:$0xff] }
 0x223   : > { %v1753_v61 = vmax.f32 %v1671_v51, 0.0  ;;  %2973 = vmatmul.bf16.gmra.mxu0 %v12773_v59  ;;  %2775 = vmatmul.bf16.gmra.mxu3 %v12764_v56  ;;  %v1515_v6 = vadd.f32 %v1514_v54, %v1356_v2 }
 0x225   : > { %v1815_v49 = vmul.f32 %v14418_v33, %v1753_v61 }
 0x226   : > { %v14486_v11 = vpop.f32.mrf.mxu3 }
 0x227   : > { %v1877_v4 = vadd.f32 %v14426_v40, %v1815_v49 }
 0x228   : > { %v1673_v8 = vpop.f32.mrf.mxu2  ;;  %v1357_v14 = vpop.f32.mrf.mxu0 }
 0x229   : > { %v13405_v12 = vpack.c.bf16 %v1877_v4, %v1876_v3  ;;  %v1516_v16 = vpop.f32.mrf.mxu1  ;;  %v1674_v18 = vadd.f32 %v1673_v8, %v1515_v6  ;;  %v1358_v19 = vadd.f32 %v14402_v5, %v1357_v14  ;;  %v12808_v3 = vld [vmem:[%s18706_s3 + $0x40] sm:$0xff] }
 0x22a   : > { %2818 = vmatpush.bf16.msrb.mxu3 %v12808_v3  ;;  %v12776_v3 = vld [vmem:[#allocation2 + $0x30] sm:$0xff] }
 0x22b   : > { %13800 = vst [vmem:[#allocation2 + $0x90] sm:$0xff] %v13405_v12   ;;  %v1754_v20 = vmax.f32 %v1674_v18, 0.0  ;;  %v1517_v0 = vadd.f32 %v1516_v16, %v1358_v19  ;;  %v12775_v18 = vld [vmem:[#allocation2 + $0x68] sm:$0xff] }
 0x22d   : > { %v1816_v37 = vmul.f32 %v14418_v33, %v1754_v20 }
 0x22e   : > { %v14489_v24 = vpop.f32.mrf.mxu3 }
 0x22f   : > { %v1878_v43 = vadd.f32 %v14426_v40, %v1816_v37 }
 0x230   : > { %v1675_v22 = vpop.f32.mrf.mxu2  ;;  %v1360_v9 = vpop.f32.mrf.mxu0 }
 0x231   : > { %v1676_v29 = vadd.f32 %v1675_v22, %v1517_v0  ;;  %v1519_v30 = vpop.f32.mrf.mxu1  ;;  %v1361_v39 = vadd.f32 %v14402_v5, %v1360_v9 }
 0x232   : > { %v12765_v31 = vld [vmem:[#allocation2 + $0x90] sm:$0xff] }
 0x233   : > { %v1755_v38 = vmax.f32 %v1676_v29, 0.0  ;;  %2978 = vmatmul.bf16.gmra.mxu0 %v12774_v35  ;;  %2780 = vmatmul.bf16.gmra.mxu3 %v12765_v31  ;;  %v1520_v46 = vadd.f32 %v1519_v30, %v1361_v39 }
 0x235   : > { %v1817_v41 = vmul.f32 %v14418_v33, %v1755_v38 }
 0x236   : > { %v14496_v53 = vpop.f32.mrf.mxu3 }
 0x237   : > { %v1879_v44 = vadd.f32 %v14426_v40, %v1817_v41 }
 0x238   : > { %v1678_v51 = vpop.f32.mrf.mxu2  ;;  %v1362_v56 = vpop.f32.mrf.mxu0 }
 0x239   : > { %v13410_v54 = vpack.c.bf16 %v1879_v44, %v1878_v43  ;;  %v1521_v59 = vpop.f32.mrf.mxu1  ;;  %v1679_v60 = vadd.f32 %v1678_v51, %v1520_v46  ;;  %v1363_v61 = vadd.f32 %v14402_v5, %v1362_v56  ;;  %v12838_v51 = vld [vmem:[%s18708_s5 + $0x70] sm:$0xff] }
 0x23a   : > { %3854 = vmatpush.bf16.msrb.mxu2 %v12838_v51  ;;  %v12718_v51 = vld [vmem:[%s14127_s29 + $0xf8] sm:$0xff] }
 0x23b   : > { %13801 = vst [vmem:[#allocation2 + $0xa0] sm:$0xff] %v13410_v54   ;;  %v1756_v2 = vmax.f32 %v1679_v60, 0.0  ;;  %v1522_v49 = vadd.f32 %v1521_v59, %v1363_v61 }
 0x23d   : > { %v1818_v19 = vmul.f32 %v14418_v33, %v1756_v2  ;;  %v12717_v2 = vld [vmem:[%s14127_s29 + $0xf0] sm:$0xff] }
 0x23e   : > { %v14502_v6 = vpop.f32.mrf.mxu3  ;;  %1697 = vmatmul.bf16.gmra.mxu2 %v12717_v2 }
 0x23f   : > { %v1880_v29 = vadd.f32 %v14426_v40, %v1818_v19 }
 0x240   : > { %v1680_v4 = vpop.f32.mrf.mxu2  ;;  %v1365_v12 = vpop.f32.mrf.mxu0 }
 0x241   : > { %v1681_v8 = vadd.f32 %v1680_v4, %v1522_v49  ;;  %v1524_v14 = vpop.f32.mrf.mxu1  ;;  %v1366_v0 = vadd.f32 %v14402_v5, %v1365_v12 }
 0x242   : > { %v12766_v16 = vld [vmem:[#allocation2 + $0xa0] sm:$0xff] }
 0x243   : > { %v1757_v20 = vmax.f32 %v1681_v8, 0.0  ;;  %2983 = vmatmul.bf16.gmra.mxu0 %v12775_v18  ;;  %2785 = vmatmul.bf16.gmra.mxu3 %v12766_v16  ;;  %v1525_v30 = vadd.f32 %v1524_v14, %v1366_v0 }
 0x245   : > { %v1819_v22 = vmul.f32 %v14418_v33, %v1757_v20 }
 0x246   : > { %v14509_v35 = vpop.f32.mrf.mxu3 }
 0x247   : > { %v1881_v9 = vadd.f32 %v14426_v40, %v1819_v22 }
 0x248   : > { %v1683_v31 = vpop.f32.mrf.mxu2  ;;  %v1367_v38 = vpop.f32.mrf.mxu0 }
 0x249   : > { %v13415_v37 = vpack.c.bf16 %v1881_v9, %v1880_v29  ;;  %v1526_v39 = vpop.f32.mrf.mxu1  ;;  %v1684_v41 = vadd.f32 %v1683_v31, %v1525_v30  ;;  %v1368_v43 = vadd.f32 %v14402_v5, %v1367_v38 }
 0x24b   : > { %13802 = vst [vmem:[#allocation2 + $0x58] sm:$0xff] %v13415_v37   ;;  %v1758_v44 = vmax.f32 %v1684_v41, 0.0  ;;  %v1527_v46 = vadd.f32 %v1526_v39, %v1368_v43  ;;  %v12830_v37 = vld [vmem:[%s18708_s5 + $0x30] sm:$0xff] }
 0x24c   : > { %3710 = vmatpush.bf16.msrb.mxu1 %v12830_v37 }
 0x24d   : > { %v1820_v4 = vmul.f32 %v14418_v33, %v1758_v44 }
 0x24e   : > { %v14515_v56 = vpop.f32.mrf.mxu3  ;;  %1702 = vmatmul.bf16.gmra.mxu2 %v12718_v51 }
 0x24f   : > { %v1882_v16 = vadd.f32 %v14426_v40, %v1820_v4  ;;  %v12688_v4 = vld [vmem:[%s14127_s29 + $0xf0] sm:$0xff] }
 0x250   : > { %v1685_v54 = vpop.f32.mrf.mxu2  ;;  %v1370_v60 = vpop.f32.mrf.mxu0  ;;  %1543 = vmatmul.bf16.gmra.mxu1 %v12688_v4 }
 0x251   : > { %v1686_v59 = vadd.f32 %v1685_v54, %v1527_v46  ;;  %v1529_v61 = vpop.f32.mrf.mxu1  ;;  %v1371_v12 = vadd.f32 %v14402_v5, %v1370_v60 }
 0x252   : > { %v12767_v49 = vld [vmem:[#allocation2 + $0x58] sm:$0xff] }
 0x253   : > { %v1759_v8 = vmax.f32 %v1686_v59, 0.0  ;;  %2988 = vmatmul.bf16.gmra.mxu0 %v12776_v3  ;;  %2790 = vmatmul.bf16.gmra.mxu3 %v12767_v49  ;;  %v1530_v19 = vadd.f32 %v1529_v61, %v1371_v12  ;;  %v12777_v59 = vld [vmem:[#allocation2 + $0x48] sm:$0xff] }
 0x255   : > { %v1821_v14 = vmul.f32 %v14418_v33, %v1759_v8 }
 0x256   : > { %v14523_v0 = vpop.f32.mrf.mxu3 }
 0x257   : > { %v1883_v18 = vadd.f32 %v14426_v40, %v1821_v14 }
 0x258   : > { %v1688_v20 = vpop.f32.mrf.mxu2  ;;  %v1372_v29 = vpop.f32.mrf.mxu0 }
 0x259   : > { %v13420_v22 = vpack.c.bf16 %v1883_v18, %v1882_v16  ;;  %v1531_v9 = vpop.f32.mrf.mxu1  ;;  %v1689_v30 = vadd.f32 %v1688_v20, %v1530_v19  ;;  %v1373_v31 = vadd.f32 %v14402_v5, %v1372_v29 }
 0x25b   : > { %13803 = vst [vmem:[#allocation2 + $0xd0] sm:$0xff] %v13420_v22   ;;  %v1760_v38 = vmax.f32 %v1689_v30, 0.0  ;;  %v1532_v39 = vadd.f32 %v1531_v9, %v1373_v31 }
 0x25d   : > { %v1822_v60 = vmul.f32 %v14418_v33, %v1760_v38 }
 0x25e   : > { %v14529_v43 = vpop.f32.mrf.mxu3 }
 0x25f   : > { %18773 = vst [vmem:[#allocation9_spill] sm:$0xff] %v14529_v43  ;;  %v1884_v8 = vadd.f32 %v14426_v40, %v1822_v60 }
 0x260   : > { %v1690_v41 = vpop.f32.mrf.mxu2  ;;  %v1375_v46 = vpop.f32.mrf.mxu0 }
 0x261   : > { %v1691_v44 = vadd.f32 %v1690_v41, %v1532_v39  ;;  %v1376_v2 = vadd.f32 %v14402_v5, %v1375_v46  ;;  %v1534_v49 = vpop.f32.mrf.mxu1  ;;  %v12778_v46 = vld [vmem:[#allocation2 + $0x80] sm:$0xff] }
 0x262   : > { %v12768_v54 = vld [vmem:[#allocation2 + $0xd0] sm:$0xff] }
 0x263   : > { %v1761_v61 = vmax.f32 %v1691_v44, 0.0  ;;  %2993 = vmatmul.bf16.gmra.mxu0 %v12777_v59  ;;  %2795 = vmatmul.bf16.gmra.mxu3 %v12768_v54  ;;  %v1535_v14 = vadd.f32 %v1534_v49, %v1376_v2 }
 0x265   : > { %v1823_v3 = vmul.f32 %v14418_v33, %v1761_v61 }
 0x266   : > { %v14538_v18 = vpop.f32.mrf.mxu3 }
 0x267   : > { %v1885_v12 = vadd.f32 %v14426_v40, %v1823_v3  ;;  %18774 = vst [vmem:[#allocation10_spill] sm:$0xff] %v14538_v18  ;;  %v12785_v18 = vld [vmem:[#allocation2 + $0x40] sm:$0xff] }
 0x268   : > { %v1693_v16 = vpop.f32.mrf.mxu2  ;;  %v1377_v20 = vpop.f32.mrf.mxu0 }
 0x269   : > { %v13425_v19 = vpack.c.bf16 %v1885_v12, %v1884_v8  ;;  %v1694_v22 = vadd.f32 %v1693_v16, %v1535_v14  ;;  %v1378_v29 = vadd.f32 %v14402_v5, %v1377_v20  ;;  %v1536_v9 = vpop.f32.mrf.mxu1  ;;  %v12779_v14 = vld [vmem:[#allocation2 + $0x88] sm:$0xff] }
 0x26a   : > { %v12837_v20 = vld [vmem:[%s18708_s5 + $0x68] sm:$0xff] }
 0x26b   : > { %13804 = vst [vmem:[#allocation2 + $0x98] sm:$0xff] %v13425_v19   ;;  %v1762_v30 = vmax.f32 %v1694_v22, 0.0  ;;  %v1537_v31 = vadd.f32 %v1536_v9, %v1378_v29  ;;  %v12829_v22 = vld [vmem:[%s18708_s5 + $0x28] sm:$0xff]  ;;  %3855 = vmatpush.bf16.msrb.mxu2 %v12837_v20 }
 0x26c   : > { %3711 = vmatpush.bf16.msrb.mxu1 %v12829_v22 }
 0x26d   : > { %v1824_v51 = vmul.f32 %v14418_v33, %v1762_v30  ;;  %v12780_v30 = vld [vmem:[#allocation2 + $0xe8] sm:$0xff] }
 0x26e   : > { %v14541_v38 = vpop.f32.mrf.mxu3 }
 0x26f   : > { %18775 = vst [vmem:[#allocation11_spill] sm:$0xff] %v14541_v38  ;;  %v1886_v60 = vadd.f32 %v14426_v40, %v1824_v51  ;;  %v12781_v51 = vld [vmem:[#allocation2 + $0xb8] sm:$0xff] }
 0x270   : > { %v1695_v37 = vpop.f32.mrf.mxu2  ;;  %v1380_v41 = vpop.f32.mrf.mxu0 }
 0x271   : > { %v1696_v39 = vadd.f32 %v1695_v37, %v1537_v31  ;;  %v13907_v31 = vld [vmem:[#allocation2] sm:$0xff] }
 0x272   : > { %v12769_v44 = vld [vmem:[#allocation2 + $0x98] sm:$0xff] }
 0x273   : > { %v1763_v54 = vmax.f32 %v1696_v39, 0.0  ;;  %2998 = vmatmul.bf16.gmra.mxu0 %v12778_v46  ;;  %2800 = vmatmul.bf16.gmra.mxu3 %v12769_v44 }
 0x275   : > { %v1825_v59 = vmul.f32 %v14418_v33, %v1763_v54  ;;  %v13908_v54 = vld [vmem:[#allocation2 + $0xd8] sm:$0xff] }
 0x276   : > { %v14547_v2 = vpop.f32.mrf.mxu3 }
 0x277   : > { %v1887_v61 = vadd.f32 %v14426_v40, %v1825_v59  ;;  %18776 = vst [vmem:[#allocation12_spill] sm:$0xff] %v14547_v2 }
 0x278   : > { %v1382_v3 = vpop.f32.mrf.mxu0 }
 0x279   : > { %v13430_v49 = vpack.c.bf16 %v1887_v61, %v1886_v60 }
 0x27b   : > { %13805 = vst [vmem:[#allocation2 + $0xc8] sm:$0xff] %v13430_v49   ;;  %v12782_v49 = vld [vmem:[#allocation2 + $0x60] sm:$0xff] }
 0x27e   : > { %v14549_v4 = vpop.f32.mrf.mxu3 }
 0x27f   : > { %18777 = vst [vmem:[#allocation13_spill] sm:$0xff] %v14549_v4 }
 0x280   : > { %v14551_v8 = vpop.f32.mrf.mxu0 }
 0x282   : > { %v12770_v12 = vld [vmem:[#allocation2 + $0xc8] sm:$0xff] }
 0x283   : > { %3003 = vmatmul.bf16.gmra.mxu0 %v12779_v14  ;;  %2805 = vmatmul.bf16.gmra.mxu3 %v12770_v12  ;;  %v13909_v12 = vld [vmem:[#allocation2 + $0x18] sm:$0xff] }
 0x286   : > { %v14553_v16 = vpop.f32.mrf.mxu3 }
 0x287   : > { %18778 = vst [vmem:[#allocation14_spill] sm:$0xff] %v14553_v16 }
 0x288   : > { %v14555_v19 = vpop.f32.mrf.mxu0 }
 0x28e   : > { %v14563_v29 = vpop.f32.mrf.mxu3 }
 0x28f   : > { %18779 = vst [vmem:[#allocation15_spill] sm:$0xff] %v14563_v29 }
 0x290   : > { %v14565_v9 = vpop.f32.mrf.mxu0 }
 0x293   : > { %3008 = vmatmul.bf16.gmra.mxu0 %v12780_v30  ;;  %2819 = vmatmul.bf16.vlgmr.msrb.gmra.mxu3 %v13907_v31  ;;  %v12783_v31 = vld [vmem:[#allocation2 + $0xa8] sm:$0xff] }
 0x296   : > { %v14567_v37 = vpop.f32.mrf.mxu3 }
 0x297   : > { %18780 = vst [vmem:[#allocation16_spill] sm:$0xff] %v14567_v37  ;;  %v1383_v37 = vadd.f32 %v14402_v5, %v1382_v3 }
 0x298   : > { %v14569_v39 = vpop.f32.mrf.mxu0 }
 0x29e   : > { %v14571_v44 = vpop.f32.mrf.mxu3 }
 0x29f   : > { %18781 = vst [vmem:[#allocation17_spill] sm:$0xff] %v14571_v44 }
 0x2a0   : > { %v14573_v46 = vpop.f32.mrf.mxu0 }
 0x2a3   : > { %3013 = vmatmul.bf16.gmra.mxu0 %v12781_v51  ;;  %2824 = vmatmul.bf16.gmra.mxu3 %v13908_v54  ;;  %v13910_v51 = vld [vmem:[#allocation2 + $0x50] sm:$0xff]  ;;  %v12836_v54 = vld [vmem:[%s18708_s5 + $0x60] sm:$0xff] }
 0x2a4   : > { %3856 = vmatpush.bf16.msrb.mxu2 %v12836_v54  ;;  %v13911_v54 = vld [vmem:[#allocation2 + $0x68] sm:$0xff] }
 0x2a6   : > { %v14575_v59 = vpop.f32.mrf.mxu3 }
 0x2a7   : > { %18782 = vst [vmem:[#allocation18_spill] sm:$0xff] %v14575_v59 }
 0x2a8   : > { %v14577_v60 = vpop.f32.mrf.mxu0 }
 0x2ae   : > { %v14579_v61 = vpop.f32.mrf.mxu3 }
 0x2af   : > { %18783 = vst [vmem:[#allocation19_spill] sm:$0xff] %v14579_v61 }
 0x2b0   : > { %v14581_v14 = vpop.f32.mrf.mxu0 }
 0x2b3   : > { %3018 = vmatmul.bf16.gmra.mxu0 %v12782_v49  ;;  %2829 = vmatmul.bf16.gmra.mxu3 %v13909_v12  ;;  %v12828_v12 = vld [vmem:[%s18708_s5 + $0x20] sm:$0xff] }
 0x2b4   : > { %3712 = vmatpush.bf16.msrb.mxu1 %v12828_v12 }
 0x2b6   : > { %v14583_v20 = vpop.f32.mrf.mxu3 }
 0x2b7   : > { %18784 = vst [vmem:[#allocation20_spill] sm:$0xff] %v14583_v20 }
 0x2b8   : > { %v14585_v22 = vpop.f32.mrf.mxu0 }
 0x2be   : > { %v14587_v30 = vpop.f32.mrf.mxu3 }
 0x2bf   : > { %18785 = vst [vmem:[#allocation21_spill] sm:$0xff] %v14587_v30  ;;  %v1381_v30 = vadd.f32 %v14402_v5, %v1380_v41 }
 0x2c0   : > { %v14597_v20 = vpop.f32.mrf.mxu0 }
 0x2c3   : > { %3023 = vmatmul.bf16.gmra.mxu0 %v12783_v31  ;;  %2834 = vmatmul.bf16.gmra.mxu3 %v13910_v51  ;;  %v1539_v31 = vpop.f32.mrf.mxu1  ;;  %v12784_v51 = vld [vmem:[#allocation2 + $0x70] sm:$0xff] }
 0x2c4   : > { %v1540_v59 = vadd.f32 %v1539_v31, %v1381_v30 }
 0x2c6   : > { %v14592_v49 = vpop.f32.mrf.mxu3 }
 0x2c7   : > { %18786 = vst [vmem:[#allocation22_spill] sm:$0xff] %v14592_v49  ;;  %v1698_v49 = vpop.f32.mrf.mxu2 }
 0x2c8   : > { %v14602_v44 = vpop.f32.mrf.mxu0  ;;  %v1699_v29 = vadd.f32 %v1698_v49, %v1540_v59 }
 0x2ca   : > { %v1764_v12 = vmax.f32 %v1699_v29, 0.0 }
 0x2cb   : > { %v1541_v4 = vpop.f32.mrf.mxu1 }
 0x2cc   : > { %v1542_v2 = vadd.f32 %v1541_v4, %v1383_v37  ;;  %v1826_v38 = vmul.f32 %v14418_v33, %v1764_v12  ;;  %v13912_v4 = vld [vmem:[#allocation2 + $0x30] sm:$0xff] }
 0x2ce   : > { %v14600_v61 = vpop.f32.mrf.mxu3  ;;  %v1888_v3 = vadd.f32 %v14426_v40, %v1826_v38 }
 0x2cf   : > { %18787 = vst [vmem:[#allocation23_spill] sm:$0xff] %v14600_v61  ;;  %v1700_v61 = vpop.f32.mrf.mxu2 }
 0x2d0   : > { %v14607_v41 = vpop.f32.mrf.mxu0  ;;  %v1701_v30 = vadd.f32 %v1700_v61, %v1542_v2 }
 0x2d3   : > { %3028 = vmatmul.bf16.gmra.mxu0 %v12784_v51  ;;  %2839 = vmatmul.bf16.gmra.mxu3 %v13911_v54  ;;  %v1386_v51 = vadd.f32 %v14402_v5, %v14551_v8  ;;  %v1765_v54 = vmax.f32 %v1701_v30, 0.0  ;;  %v1544_v29 = vpop.f32.mrf.mxu1  ;;  %v1388_v8 = vadd.f32 %v14402_v5, %v14555_v19  ;;  %v13913_v5 = vld [vmem:[#allocation2 + $0x48] sm:$0xff] }
 0x2d5   : > { %v1827_v59 = vmul.f32 %v14418_v33, %v1765_v54  ;;  %v1545_v49 = vadd.f32 %v1544_v29, %v1386_v51  ;;  %v12786_v29 = vld [vmem:[#allocation2 + $0x8] sm:$0xff] }
 0x2d6   : > { %v14605_v16 = vpop.f32.mrf.mxu3 }
 0x2d7   : > { %18788 = vst [vmem:[#allocation24_spill] sm:$0xff] %v14605_v16  ;;  %v1889_v37 = vadd.f32 %v14426_v40, %v1827_v59  ;;  %v1703_v12 = vpop.f32.mrf.mxu2 }
 0x2d8   : > { %v1704_v61 = vadd.f32 %v1703_v12, %v1545_v49 }
 0x2d9   : > { %v13435_v2 = vpack.c.bf16 %v1889_v37, %v1888_v3 }
 0x2da   : > { %v1766_v38 = vmax.f32 %v1704_v61, 0.0 }
 0x2db   : > { %13806 = vst [vmem:[#allocation2 + $0xe0] sm:$0xff] %v13435_v2   ;;  %v1546_v30 = vpop.f32.mrf.mxu1 }
 0x2de   : > { %v14610_v31 = vpop.f32.mrf.mxu3 }
 0x2df   : > { %18789 = vst [vmem:[#allocation25_spill] sm:$0xff] %v14610_v31  ;;  %v14617_v31 = vpop.f32.mrf.mxu0  ;;  %v1705_v54 = vpop.f32.mrf.mxu2 }
 0x2e3   : > { %3033 = vmatmul.bf16.gmra.mxu0 %v12785_v18  ;;  %2844 = vmatmul.bf16.gmra.mxu3 %v13912_v4  ;;  %v1547_v18 = vadd.f32 %v1546_v30, %v1388_v8  ;;  %v1828_v4 = vmul.f32 %v14418_v33, %v1766_v38  ;;  %v13914_v38 = vld [vmem:[#allocation2 + $0x80] sm:$0xff] }
 0x2e5   : > { %v1706_v43 = vadd.f32 %v1705_v54, %v1547_v18  ;;  %v1890_v37 = vadd.f32 %v14426_v40, %v1828_v4  ;;  %v12827_v18 = vld [vmem:[%s18708_s5 + $0x18] sm:$0xff] }
 0x2e6   : > { %v14619_v16 = vpop.f32.mrf.mxu3  ;;  %3713 = vmatpush.bf16.msrb.mxu1 %v12827_v18  ;;  %v12832_v18 = vld [vmem:[%s18708_s5 + $0x40] sm:$0xff] }
 0x2e7   : > { %18790 = vst [vmem:[#allocation26_spill] sm:$0xff] %v14619_v16  ;;  %v1767_v51 = vmax.f32 %v1706_v43, 0.0  ;;  %v14626_v3 = vpop.f32.mrf.mxu0  ;;  %v12787_v43 = vld [vmem:[#allocation2 + $0x78] sm:$0xff] }
 0x2e9   : > { %v1829_v49 = vmul.f32 %v14418_v33, %v1767_v51  ;;  %v12788_v51 = vld [vmem:[#allocation2 + $0xc0] sm:$0xff] }
 0x2eb   : > { %v1891_v19 = vadd.f32 %v14426_v40, %v1829_v49  ;;  %v12835_v40 = vld [vmem:[%s18708_s5 + $0x58] sm:$0xff]  ;;  %v12834_v49 = vld [vmem:[%s18708_s5 + $0x50] sm:$0xff] }
 0x2ec   : > { %3857 = vmatpush.bf16.msrb.mxu2 %v12835_v40  ;;  %v12824_v40 = vld [vmem:[%s18708_s5] sm:$0xff] }
 0x2ed   : > { %v13440_v12 = vpack.c.bf16 %v1891_v19, %v1890_v37  ;;  %v12826_v37 = vld [vmem:[%s18708_s5 + $0x10] sm:$0xff] }
 0x2ee   : > { %v14624_v59 = vpop.f32.mrf.mxu3  ;;  %3714 = vmatpush.bf16.msrb.mxu1 %v12826_v37 }
 0x2ef   : > { %18791 = vst [vmem:[#allocation27_spill] sm:$0xff] %v14624_v59  ;;  %v14633_v61 = vpop.f32.mrf.mxu0 }
 0x2f0   : > { %13807 = vst [vmem:[#allocation2 + $0x20] sm:$0xff] %v13440_v12   ;;  %3858 = vmatpush.bf16.msrb.mxu2 %v12834_v49  ;;  %v12825_v12 = vld [vmem:[%s18708_s5 + $0x8] sm:$0xff]  ;;  %v12789_v49 = vld [vmem:[#allocation2 + $0x10] sm:$0xff] }
 0x2f2   : > { %3715 = vmatpush.bf16.msrb.mxu1 %v12825_v12 }
 0x2f3   : > { %3038 = vmatmul.bf16.gmra.mxu0 %v12786_v29  ;;  %2849 = vmatmul.bf16.gmra.mxu3 %v13913_v5  ;;  %v13915_v29 = vld [vmem:[#allocation2 + $0x88] sm:$0xff] }
 0x2f6   : > { %v14631_v2 = vpop.f32.mrf.mxu3  ;;  %3716 = vmatpush.bf16.msrb.mxu1 %v12824_v40 }
 0x2f7   : > { %18792 = vst [vmem:[#allocation28_spill] sm:$0xff] %v14631_v2  ;;  %v14637_v30 = vpop.f32.mrf.mxu0 }
 0x2fe   : > { %v14635_v8 = vpop.f32.mrf.mxu3 }
 0x2ff   : > { %18793 = vst [vmem:[#allocation29_spill] sm:$0xff] %v14635_v8  ;;  %v14647_v54 = vpop.f32.mrf.mxu0 }
 0x303   : > { %3043 = vmatmul.bf16.gmra.mxu0 %v12787_v43  ;;  %2854 = vmatmul.bf16.gmra.mxu3 %v13914_v38  ;;  %v12833_v43 = vld [vmem:[%s18708_s5 + $0x48] sm:$0xff]  ;;  %v14668_v38 = vld [vmem:[%s18707_s4] ss:$0 sm:$0xff] }
 0x304   : > { %3859 = vmatpush.bf16.msrb.mxu2 %v12833_v43  ;;  %v13916_v43 = vld [vmem:[#allocation2 + $0xe8] sm:$0xff]  ;;  %v2677_v8 = vadd.f32 %v14668_v38, %v14307_v63 }
 0x306   : > { %v14639_v33 = vpop.f32.mrf.mxu3 }
 0x307   : > { %18794 = vst [vmem:[#allocation30_spill] sm:$0xff] %v14639_v33  ;;  %v14657_v19 = vpop.f32.mrf.mxu0  ;;  %v2674_v33 = vadd.f32 %v14668_v38, %v14298_v47  ;;  %v14695_v47 = vld [vmem:[%s18707_s4 + $0x2] ss:$0 sm:$0xff] }
 0x308   : > { %3860 = vmatpush.bf16.msrb.mxu2 %v12832_v18 }
 0x30e   : > { %v14649_v4 = vpop.f32.mrf.mxu3 }
 0x30f   : > { %18795 = vst [vmem:[#allocation31_spill] sm:$0xff] %v14649_v4  ;;  %v14678_v4 = vpop.f32.mrf.mxu0 }
 0x313   : > { %3048 = vmatmul.bf16.gmra.mxu0 %v12788_v51  ;;  %2859 = vmatmul.bf16.gmra.mxu3 %v13915_v29  ;;  %v2672_v51 = vadd.f32 %v14668_v38, %v14289_v36 }
 0x316   : > { %v2820_v5 = vpop.f32.mrf.mxu3 }
 0x317   : > { %v2821_v37 = vadd.f32 %v2820_v5, %v2672_v51  ;;  %v14688_v5 = vld [vmem:[%s18707_s4 + $0x1] ss:$0 sm:$0xff] }
 0x319   : > { %v2970_v12 = vadd.f32 %v14565_v9, %v2821_v37 }
 0x31b   : > { %v3109_v36 = vmax.f32 %v2970_v12, 0.0  ;;  %v2679_v12 = vadd.f32 %v14668_v38, %v14310_v10 }
 0x31d   : > { %v3167_v9 = vmul.f32 %v14688_v5, %v3109_v36  ;;  %v12790_v36 = vld [vmem:[#allocation2 + $0x38] sm:$0xff] }
 0x31e   : > { %v2822_v29 = vpop.f32.mrf.mxu3 }
 0x31f   : > { %v2823_v40 = vadd.f32 %v2822_v29, %v2674_v33 }
 0x321   : > { %v2972_v63 = vadd.f32 %v14569_v39, %v2823_v40 }
 0x323   : > { %3053 = vmatmul.bf16.gmra.mxu0 %v12789_v49  ;;  %2864 = vmatmul.bf16.gmra.mxu3 %v13916_v43  ;;  %v14698_v49 = vpop.f32.mrf.mxu0 }
 0x326   : > { %v2825_v2 = vpop.f32.mrf.mxu3 }
 0x327   : > { %v2826_v18 = vadd.f32 %v2825_v2, %v2677_v8  ;;  %v3110_v8 = vmax.f32 %v2972_v63, 0.0 }
 0x329   : > { %v2975_v51 = vadd.f32 %v14573_v46, %v2826_v18  ;;  %v3225_v46 = vadd.f32 %v14695_v47, %v3167_v9  ;;  %v3168_v39 = vmul.f32 %v14688_v5, %v3110_v8 }
 0x32b   : > { %v3111_v37 = vmax.f32 %v2975_v51, 0.0  ;;  %v13917_v51 = vld [vmem:[#allocation2 + $0xb8] sm:$0xff]  ;;  %v3226_v9 = vadd.f32 %v14695_v47, %v3168_v39 }
 0x32d   : > { %v3169_v33 = vmul.f32 %v14688_v5, %v3111_v37  ;;  %v14708_v37 = vpop.f32.mrf.mxu0 }
 0x32e   : > { %v2827_v2 = vpop.f32.mrf.mxu3 }
 0x32f   : > { %v3227_v29 = vadd.f32 %v14695_v47, %v3169_v33  ;;  %v2828_v43 = vadd.f32 %v2827_v2, %v2679_v12 }
 0x331   : > { %v3401_v18 = vmax.f32 %v3225_v46, %v3227_v29  ;;  %v2977_v59 = vadd.f32 %v14577_v60, %v2828_v43  ;;  %v2682_v60 = vadd.f32 %v14668_v38, %v14319_v25  ;;  %v2687_v25 = vadd.f32 %v14668_v38, %v14331_v52 }
 0x333   : > { %3058 = vmatmul.bf16.gmra.mxu0 %v12790_v36  ;;  %v3112_v40 = vmax.f32 %v2977_v59, 0.0  ;;  %2869 = vmatmul.bf16.gmra.mxu3 %v13917_v51  ;;  %v3403_v12 = vpack.c.bf16 %v3401_v18, %v3401_v18  ;;  %v13918_v51 = vld [vmem:[#allocation2 + $0x60] sm:$0xff]  ;;  %v2684_v18 = vadd.f32 %v14668_v38, %v14322_v34 }
 0x335   : > { %v3170_v10 = vmul.f32 %v14688_v5, %v3112_v40  ;;  %v3563_v46 = vunpack.c.l.b16 %v3403_v12  ;;  %v14714_v36 = vpop.f32.mrf.mxu0  ;;  %v12791_v40 = vld [vmem:[#allocation2 + $0x28] sm:$0xff] }
 0x336   : > { %v2830_v16 = vpop.f32.mrf.mxu3 }
 0x337   : > { %v3228_v63 = vadd.f32 %v14695_v47, %v3170_v10  ;;  %v2831_v29 = vadd.f32 %v2830_v16, %v2682_v60 }
 0x339   : > { %v3402_v33 = vmax.f32 %v3226_v9, %v3228_v63  ;;  %v2980_v39 = vadd.f32 %v14581_v14, %v2831_v29 }
 0x33b   : > { %v3404_v2 = vpack.c.bf16 %v3402_v33, %v3402_v33  ;;  %v3113_v9 = vmax.f32 %v2980_v39, 0.0 }
 0x33d   : > { %v3564_v8 = vunpack.c.l.b16 %v3404_v2  ;;  %v14722_v33 = vpop.f32.mrf.mxu0  ;;  %v3171_v2 = vmul.f32 %v14688_v5, %v3113_v9 }
 0x33e   : > { %v2832_v59 = vpop.f32.mrf.mxu3 }
 0x33f   : > { %v3565_v43 = vpack.c.b16 %v3564_v8, %v3563_v46  ;;  %v2833_v16 = vadd.f32 %v2832_v59, %v2684_v18  ;;  %v2689_v46 = vadd.f32 %v14668_v38, %v14337_v62  ;;  %v3229_v52 = vadd.f32 %v14695_v47, %v3171_v2  ;;  %v13919_v18 = vld [vmem:[#allocation2 + $0xa8] sm:$0xff] }
 0x341   : > { %3717 = vmatmul.bf16.vlgmr.msrb.gmra.mxu1 %v3565_v43  ;;  %3861 = vmatmul.bf16.vlgmr.msrb.gmra.mxu2 %v3565_v43  ;;  %v2982_v14 = vadd.f32 %v14585_v22, %v2833_v16 }
 0x343   : > { %3063 = vmatmul.bf16.gmra.mxu0 %v12791_v40  ;;  %2874 = vmatmul.bf16.gmra.mxu3 %v13918_v51  ;;  %v3114_v29 = vmax.f32 %v2982_v14, 0.0 }
 0x345   : > { %v3172_v22 = vmul.f32 %v14688_v5, %v3114_v29  ;;  %v14733_v62 = vpop.f32.mrf.mxu0  ;;  %v12793_v29 = vld [vmem:[#allocation2 + $0xa0] sm:$0xff] }
 0x346   : > { %v2835_v10 = vpop.f32.mrf.mxu3 }
 0x347   : > { %v2836_v63 = vadd.f32 %v2835_v10, %v2687_v25  ;;  %v3230_v9 = vadd.f32 %v14695_v47, %v3172_v22 }
 0x349   : > { %v2985_v12 = vadd.f32 %v14597_v20, %v2836_v63  ;;  %v12792_v20 = vld [vmem:[#allocation2 + $0x90] sm:$0xff] }
 0x34b   : > { %v3115_v60 = vmax.f32 %v2985_v12, 0.0 }
 0x34d   : > { %v3173_v34 = vmul.f32 %v14688_v5, %v3115_v60 }
 0x34e   : > { %v2837_v8 = vpop.f32.mrf.mxu3 }
 0x34f   : > { %v3231_v59 = vadd.f32 %v14695_v47, %v3173_v34  ;;  %v2838_v43 = vadd.f32 %v2837_v8, %v2689_v46  ;;  %v14740_v46 = vpop.f32.mrf.mxu0 }
 0x351   : > { %v2987_v40 = vadd.f32 %v14602_v44, %v2838_v43  ;;  %v3413_v39 = vmax.f32 %v3229_v52, %v3231_v59  ;;  %v2692_v44 = vadd.f32 %v14668_v38, %v14346_v17  ;;  %v13920_v43 = vld [vmem:[#allocation2 + $0x70] sm:$0xff]  ;;  %v2697_v17 = vadd.f32 %v14668_v38, %v14361_v45 }
 0x353   : > { %3068 = vmatmul.bf16.gmra.mxu0 %v12792_v20  ;;  %v3116_v51 = vmax.f32 %v2987_v40, 0.0  ;;  %2879 = vmatmul.bf16.gmra.mxu3 %v13919_v18  ;;  %v3415_v12 = vpack.c.bf16 %v3413_v39, %v3413_v39  ;;  %v2694_v20 = vadd.f32 %v14668_v38, %v14352_v28 }
 0x355   : > { %v3174_v25 = vmul.f32 %v14688_v5, %v3116_v51  ;;  %v3569_v14 = vunpack.c.l.b16 %v3415_v12 }
 0x356   : > { %v2840_v10 = vpop.f32.mrf.mxu3 }
 0x357   : > { %v3232_v16 = vadd.f32 %v14695_v47, %v3174_v25  ;;  %v2841_v8 = vadd.f32 %v2840_v10, %v2692_v44  ;;  %v14747_v18 = vpop.f32.mrf.mxu0 }
 0x359   : > { %v3414_v63 = vmax.f32 %v3230_v9, %v3232_v16  ;;  %v2990_v59 = vadd.f32 %v14607_v41, %v2841_v8  ;;  %v2699_v16 = vadd.f32 %v14668_v38, %v14364_v57  ;;  %v13921_v57 = vld [vmem:[#allocation2 + $0x40] sm:$0xff] }
 0x35b   : > { %v3416_v2 = vpack.c.bf16 %v3414_v63, %v3414_v63  ;;  %v3117_v39 = vmax.f32 %v2990_v59, 0.0 }
 0x35d   : > { %v3570_v60 = vunpack.c.l.b16 %v3416_v2  ;;  %v3175_v10 = vmul.f32 %v14688_v5, %v3117_v39  ;;  %v2702_v39 = vadd.f32 %v14668_v38, %v14373_v13 }
 0x35e   : > { %v2842_v34 = vpop.f32.mrf.mxu3 }
 0x35f   : > { %v3571_v52 = vpack.c.b16 %v3570_v60, %v3569_v14  ;;  %v2843_v22 = vadd.f32 %v2842_v34, %v2694_v20  ;;  %v3233_v45 = vadd.f32 %v14695_v47, %v3175_v10  ;;  %v12794_v14 = vld [vmem:[#allocation2 + $0x58] sm:$0xff]  ;;  %v14758_v34 = vpop.f32.mrf.mxu0 }
 0x361   : > { %3722 = vmatmul.bf16.gmra.mxu1 %v3571_v52  ;;  %3866 = vmatmul.bf16.gmra.mxu2 %v3571_v52  ;;  %v2992_v41 = vadd.f32 %v14617_v31, %v2843_v22 }
 0x363   : > { %3073 = vmatmul.bf16.gmra.mxu0 %v12793_v29  ;;  %2884 = vmatmul.bf16.gmra.mxu3 %v13920_v43  ;;  %v3118_v12 = vmax.f32 %v2992_v41, 0.0 }
 0x365   : > { %v3176_v31 = vmul.f32 %v14688_v5, %v3118_v12 }
 0x366   : > { %v2845_v40 = vpop.f32.mrf.mxu3 }
 0x367   : > { %v2846_v51 = vadd.f32 %v2845_v40, %v2697_v17  ;;  %v3234_v59 = vadd.f32 %v14695_v47, %v3176_v31 }
 0x369   : > { %v2995_v25 = vadd.f32 %v14626_v3, %v2846_v51 }
 0x36b   : > { %v3119_v9 = vmax.f32 %v2995_v25, 0.0 }
 0x36d   : > { %v3177_v28 = vmul.f32 %v14688_v5, %v3119_v9  ;;  %v12795_v9 = vld [vmem:[#allocation2 + $0xd0] sm:$0xff] }
 0x36e   : > { %v2847_v63 = vpop.f32.mrf.mxu3 }
 0x36f   : > { %v3235_v2 = vadd.f32 %v14695_v47, %v3177_v28  ;;  %v2848_v44 = vadd.f32 %v2847_v63, %v2699_v16  ;;  %v13922_v28 = vld [vmem:[#allocation2 + $0x8] sm:$0xff]  ;;  %v2704_v63 = vadd.f32 %v14668_v38, %v14376_v23 }
 0x371   : > { %v2997_v3 = vadd.f32 %v14633_v61, %v2848_v44  ;;  %v3425_v60 = vmax.f32 %v3233_v45, %v3235_v2  ;;  %v14764_v61 = vpop.f32.mrf.mxu0  ;;  %v2707_v45 = vadd.f32 %v14668_v38, %v14385_v42 }
 0x373   : > { %3078 = vmatmul.bf16.gmra.mxu0 %v12794_v14  ;;  %v3120_v8 = vmax.f32 %v2997_v3, 0.0  ;;  %2889 = vmatmul.bf16.gmra.mxu3 %v13921_v57  ;;  %v3427_v17 = vpack.c.bf16 %v3425_v60, %v3425_v60 }
 0x375   : > { %v3178_v52 = vmul.f32 %v14688_v5, %v3120_v8  ;;  %v3575_v22 = vunpack.c.l.b16 %v3427_v17  ;;  %v2709_v8 = vadd.f32 %v14668_v38, %v14394_v58  ;;  %v13923_v58 = vld [vmem:[#allocation2 + $0x78] sm:$0xff] }
 0x376   : > { %v2850_v29 = vpop.f32.mrf.mxu3 }
 0x377   : > { %v3236_v43 = vadd.f32 %v14695_v47, %v3178_v52  ;;  %v2851_v10 = vadd.f32 %v2850_v29, %v2702_v39 }
 0x379   : > { %v3426_v20 = vmax.f32 %v3234_v59, %v3236_v43  ;;  %v3000_v16 = vadd.f32 %v14637_v30, %v2851_v10  ;;  %v14773_v13 = vpop.f32.mrf.mxu0 }
 0x37b   : > { %v3428_v40 = vpack.c.bf16 %v3426_v20, %v3426_v20  ;;  %v3121_v2 = vmax.f32 %v3000_v16, 0.0 }
 0x37d   : > { %v3576_v51 = vunpack.c.l.b16 %v3428_v40  ;;  %v3179_v60 = vmul.f32 %v14688_v5, %v3121_v2 }
 0x37e   : > { %v2852_v25 = vpop.f32.mrf.mxu3 }
 0x37f   : > { %v3577_v41 = vpack.c.b16 %v3576_v51, %v3575_v22  ;;  %v2853_v44 = vadd.f32 %v2852_v25, %v2704_v63  ;;  %v3237_v42 = vadd.f32 %v14695_v47, %v3179_v60 }
 0x381   : > { %3727 = vmatmul.bf16.gmra.mxu1 %v3577_v41  ;;  %3871 = vmatmul.bf16.gmra.mxu2 %v3577_v41  ;;  %v3002_v30 = vadd.f32 %v14647_v54, %v2853_v44  ;;  %v14783_v43 = vpop.f32.mrf.mxu0  ;;  %v12797_v44 = vld [vmem:[#allocation2 + $0xc8] sm:$0xff] }
 0x383   : > { %3083 = vmatmul.bf16.gmra.mxu0 %v12795_v9  ;;  %2894 = vmatmul.bf16.gmra.mxu3 %v13922_v28  ;;  %v3122_v52 = vmax.f32 %v3002_v30, 0.0  ;;  %v2714_v30 = vadd.f32 %v14668_v38, %v14411_v26 }
 0x385   : > { %v3180_v54 = vmul.f32 %v14688_v5, %v3122_v52 }
 0x386   : > { %v2855_v12 = vpop.f32.mrf.mxu3 }
 0x387   : > { %v2856_v14 = vadd.f32 %v2855_v12, %v2707_v45  ;;  %v3238_v51 = vadd.f32 %v14695_v47, %v3180_v54 }
 0x389   : > { %v3005_v3 = vadd.f32 %v14657_v19, %v2856_v14  ;;  %v12796_v19 = vld [vmem:[#allocation2 + $0x98] sm:$0xff]  ;;  %v14790_v9 = vpop.f32.mrf.mxu0 }
 0x38b   : > { %v3123_v31 = vmax.f32 %v3005_v3, 0.0  ;;  %v13924_v3 = vld [vmem:[#allocation2 + $0xc0] sm:$0xff] }
 0x38d   : > { %v3181_v23 = vmul.f32 %v14688_v5, %v3123_v31 }
 0x38e   : > { %v2857_v57 = vpop.f32.mrf.mxu3 }
 0x38f   : > { %v3239_v29 = vadd.f32 %v14695_v47, %v3181_v23  ;;  %v2858_v59 = vadd.f32 %v2857_v57, %v2709_v8 }
 0x391   : > { %v3007_v20 = vadd.f32 %v14678_v4, %v2858_v59  ;;  %v3437_v17 = vmax.f32 %v3237_v42, %v3239_v29  ;;  %v2712_v4 = vadd.f32 %v14668_v38, %v14408_v15  ;;  %v14795_v60 = vpop.f32.mrf.mxu0  ;;  %v2717_v15 = vadd.f32 %v14668_v38, %v14430_v48 }
 0x392   : > { %v2719_v59 = vadd.f32 %v14668_v38, %v14436_v1  ;;  %v13925_v1 = vld [vmem:[#allocation2 + $0x10] sm:$0xff] }
 0x393   : > { %3088 = vmatmul.bf16.gmra.mxu0 %v12796_v19  ;;  %v3124_v40 = vmax.f32 %v3007_v20, 0.0  ;;  %2899 = vmatmul.bf16.gmra.mxu3 %v13923_v58  ;;  %v3439_v41 = vpack.c.bf16 %v3437_v17, %v3437_v17 }
 0x395   : > { %v3182_v39 = vmul.f32 %v14688_v5, %v3124_v40  ;;  %v3581_v28 = vunpack.c.l.b16 %v3439_v41 }
 0x396   : > { %v2860_v22 = vpop.f32.mrf.mxu3 }
 0x397   : > { %v3240_v25 = vadd.f32 %v14695_v47, %v3182_v39  ;;  %v2861_v12 = vadd.f32 %v2860_v22, %v2712_v4 }
 0x399   : > { %v3438_v10 = vmax.f32 %v3238_v51, %v3240_v25  ;;  %v3010_v14 = vadd.f32 %v14698_v49, %v2861_v12  ;;  %v14807_v26 = vpop.f32.mrf.mxu0 }
 0x39b   : > { %v3440_v16 = vpack.c.bf16 %v3438_v10, %v3438_v10  ;;  %v3125_v8 = vmax.f32 %v3010_v14, 0.0 }
 0x39d   : > { %v3582_v63 = vunpack.c.l.b16 %v3440_v16  ;;  %v3183_v52 = vmul.f32 %v14688_v5, %v3125_v8  ;;  %v13926_v8 = vld [vmem:[#allocation2 + $0x38] sm:$0xff] }
 0x39e   : > { %v2862_v45 = vpop.f32.mrf.mxu3 }
 0x39f   : > { %v3583_v2 = vpack.c.b16 %v3582_v63, %v3581_v28  ;;  %v2863_v23 = vadd.f32 %v2862_v45, %v2714_v30  ;;  %v3241_v48 = vadd.f32 %v14695_v47, %v3183_v52 }
 0x3a1   : > { %3732 = vmatmul.bf16.gmra.mxu1 %v3583_v2  ;;  %3876 = vmatmul.bf16.gmra.mxu2 %v3583_v2  ;;  %v3012_v49 = vadd.f32 %v14708_v37, %v2863_v23  ;;  %v14816_v16 = vpop.f32.mrf.mxu0 }
 0x3a3   : > { %3093 = vmatmul.bf16.gmra.mxu0 %v12797_v44  ;;  %2904 = vmatmul.bf16.gmra.mxu3 %v13924_v3  ;;  %v3126_v17 = vmax.f32 %v3012_v49, 0.0  ;;  %v12799_v3 = vld [vmem:[#allocation2 + $0x20] sm:$0xff] }
 0x3a5   : > { %v3184_v37 = vmul.f32 %v14688_v5, %v3126_v17 }
 0x3a6   : > { %v2865_v31 = vpop.f32.mrf.mxu3 }
 0x3a7   : > { %v2866_v57 = vadd.f32 %v2865_v31, %v2717_v15  ;;  %v3242_v10 = vadd.f32 %v14695_v47, %v3184_v37 }
 0x3a9   : > { %v3015_v42 = vadd.f32 %v14714_v36, %v2866_v57  ;;  %v12798_v36 = vld [vmem:[#allocation2 + $0xe0] sm:$0xff]  ;;  %v14820_v30 = vpop.f32.mrf.mxu0  ;;  %v2727_v57 = vadd.f32 %v14668_v38, %v14457_v55 }
 0x3ab   : > { %v3127_v29 = vmax.f32 %v3015_v42, 0.0 }
 0x3ad   : > { %v3185_v19 = vmul.f32 %v14688_v5, %v3127_v29 }
 0x3ae   : > { %v2867_v20 = vpop.f32.mrf.mxu3 }
 0x3af   : > { %v3243_v54 = vadd.f32 %v14695_v47, %v3185_v19  ;;  %v2868_v40 = vadd.f32 %v2867_v20, %v2719_v59 }
 0x3b1   : > { %v3017_v58 = vadd.f32 %v14722_v33, %v2868_v40  ;;  %v3449_v39 = vmax.f32 %v3241_v48, %v3243_v54  ;;  %v2722_v33 = vadd.f32 %v14668_v38, %v14447_v21  ;;  %v2724_v21 = vadd.f32 %v14668_v38, %v14450_v32 }
 0x3b2   : > { %v2729_v54 = vadd.f32 %v14668_v38, %v14463_v7  ;;  %v13927_v7 = vld [vmem:[#allocation2 + $0x28] sm:$0xff] }
 0x3b3   : > { %3098 = vmatmul.bf16.gmra.mxu0 %v12798_v36  ;;  %v3128_v22 = vmax.f32 %v3017_v58, 0.0  ;;  %2909 = vmatmul.bf16.gmra.mxu3 %v13925_v1  ;;  %v3451_v28 = vpack.c.bf16 %v3449_v39, %v3449_v39 }
 0x3b5   : > { %v3186_v51 = vmul.f32 %v14688_v5, %v3128_v22  ;;  %v3587_v45 = vunpack.c.l.b16 %v3451_v28 }
 0x3b6   : > { %v2870_v25 = vpop.f32.mrf.mxu3 }
 0x3b7   : > { %v3244_v41 = vadd.f32 %v14695_v47, %v3186_v51  ;;  %v2871_v2 = vadd.f32 %v2870_v25, %v2722_v33 }
 0x3b9   : > { %v3450_v4 = vmax.f32 %v3242_v10, %v3244_v41  ;;  %v3020_v15 = vadd.f32 %v14733_v62, %v2871_v2 }
 0x3bb   : > { %v3452_v63 = vpack.c.bf16 %v3450_v4, %v3450_v4  ;;  %v3129_v42 = vmax.f32 %v3020_v15, 0.0 }
 0x3bd   : > { %v3588_v12 = vunpack.c.l.b16 %v3452_v63  ;;  %v3187_v19 = vmul.f32 %v14688_v5, %v3129_v42  ;;  %v12911_v63 = vld [vmem:[%s18709_s6 + $0x174] sm:$0xf] }
 0x3be   : > { %v2872_v44 = vpop.f32.mrf.mxu3  ;;  %v3718_v31 = vpop.f32.mrf.mxu1  ;;  %v12907_v42 = vld [vmem:[%s18709_s6 + $0x154] sm:$0xf] }
 0x3bf   : > { %v3589_v14 = vpack.c.b16 %v3588_v12, %v3587_v45  ;;  %v2873_v49 = vadd.f32 %v2872_v44, %v2724_v21  ;;  %v3245_v36 = vadd.f32 %v14695_v47, %v3187_v19  ;;  %v2732_v44 = vadd.f32 %v14668_v38, %v14470_v27  ;;  %v11066_v27 = vld [vmem:[%s18709_s6 + $0x158] sm:$0xf0] }
 0x3c1   : > { %3737 = vmatmul.bf16.gmra.mxu1 %v3589_v14  ;;  %3881 = vmatmul.bf16.gmra.mxu2 %v3589_v14  ;;  %v3022_v62 = vadd.f32 %v14740_v46, %v2873_v49  ;;  %v12909_v14 = vld [vmem:[%s18709_s6 + $0x164] sm:$0xf] }
 0x3c3   : > { %3103 = vmatmul.bf16.gmra.mxu0 %v12799_v3  ;;  %2914 = vmatmul.bf16.gmra.mxu3 %v13926_v8  ;;  %v3130_v39 = vmax.f32 %v3022_v62, 0.0  ;;  %v11074_v3 = vld [vmem:[%s18709_s6 + $0x168] sm:$0xf0]  ;;  %v12905_v62 = vld [vmem:[%s18709_s6 + $0x144] sm:$0xf] }
 0x3c4   : > { %v3862_v23 = vpop.f32.mrf.mxu2  ;;  %v11077_v8 = vor.u32 %v12909_v14, %v11074_v3 }
 0x3c5   : > { %v3932_v32 = vmax.f32 %v3718_v31, %v3862_v23  ;;  %v3188_v51 = vmul.f32 %v14688_v5, %v3130_v39  ;;  %v14877_v39 = vpop.f32.mrf.mxu0 }
 0x3c6   : > { %v2875_v52 = vpop.f32.mrf.mxu3  ;;  %v3720_v48 = vpop.f32.mrf.mxu1 }
 0x3c7   : > { %v2876_v29 = vadd.f32 %v2875_v52, %v2727_v57  ;;  %v3246_v4 = vadd.f32 %v14695_v47, %v3188_v51  ;;  %v11069_v52 = vor.u32 %v12907_v42, %v11066_v27 }
 0x3c9   : > { %v3025_v59 = vadd.f32 %v14747_v18, %v2876_v29 }
 0x3cb   : > { %v3131_v20 = vmax.f32 %v3025_v59, 0.0  ;;  %v13928_v59 = vld [vmem:[#allocation2 + $0x90] sm:$0xff] }
 0x3cc   : > { %v3864_v17 = vpop.f32.mrf.mxu2 }
 0x3cd   : > { %v3189_v40 = vmul.f32 %v14688_v5, %v3131_v20  ;;  %v3933_v55 = vmax.f32 %v3720_v48, %v3864_v17  ;;  %v11058_v20 = vld [vmem:[%s18709_s6 + $0x148] sm:$0xf0]  ;;  %v2734_v48 = vadd.f32 %v14668_v38, %v14479_v50  ;;  %v2737_v17 = vadd.f32 %v14668_v38, %v14486_v11  ;;  %v14900_v3 = vpop.f32.mrf.mxu0 }
 0x3ce   : > { %v2877_v58 = vpop.f32.mrf.mxu3 }
 0x3cf   : > { %v3247_v18 = vadd.f32 %v14695_v47, %v3189_v40  ;;  %v13697_v37 = vpack.c.bf16 %v3933_v55, %v3932_v32  ;;  %v2878_v22 = vadd.f32 %v2877_v58, %v2729_v54  ;;  %v11050_v58 = vld [vmem:[%s18709_s6 + $0x138] sm:$0xf0] }
 0x3d1   : > { %13698 = vst [vmem:[#allocation4 + $0x58] sm:$0xff] %v13697_v37   ;;  %v3027_v46 = vadd.f32 %v14758_v34, %v2878_v22  ;;  %v3461_v1 = vmax.f32 %v3245_v36, %v3247_v18  ;;  %v11082_v34 = vld [vmem:[%s18709_s6 + $0x178] sm:$0xf0]  ;;  %v12903_v36 = vld [vmem:[%s18709_s6 + $0x134] sm:$0xf] }
 0x3d2   : > { %v11085_v12 = vor.u32 %v12911_v63, %v11082_v34  ;;  %v11053_v18 = vor.u32 %v12903_v36, %v11050_v58 }
 0x3d3   : > { %v3132_v25 = vmax.f32 %v3027_v46, 0.0  ;;  %2919 = vmatmul.bf16.gmra.mxu3 %v13927_v7  ;;  %v3463_v45 = vpack.c.bf16 %v3461_v1, %v3461_v1  ;;  %v2739_v46 = vadd.f32 %v14668_v38, %v14489_v24 }
 0x3d4   : > { %4855 = vmatpush.bf16.msra.mxu0 %v11085_v12  ;;  %v11034_v12 = vld [vmem:[%s18709_s6 + $0x118] sm:$0xf0] }
 0x3d5   : > { %v3190_v10 = vmul.f32 %v14688_v5, %v3132_v25  ;;  %v3593_v15 = vunpack.c.l.b16 %v3463_v45  ;;  %v12901_v25 = vld [vmem:[%s18709_s6 + $0x124] sm:$0xf]  ;;  %v12899_v45 = vld [vmem:[%s18709_s6 + $0x114] sm:$0xf]  ;;  %v14932_v36 = vpop.f32.mrf.mxu0 }
 0x3d6   : > { %v2880_v41 = vpop.f32.mrf.mxu3  ;;  %v11037_v14 = vor.u32 %v12899_v45, %v11034_v12 }
 0x3d7   : > { %v3248_v28 = vadd.f32 %v14695_v47, %v3190_v10  ;;  %v2881_v23 = vadd.f32 %v2880_v41, %v2732_v44 }
 0x3d8   : > { %4856 = vmatpush.bf16.msra.mxu0 %v11077_v8  ;;  %v13929_v8 = vld [vmem:[#allocation2 + $0xa0] sm:$0xff] }
 0x3d9   : > { %v3462_v33 = vmax.f32 %v3246_v4, %v3248_v28  ;;  %v3030_v49 = vadd.f32 %v14764_v61, %v2881_v23  ;;  %v11061_v61 = vor.u32 %v12905_v62, %v11058_v20  ;;  %v12897_v23 = vld [vmem:[%s18709_s6 + $0x104] sm:$0xf]  ;;  %v12896_v62 = vld [vmem:[%s18709_s6 + $0xf4] sm:$0xf0]  ;;  %v10952_v20 = vld [vmem:[%s18709_s6 + $0x70] sm:$0xf] }
 0x3db   : > { %v3464_v2 = vpack.c.bf16 %v3462_v33, %v3462_v33  ;;  %v3133_v54 = vmax.f32 %v3030_v49, 0.0  ;;  %v12895_v49 = vld [vmem:[%s18709_s6 + $0xf4] sm:$0xf] }
 0x3dc   : > { %4857 = vmatpush.bf16.msra.mxu0 %v11069_v52 }
 0x3dd   : > { %v3594_v31 = vunpack.c.l.b16 %v3464_v2  ;;  %v3191_v11 = vmul.f32 %v14688_v5, %v3133_v54 }
 0x3de   : > { %v2882_v21 = vpop.f32.mrf.mxu3  ;;  %v3723_v29 = vpop.f32.mrf.mxu1 }
 0x3df   : > { %v3595_v57 = vpack.c.b16 %v3594_v31, %v3593_v15  ;;  %v2883_v40 = vadd.f32 %v2882_v21, %v2734_v48  ;;  %v3249_v4 = vadd.f32 %v14695_v47, %v3191_v11  ;;  %v11026_v21 = vld [vmem:[%s18709_s6 + $0x108] sm:$0xf0]  ;;  %v12880_v48 = vld [vmem:[%s18709_s6 + $0x74] sm:$0xf0] }
 0x3e0   : > { %4858 = vmatpush.bf16.msra.mxu0 %v11061_v61 }
 0x3e1   : > { %3742 = vmatmul.bf16.gmra.mxu1 %v3595_v57  ;;  %3886 = vmatmul.bf16.gmra.mxu2 %v3595_v57  ;;  %v3032_v37 = vadd.f32 %v14773_v13, %v2883_v40  ;;  %v11029_v57 = vor.u32 %v12897_v23, %v11026_v21  ;;  %v12894_v23 = vld [vmem:[%s18709_s6 + $0xe4] sm:$0xf0] }
 0x3e3   : > { %2924 = vmatmul.bf16.gmra.mxu3 %v13928_v59  ;;  %v3134_v63 = vmax.f32 %v3032_v37, 0.0  ;;  %v11016_v59 = vld [vmem:[%s18709_s6 + $0xf0] sm:$0xf] }
 0x3e4   : > { %v3867_v19 = vpop.f32.mrf.mxu2  ;;  %4859 = vmatpush.bf16.msra.mxu0 %v11053_v18  ;;  %v11017_v54 = vor.u32 %v12896_v62, %v11016_v59  ;;  %v10944_v62 = vld [vmem:[%s18709_s6 + $0x60] sm:$0xf] }
 0x3e5   : > { %v3934_v7 = vmax.f32 %v3723_v29, %v3867_v19  ;;  %v3192_v15 = vmul.f32 %v14688_v5, %v3134_v63  ;;  %v11018_v29 = vld [vmem:[%s18709_s6 + $0xf8] sm:$0xf0] }
 0x3e6   : > { %v2885_v32 = vpop.f32.mrf.mxu3  ;;  %v3725_v1 = vpop.f32.mrf.mxu1  ;;  %v11021_v19 = vor.u32 %v12895_v49, %v11018_v29  ;;  %4579 = vmatpush.bf16.msra.mxu2 %v11017_v54 }
 0x3e7   : > { %v2886_v55 = vadd.f32 %v2885_v32, %v2737_v17  ;;  %v3250_v27 = vadd.f32 %v14695_v47, %v3192_v15  ;;  %v10953_v32 = vor.u32 %v12880_v48, %v10952_v20  ;;  %v12878_v20 = vld [vmem:[%s18709_s6 + $0x64] sm:$0xf0] }
 0x3e8   : > { %4786 = vmatpush.bf16.msra.mxu3 %v11021_v19 }
 0x3e9   : > { %v3035_v50 = vadd.f32 %v14783_v43, %v2886_v55  ;;  %v11042_v43 = vld [vmem:[%s18709_s6 + $0x128] sm:$0xf0]  ;;  %4510 = vmatpush.bf16.msra.mxu1 %v10953_v32  ;;  %v2742_v55 = vadd.f32 %v14668_v38, %v14496_v53  ;;  %v2747_v53 = vadd.f32 %v14668_v38, %v14509_v35  ;;  %v12891_v32 = vld [vmem:[%s18709_s6 + $0xd4] sm:$0xf] }
 0x3ea   : > { %v11045_v13 = vor.u32 %v12901_v25, %v11042_v43  ;;  %v2744_v25 = vadd.f32 %v14668_v38, %v14502_v6  ;;  %v2749_v6 = vadd.f32 %v14668_v38, %v14515_v56  ;;  %v11008_v56 = vld [vmem:[%s18709_s6 + $0xe0] sm:$0xf] }
 0x3eb   : > { %v3135_v22 = vmax.f32 %v3035_v50, 0.0  ;;  %v11009_v21 = vor.u32 %v12894_v23, %v11008_v56 }
 0x3ec   : > { %v3869_v51 = vpop.f32.mrf.mxu2  ;;  %4860 = vmatpush.bf16.msra.mxu0 %v11045_v13 }
 0x3ed   : > { %v3193_v10 = vmul.f32 %v14688_v5, %v3135_v22  ;;  %v3935_v41 = vmax.f32 %v3725_v1, %v3869_v51  ;;  %v13930_v1 = vld [vmem:[#allocation2 + $0x58] sm:$0xff]  ;;  %4580 = vmatpush.bf16.msra.mxu2 %v11009_v21 }
 0x3ee   : > { %v2887_v28 = vpop.f32.mrf.mxu3 }
 0x3ef   : > { %v3251_v24 = vadd.f32 %v14695_v47, %v3193_v10  ;;  %v13702_v34 = vpack.c.bf16 %v3935_v41, %v3934_v7  ;;  %v2888_v33 = vadd.f32 %v2887_v28, %v2739_v46  ;;  %v14939_v10 = vpop.f32.mrf.mxu0 }
 0x3f0   : > { %4861 = vmatpush.bf16.msra.mxu0 %v11037_v14 }
 0x3f1   : > { %13862 = vst [vmem:[#allocation4 + $0x8] sm:$0xff] %v13702_v34   ;;  %v3037_v2 = vadd.f32 %v14790_v9, %v2888_v33  ;;  %v3473_v44 = vmax.f32 %v3249_v4, %v3251_v24 }
 0x3f3   : > { %v3136_v31 = vmax.f32 %v3037_v2, 0.0  ;;  %2929 = vmatmul.bf16.gmra.mxu3 %v13929_v8  ;;  %v3475_v61 = vpack.c.bf16 %v3473_v44, %v3473_v44 }
 0x3f4   : > { %4862 = vmatpush.bf16.msra.mxu0 %v11029_v57 }
 0x3f5   : > { %v3194_v9 = vmul.f32 %v14688_v5, %v3136_v31  ;;  %v3599_v58 = vunpack.c.l.b16 %v3475_v61 }
 0x3f6   : > { %v2890_v42 = vpop.f32.mrf.mxu3 }
 0x3f7   : > { %v3252_v52 = vadd.f32 %v14695_v47, %v3194_v9  ;;  %v2891_v18 = vadd.f32 %v2890_v42, %v2742_v55  ;;  %v14949_v31 = vpop.f32.mrf.mxu0  ;;  %v13931_v42 = vld [vmem:[#allocation2 + $0xd0] sm:$0xff] }
 0x3f9   : > { %v3474_v17 = vmax.f32 %v3250_v27, %v3252_v52  ;;  %v3040_v22 = vadd.f32 %v14795_v60, %v2891_v18  ;;  %v11010_v52 = vld [vmem:[%s18709_s6 + $0xe8] sm:$0xf0]  ;;  %v2752_v18 = vadd.f32 %v14668_v38, %v14523_v0  ;;  %v12887_v0 = vld [vmem:[%s18709_s6 + $0xb4] sm:$0xf] }
 0x3fb   : > { %v3476_v40 = vpack.c.bf16 %v3474_v17, %v3474_v17  ;;  %v3137_v43 = vmax.f32 %v3040_v22, 0.0  ;;  %v10945_v17 = vor.u32 %v12878_v20, %v10944_v62  ;;  %v12889_v22 = vld [vmem:[%s18709_s6 + $0xc4] sm:$0xf] }
 0x3fd   : > { %v3600_v50 = vunpack.c.l.b16 %v3476_v40  ;;  %v3195_v60 = vmul.f32 %v14688_v5, %v3137_v43  ;;  %v11002_v40 = vld [vmem:[%s18709_s6 + $0xd8] sm:$0xf0]  ;;  %4511 = vmatpush.bf16.msra.mxu1 %v10945_v17  ;;  %v11000_v17 = vld [vmem:[%s18709_s6 + $0xd0] sm:$0xf] }
 0x3fe   : > { %v2892_v11 = vpop.f32.mrf.mxu3  ;;  %v3728_v46 = vpop.f32.mrf.mxu1  ;;  %v11005_v55 = vor.u32 %v12891_v32, %v11002_v40  ;;  %v10986_v43 = vld [vmem:[%s18709_s6 + $0xb8] sm:$0xf0] }
 0x3ff   : > { %v3601_v37 = vpack.c.b16 %v3600_v50, %v3599_v58  ;;  %v2893_v41 = vadd.f32 %v2892_v11, %v2744_v25  ;;  %v3253_v12 = vadd.f32 %v14695_v47, %v3195_v60  ;;  %v14980_v58 = vpop.f32.mrf.mxu0 }
 0x401   : > { %3747 = vmatmul.bf16.gmra.mxu1 %v3601_v37  ;;  %3891 = vmatmul.bf16.gmra.mxu2 %v3601_v37  ;;  %v3042_v28 = vadd.f32 %v14807_v26, %v2893_v41 }
 0x403   : > { %2934 = vmatmul.bf16.gmra.mxu3 %v13930_v1  ;;  %v3138_v44 = vmax.f32 %v3042_v28, 0.0  ;;  %v18796_v28 = vld [vmem:[#allocation9_spill] sm:$0xff] }
 0x404   : > { %v3872_v51 = vpop.f32.mrf.mxu2 }
 0x405   : > { %v3936_v33 = vmax.f32 %v3728_v46, %v3872_v51  ;;  %v3196_v9 = vmul.f32 %v14688_v5, %v3138_v44  ;;  %v10994_v46 = vld [vmem:[%s18709_s6 + $0xc8] sm:$0xf0] }
 0x406   : > { %v2895_v7 = vpop.f32.mrf.mxu3  ;;  %v3730_v24 = vpop.f32.mrf.mxu1  ;;  %v10997_v25 = vor.u32 %v12889_v22, %v10994_v46  ;;  %v13933_v22 = vld [vmem:[#allocation2 + $0xc8] sm:$0xff] }
 0x407   : > { %v2896_v13 = vadd.f32 %v2895_v7, %v2747_v53  ;;  %v3254_v59 = vadd.f32 %v14695_v47, %v3196_v9 }
 0x409   : > { %v3045_v4 = vadd.f32 %v14816_v16, %v2896_v13  ;;  %v10989_v13 = vor.u32 %v12887_v0, %v10986_v43 }
 0x40b   : > { %v3139_v63 = vmax.f32 %v3045_v4, 0.0  ;;  %v13932_v4 = vld [vmem:[#allocation2 + $0x98] sm:$0xff] }
 0x40c   : > { %v3874_v34 = vpop.f32.mrf.mxu2 }
 0x40d   : > { %v3197_v35 = vmul.f32 %v14688_v5, %v3139_v63  ;;  %v3937_v45 = vmax.f32 %v3730_v24, %v3874_v34  ;;  %v2754_v63 = vadd.f32 %v14668_v38, %v18796_v28  ;;  %v18797_v24 = vld [vmem:[#allocation10_spill] sm:$0xff] }
 0x40e   : > { %v2897_v2 = vpop.f32.mrf.mxu3  ;;  %v2757_v34 = vadd.f32 %v14668_v38, %v18797_v24  ;;  %v12771_v24 = vld [vmem:[#allocation2 + $0xe0] sm:$0xff] }
 0x40f   : > { %v3255_v16 = vadd.f32 %v14695_v47, %v3197_v35  ;;  %v13707_v14 = vpack.c.bf16 %v3937_v45, %v3936_v33  ;;  %v2898_v15 = vadd.f32 %v2897_v2, %v2749_v6  ;;  %v15001_v6 = vpop.f32.mrf.mxu0  ;;  %v12885_v33 = vld [vmem:[%s18709_s6 + $0xa4] sm:$0xf] }
 0x411   : > { %13863 = vst [vmem:[#allocation4 + $0x50] sm:$0xff] %v13707_v14   ;;  %v3047_v26 = vadd.f32 %v14820_v30, %v2898_v15  ;;  %v3485_v8 = vmax.f32 %v3253_v12, %v3255_v16  ;;  %v12893_v30 = vld [vmem:[%s18709_s6 + $0xe4] sm:$0xf]  ;;  %v12883_v14 = vld [vmem:[%s18709_s6 + $0x94] sm:$0xf] }
 0x412   : > { %v11013_v29 = vor.u32 %v12893_v30, %v11010_v52  ;;  %v10970_v15 = vld [vmem:[%s18709_s6 + $0x98] sm:$0xf0]  ;;  %v12881_v52 = vld [vmem:[%s18709_s6 + $0x84] sm:$0xf] }
 0x413   : > { %v3140_v57 = vmax.f32 %v3047_v26, 0.0  ;;  %2939 = vmatmul.bf16.gmra.mxu3 %v13931_v42  ;;  %v3487_v54 = vpack.c.bf16 %v3485_v8, %v3485_v8  ;;  %v10973_v8 = vor.u32 %v12883_v14, %v10970_v15 }
 0x414   : > { %4787 = vmatpush.bf16.msra.mxu3 %v11013_v29 }
 0x415   : > { %v3198_v27 = vmul.f32 %v14688_v5, %v3140_v57  ;;  %v3605_v11 = vunpack.c.l.b16 %v3487_v54  ;;  %v18798_v57 = vld [vmem:[#allocation11_spill] sm:$0xff] }
 0x416   : > { %v2900_v49 = vpop.f32.mrf.mxu3 }
 0x417   : > { %v3256_v19 = vadd.f32 %v14695_v47, %v3198_v27  ;;  %v2901_v1 = vadd.f32 %v2900_v49, %v2752_v18  ;;  %v10962_v49 = vld [vmem:[%s18709_s6 + $0x88] sm:$0xf0] }
 0x418   : > { %v12853_v48 = vld [vmem:[#allocation4 + $0x50] sm:$0xff]  ;;  %4788 = vmatpush.bf16.msra.mxu3 %v11005_v55  ;;  %v10936_v55 = vld [vmem:[%s18709_s6 + $0x50] sm:$0xf] }
 0x419   : > { %v3486_v61 = vmax.f32 %v3254_v59, %v3256_v19  ;;  %4863 = vmatmul.bf16.vlgmr.msra.gmra.mxu0 %v12853_v48  ;;  %v3050_v7 = vadd.f32 %v14877_v39, %v2901_v1  ;;  %v10978_v39 = vld [vmem:[%s18709_s6 + $0xa8] sm:$0xf0]  ;;  %v10965_v59 = vor.u32 %v12881_v52, %v10962_v49  ;;  %v15028_v19 = vpop.f32.mrf.mxu0 }
 0x41a   : > { %v10981_v12 = vor.u32 %v12885_v33, %v10978_v39 }
 0x41b   : > { %v3488_v50 = vpack.c.bf16 %v3486_v61, %v3486_v61  ;;  %v3141_v35 = vmax.f32 %v3050_v7, 0.0  ;;  %v12892_v61 = vld [vmem:[%s18709_s6 + $0xd4] sm:$0xf0] }
 0x41c   : > { %4789 = vmatpush.bf16.msra.mxu3 %v10997_v25  ;;  %v11001_v54 = vor.u32 %v12892_v61, %v11000_v17  ;;  %v10928_v61 = vld [vmem:[%s18709_s6 + $0x40] sm:$0xf] }
 0x41d   : > { %v3606_v37 = vunpack.c.l.b16 %v3488_v50  ;;  %v3199_v26 = vmul.f32 %v14688_v5, %v3141_v35  ;;  %v12876_v50 = vld [vmem:[%s18709_s6 + $0x54] sm:$0xf0] }
 0x41e   : > { %v2902_v51 = vpop.f32.mrf.mxu3  ;;  %v3733_v41 = vpop.f32.mrf.mxu1  ;;  %4581 = vmatpush.bf16.msra.mxu2 %v11001_v54  ;;  %v10937_v18 = vor.u32 %v12876_v50, %v10936_v55  ;;  %v12874_v54 = vld [vmem:[%s18709_s6 + $0x44] sm:$0xf0]  ;;  %v15095_v55 = vld [vmem:[#allocation4 + $0x8] sm:$0xff] }
 0x41f   : > { %v3607_v53 = vpack.c.b16 %v3606_v37, %v3605_v11  ;;  %v2903_v2 = vadd.f32 %v2902_v51, %v2754_v63 }
 0x420   : > { %4790 = vmatpush.bf16.msra.mxu3 %v10989_v13  ;;  %4512 = vmatpush.bf16.msra.mxu1 %v10937_v18  ;;  %v18799_v13 = vld [vmem:[#allocation12_spill] sm:$0xff] }
 0x421   : > { %3752 = vmatmul.bf16.gmra.mxu1 %v3607_v53  ;;  %3896 = vmatmul.bf16.gmra.mxu2 %v3607_v53  ;;  %v3052_v56 = vadd.f32 %v14900_v3, %v2903_v2  ;;  %v3257_v3 = vadd.f32 %v14695_v47, %v3199_v26  ;;  %v15048_v53 = vpop.f32.mrf.mxu0  ;;  %v18801_v2 = vld [vmem:[#allocation14_spill] sm:$0xff] }
 0x423   : > { %2944 = vmatmul.bf16.gmra.mxu3 %v13932_v4  ;;  %v3142_v62 = vmax.f32 %v3052_v56, 0.0 }
 0x424   : > { %v3877_v60 = vpop.f32.mrf.mxu2  ;;  %4791 = vmatpush.bf16.msra.mxu3 %v10981_v12 }
 0x425   : > { %v3938_v42 = vmax.f32 %v3733_v41, %v3877_v60  ;;  %v3200_v11 = vmul.f32 %v14688_v5, %v3142_v62  ;;  %v15053_v41 = vld [vmem:[%s18707_s4] ss:$0 sm:$0xff] }
 0x426   : > { %v2905_v45 = vpop.f32.mrf.mxu3  ;;  %v3735_v21 = vpop.f32.mrf.mxu1 }
 0x427   : > { %v2906_v44 = vadd.f32 %v2905_v45, %v2757_v34  ;;  %v3258_v1 = vadd.f32 %v14695_v47, %v3200_v11  ;;  %v18800_v45 = vld [vmem:[#allocation13_spill] sm:$0xff] }
 0x428   : > { %4792 = vmatpush.bf16.msra.mxu3 %v10973_v8  ;;  %v2764_v12 = vadd.f32 %v15053_v41, %v18800_v45  ;;  %v10992_v8 = vld [vmem:[%s18709_s6 + $0xc0] sm:$0xf] }
 0x429   : > { %v3055_v16 = vadd.f32 %v14932_v36, %v2906_v44  ;;  %v2759_v36 = vadd.f32 %v14668_v38, %v18798_v57  ;;  %v15058_v39 = vpop.f32.mrf.mxu0  ;;  %v2767_v44 = vadd.f32 %v15053_v41, %v18801_v2 }
 0x42b   : > { %v3143_v23 = vmax.f32 %v3055_v16, 0.0 }
 0x42c   : > { %v3879_v9 = vpop.f32.mrf.mxu2  ;;  %4793 = vmatpush.bf16.msra.mxu3 %v10965_v59  ;;  %v15084_v59 = vld [vmem:[%s18707_s4 + $0x2] ss:$0 sm:$0xff] }
 0x42d   : > { %v3201_v27 = vmul.f32 %v14688_v5, %v3143_v23  ;;  %v3939_v30 = vmax.f32 %v3735_v21, %v3879_v9  ;;  %v15074_v21 = vld [vmem:[%s18707_s4 + $0x1] ss:$0 sm:$0xff] }
 0x42e   : > { %v2907_v29 = vpop.f32.mrf.mxu3 }
 0x42f   : > { %v3259_v38 = vadd.f32 %v14695_v47, %v3201_v27  ;;  %v13712_v20 = vpack.c.bf16 %v3939_v30, %v3938_v42  ;;  %v2908_v48 = vadd.f32 %v2907_v29, %v2759_v36  ;;  %v18802_v30 = vld [vmem:[#allocation15_spill] sm:$0xff] }
 0x430   : > { %v2769_v52 = vadd.f32 %v15053_v41, %v18802_v30 }
 0x431   : > { %13864 = vst [vmem:[#allocation4 + $0x40] sm:$0xff] %v13712_v20   ;;  %v3057_v32 = vadd.f32 %v14939_v10, %v2908_v48  ;;  %v3497_v40 = vmax.f32 %v3257_v3, %v3259_v38  ;;  %v3074_v49 = vpop.f32.mrf.mxu0 }
 0x433   : > { %v3144_v37 = vmax.f32 %v3057_v32, 0.0  ;;  %2949 = vmatmul.bf16.gmra.mxu3 %v13933_v22  ;;  %v3499_v43 = vpack.c.bf16 %v3497_v40, %v3497_v40  ;;  %v10929_v32 = vor.u32 %v12874_v54, %v10928_v61 }
 0x435   : > { %v3202_v46 = vmul.f32 %v14688_v5, %v3144_v37  ;;  %v2762_v5 = vadd.f32 %v15053_v41, %v18799_v13  ;;  %v3611_v4 = vunpack.c.l.b16 %v3499_v43  ;;  %4513 = vmatpush.bf16.msra.mxu1 %v10929_v32  ;;  %v18803_v43 = vld [vmem:[#allocation16_spill] sm:$0xff] }
 0x436   : > { %v2910_v10 = vpop.f32.mrf.mxu3 }
 0x437   : > { %v3260_v51 = vadd.f32 %v14695_v47, %v3202_v46  ;;  %v2911_v28 = vadd.f32 %v2910_v10, %v2762_v5 }
 0x438   : > { %v12854_v25 = vld [vmem:[#allocation4 + $0x40] sm:$0xff] }
 0x439   : > { %v3498_v0 = vmax.f32 %v3258_v1, %v3260_v51  ;;  %4868 = vmatmul.bf16.gmra.mxu0 %v12854_v25  ;;  %v3060_v34 = vadd.f32 %v14949_v31, %v2911_v28  ;;  %v12890_v31 = vld [vmem:[%s18709_s6 + $0xc4] sm:$0xf0]  ;;  %v3076_v46 = vpop.f32.mrf.mxu0  ;;  %v15138_v54 = vld [vmem:[#allocation4 + $0x40] sm:$0xff] }
 0x43a   : > { %v10993_v56 = vor.u32 %v12890_v31, %v10992_v8  ;;  %v10920_v8 = vld [vmem:[%s18709_s6 + $0x30] sm:$0xf] }
 0x43b   : > { %v3500_v7 = vpack.c.bf16 %v3498_v0, %v3498_v0  ;;  %v3145_v16 = vmax.f32 %v3060_v34, 0.0 }
 0x43c   : > { %4582 = vmatpush.bf16.msra.mxu2 %v10993_v56  ;;  %v12872_v56 = vld [vmem:[%s18709_s6 + $0x34] sm:$0xf0] }
 0x43d   : > { %v3612_v60 = vunpack.c.l.b16 %v3500_v7  ;;  %v3203_v9 = vmul.f32 %v15074_v21, %v3145_v16  ;;  %v2772_v7 = vadd.f32 %v15053_v41, %v18803_v43 }
 0x43e   : > { %v2912_v63 = vpop.f32.mrf.mxu3  ;;  %v3738_v33 = vpop.f32.mrf.mxu1 }
 0x43f   : > { %v3613_v47 = vpack.c.b16 %v3612_v60, %v3611_v4  ;;  %v2913_v15 = vadd.f32 %v2912_v63, %v2764_v12  ;;  %v3261_v62 = vadd.f32 %v15084_v59, %v3203_v9  ;;  %v18805_v12 = vld [vmem:[#allocation18_spill] sm:$0xff]  ;;  %v10921_v9 = vor.u32 %v12872_v56, %v10920_v8 }
 0x440   : > { %v2777_v2 = vadd.f32 %v15053_v41, %v18805_v12  ;;  %v10912_v56 = vld [vmem:[%s18709_s6 + $0x20] sm:$0xf] }
 0x441   : > { %3757 = vmatmul.bf16.gmra.mxu1 %v3613_v47  ;;  %3901 = vmatmul.bf16.gmra.mxu2 %v3613_v47  ;;  %v3062_v57 = vadd.f32 %v14980_v58, %v2913_v15  ;;  %v15107_v63 = vpop.f32.mrf.mxu0  ;;  %v15109_v47 = vld [vmem:[#allocation4 + $0x50] sm:$0xff] }
 0x442   : > { %4514 = vmatpush.bf16.msra.mxu1 %v10921_v9 }
 0x443   : > { %2954 = vmatmul.bf16.gmra.mxu3 %v12771_v24  ;;  %v3146_v58 = vmax.f32 %v3062_v57, 0.0 }
 0x444   : > { %v3882_v35 = vpop.f32.mrf.mxu2 }
 0x445   : > { %v3940_v3 = vmax.f32 %v3738_v33, %v3882_v35  ;;  %v3204_v18 = vmul.f32 %v15074_v21, %v3146_v58  ;;  %v18804_v35 = vld [vmem:[#allocation17_spill] sm:$0xff] }
 0x446   : > { %v2915_v14 = vpop.f32.mrf.mxu3  ;;  %v3740_v42 = vpop.f32.mrf.mxu1  ;;  %v2774_v45 = vadd.f32 %v15053_v41, %v18804_v35 }
 0x447   : > { %v2916_v26 = vadd.f32 %v2915_v14, %v2767_v44  ;;  %v3262_v10 = vadd.f32 %v15084_v59, %v3204_v18 }
 0x449   : > { %v3065_v23 = vadd.f32 %v15001_v6, %v2916_v26  ;;  %v10984_v26 = vld [vmem:[%s18709_s6 + $0xb0] sm:$0xf] }
 0x44b   : > { %v3147_v36 = vmax.f32 %v3065_v23, 0.0 }
 0x44c   : > { %v3884_v27 = vpop.f32.mrf.mxu2 }
 0x44d   : > { %v3205_v6 = vmul.f32 %v15074_v21, %v3147_v36  ;;  %v3941_v29 = vmax.f32 %v3740_v42, %v3884_v27  ;;  %v15130_v36 = vpop.f32.mrf.mxu0 }
 0x44e   : > { %v2917_v38 = vpop.f32.mrf.mxu3 }
 0x44f   : > { %v3263_v20 = vadd.f32 %v15084_v59, %v3205_v6  ;;  %v13717_v48 = vpack.c.bf16 %v3941_v29, %v3940_v3  ;;  %v2918_v17 = vadd.f32 %v2917_v38, %v2769_v52  ;;  %v18806_v3 = vld [vmem:[#allocation19_spill] sm:$0xff] }
 0x450   : > { %v2779_v6 = vadd.f32 %v15053_v41, %v18806_v3 }
 0x451   : > { %13865 = vst [vmem:[#allocation4 + $0x48] sm:$0xff] %v13717_v48   ;;  %v3067_v40 = vadd.f32 %v15028_v19, %v2918_v17  ;;  %v3509_v50 = vmax.f32 %v3261_v62, %v3263_v20 }
 0x453   : > { %v3148_v11 = vmax.f32 %v3067_v40, 0.0  ;;  %4794 = vmatmul.bf16.vlgmr.msra.gmra.mxu3 %v15095_v55  ;;  %v3511_v25 = vpack.c.bf16 %v3509_v50, %v3509_v50 }
 0x455   : > { %v3206_v37 = vmul.f32 %v15074_v21, %v3148_v11  ;;  %v3617_v13 = vunpack.c.l.b16 %v3511_v25  ;;  %v3084_v11 = vpop.f32.mrf.mxu0 }
 0x456   : > { %v2920_v22 = vpop.f32.mrf.mxu3 }
 0x457   : > { %v3264_v1 = vadd.f32 %v15084_v59, %v3206_v37  ;;  %v2921_v4 = vadd.f32 %v2920_v22, %v2772_v7 }
 0x458   : > { %v15102_v51 = vld [vmem:[#allocation4 + $0x48] sm:$0xff] }
 0x459   : > { %v3510_v19 = vmax.f32 %v3262_v10, %v3264_v1  ;;  %4873 = vmatmul.bf16.gmra.mxu0 %v15102_v51  ;;  %v3070_v24 = vadd.f32 %v15048_v53, %v2921_v4  ;;  %v12888_v53 = vld [vmem:[%s18709_s6 + $0xb4] sm:$0xf0] }
 0x45a   : > { %v10985_v31 = vor.u32 %v12888_v53, %v10984_v26  ;;  %v15156_v35 = vld [vmem:[#allocation4 + $0x48] sm:$0xff] }
 0x45b   : > { %v3512_v0 = vpack.c.bf16 %v3510_v19, %v3510_v19  ;;  %v3149_v44 = vmax.f32 %v3070_v24, 0.0  ;;  %v12886_v24 = vld [vmem:[%s18709_s6 + $0xa4] sm:$0xf0] }
 0x45c   : > { %4583 = vmatpush.bf16.msra.mxu2 %v10985_v31 }
 0x45d   : > { %v3618_v5 = vunpack.c.l.b16 %v3512_v0  ;;  %v3207_v57 = vmul.f32 %v15074_v21, %v3149_v44  ;;  %v18807_v0 = vld [vmem:[#allocation20_spill] sm:$0xff]  ;;  %v18808_v44 = vld [vmem:[#allocation21_spill] sm:$0xff] }
 0x45e   : > { %v2922_v60 = vpop.f32.mrf.mxu3  ;;  %v3743_v34 = vpop.f32.mrf.mxu1  ;;  %v2782_v43 = vadd.f32 %v15053_v41, %v18807_v0 }
 0x45f   : > { %v3619_v28 = vpack.c.b16 %v3618_v5, %v3617_v13  ;;  %v2923_v14 = vadd.f32 %v2922_v60, %v2774_v45 }
 0x461   : > { %3762 = vmatmul.bf16.gmra.mxu1 %v3619_v28  ;;  %3906 = vmatmul.bf16.gmra.mxu2 %v3619_v28  ;;  %v3072_v42 = vadd.f32 %v15058_v39, %v2923_v14  ;;  %v10976_v28 = vld [vmem:[%s18709_s6 + $0xa0] sm:$0xf] }
 0x462   : > { %v18809_v14 = vld [vmem:[#allocation22_spill] sm:$0xff] }
 0x463   : > { %4799 = vmatmul.bf16.gmra.mxu3 %v15109_v47  ;;  %v3150_v20 = vmax.f32 %v3072_v42, 0.0 }
 0x464   : > { %v3887_v33 = vpop.f32.mrf.mxu2 }
 0x465   : > { %v3942_v29 = vmax.f32 %v3743_v34, %v3887_v33  ;;  %v3208_v40 = vmul.f32 %v15074_v21, %v3150_v20  ;;  %v3086_v34 = vpop.f32.mrf.mxu0  ;;  %v10977_v33 = vor.u32 %v12886_v24, %v10976_v28 }
 0x466   : > { %v2925_v16 = vpop.f32.mrf.mxu3  ;;  %v3745_v30 = vpop.f32.mrf.mxu1 }
 0x467   : > { %v2926_v15 = vadd.f32 %v2925_v16, %v2777_v2  ;;  %v3266_v22 = vadd.f32 %v15084_v59, %v3208_v40  ;;  %4584 = vmatpush.bf16.msra.mxu2 %v10977_v33  ;;  %v2784_v16 = vadd.f32 %v15053_v41, %v18808_v44  ;;  %v10968_v33 = vld [vmem:[%s18709_s6 + $0x90] sm:$0xf]  ;;  %v12868_v44 = vld [vmem:[%s18709_s6 + $0x14] sm:$0xf0] }
 0x469   : > { %v3075_v23 = vadd.f32 %v3074_v49, %v2926_v15  ;;  %v3265_v49 = vadd.f32 %v15084_v59, %v3207_v57  ;;  %v2787_v15 = vadd.f32 %v15053_v41, %v18809_v14 }
 0x46b   : > { %v3151_v27 = vmax.f32 %v3075_v23, 0.0 }
 0x46c   : > { %v3889_v52 = vpop.f32.mrf.mxu2 }
 0x46d   : > { %v3209_v62 = vmul.f32 %v15074_v21, %v3151_v27  ;;  %v3943_v38 = vmax.f32 %v3745_v30, %v3889_v52  ;;  %v3089_v57 = vpop.f32.mrf.mxu0 }
 0x46e   : > { %v2927_v58 = vpop.f32.mrf.mxu3 }
 0x46f   : > { %v3267_v48 = vadd.f32 %v15084_v59, %v3209_v62  ;;  %v13722_v17 = vpack.c.bf16 %v3943_v38, %v3942_v29  ;;  %v2928_v61 = vadd.f32 %v2927_v58, %v2779_v6  ;;  %v18810_v6 = vld [vmem:[#allocation23_spill] sm:$0xff] }
 0x470   : > { %v2789_v29 = vadd.f32 %v15053_v41, %v18810_v6 }
 0x471   : > { %13866 = vst [vmem:[#allocation4 + $0x38] sm:$0xff] %v13722_v17   ;;  %v3077_v39 = vadd.f32 %v3076_v46, %v2928_v61  ;;  %v3521_v32 = vmax.f32 %v3265_v49, %v3267_v48 }
 0x473   : > { %v3152_v50 = vmax.f32 %v3077_v39, 0.0  ;;  %4804 = vmatmul.bf16.gmra.mxu3 %v15138_v54  ;;  %v3523_v46 = vpack.c.bf16 %v3521_v32, %v3521_v32 }
 0x475   : > { %v3210_v18 = vmul.f32 %v15074_v21, %v3152_v50  ;;  %v3623_v7 = vunpack.c.l.b16 %v3523_v46 }
 0x476   : > { %v2930_v37 = vpop.f32.mrf.mxu3 }
 0x477   : > { %v3268_v10 = vadd.f32 %v15084_v59, %v3210_v18  ;;  %v2931_v5 = vadd.f32 %v2930_v37, %v2782_v43 }
 0x478   : > { %v15145_v1 = vld [vmem:[#allocation4 + $0x38] sm:$0xff] }
 0x479   : > { %v3522_v19 = vmax.f32 %v3266_v22, %v3268_v10  ;;  %4878 = vmatmul.bf16.gmra.mxu0 %v15145_v1  ;;  %v3080_v45 = vadd.f32 %v15107_v63, %v2931_v5  ;;  %v12870_v63 = vld [vmem:[%s18709_s6 + $0x24] sm:$0xf0] }
 0x47a   : > { %v10913_v23 = vor.u32 %v12870_v63, %v10912_v56  ;;  %v15177_v32 = vld [vmem:[#allocation4 + $0x38] sm:$0xff]  ;;  %v18813_v56 = vld [vmem:[#allocation26_spill] sm:$0xff] }
 0x47b   : > { %v3524_v25 = vpack.c.bf16 %v3522_v19, %v3522_v19  ;;  %v3153_v26 = vmax.f32 %v3080_v45, 0.0  ;;  %v12884_v45 = vld [vmem:[%s18709_s6 + $0x94] sm:$0xf0]  ;;  %v2797_v63 = vadd.f32 %v15053_v41, %v18813_v56 }
 0x47c   : > { %4515 = vmatpush.bf16.msra.mxu1 %v10913_v23 }
 0x47d   : > { %v3624_v13 = vunpack.c.l.b16 %v3524_v25  ;;  %v3211_v42 = vmul.f32 %v15074_v21, %v3153_v26 }
 0x47e   : > { %v2932_v4 = vpop.f32.mrf.mxu3  ;;  %v3748_v12 = vpop.f32.mrf.mxu1 }
 0x47f   : > { %v3625_v60 = vpack.c.b16 %v3624_v13, %v3623_v7  ;;  %v2933_v8 = vadd.f32 %v2932_v4, %v2784_v16  ;;  %v3269_v58 = vadd.f32 %v15084_v59, %v3211_v42  ;;  %v18811_v7 = vld [vmem:[#allocation24_spill] sm:$0xff] }
 0x480   : > { %v2792_v13 = vadd.f32 %v15053_v41, %v18811_v7  ;;  %v10960_v7 = vld [vmem:[%s18709_s6 + $0x80] sm:$0xf] }
 0x481   : > { %3767 = vmatmul.bf16.gmra.mxu1 %v3625_v60  ;;  %3911 = vmatmul.bf16.gmra.mxu2 %v3625_v60  ;;  %v3082_v27 = vadd.f32 %v15130_v36, %v2933_v8  ;;  %v18812_v8 = vld [vmem:[#allocation25_spill] sm:$0xff] }
 0x483   : > { %4809 = vmatmul.bf16.gmra.mxu3 %v15156_v35  ;;  %v3154_v48 = vmax.f32 %v3082_v27, 0.0 }
 0x484   : > { %v3892_v2 = vpop.f32.mrf.mxu2 }
 0x485   : > { %v3944_v62 = vmax.f32 %v3748_v12, %v3892_v2  ;;  %v3212_v50 = vmul.f32 %v15074_v21, %v3154_v48  ;;  %v10904_v12 = vld [vmem:[%s18709_s6 + $0x10] sm:$0xf]  ;;  %v10969_v2 = vor.u32 %v12884_v45, %v10968_v33 }
 0x486   : > { %v2935_v53 = vpop.f32.mrf.mxu3  ;;  %v3750_v52 = vpop.f32.mrf.mxu1  ;;  %v10905_v14 = vor.u32 %v12868_v44, %v10904_v12 }
 0x487   : > { %v2936_v31 = vadd.f32 %v2935_v53, %v2787_v15  ;;  %v3270_v10 = vadd.f32 %v15084_v59, %v3212_v50  ;;  %4585 = vmatpush.bf16.msra.mxu2 %v10969_v2  ;;  %v18815_v2 = vld [vmem:[#allocation28_spill] sm:$0xff] }
 0x488   : > { %4516 = vmatpush.bf16.msra.mxu1 %v10905_v14  ;;  %v2802_v44 = vadd.f32 %v15053_v41, %v18815_v2 }
 0x489   : > { %v3085_v9 = vadd.f32 %v3084_v11, %v2936_v31  ;;  %v3091_v11 = vpop.f32.mrf.mxu0  ;;  %v2794_v31 = vadd.f32 %v15053_v41, %v18812_v8 }
 0x48b   : > { %v3155_v30 = vmax.f32 %v3085_v9, 0.0 }
 0x48c   : > { %v3894_v3 = vpop.f32.mrf.mxu2 }
 0x48d   : > { %v3213_v38 = vmul.f32 %v15074_v21, %v3155_v30  ;;  %v3945_v49 = vmax.f32 %v3750_v52, %v3894_v3 }
 0x48e   : > { %v2937_v20 = vpop.f32.mrf.mxu3 }
 0x48f   : > { %v3271_v17 = vadd.f32 %v15084_v59, %v3213_v38  ;;  %v13727_v61 = vpack.c.bf16 %v3945_v49, %v3944_v62  ;;  %v2938_v39 = vadd.f32 %v2937_v20, %v2789_v29  ;;  %v18814_v38 = vld [vmem:[#allocation27_spill] sm:$0xff] }
 0x490   : > { %v2799_v49 = vadd.f32 %v15053_v41, %v18814_v38 }
 0x491   : > { %13867 = vst [vmem:[#allocation4] sm:$0xff] %v13727_v61   ;;  %v3087_v36 = vadd.f32 %v3086_v34, %v2938_v39  ;;  %v3533_v40 = vmax.f32 %v3269_v58, %v3271_v17  ;;  %v3094_v60 = vpop.f32.mrf.mxu0 }
 0x493   : > { %v3156_v18 = vmax.f32 %v3087_v36, 0.0  ;;  %4814 = vmatmul.bf16.gmra.mxu3 %v15177_v32  ;;  %v3535_v0 = vpack.c.bf16 %v3533_v40, %v3533_v40 }
 0x495   : > { %v3214_v37 = vmul.f32 %v15074_v21, %v3156_v18  ;;  %v3629_v5 = vunpack.c.l.b16 %v3535_v0 }
 0x496   : > { %v2940_v22 = vpop.f32.mrf.mxu3 }
 0x497   : > { %v3272_v19 = vadd.f32 %v15084_v59, %v3214_v37  ;;  %v2941_v28 = vadd.f32 %v2940_v22, %v2792_v13  ;;  %v12882_v13 = vld [vmem:[%s18709_s6 + $0x84] sm:$0xf0] }
 0x498   : > { %v15184_v46 = vld [vmem:[#allocation4] sm:$0xff] }
 0x499   : > { %v3534_v25 = vmax.f32 %v3270_v10, %v3272_v19  ;;  %4883 = vmatmul.bf16.gmra.mxu0 %v15184_v46  ;;  %v15201_v16 = vld [vmem:[#allocation4] sm:$0xff]  ;;  %v3090_v15 = vadd.f32 %v3089_v57, %v2941_v28  ;;  %v3096_v30 = vpop.f32.mrf.mxu0  ;;  %v10961_v28 = vor.u32 %v12882_v13, %v10960_v7 }
 0x49a   : > { %v11080_v13 = vld [vmem:[%s18709_s6 + $0x170] sm:$0xf] }
 0x49b   : > { %v3536_v43 = vpack.c.bf16 %v3534_v25, %v3534_v25  ;;  %v3157_v23 = vmax.f32 %v3090_v15, 0.0  ;;  %4586 = vmatpush.bf16.msra.mxu2 %v10961_v28 }
 0x49d   : > { %v3630_v4 = vunpack.c.l.b16 %v3536_v43  ;;  %v3215_v57 = vmul.f32 %v15074_v21, %v3157_v23 }
 0x49e   : > { %v2942_v24 = vpop.f32.mrf.mxu3  ;;  %v3753_v26 = vpop.f32.mrf.mxu1 }
 0x49f   : > { %v3631_v34 = vpack.c.b16 %v3630_v4, %v3629_v5  ;;  %v2943_v42 = vadd.f32 %v2942_v24, %v2794_v31  ;;  %v3273_v17 = vadd.f32 %v15084_v59, %v3215_v57  ;;  %v10896_v5 = vld [vmem:[%s18709_s6] sm:$0xf]  ;;  %v12866_v24 = vld [vmem:[%s18709_s6 + $0x4] sm:$0xf0] }
 0x4a0   : > { %v10897_v45 = vor.u32 %v12866_v24, %v10896_v5  ;;  %v12912_v5 = vld [vmem:[%s18709_s6 + $0x174] sm:$0xf0] }
 0x4a1   : > { %3772 = vmatmul.bf16.gmra.mxu1 %v3631_v34  ;;  %3916 = vmatmul.bf16.gmra.mxu2 %v3631_v34  ;;  %v3092_v3 = vadd.f32 %v3091_v11, %v2943_v42  ;;  %v3099_v37 = vpop.f32.mrf.mxu0 }
 0x4a2   : > { %4517 = vmatpush.bf16.msra.mxu1 %v10897_v45 }
 0x4a3   : > { %4819 = vmatmul.bf16.gmra.mxu3 %v15201_v16  ;;  %v3158_v39 = vmax.f32 %v3092_v3, 0.0 }
 0x4a4   : > { %v3897_v53 = vpop.f32.mrf.mxu2 }
 0x4a5   : > { %v3946_v58 = vmax.f32 %v3753_v26, %v3897_v53  ;;  %v3216_v22 = vmul.f32 %v15074_v21, %v3158_v39 }
 0x4a6   : > { %v2945_v9 = vpop.f32.mrf.mxu3  ;;  %v3755_v29 = vpop.f32.mrf.mxu1 }
 0x4a7   : > { %v2946_v27 = vadd.f32 %v2945_v9, %v2797_v63  ;;  %v3274_v0 = vadd.f32 %v15084_v59, %v3216_v22  ;;  %v18816_v9 = vld [vmem:[#allocation29_spill] sm:$0xff] }
 0x4a8   : > { %v2804_v42 = vadd.f32 %v15053_v41, %v18816_v9 }
 0x4a9   : > { %v3095_v52 = vadd.f32 %v3094_v60, %v2946_v27  ;;  %v3101_v14 = vpop.f32.mrf.mxu0  ;;  %v18817_v27 = vld [vmem:[#allocation30_spill] sm:$0xff] }
 0x4ab   : > { %v3159_v6 = vmax.f32 %v3095_v52, 0.0 }
 0x4ac   : > { %v3899_v62 = vpop.f32.mrf.mxu2 }
 0x4ad   : > { %v3217_v20 = vmul.f32 %v15074_v21, %v3159_v6  ;;  %v3947_v48 = vmax.f32 %v3755_v29, %v3899_v62 }
 0x4ae   : > { %v2947_v61 = vpop.f32.mrf.mxu3 }
 0x4af   : > { %v3275_v36 = vadd.f32 %v15084_v59, %v3217_v20  ;;  %v13732_v40 = vpack.c.bf16 %v3947_v48, %v3946_v58  ;;  %v2948_v50 = vadd.f32 %v2947_v61, %v2799_v49 }
 0x4b1   : > { %13868 = vst [vmem:[#allocation4 + $0x10] sm:$0xff] %v13732_v40   ;;  %v3097_v18 = vadd.f32 %v3096_v30, %v2948_v50  ;;  %v3545_v11 = vmax.f32 %v3273_v17, %v3275_v36  ;;  %v2807_v30 = vadd.f32 %v15053_v41, %v18817_v27  ;;  %v3104_v52 = vpop.f32.mrf.mxu0  ;;  %v18818_v17 = vld [vmem:[#allocation31_spill] sm:$0xff] }
 0x4b2   : > { %v2809_v61 = vadd.f32 %v15053_v41, %v18818_v17  ;;  %v12879_v41 = vld [vmem:[%s18709_s6 + $0x74] sm:$0xf] }
 0x4b3   : > { %v3160_v10 = vmax.f32 %v3097_v18, 0.0  ;;  %v3547_v33 = vpack.c.bf16 %v3545_v11, %v3545_v11 }
 0x4b5   : > { %v3218_v19 = vmul.f32 %v15074_v21, %v3160_v10  ;;  %v3635_v15 = vunpack.c.l.b16 %v3547_v33 }
 0x4b6   : > { %v2950_v25 = vpop.f32.mrf.mxu3 }
 0x4b7   : > { %v3276_v43 = vadd.f32 %v15084_v59, %v3218_v19  ;;  %v2951_v53 = vadd.f32 %v2950_v25, %v2802_v44 }
 0x4b8   : > { %v15227_v4 = vld [vmem:[#allocation4 + $0x10] sm:$0xff] }
 0x4b9   : > { %v15229_v60 = vld [vmem:[#allocation4 + $0x10] sm:$0xff]  ;;  %v3546_v34 = vmax.f32 %v3274_v0, %v3276_v43  ;;  %4824 = vmatmul.bf16.gmra.mxu3 %v15227_v4  ;;  %v3100_v56 = vadd.f32 %v3099_v37, %v2951_v53  ;;  %v3106_v19 = vpop.f32.mrf.mxu0  ;;  %v10954_v43 = vld [vmem:[%s18709_s6 + $0x78] sm:$0xf0] }
 0x4ba   : > { %4888 = vmatmul.bf16.gmra.mxu0 %v15229_v60  ;;  %v10957_v7 = vor.u32 %v12879_v41, %v10954_v43  ;;  %v11056_v41 = vld [vmem:[%s18709_s6 + $0x140] sm:$0xf]  ;;  %v12906_v43 = vld [vmem:[%s18709_s6 + $0x144] sm:$0xf0] }
 0x4bb   : > { %v3548_v12 = vpack.c.bf16 %v3546_v34, %v3546_v34  ;;  %v3161_v57 = vmax.f32 %v3100_v56, 0.0  ;;  %v11081_v34 = vor.u32 %v12912_v5, %v11080_v13 }
 0x4bc   : > { %4717 = vmatpush.bf16.msrb.mxu2 %v10957_v7  ;;  %v11057_v7 = vor.u32 %v12906_v43, %v11056_v41 }
 0x4bd   : > { %v3636_v26 = vunpack.c.l.b16 %v3548_v12  ;;  %v3219_v38 = vmul.f32 %v15074_v21, %v3161_v57  ;;  %4648 = vmatpush.bf16.msrb.mxu1 %v11081_v34  ;;  %v15276_v57 = vld [vmem:[#allocation4 + $0x58] sm:$0xff] }
 0x4be   : > { %v2952_v8 = vpop.f32.mrf.mxu3  ;;  %v3758_v63 = vpop.f32.mrf.mxu1 }
 0x4bf   : > { %v3637_v31 = vpack.c.b16 %v3636_v26, %v3635_v15  ;;  %v2953_v6 = vadd.f32 %v2952_v8, %v2804_v42  ;;  %v3277_v50 = vadd.f32 %v15084_v59, %v3219_v38 }
 0x4c1   : > { %3777 = vmatmul.bf16.gmra.mxu1 %v3637_v31  ;;  %3921 = vmatmul.bf16.gmra.mxu2 %v3637_v31  ;;  %v3102_v49 = vadd.f32 %v3101_v14, %v2953_v6  ;;  %v12910_v6 = vld [vmem:[%s18709_s6 + $0x164] sm:$0xf0] }
 0x4c3   : > { %v3162_v11 = vmax.f32 %v3102_v49, 0.0  ;;  %v12875_v49 = vld [vmem:[%s18709_s6 + $0x54] sm:$0xf] }
 0x4c4   : > { %v3902_v23 = vpop.f32.mrf.mxu2 }
 0x4c5   : > { %v3948_v39 = vmax.f32 %v3758_v63, %v3902_v23  ;;  %v3220_v28 = vmul.f32 %v15074_v21, %v3162_v11  ;;  %v10946_v63 = vld [vmem:[%s18709_s6 + $0x68] sm:$0xf0] }
 0x4c6   : > { %v2955_v3 = vpop.f32.mrf.mxu3  ;;  %v3760_v20 = vpop.f32.mrf.mxu1 }
 0x4c7   : > { %v2956_v29 = vadd.f32 %v2955_v3, %v2807_v30  ;;  %v3278_v45 = vadd.f32 %v15084_v59, %v3220_v28  ;;  %v11072_v3 = vld [vmem:[%s18709_s6 + $0x160] sm:$0xf] }
 0x4c9   : > { %v3105_v62 = vadd.f32 %v3104_v52, %v2956_v29  ;;  %v11073_v29 = vor.u32 %v12910_v6, %v11072_v3  ;;  %v11040_v6 = vld [vmem:[%s18709_s6 + $0x120] sm:$0xf] }
 0x4cb   : > { %v3163_v58 = vmax.f32 %v3105_v62, 0.0  ;;  %4649 = vmatpush.bf16.msrb.mxu1 %v11073_v29  ;;  %v12902_v29 = vld [vmem:[%s18709_s6 + $0x124] sm:$0xf0] }
 0x4cc   : > { %v3904_v48 = vpop.f32.mrf.mxu2 }
 0x4cd   : > { %v3221_v36 = vmul.f32 %v15074_v21, %v3163_v58  ;;  %v3949_v40 = vmax.f32 %v3760_v20, %v3904_v48  ;;  %v10938_v58 = vld [vmem:[%s18709_s6 + $0x58] sm:$0xf0] }
 0x4ce   : > { %v2957_v18 = vpop.f32.mrf.mxu3  ;;  %v10941_v48 = vor.u32 %v12875_v49, %v10938_v58  ;;  %v11041_v49 = vor.u32 %v12902_v29, %v11040_v6  ;;  %v11438_v6 = vld [vmem:[%s18711_s8 + $0x168] sm:$0xf]  ;;  %v13001_v29 = vld [vmem:[%s18711_s8 + $0x170] sm:$0xf0] }
 0x4cf   : > { %v3279_v37 = vadd.f32 %v15084_v59, %v3221_v36  ;;  %v13737_v22 = vpack.c.bf16 %v3949_v40, %v3948_v39  ;;  %v2958_v10 = vadd.f32 %v2957_v18, %v2809_v61  ;;  %v11064_v61 = vld [vmem:[%s18709_s6 + $0x150] sm:$0xf]  ;;  %v12908_v39 = vld [vmem:[%s18709_s6 + $0x154] sm:$0xf0] }
 0x4d0   : > { %v11065_v36 = vor.u32 %v12908_v39, %v11064_v61  ;;  %v10906_v61 = vld [vmem:[%s18709_s6 + $0x18] sm:$0xf0] }
 0x4d1   : > { %13869 = vst [vmem:[#allocation4 + $0x18] sm:$0xff] %v13737_v22   ;;  %v3107_v25 = vadd.f32 %v3106_v19, %v2958_v10  ;;  %v3557_v0 = vmax.f32 %v3277_v50, %v3279_v37  ;;  %v12873_v22 = vld [vmem:[%s18709_s6 + $0x44] sm:$0xf]  ;;  %v10930_v10 = vld [vmem:[%s18709_s6 + $0x48] sm:$0xf0] }
 0x4d2   : > { %4650 = vmatpush.bf16.msrb.mxu1 %v11065_v36 }
 0x4d3   : > { %v3164_v24 = vmax.f32 %v3107_v25, 0.0  ;;  %v3559_v15 = vpack.c.bf16 %v3557_v0, %v3557_v0  ;;  %v10933_v0 = vor.u32 %v12873_v22, %v10930_v10  ;;  %v15387_v22 = vld [vmem:[%s18710_s7] ss:$4 sm:$0x3] }
 0x4d5   : > { %v3222_v33 = vmul.f32 %v15074_v21, %v3164_v24  ;;  %v3641_v53 = vunpack.c.l.b16 %v3559_v15 }
 0x4d6   : > { %4651 = vmatpush.bf16.msrb.mxu1 %v11057_v7  ;;  %v15390_v7 = vperm.slane %v15387_v22, 0 }
 0x4d7   : > { %v3280_v12 = vadd.f32 %v15084_v59, %v3222_v33  ;;  %v12877_v59 = vld [vmem:[%s18709_s6 + $0x64] sm:$0xf] }
 0x4d8   : > { %v15264_v2 = vld [vmem:[#allocation4 + $0x18] sm:$0xff]  ;;  %v10949_v23 = vor.u32 %v12877_v59, %v10946_v63  ;;  %v12869_v63 = vld [vmem:[%s18709_s6 + $0x24] sm:$0xf] }
 0x4d9   : > { %v15266_v44 = vld [vmem:[#allocation4 + $0x18] sm:$0xff]  ;;  %v3558_v14 = vmax.f32 %v3278_v45, %v3280_v12  ;;  %4829 = vmatmul.bf16.gmra.mxu3 %v15264_v2  ;;  %v12871_v12 = vld [vmem:[%s18709_s6 + $0x34] sm:$0xf] }
 0x4da   : > { %4893 = vmatmul.bf16.gmra.mxu0 %v15266_v44  ;;  %4718 = vmatpush.bf16.msrb.mxu2 %v10949_v23  ;;  %v10914_v23 = vld [vmem:[%s18709_s6 + $0x28] sm:$0xf0] }
 0x4db   : > { %v3560_v26 = vpack.c.bf16 %v3558_v14, %v3558_v14  ;;  %v10922_v14 = vld [vmem:[%s18709_s6 + $0x38] sm:$0xf0] }
 0x4dc   : > { %v10925_v15 = vor.u32 %v12871_v12, %v10922_v14 }
 0x4dd   : > { %v3642_v8 = vunpack.c.l.b16 %v3560_v26  ;;  %v11048_v26 = vld [vmem:[%s18709_s6 + $0x130] sm:$0xf] }
 0x4de   : > { %v3763_v21 = vpop.f32.mrf.mxu1  ;;  %4719 = vmatpush.bf16.msrb.mxu2 %v10941_v48 }
 0x4df   : > { %v3643_v31 = vpack.c.b16 %v3642_v8, %v3641_v53  ;;  %v12904_v53 = vld [vmem:[%s18709_s6 + $0x134] sm:$0xf0] }
 0x4e0   : > { %v11049_v8 = vor.u32 %v12904_v53, %v11048_v26  ;;  %v11024_v53 = vld [vmem:[%s18709_s6 + $0x100] sm:$0xf] }
 0x4e1   : > { %3782 = vmatmul.bf16.gmra.mxu1 %v3643_v31  ;;  %3926 = vmatmul.bf16.gmra.mxu2 %v3643_v31 }
 0x4e2   : > { %4720 = vmatpush.bf16.msrb.mxu2 %v10933_v0  ;;  %4652 = vmatpush.bf16.msrb.mxu1 %v11049_v8  ;;  %v12898_v8 = vld [vmem:[%s18709_s6 + $0x104] sm:$0xf0] }
 0x4e4   : > { %v3907_v56 = vpop.f32.mrf.mxu2 }
 0x4e5   : > { %v3950_v27 = vmax.f32 %v3763_v21, %v3907_v56 }
 0x4e6   : > { %v3765_v9 = vpop.f32.mrf.mxu1  ;;  %4721 = vmatpush.bf16.msrb.mxu2 %v10925_v15  ;;  %4653 = vmatpush.bf16.msrb.mxu1 %v11041_v49  ;;  %v11439_v49 = vor.u32 %v13001_v29, %v11438_v6  ;;  %v13938_v29 = vld [vmem:[#allocation4 + $0x40] sm:$0xff] }
 0x4ec   : > { %v3909_v42 = vpop.f32.mrf.mxu2 }
 0x4ed   : > { %v3951_v30 = vmax.f32 %v3765_v9, %v3909_v42  ;;  %v10917_v9 = vor.u32 %v12869_v63, %v10914_v23 }
 0x4ef   : > { %v13742_v52 = vpack.c.bf16 %v3951_v30, %v3950_v27  ;;  %4722 = vmatpush.bf16.msrb.mxu2 %v10917_v9 }
 0x4f1   : > { %13870 = vst [vmem:[#allocation4 + $0x60] sm:$0xff] %v13742_v52   ;;  %4518 = vmatmul.bf16.vlgmr.msra.gmra.mxu1 %v15276_v57  ;;  %4587 = vmatmul.bf16.vlgmr.msra.gmra.mxu2 %v15095_v55 }
 0x4f8   : > { %v15286_v62 = vld [vmem:[#allocation4 + $0x60] sm:$0xff] }
 0x4f9   : > { %v15288_v38 = vld [vmem:[#allocation4 + $0x60] sm:$0xff]  ;;  %4834 = vmatmul.bf16.gmra.mxu3 %v15286_v62 }
 0x4fa   : > { %4898 = vmatmul.bf16.gmra.mxu0 %v15288_v38 }
 0x4fe   : > { %v3768_v20 = vpop.f32.mrf.mxu1 }
 0x501   : > { %4523 = vmatmul.bf16.gmra.mxu1 %v15095_v55  ;;  %4592 = vmatmul.bf16.gmra.mxu2 %v15109_v47 }
 0x504   : > { %v3912_v17 = vpop.f32.mrf.mxu2 }
 0x505   : > { %v3952_v18 = vmax.f32 %v3768_v20, %v3912_v17  ;;  %v12867_v17 = vld [vmem:[%s18709_s6 + $0x14] sm:$0xf] }
 0x506   : > { %v3770_v40 = vpop.f32.mrf.mxu1  ;;  %v10909_v39 = vor.u32 %v12867_v17, %v10906_v61 }
 0x508   : > { %4723 = vmatpush.bf16.msrb.mxu2 %v10909_v39  ;;  %v11342_v39 = vld [vmem:[%s18711_s8 + $0xa8] sm:$0xf] }
 0x50c   : > { %v3914_v50 = vpop.f32.mrf.mxu2 }
 0x50d   : > { %v3953_v11 = vmax.f32 %v3770_v40, %v3914_v50  ;;  %v11032_v40 = vld [vmem:[%s18709_s6 + $0x110] sm:$0xf]  ;;  %v12900_v50 = vld [vmem:[%s18709_s6 + $0x114] sm:$0xf0] }
 0x50f   : > { %v13747_v37 = vpack.c.bf16 %v3953_v11, %v3952_v18  ;;  %v11033_v11 = vor.u32 %v12900_v50, %v11032_v40 }
 0x511   : > { %13871 = vst [vmem:[#allocation4 + $0x20] sm:$0xff] %v13747_v37   ;;  %4528 = vmatmul.bf16.gmra.mxu1 %v15109_v47  ;;  %4597 = vmatmul.bf16.gmra.mxu2 %v15138_v54 }
 0x512   : > { %4654 = vmatpush.bf16.msrb.mxu1 %v11033_v11 }
 0x518   : > { %v15314_v19 = vld [vmem:[#allocation4 + $0x20] sm:$0xff] }
 0x519   : > { %v15316_v25 = vld [vmem:[#allocation4 + $0x20] sm:$0xff]  ;;  %4839 = vmatmul.bf16.gmra.mxu3 %v15314_v19 }
 0x51a   : > { %4903 = vmatmul.bf16.gmra.mxu0 %v15316_v25 }
 0x51e   : > { %v3773_v13 = vpop.f32.mrf.mxu1 }
 0x521   : > { %4533 = vmatmul.bf16.gmra.mxu1 %v15138_v54  ;;  %4602 = vmatmul.bf16.gmra.mxu2 %v15156_v35 }
 0x524   : > { %v3917_v5 = vpop.f32.mrf.mxu2 }
 0x525   : > { %v3954_v34 = vmax.f32 %v3773_v13, %v3917_v5 }
 0x526   : > { %v3775_v28 = vpop.f32.mrf.mxu1 }
 0x52c   : > { %v3919_v24 = vpop.f32.mrf.mxu2 }
 0x52d   : > { %v3955_v33 = vmax.f32 %v3775_v28, %v3919_v24 }
 0x52f   : > { %v13752_v45 = vpack.c.bf16 %v3955_v33, %v3954_v34  ;;  %v12865_v34 = vld [vmem:[%s18709_s6 + $0x4] sm:$0xf]  ;;  %v10898_v33 = vld [vmem:[%s18709_s6 + $0x8] sm:$0xf0] }
 0x530   : > { %v10901_v12 = vor.u32 %v12865_v34, %v10898_v33 }
 0x531   : > { %13872 = vst [vmem:[#allocation4 + $0x28] sm:$0xff] %v13752_v45   ;;  %4538 = vmatmul.bf16.gmra.mxu1 %v15156_v35  ;;  %4607 = vmatmul.bf16.gmra.mxu2 %v15177_v32 }
 0x532   : > { %4724 = vmatpush.bf16.msrb.mxu2 %v10901_v12 }
 0x536   : > { %6409 = vmatpush.bf16.msra.mxu2 %v11439_v49  ;;  %v12995_v49 = vld [vmem:[%s18711_s8 + $0x140] sm:$0xf0] }
 0x538   : > { %v15342_v31 = vld [vmem:[#allocation4 + $0x28] sm:$0xff] }
 0x539   : > { %v15344_v21 = vld [vmem:[#allocation4 + $0x28] sm:$0xff]  ;;  %4844 = vmatmul.bf16.gmra.mxu3 %v15342_v31 }
 0x53a   : > { %4908 = vmatmul.bf16.gmra.mxu0 %v15344_v21 }
 0x53e   : > { %v3778_v56 = vpop.f32.mrf.mxu1 }
 0x541   : > { %4543 = vmatmul.bf16.gmra.mxu1 %v15177_v32  ;;  %4612 = vmatmul.bf16.gmra.mxu2 %v15201_v16 }
 0x544   : > { %v3922_v59 = vpop.f32.mrf.mxu2 }
 0x545   : > { %v3956_v30 = vmax.f32 %v3778_v56, %v3922_v59  ;;  %v11025_v59 = vor.u32 %v12898_v8, %v11024_v53 }
 0x546   : > { %v3780_v42 = vpop.f32.mrf.mxu1 }
 0x547   : > { %4655 = vmatpush.bf16.msrb.mxu1 %v11025_v59 }
 0x54c   : > { %v3924_v27 = vpop.f32.mrf.mxu2 }
 0x54d   : > { %v3957_v52 = vmax.f32 %v3780_v42, %v3924_v27 }
 0x54f   : > { %v13757_v3 = vpack.c.bf16 %v3957_v52, %v3956_v30 }
 0x551   : > { %13873 = vst [vmem:[#allocation4 + $0x68] sm:$0xff] %v13757_v3   ;;  %4548 = vmatmul.bf16.gmra.mxu1 %v15201_v16  ;;  %4617 = vmatmul.bf16.gmra.mxu2 %v15227_v4 }
 0x558   : > { %v15364_v58 = vld [vmem:[#allocation4 + $0x68] sm:$0xff] }
 0x559   : > { %v15366_v20 = vld [vmem:[#allocation4 + $0x68] sm:$0xff]  ;;  %4849 = vmatmul.bf16.gmra.mxu3 %v15364_v58 }
 0x55a   : > { %4913 = vmatmul.bf16.gmra.mxu0 %v15366_v20 }
 0x55e   : > { %v3783_v48 = vpop.f32.mrf.mxu1 }
 0x561   : > { %4553 = vmatmul.bf16.gmra.mxu1 %v15227_v4  ;;  %4622 = vmatmul.bf16.gmra.mxu2 %v15264_v2 }
 0x564   : > { %v3927_v36 = vpop.f32.mrf.mxu2 }
 0x565   : > { %v3958_v10 = vmax.f32 %v3783_v48, %v3927_v36  ;;  %v12977_v36 = vld [vmem:[%s18711_s8 + $0xb0] sm:$0xf0] }
 0x566   : > { %v3785_v18 = vpop.f32.mrf.mxu1  ;;  %v11343_v50 = vor.u32 %v12977_v36, %v11342_v39 }
 0x568   : > { %6350 = vmatpush.bf16.msra.mxu1 %v11343_v50 }
 0x56c   : > { %v3929_v37 = vpop.f32.mrf.mxu2 }
 0x56d   : > { %v3959_v0 = vmax.f32 %v3785_v18, %v3929_v37 }
 0x56e   : > { %v4519_v41 = vpop.f32.mrf.mxu1 }
 0x56f   : > { %v13762_v43 = vpack.c.bf16 %v3959_v0, %v3958_v10  ;;  %v4520_v13 = vadd.f32 %v4519_v41, %v15390_v7 }
 0x571   : > { %13874 = vst [vmem:[#allocation4 + $0x30] sm:$0xff] %v13762_v43   ;;  %4558 = vmatmul.bf16.gmra.mxu1 %v15264_v2  ;;  %4627 = vmatmul.bf16.gmra.mxu2 %v15286_v62 }
 0x574   : > { %v4588_v5 = vpop.f32.mrf.mxu2 }
 0x575   : > { %v15395_v28 = vadd.f32 %v4588_v5, %v4520_v13  ;;  %v11426_v5 = vld [vmem:[%s18711_s8 + $0x150] sm:$0xf] }
 0x576   : > { %v4521_v24 = vpop.f32.mrf.mxu1 }
 0x577   : > { %v4522_v14 = vadd.f32 %v4521_v24, %v15390_v7  ;;  %v12998_v24 = vld [vmem:[%s18711_s8 + $0x158] sm:$0xf0] }
 0x578   : > { %v15403_v45 = vld [vmem:[#allocation4 + $0x30] sm:$0xff]  ;;  %v11427_v34 = vor.u32 %v12998_v24, %v11426_v5 }
 0x579   : > { %4918 = vmatmul.bf16.gmra.mxu0 %v15403_v45 }
 0x57a   : > { %6410 = vmatpush.bf16.msra.mxu2 %v11427_v34 }
 0x57c   : > { %v4590_v15 = vpop.f32.mrf.mxu2 }
 0x57d   : > { %v15407_v26 = vadd.f32 %v4590_v15, %v4522_v14  ;;  %v11330_v14 = vld [vmem:[%s18711_s8 + $0x90] sm:$0xf]  ;;  %v12974_v15 = vld [vmem:[%s18711_s8 + $0x98] sm:$0xf0] }
 0x57e   : > { %v4524_v56 = vpop.f32.mrf.mxu1  ;;  %v11331_v8 = vor.u32 %v12974_v15, %v11330_v14 }
 0x57f   : > { %v4525_v63 = vadd.f32 %v4524_v56, %v15390_v7  ;;  %v13937_v56 = vld [vmem:[#allocation4 + $0x50] sm:$0xff] }
 0x580   : > { %6351 = vmatpush.bf16.msra.mxu1 %v11331_v8  ;;  %v12968_v8 = vld [vmem:[%s18711_s8 + $0x68] sm:$0xf0] }
 0x581   : > { %4563 = vmatmul.bf16.gmra.mxu1 %v15286_v62  ;;  %4632 = vmatmul.bf16.gmra.mxu2 %v15314_v19 }
 0x584   : > { %v4593_v23 = vpop.f32.mrf.mxu2 }
 0x585   : > { %v15418_v9 = vadd.f32 %v4593_v23, %v4525_v63 }
 0x586   : > { %v4526_v42 = vpop.f32.mrf.mxu1 }
 0x587   : > { %v4527_v27 = vadd.f32 %v4526_v42, %v15390_v7 }
 0x58c   : > { %v4595_v30 = vpop.f32.mrf.mxu2 }
 0x58d   : > { %v15421_v52 = vadd.f32 %v4595_v30, %v4527_v27 }
 0x58e   : > { %v4529_v3 = vpop.f32.mrf.mxu1 }
 0x58f   : > { %v4530_v48 = vadd.f32 %v4529_v3, %v15390_v7 }
 0x591   : > { %4568 = vmatmul.bf16.gmra.mxu1 %v15314_v19  ;;  %4637 = vmatmul.bf16.gmra.mxu2 %v15342_v31 }
 0x594   : > { %v4598_v17 = vpop.f32.mrf.mxu2 }
 0x595   : > { %v15432_v61 = vadd.f32 %v4598_v17, %v4530_v48 }
 0x596   : > { %v4531_v40 = vpop.f32.mrf.mxu1 }
 0x597   : > { %v4532_v18 = vadd.f32 %v4531_v40, %v15390_v7  ;;  %v11318_v40 = vld [vmem:[%s18711_s8 + $0x78] sm:$0xf] }
 0x59c   : > { %v4600_v11 = vpop.f32.mrf.mxu2 }
 0x59d   : > { %v15441_v37 = vadd.f32 %v4600_v11, %v4532_v18 }
 0x59e   : > { %v4534_v10 = vpop.f32.mrf.mxu1 }
 0x59f   : > { %v4535_v0 = vadd.f32 %v4534_v10, %v15390_v7 }
 0x5a1   : > { %4573 = vmatmul.bf16.gmra.mxu1 %v15342_v31  ;;  %4642 = vmatmul.bf16.gmra.mxu2 %v15364_v58 }
 0x5a4   : > { %v4603_v41 = vpop.f32.mrf.mxu2 }
 0x5a5   : > { %v15446_v43 = vadd.f32 %v4603_v41, %v4535_v0 }
 0x5a6   : > { %v4536_v13 = vpop.f32.mrf.mxu1 }
 0x5a7   : > { %v4537_v33 = vadd.f32 %v4536_v13, %v15390_v7 }
 0x5ac   : > { %v4605_v12 = vpop.f32.mrf.mxu2 }
 0x5ad   : > { %v15455_v58 = vadd.f32 %v4605_v12, %v4537_v33  ;;  %v11402_v33 = vld [vmem:[%s18711_s8 + $0x120] sm:$0xf]  ;;  %v12992_v12 = vld [vmem:[%s18711_s8 + $0x128] sm:$0xf0] }
 0x5ae   : > { %v4539_v53 = vpop.f32.mrf.mxu1  ;;  %v11403_v14 = vor.u32 %v12992_v12, %v11402_v33  ;;  %v15542_v33 = vpop.f32.mrf.mxu3 }
 0x5af   : > { %v4540_v59 = vadd.f32 %v4539_v53, %v15390_v7  ;;  %v11306_v53 = vld [vmem:[%s18711_s8 + $0x60] sm:$0xf] }
 0x5b1   : > { %4656 = vmatmul.bf16.vlgmr.msrb.gmra.mxu1 %v13937_v56  ;;  %4725 = vmatmul.bf16.vlgmr.msrb.gmra.mxu2 %v15276_v57  ;;  %v11414_v57 = vld [vmem:[%s18711_s8 + $0x138] sm:$0xf] }
 0x5b2   : > { %v11415_v48 = vor.u32 %v12995_v49, %v11414_v57 }
 0x5b4   : > { %v4608_v63 = vpop.f32.mrf.mxu2  ;;  %6411 = vmatpush.bf16.msra.mxu2 %v11415_v48 }
 0x5b5   : > { %v15465_v23 = vadd.f32 %v4608_v63, %v4540_v59  ;;  %v11307_v59 = vor.u32 %v12968_v8, %v11306_v53 }
 0x5b6   : > { %v4541_v42 = vpop.f32.mrf.mxu1 }
 0x5b7   : > { %v4542_v27 = vadd.f32 %v4541_v42, %v15390_v7 }
 0x5b8   : > { %6412 = vmatpush.bf16.msra.mxu2 %v11403_v14  ;;  %v11378_v14 = vld [vmem:[%s18711_s8 + $0xf0] sm:$0xf] }
 0x5bc   : > { %v4610_v30 = vpop.f32.mrf.mxu2 }
 0x5bd   : > { %v15468_v3 = vadd.f32 %v4610_v30, %v4542_v27 }
 0x5be   : > { %v4544_v6 = vpop.f32.mrf.mxu1 }
 0x5bf   : > { %v4545_v17 = vadd.f32 %v4544_v6, %v15390_v7 }
 0x5c1   : > { %4661 = vmatmul.bf16.gmra.mxu1 %v13938_v29  ;;  %4730 = vmatmul.bf16.gmra.mxu2 %v15095_v55  ;;  %v12971_v55 = vld [vmem:[%s18711_s8 + $0x80] sm:$0xf0] }
 0x5c2   : > { %v11319_v18 = vor.u32 %v12971_v55, %v11318_v40 }
 0x5c4   : > { %v4613_v39 = vpop.f32.mrf.mxu2  ;;  %6352 = vmatpush.bf16.msra.mxu1 %v11319_v18 }
 0x5c5   : > { %v15478_v36 = vadd.f32 %v4613_v39, %v4545_v17 }
 0x5c6   : > { %v4546_v50 = vpop.f32.mrf.mxu1 }
 0x5c7   : > { %v4547_v11 = vadd.f32 %v4546_v50, %v15390_v7 }
 0x5c8   : > { %6353 = vmatpush.bf16.msra.mxu1 %v11307_v59  ;;  %v12962_v59 = vld [vmem:[%s18711_s8 + $0x38] sm:$0xf0] }
 0x5cc   : > { %v4615_v10 = vpop.f32.mrf.mxu2 }
 0x5cd   : > { %v15487_v0 = vadd.f32 %v4615_v10, %v4547_v11 }
 0x5ce   : > { %v4549_v41 = vpop.f32.mrf.mxu1 }
 0x5cf   : > { %v4550_v13 = vadd.f32 %v4549_v41, %v15390_v7 }
 0x5d1   : > { %4666 = vmatmul.bf16.gmra.mxu1 %v15102_v51  ;;  %4735 = vmatmul.bf16.gmra.mxu2 %v15109_v47 }
 0x5d4   : > { %v4618_v5 = vpop.f32.mrf.mxu2 }
 0x5d5   : > { %v15492_v24 = vadd.f32 %v4618_v5, %v4550_v13 }
 0x5d6   : > { %v4551_v34 = vpop.f32.mrf.mxu1 }
 0x5d7   : > { %v4552_v51 = vadd.f32 %v4551_v34, %v15390_v7 }
 0x5dc   : > { %v4620_v15 = vpop.f32.mrf.mxu2 }
 0x5dd   : > { %v15501_v47 = vadd.f32 %v4620_v15, %v4552_v51  ;;  %v12986_v51 = vld [vmem:[%s18711_s8 + $0xf8] sm:$0xf0] }
 0x5de   : > { %v4554_v56 = vpop.f32.mrf.mxu1  ;;  %v11379_v15 = vor.u32 %v12986_v51, %v11378_v14  ;;  %v11522_v51 = vld [vmem:[%s18711_s8 + $0x210] sm:$0xf] }
 0x5df   : > { %v4555_v63 = vadd.f32 %v4554_v56, %v15390_v7  ;;  %v11282_v56 = vld [vmem:[%s18711_s8 + $0x30] sm:$0xf] }
 0x5e1   : > { %4671 = vmatmul.bf16.gmra.mxu1 %v15145_v1  ;;  %4740 = vmatmul.bf16.gmra.mxu2 %v15138_v54  ;;  %v11390_v54 = vld [vmem:[%s18711_s8 + $0x108] sm:$0xf]  ;;  %v12989_v1 = vld [vmem:[%s18711_s8 + $0x110] sm:$0xf0] }
 0x5e2   : > { %v11391_v48 = vor.u32 %v12989_v1, %v11390_v54 }
 0x5e4   : > { %v4623_v42 = vpop.f32.mrf.mxu2  ;;  %6413 = vmatpush.bf16.msra.mxu2 %v11391_v48 }
 0x5e5   : > { %v15512_v27 = vadd.f32 %v4623_v42, %v4555_v63  ;;  %v11283_v42 = vor.u32 %v12962_v59, %v11282_v56  ;;  %v13046_v56 = vld [vmem:[%s18711_s8 + $0x2d8] sm:$0xf0] }
 0x5e6   : > { %v4556_v30 = vpop.f32.mrf.mxu1 }
 0x5e7   : > { %v4557_v6 = vadd.f32 %v4556_v30, %v15390_v7  ;;  %v15561_v30 = vpop.f32.mrf.mxu3 }
 0x5e8   : > { %6414 = vmatpush.bf16.msra.mxu2 %v11379_v15  ;;  %v13022_v15 = vld [vmem:[%s18711_s8 + $0x218] sm:$0xf0] }
 0x5ec   : > { %v4625_v29 = vpop.f32.mrf.mxu2 }
 0x5ed   : > { %v15515_v57 = vadd.f32 %v4625_v29, %v4557_v6 }
 0x5ee   : > { %v4559_v49 = vpop.f32.mrf.mxu1 }
 0x5ef   : > { %v4560_v17 = vadd.f32 %v4559_v49, %v15390_v7  ;;  %v15570_v48 = vpop.f32.mrf.mxu3 }
 0x5f1   : > { %4676 = vmatmul.bf16.gmra.mxu1 %v15184_v46  ;;  %4745 = vmatmul.bf16.gmra.mxu2 %v15156_v35  ;;  %v11294_v46 = vld [vmem:[%s18711_s8 + $0x48] sm:$0xf]  ;;  %v12965_v35 = vld [vmem:[%s18711_s8 + $0x50] sm:$0xf0] }
 0x5f2   : > { %v11295_v50 = vor.u32 %v12965_v35, %v11294_v46 }
 0x5f4   : > { %v4628_v39 = vpop.f32.mrf.mxu2  ;;  %6354 = vmatpush.bf16.msra.mxu1 %v11295_v50 }
 0x5f5   : > { %v15526_v40 = vadd.f32 %v4628_v39, %v4560_v17 }
 0x5f6   : > { %v4561_v55 = vpop.f32.mrf.mxu1 }
 0x5f7   : > { %v4562_v18 = vadd.f32 %v4561_v55, %v15390_v7  ;;  %v15580_v55 = vpop.f32.mrf.mxu3 }
 0x5f8   : > { %6355 = vmatpush.bf16.msra.mxu1 %v11283_v42  ;;  %v11366_v42 = vld [vmem:[%s18711_s8 + $0xd8] sm:$0xf] }
 0x5fc   : > { %v4630_v11 = vpop.f32.mrf.mxu2 }
 0x5fd   : > { %v15535_v10 = vadd.f32 %v4630_v11, %v4562_v18  ;;  %v11534_v18 = vld [vmem:[%s18711_s8 + $0x228] sm:$0xf]  ;;  %v13025_v11 = vld [vmem:[%s18711_s8 + $0x230] sm:$0xf0] }
 0x5fe   : > { %v4564_v41 = vpop.f32.mrf.mxu1 }
 0x5ff   : > { %v4565_v13 = vadd.f32 %v4564_v41, %v15390_v7  ;;  %v11630_v41 = vld [vmem:[%s18711_s8 + $0x2e8] sm:$0xf] }
 0x601   : > { %4681 = vmatmul.bf16.gmra.mxu1 %v15229_v60  ;;  %4750 = vmatmul.bf16.gmra.mxu2 %v15177_v32  ;;  %v15550_v60 = vpop.f32.mrf.mxu0 }
 0x604   : > { %v4633_v5 = vpop.f32.mrf.mxu2 }
 0x605   : > { %v15540_v34 = vadd.f32 %v4633_v5, %v4565_v13  ;;  %v11535_v13 = vor.u32 %v13025_v11, %v11534_v18  ;;  %v13049_v5 = vld [vmem:[%s18711_s8 + $0x2f0] sm:$0xf0]  ;;  %v13043_v18 = vld [vmem:[%s18711_s8 + $0x2c0] sm:$0xf0]  ;;  %v15633_v11 = vpop.f32.mrf.mxu3 }
 0x606   : > { %v4566_v12 = vpop.f32.mrf.mxu1  ;;  %v11631_v14 = vor.u32 %v13049_v5, %v11630_v41  ;;  %v11498_v5 = vld [vmem:[%s18711_s8 + $0x1e0] sm:$0xf] }
 0x607   : > { %v4567_v32 = vadd.f32 %v4566_v12, %v15390_v7  ;;  %6468 = vmatpush.bf16.msrb.mxu3 %v11535_v13 }
 0x608   : > { %6527 = vmatpush.bf16.msrb.mxu0 %v11631_v14  ;;  %v11594_v14 = vld [vmem:[%s18711_s8 + $0x2a0] sm:$0xf] }
 0x609   : > { %v15565_v6 = vpop.f32.mrf.mxu0 }
 0x60c   : > { %v4635_v53 = vpop.f32.mrf.mxu2 }
 0x60d   : > { %v15553_v8 = vadd.f32 %v4635_v53, %v4567_v32  ;;  %v11618_v32 = vld [vmem:[%s18711_s8 + $0x2d0] sm:$0xf]  ;;  %v11523_v53 = vor.u32 %v13022_v15, %v11522_v51  ;;  %v15647_v51 = vperm.slane %v15387_v22, 1 }
 0x60e   : > { %v4569_v63 = vpop.f32.mrf.mxu1  ;;  %v11619_v59 = vor.u32 %v13046_v56, %v11618_v32  ;;  %v13040_v32 = vld [vmem:[%s18711_s8 + $0x2a8] sm:$0xf0] }
 0x60f   : > { %v4570_v29 = vadd.f32 %v4569_v63, %v15390_v7  ;;  %6469 = vmatpush.bf16.msrb.mxu3 %v11523_v53  ;;  %v11086_v53 = vld [vmem:[%s18710_s7 + $0x1] ss:$4 sm:$0x3]  ;;  %v11595_v56 = vor.u32 %v13040_v32, %v11594_v14  ;;  %v11474_v14 = vld [vmem:[%s18711_s8 + $0x1b0] sm:$0xf] }
 0x610   : > { %6528 = vmatpush.bf16.msrb.mxu0 %v11619_v59  ;;  %v11570_v32 = vld [vmem:[%s18711_s8 + $0x270] sm:$0xf] }
 0x611   : > { %4686 = vmatmul.bf16.gmra.mxu1 %v15266_v44  ;;  %4755 = vmatmul.bf16.gmra.mxu2 %v15201_v16  ;;  %v15572_v17 = vpop.f32.mrf.mxu0 }
 0x614   : > { %v4638_v49 = vpop.f32.mrf.mxu2 }
 0x615   : > { %v15568_v54 = vadd.f32 %v4638_v49, %v4570_v29  ;;  %v12983_v29 = vld [vmem:[%s18711_s8 + $0xe0] sm:$0xf0] }
 0x616   : > { %v4571_v1 = vpop.f32.mrf.mxu1 }
 0x617   : > { %v4572_v39 = vadd.f32 %v4571_v1, %v15390_v7  ;;  %v11367_v1 = vor.u32 %v12983_v29, %v11366_v42  ;;  %v11486_v42 = vld [vmem:[%s18711_s8 + $0x1c8] sm:$0xf] }
 0x618   : > { %v11582_v29 = vld [vmem:[%s18711_s8 + $0x288] sm:$0xf] }
 0x619   : > { %6415 = vmatpush.bf16.msra.mxu2 %v11367_v1 }
 0x61c   : > { %v4640_v46 = vpop.f32.mrf.mxu2 }
 0x61d   : > { %v15575_v35 = vadd.f32 %v4640_v46, %v4572_v39  ;;  %v11510_v39 = vld [vmem:[%s18711_s8 + $0x1f8] sm:$0xf] }
 0x61e   : > { %v4574_v44 = vpop.f32.mrf.mxu1  ;;  %v11606_v46 = vld [vmem:[%s18711_s8 + $0x2b8] sm:$0xf] }
 0x61f   : > { %v4575_v16 = vadd.f32 %v4574_v44, %v15390_v7  ;;  %v11607_v13 = vor.u32 %v13043_v18, %v11606_v46  ;;  %v15675_v18 = vperm.slane %v11086_v53, 0 }
 0x621   : > { %4691 = vmatmul.bf16.gmra.mxu1 %v15288_v38  ;;  %4760 = vmatmul.bf16.gmra.mxu2 %v15227_v4  ;;  %v15591_v38 = vpop.f32.mrf.mxu0 }
 0x622   : > { %6529 = vmatpush.bf16.msrb.mxu0 %v11607_v13 }
 0x624   : > { %v4643_v50 = vpop.f32.mrf.mxu2 }
 0x625   : > { %v15593_v4 = vadd.f32 %v4643_v50, %v4575_v16 }
 0x626   : > { %v4576_v12 = vpop.f32.mrf.mxu1  ;;  %6530 = vmatpush.bf16.msrb.mxu0 %v11595_v56  ;;  %v15695_v56 = vperm.slane %v11086_v53, 1  ;;  %v13007_v53 = vld [vmem:[%s18711_s8 + $0x1a0] sm:$0xf0] }
 0x627   : > { %v4577_v63 = vadd.f32 %v4576_v12, %v15390_v7  ;;  %v13019_v7 = vld [vmem:[%s18711_s8 + $0x200] sm:$0xf0]  ;;  %v13016_v12 = vld [vmem:[%s18711_s8 + $0x1e8] sm:$0xf0] }
 0x628   : > { %v11511_v50 = vor.u32 %v13019_v7, %v11510_v39  ;;  %v11499_v15 = vor.u32 %v13016_v12, %v11498_v5  ;;  %v13037_v39 = vld [vmem:[%s18711_s8 + $0x290] sm:$0xf0]  ;;  %v15683_v12 = vpop.f32.mrf.mxu3 }
 0x629   : > { %v15626_v44 = vpop.f32.mrf.mxu0  ;;  %v11583_v46 = vor.u32 %v13037_v39, %v11582_v29 }
 0x62a   : > { %6470 = vmatpush.bf16.msrb.mxu3 %v11511_v50 }
 0x62b   : > { %6531 = vmatpush.bf16.msrb.mxu0 %v11583_v46 }
 0x62c   : > { %v4645_v49 = vpop.f32.mrf.mxu2 }
 0x62d   : > { %v15628_v16 = vadd.f32 %v4645_v49, %v4577_v63 }
 0x62e   : > { %v4657_v41 = vpop.f32.mrf.mxu1  ;;  %6471 = vmatpush.bf16.msrb.mxu3 %v11499_v15  ;;  %v13010_v15 = vld [vmem:[%s18711_s8 + $0x1b8] sm:$0xf0] }
 0x62f   : > { %v4658_v59 = vadd.f32 %v4657_v41, %v15395_v28  ;;  %v13013_v28 = vld [vmem:[%s18711_s8 + $0x1d0] sm:$0xf0]  ;;  %v11087_v41 = vld [vmem:[%s18710_s7 + $0x2] ss:$4 sm:$0x3] }
 0x630   : > { %v11487_v1 = vor.u32 %v13013_v28, %v11486_v42  ;;  %v15703_v28 = vperm.slane %v11087_v41, 1 }
 0x631   : > { %4696 = vmatmul.bf16.gmra.mxu1 %v15316_v25  ;;  %4765 = vmatmul.bf16.gmra.mxu2 %v15264_v2  ;;  %v11270_v25 = vld [vmem:[%s18711_s8 + $0x18] sm:$0xf]  ;;  %v12959_v2 = vld [vmem:[%s18711_s8 + $0x20] sm:$0xf0]  ;;  %v4924_v50 = vmax.f32 %v4658_v59, 0.0  ;;  %v15681_v5 = vpop.f32.mrf.mxu0  ;;  %v11475_v59 = vor.u32 %v13010_v15, %v11474_v14 }
 0x632   : > { %v11271_v63 = vor.u32 %v12959_v2, %v11270_v25  ;;  %6472 = vmatpush.bf16.msrb.mxu3 %v11487_v1  ;;  %v13034_v25 = vld [vmem:[%s18711_s8 + $0x278] sm:$0xf0]  ;;  %v15700_v2 = vperm.slane %v11087_v41, 0  ;;  %v11558_v1 = vld [vmem:[%s18711_s8 + $0x258] sm:$0xf] }
 0x634   : > { %v4726_v22 = vpop.f32.mrf.mxu2  ;;  %6356 = vmatpush.bf16.msra.mxu1 %v11271_v63  ;;  %v4979_v63 = vmul.f32 %v15675_v18, %v4924_v50 }
 0x635   : > { %v4727_v49 = vadd.f32 %v4726_v22, %v15647_v51  ;;  %v11571_v22 = vor.u32 %v13034_v25, %v11570_v32  ;;  %v13004_v25 = vld [vmem:[%s18711_s8 + $0x188] sm:$0xf0] }
 0x636   : > { %v4659_v7 = vpop.f32.mrf.mxu1  ;;  %6473 = vmatpush.bf16.msrb.mxu3 %v11475_v59  ;;  %v11450_v59 = vld [vmem:[%s18711_s8 + $0x180] sm:$0xf] }
 0x637   : > { %v4796_v13 = vadd.f32 %v15542_v33, %v4727_v49  ;;  %v4660_v29 = vadd.f32 %v4659_v7, %v15407_v26  ;;  %6532 = vmatpush.bf16.msrb.mxu0 %v11571_v22  ;;  %v13031_v7 = vld [vmem:[%s18711_s8 + $0x260] sm:$0xf0]  ;;  %v11546_v22 = vld [vmem:[%s18711_s8 + $0x240] sm:$0xf] }
 0x638   : > { %v11559_v41 = vor.u32 %v13031_v7, %v11558_v1 }
 0x639   : > { %v4865_v33 = vadd.f32 %v15550_v60, %v4796_v13  ;;  %v11462_v60 = vld [vmem:[%s18711_s8 + $0x198] sm:$0xf]  ;;  %v5034_v13 = vadd.f32 %v15700_v2, %v4979_v63  ;;  %v4926_v15 = vmax.f32 %v4660_v29, 0.0  ;;  %v13028_v29 = vld [vmem:[%s18711_s8 + $0x248] sm:$0xf0] }
 0x63a   : > { %v11463_v26 = vor.u32 %v13007_v53, %v11462_v60  ;;  %v11547_v60 = vor.u32 %v13028_v29, %v11546_v22 }
 0x63b   : > { %v4925_v42 = vmax.f32 %v4865_v33, 0.0  ;;  %v15723_v33 = vpop.f32.mrf.mxu0  ;;  %6533 = vmatpush.bf16.msrb.mxu0 %v11559_v41  ;;  %v4981_v53 = vmul.f32 %v15675_v18, %v4926_v15 }
 0x63c   : > { %v4728_v49 = vpop.f32.mrf.mxu2  ;;  %6474 = vmatpush.bf16.msrb.mxu3 %v11463_v26 }
 0x63d   : > { %v4980_v39 = vmul.f32 %v15695_v56, %v4925_v42  ;;  %v4729_v46 = vadd.f32 %v4728_v49, %v15647_v51  ;;  %v15740_v49 = vpop.f32.mrf.mxu3 }
 0x63e   : > { %v4662_v50 = vpop.f32.mrf.mxu1 }
 0x63f   : > { %v5035_v14 = vadd.f32 %v15703_v28, %v4980_v39  ;;  %v4798_v32 = vadd.f32 %v15561_v30, %v4729_v46  ;;  %v11451_v30 = vor.u32 %v13004_v25, %v11450_v59  ;;  %v4663_v39 = vadd.f32 %v4662_v50, %v15418_v9  ;;  %6534 = vmatpush.bf16.msrb.mxu0 %v11547_v60 }
 0x640   : > { %v5036_v9 = vadd.f32 %v15700_v2, %v4981_v53 }
 0x641   : > { %v5082_v63 = vpack.c.bf16 %v5035_v14, %v5034_v13  ;;  %v4867_v42 = vadd.f32 %v15565_v6, %v4798_v32  ;;  %4701 = vmatmul.bf16.gmra.mxu1 %v15344_v21  ;;  %4770 = vmatmul.bf16.gmra.mxu2 %v15286_v62  ;;  %v11354_v21 = vld [vmem:[%s18711_s8 + $0xc0] sm:$0xf]  ;;  %v12980_v62 = vld [vmem:[%s18711_s8 + $0xc8] sm:$0xf0]  ;;  %v4928_v13 = vmax.f32 %v4663_v39, 0.0 }
 0x642   : > { %6475 = vmatpush.bf16.msrb.mxu3 %v11451_v30  ;;  %v11355_v46 = vor.u32 %v12980_v62, %v11354_v21  ;;  %v12956_v30 = vld [vmem:[%s18711_s8 + $0x8] sm:$0xf0] }
 0x643   : > { %5106 = vst [vmem:[#allocation5] sm:$0xff] %v5082_v63  ;;  %v4927_v1 = vmax.f32 %v4867_v42, 0.0  ;;  %v15756_v59 = vpop.f32.mrf.mxu0  ;;  %v4983_v25 = vmul.f32 %v15675_v18, %v4928_v13  ;;  %v11258_v42 = vld [vmem:[%s18711_s8] sm:$0xf] }
 0x644   : > { %v4731_v6 = vpop.f32.mrf.mxu2  ;;  %6416 = vmatpush.bf16.msra.mxu2 %v11355_v46 }
 0x645   : > { %v4982_v26 = vmul.f32 %v15695_v56, %v4927_v1  ;;  %v4732_v7 = vadd.f32 %v4731_v6, %v15647_v51 }
 0x646   : > { %v4664_v41 = vpop.f32.mrf.mxu1 }
 0x647   : > { %v5037_v50 = vadd.f32 %v15703_v28, %v4982_v26  ;;  %v4801_v14 = vadd.f32 %v15570_v48, %v4732_v7  ;;  %v4665_v63 = vadd.f32 %v4664_v41, %v15421_v52  ;;  %v15766_v48 = vpop.f32.mrf.mxu3  ;;  %v5038_v52 = vadd.f32 %v15700_v2, %v4983_v25 }
 0x649   : > { %v5083_v15 = vpack.c.bf16 %v5037_v50, %v5036_v9  ;;  %v4870_v32 = vadd.f32 %v15572_v17, %v4801_v14  ;;  %v11259_v17 = vor.u32 %v12956_v30, %v11258_v42  ;;  %v4930_v21 = vmax.f32 %v4665_v63, 0.0  ;;  %v11822_v30 = vld [vmem:[%s18711_s8 + $0x468] sm:$0xf] }
 0x64b   : > { %5107 = vst [vmem:[#allocation5 + $0x8] sm:$0xff] %v5083_v15  ;;  %v4929_v22 = vmax.f32 %v4870_v32, 0.0  ;;  %6357 = vmatpush.bf16.msra.mxu1 %v11259_v17  ;;  %v15776_v26 = vpop.f32.mrf.mxu0  ;;  %v4985_v7 = vmul.f32 %v15675_v18, %v4930_v21 }
 0x64c   : > { %v4733_v29 = vpop.f32.mrf.mxu2 }
 0x64d   : > { %v4984_v60 = vmul.f32 %v15695_v56, %v4929_v22  ;;  %v4734_v53 = vadd.f32 %v4733_v29, %v15647_v51  ;;  %v13097_v29 = vld [vmem:[%s18711_s8 + $0x470] sm:$0xf0] }
 0x64e   : > { %v4667_v1 = vpop.f32.mrf.mxu1 }
 0x64f   : > { %v5039_v39 = vadd.f32 %v15703_v28, %v4984_v60  ;;  %v4803_v62 = vadd.f32 %v15580_v55, %v4734_v53  ;;  %v4668_v9 = vadd.f32 %v4667_v1, %v15432_v61  ;;  %v15782_v14 = vpop.f32.mrf.mxu3  ;;  %v11823_v60 = vor.u32 %v13097_v29, %v11822_v30 }
 0x651   : > { %v5084_v6 = vpack.c.bf16 %v5039_v39, %v5038_v52  ;;  %v4872_v46 = vadd.f32 %v15591_v38, %v4803_v62  ;;  %4706 = vmatmul.bf16.gmra.mxu1 %v15366_v20  ;;  %4775 = vmatmul.bf16.gmra.mxu2 %v15314_v19  ;;  %v5040_v20 = vadd.f32 %v15700_v2, %v4985_v7  ;;  %v4932_v15 = vmax.f32 %v4668_v9, 0.0 }
 0x652   : > { %6645 = vmatpush.bf16.msrb.mxu2 %v11823_v60 }
 0x653   : > { %5108 = vst [vmem:[#allocation5 + $0x10] sm:$0xff] %v5084_v6  ;;  %v4931_v41 = vmax.f32 %v4872_v46, 0.0  ;;  %v4987_v63 = vmul.f32 %v15675_v18, %v4932_v15  ;;  %v15796_v17 = vpop.f32.mrf.mxu0 }
 0x654   : > { %v4736_v50 = vpop.f32.mrf.mxu2 }
 0x655   : > { %v4986_v13 = vmul.f32 %v15695_v56, %v4931_v41  ;;  %v4737_v55 = vadd.f32 %v4736_v50, %v15647_v51  ;;  %v5042_v52 = vadd.f32 %v15700_v2, %v4987_v63 }
 0x656   : > { %v4669_v38 = vpop.f32.mrf.mxu1 }
 0x657   : > { %v5041_v19 = vadd.f32 %v15703_v28, %v4986_v13  ;;  %v4806_v32 = vadd.f32 %v15633_v11, %v4737_v55  ;;  %v4670_v61 = vadd.f32 %v4669_v38, %v15441_v37  ;;  %v15803_v62 = vpop.f32.mrf.mxu3 }
 0x659   : > { %v5085_v25 = vpack.c.bf16 %v5041_v19, %v5040_v20  ;;  %v4875_v22 = vadd.f32 %v15626_v44, %v4806_v32  ;;  %v4934_v53 = vmax.f32 %v4670_v61, 0.0 }
 0x65a   : > { %v11098_v7 = vld [vmem:[#allocation5 + $0x10] sm:$0xf]  ;;  %v12915_v50 = vld [vmem:[#allocation5 + $0x14] sm:$0xf] }
 0x65b   : > { %5109 = vst [vmem:[#allocation5 + $0x18] sm:$0xff] %v5085_v25  ;;  %v4933_v42 = vmax.f32 %v4875_v22, 0.0  ;;  %v4989_v41 = vmul.f32 %v15675_v18, %v4934_v53  ;;  %v12914_v53 = vld [vmem:[#allocation5 + $0x4] sm:$0xf0] }
 0x65c   : > { %v4738_v11 = vpop.f32.mrf.mxu2 }
 0x65d   : > { %v4988_v44 = vmul.f32 %v15695_v56, %v4933_v42  ;;  %v4739_v37 = vadd.f32 %v4738_v11, %v15647_v51  ;;  %v5044_v22 = vadd.f32 %v15700_v2, %v4989_v41  ;;  %v12913_v41 = vld [vmem:[#allocation5 + $0x4] sm:$0xf] }
 0x65e   : > { %v4672_v1 = vpop.f32.mrf.mxu1 }
 0x65f   : > { %v5043_v39 = vadd.f32 %v15703_v28, %v4988_v44  ;;  %v4808_v21 = vadd.f32 %v15683_v12, %v4739_v37  ;;  %v4673_v38 = vadd.f32 %v4672_v1, %v15446_v43  ;;  %v15830_v11 = vpop.f32.mrf.mxu3 }
 0x661   : > { %v5086_v6 = vpack.c.bf16 %v5043_v39, %v5042_v52  ;;  %v4877_v46 = vadd.f32 %v15681_v5, %v4808_v21  ;;  %4711 = vmatmul.bf16.gmra.mxu1 %v15403_v45  ;;  %4780 = vmatmul.bf16.gmra.mxu2 %v15342_v31  ;;  %v11726_v45 = vld [vmem:[%s18711_s8 + $0x3a8] sm:$0xf]  ;;  %v13073_v31 = vld [vmem:[%s18711_s8 + $0x3b0] sm:$0xf0]  ;;  %v15820_v5 = vpop.f32.mrf.mxu0  ;;  %v4936_v63 = vmax.f32 %v4673_v38, 0.0 }
 0x662   : > { %v12916_v9 = vld [vmem:[#allocation5 + $0x14] sm:$0xf0]  ;;  %v11100_v13 = vld [vmem:[#allocation5 + $0x18] sm:$0xf0]  ;;  %v11727_v15 = vor.u32 %v13073_v31, %v11726_v45  ;;  %v11092_v52 = vld [vmem:[#allocation5 + $0x8] sm:$0xf0] }
 0x663   : > { %5110 = vst [vmem:[#allocation5 + $0x20] sm:$0xff] %v5086_v6  ;;  %v4935_v55 = vmax.f32 %v4877_v46, 0.0  ;;  %v15810_v12 = vor.u32 %v12916_v9, %v11098_v7  ;;  %v15812_v20 = vor.u32 %v12915_v50, %v11100_v13  ;;  %v4991_v44 = vmul.f32 %v15675_v18, %v4936_v63  ;;  %v11090_v6 = vld [vmem:[#allocation5] sm:$0xf] }
 0x664   : > { %v4741_v19 = vpop.f32.mrf.mxu2  ;;  %6586 = vmatpush.bf16.msrb.mxu1 %v11727_v15  ;;  %v15838_v7 = vor.u32 %v12914_v53, %v11090_v6  ;;  %v15843_v13 = vor.u32 %v12913_v41, %v11092_v52 }
 0x665   : > { %v4990_v32 = vmul.f32 %v15695_v56, %v4935_v55  ;;  %v4742_v43 = vadd.f32 %v4741_v19, %v15647_v51  ;;  %6476 = vmatmul.bf16.vlgmr.msrb.gmra.mxu3 %v15810_v12  ;;  %6535 = vmatmul.bf16.vlgmr.msrb.gmra.mxu0 %v15812_v20 }
 0x666   : > { %v4674_v25 = vpop.f32.mrf.mxu1  ;;  %18819 = vst [vmem:[#allocation9_spill] sm:$0xff] %v15838_v7 }
 0x667   : > { %v5045_v61 = vadd.f32 %v15703_v28, %v4990_v32  ;;  %v4811_v42 = vadd.f32 %v15740_v49, %v4742_v43  ;;  %v4675_v60 = vadd.f32 %v4674_v25, %v15455_v58  ;;  %v5046_v58 = vadd.f32 %v15700_v2, %v4991_v44  ;;  %18820 = vst [vmem:[#allocation10_spill] sm:$0xff] %v15843_v13  ;;  %v15860_v63 = vpop.f32.mrf.mxu3 }
 0x669   : > { %v5087_v30 = vpack.c.bf16 %v5045_v61, %v5044_v22  ;;  %v4880_v29 = vadd.f32 %v15723_v33, %v4811_v42  ;;  %v15836_v49 = vpop.f32.mrf.mxu0  ;;  %v4938_v46 = vmax.f32 %v4675_v60, 0.0  ;;  %v13094_v61 = vld [vmem:[%s18711_s8 + $0x458] sm:$0xf0] }
 0x66a   : > { %v11106_v45 = vld [vmem:[#allocation5 + $0x20] sm:$0xf]  ;;  %v12917_v15 = vld [vmem:[#allocation5 + $0x24] sm:$0xf] }
 0x66b   : > { %5111 = vst [vmem:[#allocation5 + $0x28] sm:$0xff] %v5087_v30  ;;  %v4937_v37 = vmax.f32 %v4880_v29, 0.0  ;;  %v4993_v31 = vmul.f32 %v15675_v18, %v4938_v46  ;;  %v13070_v29 = vld [vmem:[%s18711_s8 + $0x398] sm:$0xf0] }
 0x66c   : > { %v4743_v1 = vpop.f32.mrf.mxu2 }
 0x66d   : > { %v4992_v39 = vmul.f32 %v15695_v56, %v4937_v37  ;;  %v4744_v21 = vadd.f32 %v4743_v1, %v15647_v51  ;;  %v5048_v52 = vadd.f32 %v15700_v2, %v4993_v31 }
 0x66e   : > { %v4677_v33 = vpop.f32.mrf.mxu1 }
 0x66f   : > { %v5047_v9 = vadd.f32 %v15703_v28, %v4992_v39  ;;  %v4813_v50 = vadd.f32 %v15766_v48, %v4744_v21  ;;  %v4678_v25 = vadd.f32 %v4677_v33, %v15465_v23  ;;  %v11714_v23 = vld [vmem:[%s18711_s8 + $0x390] sm:$0xf] }
 0x670   : > { %v11715_v1 = vor.u32 %v13070_v29, %v11714_v23 }
 0x671   : > { %v5088_v55 = vpack.c.bf16 %v5047_v9, %v5046_v58  ;;  %v4882_v38 = vadd.f32 %v15756_v59, %v4813_v50  ;;  %6358 = vmatmul.bf16.vlgmr.msra.gmra.mxu1 %v15838_v7  ;;  %6417 = vmatmul.bf16.vlgmr.msra.gmra.mxu2 %v15843_v13  ;;  %v11810_v59 = vld [vmem:[%s18711_s8 + $0x450] sm:$0xf]  ;;  %v15872_v37 = vpop.f32.mrf.mxu0  ;;  %v4940_v21 = vmax.f32 %v4678_v25, 0.0  ;;  %v15880_v50 = vpop.f32.mrf.mxu3 }
 0x672   : > { %v12918_v19 = vld [vmem:[#allocation5 + $0x24] sm:$0xf0]  ;;  %v11108_v32 = vld [vmem:[#allocation5 + $0x28] sm:$0xf0]  ;;  %v11811_v30 = vor.u32 %v13094_v61, %v11810_v59  ;;  %6587 = vmatpush.bf16.msrb.mxu1 %v11715_v1 }
 0x673   : > { %5112 = vst [vmem:[#allocation5 + $0x30] sm:$0xff] %v5088_v55  ;;  %v4939_v43 = vmax.f32 %v4882_v38, 0.0  ;;  %v15850_v48 = vor.u32 %v12918_v19, %v11106_v45  ;;  %v15852_v22 = vor.u32 %v12917_v15, %v11108_v32  ;;  %v4995_v58 = vmul.f32 %v15675_v18, %v4940_v21 }
 0x674   : > { %v4746_v42 = vpop.f32.mrf.mxu2  ;;  %6646 = vmatpush.bf16.msrb.mxu2 %v11811_v30 }
 0x675   : > { %v4994_v60 = vmul.f32 %v15695_v56, %v4939_v43  ;;  %v4747_v44 = vadd.f32 %v4746_v42, %v15647_v51  ;;  %6481 = vmatmul.bf16.gmra.mxu3 %v15850_v48  ;;  %6540 = vmatmul.bf16.gmra.mxu0 %v15852_v22 }
 0x676   : > { %v4679_v53 = vpop.f32.mrf.mxu1 }
 0x677   : > { %v5049_v39 = vadd.f32 %v15703_v28, %v4994_v60  ;;  %v4816_v6 = vadd.f32 %v15782_v14, %v4747_v44  ;;  %v4680_v41 = vadd.f32 %v4679_v53, %v15468_v3  ;;  %v5050_v14 = vadd.f32 %v15700_v2, %v4995_v58  ;;  %v13091_v44 = vld [vmem:[%s18711_s8 + $0x440] sm:$0xf0] }
 0x679   : > { %v5089_v46 = vpack.c.bf16 %v5049_v39, %v5048_v52  ;;  %v4885_v33 = vadd.f32 %v15776_v26, %v4816_v6  ;;  %v4942_v31 = vmax.f32 %v4680_v41, 0.0  ;;  %v15887_v3 = vpop.f32.mrf.mxu0 }
 0x67a   : > { %v11114_v25 = vld [vmem:[#allocation5 + $0x30] sm:$0xf]  ;;  %v12919_v42 = vld [vmem:[#allocation5 + $0x34] sm:$0xf] }
 0x67b   : > { %5113 = vst [vmem:[#allocation5 + $0x38] sm:$0xff] %v5089_v46  ;;  %v4941_v9 = vmax.f32 %v4885_v33, 0.0  ;;  %v4997_v59 = vmul.f32 %v15675_v18, %v4942_v31 }
 0x67c   : > { %v4748_v55 = vpop.f32.mrf.mxu2 }
 0x67d   : > { %v4996_v38 = vmul.f32 %v15695_v56, %v4941_v9  ;;  %v4749_v45 = vadd.f32 %v4748_v55, %v15647_v51  ;;  %v5052_v6 = vadd.f32 %v15700_v2, %v4997_v59 }
 0x67e   : > { %v4682_v19 = vpop.f32.mrf.mxu1 }
 0x67f   : > { %v5051_v15 = vadd.f32 %v15703_v28, %v4996_v38  ;;  %v4818_v26 = vadd.f32 %v15803_v62, %v4749_v45  ;;  %v4683_v29 = vadd.f32 %v4682_v19, %v15478_v36  ;;  %v15908_v36 = vpop.f32.mrf.mxu3  ;;  %v11702_v19 = vld [vmem:[%s18711_s8 + $0x378] sm:$0xf] }
 0x681   : > { %v5090_v32 = vpack.c.bf16 %v5051_v15, %v5050_v14  ;;  %v4887_v43 = vadd.f32 %v15796_v17, %v4818_v26  ;;  %6363 = vmatmul.bf16.gmra.mxu1 %v15810_v12  ;;  %6422 = vmatmul.bf16.gmra.mxu2 %v15812_v20  ;;  %v11798_v17 = vld [vmem:[%s18711_s8 + $0x438] sm:$0xf]  ;;  %v4944_v33 = vmax.f32 %v4683_v29, 0.0  ;;  %v15913_v58 = vpop.f32.mrf.mxu0  ;;  %v13067_v14 = vld [vmem:[%s18711_s8 + $0x380] sm:$0xf0] }
 0x682   : > { %v12920_v61 = vld [vmem:[#allocation5 + $0x34] sm:$0xf0]  ;;  %v11116_v30 = vld [vmem:[#allocation5 + $0x38] sm:$0xf0]  ;;  %v11799_v1 = vor.u32 %v13091_v44, %v11798_v17  ;;  %v11703_v15 = vor.u32 %v13067_v14, %v11702_v19 }
 0x683   : > { %5114 = vst [vmem:[#allocation5 + $0x40] sm:$0xff] %v5090_v32  ;;  %v4943_v23 = vmax.f32 %v4887_v43, 0.0  ;;  %v15894_v62 = vor.u32 %v12920_v61, %v11114_v25  ;;  %v15896_v60 = vor.u32 %v12919_v42, %v11116_v30  ;;  %v4999_v45 = vmul.f32 %v15675_v18, %v4944_v33 }
 0x684   : > { %v4751_v53 = vpop.f32.mrf.mxu2  ;;  %6647 = vmatpush.bf16.msrb.mxu2 %v11799_v1  ;;  %6588 = vmatpush.bf16.msrb.mxu1 %v11703_v15 }
 0x685   : > { %v4998_v52 = vmul.f32 %v15695_v56, %v4943_v23  ;;  %v4752_v39 = vadd.f32 %v4751_v53, %v15647_v51  ;;  %6486 = vmatmul.bf16.gmra.mxu3 %v15894_v62  ;;  %6545 = vmatmul.bf16.gmra.mxu0 %v15896_v60  ;;  %v5054_v25 = vadd.f32 %v15700_v2, %v4999_v45 }
 0x686   : > { %v4684_v21 = vpop.f32.mrf.mxu1 }
 0x687   : > { %v5053_v46 = vadd.f32 %v15703_v28, %v4998_v52  ;;  %v4821_v41 = vadd.f32 %v15830_v11, %v4752_v39  ;;  %v4685_v38 = vadd.f32 %v4684_v21, %v15487_v0  ;;  %v15926_v32 = vpop.f32.mrf.mxu3 }
 0x689   : > { %v5091_v9 = vpack.c.bf16 %v5053_v46, %v5052_v6  ;;  %v4890_v55 = vadd.f32 %v15820_v5, %v4821_v41  ;;  %v4946_v0 = vmax.f32 %v4685_v38, 0.0  ;;  %v15934_v29 = vpop.f32.mrf.mxu0 }
 0x68a   : > { %v11122_v23 = vld [vmem:[#allocation5 + $0x40] sm:$0xf]  ;;  %v12921_v53 = vld [vmem:[#allocation5 + $0x44] sm:$0xf] }
 0x68b   : > { %5115 = vst [vmem:[#allocation5 + $0x48] sm:$0xff] %v5091_v9  ;;  %v4945_v31 = vmax.f32 %v4890_v55, 0.0  ;;  %v5001_v17 = vmul.f32 %v15675_v18, %v4946_v0 }
 0x68c   : > { %v4753_v11 = vpop.f32.mrf.mxu2 }
 0x68d   : > { %v5000_v26 = vmul.f32 %v15695_v56, %v4945_v31  ;;  %v4754_v5 = vadd.f32 %v4753_v11, %v15647_v51  ;;  %v5056_v41 = vadd.f32 %v15700_v2, %v5001_v17 }
 0x68e   : > { %v4687_v43 = vpop.f32.mrf.mxu1 }
 0x68f   : > { %v5055_v59 = vadd.f32 %v15703_v28, %v5000_v26  ;;  %v4823_v61 = vadd.f32 %v15860_v63, %v4754_v5  ;;  %v4688_v39 = vadd.f32 %v4687_v43, %v15492_v24  ;;  %v15949_v38 = vpop.f32.mrf.mxu3  ;;  %v11786_v26 = vld [vmem:[%s18711_s8 + $0x420] sm:$0xf] }
 0x691   : > { %v5092_v42 = vpack.c.bf16 %v5055_v59, %v5054_v25  ;;  %v4892_v30 = vadd.f32 %v15836_v49, %v4823_v61  ;;  %6368 = vmatmul.bf16.gmra.mxu1 %v15850_v48  ;;  %6427 = vmatmul.bf16.gmra.mxu2 %v15852_v22  ;;  %v4948_v55 = vmax.f32 %v4688_v39, 0.0  ;;  %v15952_v19 = vpop.f32.mrf.mxu0 }
 0x692   : > { %v12922_v44 = vld [vmem:[#allocation5 + $0x44] sm:$0xf0]  ;;  %v11124_v1 = vld [vmem:[#allocation5 + $0x48] sm:$0xf0] }
 0x693   : > { %5116 = vst [vmem:[#allocation5 + $0x50] sm:$0xff] %v5092_v42  ;;  %v4947_v52 = vmax.f32 %v4892_v30, 0.0  ;;  %v15938_v63 = vor.u32 %v12922_v44, %v11122_v23  ;;  %v15940_v21 = vor.u32 %v12921_v53, %v11124_v1  ;;  %v5003_v11 = vmul.f32 %v15675_v18, %v4948_v55 }
 0x694   : > { %v4756_v49 = vpop.f32.mrf.mxu2 }
 0x695   : > { %v5002_v6 = vmul.f32 %v15695_v56, %v4947_v52  ;;  %v4757_v46 = vadd.f32 %v4756_v49, %v15647_v51  ;;  %6491 = vmatmul.bf16.gmra.mxu3 %v15938_v63  ;;  %6550 = vmatmul.bf16.gmra.mxu0 %v15940_v21  ;;  %v5058_v30 = vadd.f32 %v15700_v2, %v5003_v11 }
 0x696   : > { %v4689_v33 = vpop.f32.mrf.mxu1 }
 0x697   : > { %v5057_v9 = vadd.f32 %v15703_v28, %v5002_v6  ;;  %v4826_v24 = vadd.f32 %v15880_v50, %v4757_v46  ;;  %v4690_v14 = vadd.f32 %v4689_v33, %v15501_v47  ;;  %v13088_v50 = vld [vmem:[%s18711_s8 + $0x428] sm:$0xf0]  ;;  %v15973_v44 = vpop.f32.mrf.mxu3 }
 0x698   : > { %v11787_v0 = vor.u32 %v13088_v50, %v11786_v26  ;;  %v13064_v47 = vld [vmem:[%s18711_s8 + $0x368] sm:$0xf0] }
 0x699   : > { %v5093_v45 = vpack.c.bf16 %v5057_v9, %v5056_v41  ;;  %v4895_v31 = vadd.f32 %v15872_v37, %v4826_v24  ;;  %v11690_v37 = vld [vmem:[%s18711_s8 + $0x360] sm:$0xf]  ;;  %v4950_v61 = vmax.f32 %v4690_v14, 0.0  ;;  %v15984_v55 = vpop.f32.mrf.mxu0 }
 0x69a   : > { %v11691_v59 = vor.u32 %v13064_v47, %v11690_v37  ;;  %6648 = vmatpush.bf16.msrb.mxu2 %v11787_v0  ;;  %v11130_v52 = vld [vmem:[#allocation5 + $0x50] sm:$0xf]  ;;  %v12923_v6 = vld [vmem:[#allocation5 + $0x54] sm:$0xf] }
 0x69b   : > { %5117 = vst [vmem:[#allocation5 + $0x58] sm:$0xff] %v5093_v45  ;;  %v4949_v15 = vmax.f32 %v4895_v31, 0.0  ;;  %v5005_v39 = vmul.f32 %v15675_v18, %v4950_v61 }
 0x69c   : > { %v4758_v5 = vpop.f32.mrf.mxu2  ;;  %6589 = vmatpush.bf16.msrb.mxu1 %v11691_v59 }
 0x69d   : > { %v5004_v43 = vmul.f32 %v15695_v56, %v4949_v15  ;;  %v4759_v25 = vadd.f32 %v4758_v5, %v15647_v51  ;;  %v5060_v14 = vadd.f32 %v15700_v2, %v5005_v39 }
 0x69e   : > { %v4692_v42 = vpop.f32.mrf.mxu1 }
 0x69f   : > { %v5059_v23 = vadd.f32 %v15703_v28, %v5004_v43  ;;  %v4828_v17 = vadd.f32 %v15908_v36, %v4759_v25  ;;  %v4693_v36 = vadd.f32 %v4692_v42, %v15512_v27  ;;  %v15994_v5 = vpop.f32.mrf.mxu3  ;;  %v11774_v43 = vld [vmem:[%s18711_s8 + $0x408] sm:$0xf]  ;;  %v13085_v25 = vld [vmem:[%s18711_s8 + $0x410] sm:$0xf0] }
 0x6a1   : > { %v5094_v53 = vpack.c.bf16 %v5059_v23, %v5058_v30  ;;  %v4897_v1 = vadd.f32 %v15887_v3, %v4828_v17  ;;  %6373 = vmatmul.bf16.gmra.mxu1 %v15894_v62  ;;  %6432 = vmatmul.bf16.gmra.mxu2 %v15896_v60  ;;  %v4952_v11 = vmax.f32 %v4693_v36, 0.0 }
 0x6a2   : > { %v12924_v49 = vld [vmem:[#allocation5 + $0x54] sm:$0xf0]  ;;  %v11132_v46 = vld [vmem:[#allocation5 + $0x58] sm:$0xf0] }
 0x6a3   : > { %5118 = vst [vmem:[#allocation5 + $0x60] sm:$0xff] %v5094_v53  ;;  %v4951_v33 = vmax.f32 %v4897_v1, 0.0  ;;  %v15980_v41 = vor.u32 %v12924_v49, %v11130_v52  ;;  %v15982_v9 = vor.u32 %v12923_v6, %v11132_v46  ;;  %v5007_v37 = vmul.f32 %v15675_v18, %v4952_v11 }
 0x6a4   : > { %v4761_v3 = vpop.f32.mrf.mxu2 }
 0x6a5   : > { %18821 = vst [vmem:[#allocation11_spill] sm:$0xff] %v15980_v41  ;;  %v5006_v24 = vmul.f32 %v15695_v56, %v4951_v33  ;;  %v4762_v45 = vadd.f32 %v4761_v3, %v15647_v51  ;;  %6496 = vmatmul.bf16.gmra.mxu3 %v15980_v41  ;;  %6555 = vmatmul.bf16.gmra.mxu0 %v15982_v9 }
 0x6a6   : > { %18822 = vst [vmem:[#allocation12_spill] sm:$0xff] %v15982_v9  ;;  %v4694_v31 = vpop.f32.mrf.mxu1  ;;  %v5062_v23 = vadd.f32 %v15700_v2, %v5007_v37 }
 0x6a7   : > { %v5061_v27 = vadd.f32 %v15703_v28, %v5006_v24  ;;  %v4831_v15 = vadd.f32 %v15926_v32, %v4762_v45  ;;  %v4695_v0 = vadd.f32 %v4694_v31, %v15515_v57  ;;  %v16004_v32 = vpop.f32.mrf.mxu0  ;;  %v16014_v49 = vpop.f32.mrf.mxu3  ;;  %v13061_v31 = vld [vmem:[%s18711_s8 + $0x350] sm:$0xf0] }
 0x6a9   : > { %v5095_v26 = vpack.c.bf16 %v5061_v27, %v5060_v14  ;;  %v4900_v50 = vadd.f32 %v15913_v58, %v4831_v15  ;;  %v11775_v58 = vor.u32 %v13085_v25, %v11774_v43  ;;  %v4954_v42 = vmax.f32 %v4695_v0, 0.0 }
 0x6aa   : > { %v11138_v39 = vld [vmem:[#allocation5 + $0x60] sm:$0xf]  ;;  %v12925_v33 = vld [vmem:[#allocation5 + $0x64] sm:$0xf] }
 0x6ab   : > { %5119 = vst [vmem:[#allocation5 + $0x68] sm:$0xff] %v5095_v26  ;;  %v4953_v47 = vmax.f32 %v4900_v50, 0.0  ;;  %6649 = vmatpush.bf16.msrb.mxu2 %v11775_v58  ;;  %v5009_v6 = vmul.f32 %v15675_v18, %v4954_v42 }
 0x6ac   : > { %v4763_v59 = vpop.f32.mrf.mxu2 }
 0x6ad   : > { %v5008_v61 = vmul.f32 %v15695_v56, %v4953_v47  ;;  %v4764_v57 = vadd.f32 %v4763_v59, %v15647_v51  ;;  %v5064_v50 = vadd.f32 %v15700_v2, %v5009_v6 }
 0x6ae   : > { %v4697_v30 = vpop.f32.mrf.mxu1 }
 0x6af   : > { %v5063_v17 = vadd.f32 %v15703_v28, %v5008_v61  ;;  %v4833_v53 = vadd.f32 %v15949_v38, %v4764_v57  ;;  %v4698_v24 = vadd.f32 %v4697_v30, %v15526_v40  ;;  %v16032_v40 = vpop.f32.mrf.mxu0  ;;  %v16040_v57 = vpop.f32.mrf.mxu3 }
 0x6b1   : > { %v5096_v1 = vpack.c.bf16 %v5063_v17, %v5062_v23  ;;  %v4902_v52 = vadd.f32 %v15934_v29, %v4833_v53  ;;  %6378 = vmatmul.bf16.gmra.mxu1 %v15938_v63  ;;  %6437 = vmatmul.bf16.gmra.mxu2 %v15940_v21  ;;  %v11678_v29 = vld [vmem:[%s18711_s8 + $0x348] sm:$0xf]  ;;  %v4956_v37 = vmax.f32 %v4698_v24, 0.0 }
 0x6b2   : > { %v12926_v46 = vld [vmem:[#allocation5 + $0x64] sm:$0xf0]  ;;  %v11140_v36 = vld [vmem:[#allocation5 + $0x68] sm:$0xf0]  ;;  %v11679_v27 = vor.u32 %v13061_v31, %v11678_v29 }
 0x6b3   : > { %5120 = vst [vmem:[#allocation5 + $0x70] sm:$0xff] %v5096_v1  ;;  %v4955_v3 = vmax.f32 %v4902_v52, 0.0  ;;  %v16018_v38 = vor.u32 %v12926_v46, %v11138_v39  ;;  %v16020_v45 = vor.u32 %v12925_v33, %v11140_v36  ;;  %v5011_v58 = vmul.f32 %v15675_v18, %v4956_v37 }
 0x6b4   : > { %v4766_v14 = vpop.f32.mrf.mxu2  ;;  %6590 = vmatpush.bf16.msrb.mxu1 %v11679_v27 }
 0x6b5   : > { %18823 = vst [vmem:[#allocation13_spill] sm:$0xff] %v16018_v38  ;;  %v5010_v11 = vmul.f32 %v15695_v56, %v4955_v3  ;;  %v4767_v15 = vadd.f32 %v4766_v14, %v15647_v51  ;;  %6501 = vmatmul.bf16.gmra.mxu3 %v16018_v38  ;;  %6560 = vmatmul.bf16.gmra.mxu0 %v16020_v45  ;;  %v13082_v14 = vld [vmem:[%s18711_s8 + $0x3f8] sm:$0xf0] }
 0x6b6   : > { %18824 = vst [vmem:[#allocation14_spill] sm:$0xff] %v16020_v45  ;;  %v4699_v26 = vpop.f32.mrf.mxu1  ;;  %v5066_v1 = vadd.f32 %v15700_v2, %v5011_v58 }
 0x6b7   : > { %v5065_v0 = vadd.f32 %v15703_v28, %v5010_v11  ;;  %v4836_v47 = vadd.f32 %v15973_v44, %v4767_v15  ;;  %v4700_v59 = vadd.f32 %v4699_v26, %v15535_v10  ;;  %v16044_v17 = vpop.f32.mrf.mxu0  ;;  %v16064_v27 = vpop.f32.mrf.mxu3  ;;  %v13058_v26 = vld [vmem:[%s18711_s8 + $0x338] sm:$0xf0] }
 0x6b9   : > { %v5097_v43 = vpack.c.bf16 %v5065_v0, %v5064_v50  ;;  %v4905_v25 = vadd.f32 %v15952_v19, %v4836_v47  ;;  %v4958_v53 = vmax.f32 %v4700_v59, 0.0  ;;  %v12976_v50 = vld [vmem:[%s18711_s8 + $0xac] sm:$0xf]  ;;  %v11344_v47 = vld [vmem:[%s18711_s8 + $0xb4] sm:$0xf0] }
 0x6ba   : > { %v11146_v6 = vld [vmem:[#allocation5 + $0x70] sm:$0xf]  ;;  %v12927_v36 = vld [vmem:[#allocation5 + $0x74] sm:$0xf] }
 0x6bb   : > { %5121 = vst [vmem:[#allocation5 + $0x78] sm:$0xff] %v5097_v43  ;;  %v4957_v61 = vmax.f32 %v4905_v25, 0.0  ;;  %v5013_v46 = vmul.f32 %v15675_v18, %v4958_v53  ;;  %v13000_v43 = vld [vmem:[%s18711_s8 + $0x16c] sm:$0xf]  ;;  %v11440_v25 = vld [vmem:[%s18711_s8 + $0x174] sm:$0xf0] }
 0x6bc   : > { %v4768_v42 = vpop.f32.mrf.mxu2 }
 0x6bd   : > { %v5012_v30 = vmul.f32 %v15695_v56, %v4957_v61  ;;  %v4769_v23 = vadd.f32 %v4768_v42, %v15647_v51  ;;  %v11347_v61 = vor.u32 %v12976_v50, %v11344_v47  ;;  %v11443_v42 = vor.u32 %v13000_v43, %v11440_v25 }
 0x6be   : > { %v4702_v44 = vpop.f32.mrf.mxu1 }
 0x6bf   : > { %v5067_v19 = vadd.f32 %v15703_v28, %v5012_v30  ;;  %v4838_v10 = vadd.f32 %v15994_v5, %v4769_v23  ;;  %v4703_v29 = vadd.f32 %v4702_v44, %v15540_v34  ;;  %v11666_v34 = vld [vmem:[%s18711_s8 + $0x330] sm:$0xf]  ;;  %v5068_v30 = vadd.f32 %v15700_v2, %v5013_v46  ;;  %6704 = vmatpush.bf16.msra.mxu3 %v11347_v61  ;;  %v11428_v46 = vld [vmem:[%s18711_s8 + $0x15c] sm:$0xf0] }
 0x6c0   : > { %v11667_v58 = vor.u32 %v13058_v26, %v11666_v34  ;;  %6763 = vmatpush.bf16.msra.mxu0 %v11443_v42  ;;  %v11416_v34 = vld [vmem:[%s18711_s8 + $0x144] sm:$0xf0]  ;;  %v16122_v26 = vpop.f32.mrf.mxu3  ;;  %v11308_v61 = vld [vmem:[%s18711_s8 + $0x6c] sm:$0xf0]  ;;  %v12991_v42 = vld [vmem:[%s18711_s8 + $0x124] sm:$0xf] }
 0x6c1   : > { %v5098_v52 = vpack.c.bf16 %v5067_v19, %v5066_v1  ;;  %v4907_v39 = vadd.f32 %v15984_v55, %v4838_v10  ;;  %6383 = vmatmul.bf16.gmra.mxu1 %v15980_v41  ;;  %6442 = vmatmul.bf16.gmra.mxu2 %v15982_v9  ;;  %v11762_v55 = vld [vmem:[%s18711_s8 + $0x3f0] sm:$0xf]  ;;  %v4960_v53 = vmax.f32 %v4703_v29, 0.0  ;;  %v16091_v1 = vpop.f32.mrf.mxu0  ;;  %v12973_v19 = vld [vmem:[%s18711_s8 + $0x94] sm:$0xf] }
 0x6c2   : > { %v12928_v33 = vld [vmem:[#allocation5 + $0x74] sm:$0xf0]  ;;  %v11148_v3 = vld [vmem:[#allocation5 + $0x78] sm:$0xf0]  ;;  %v11763_v15 = vor.u32 %v13082_v14, %v11762_v55  ;;  %6591 = vmatpush.bf16.msrb.mxu1 %v11667_v58  ;;  %v11332_v10 = vld [vmem:[%s18711_s8 + $0x9c] sm:$0xf0] }
 0x6c3   : > { %5122 = vst [vmem:[#allocation5 + $0x80] sm:$0xff] %v5098_v52  ;;  %v4959_v24 = vmax.f32 %v4907_v39, 0.0  ;;  %v16054_v31 = vor.u32 %v12928_v33, %v11146_v6  ;;  %v16056_v5 = vor.u32 %v12927_v36, %v11148_v3  ;;  %v12997_v52 = vld [vmem:[%s18711_s8 + $0x154] sm:$0xf]  ;;  %v5015_v3 = vmul.f32 %v15675_v18, %v4960_v53  ;;  %v12970_v55 = vld [vmem:[%s18711_s8 + $0x7c] sm:$0xf] }
 0x6c4   : > { %v4771_v11 = vpop.f32.mrf.mxu2  ;;  %6650 = vmatpush.bf16.msrb.mxu2 %v11763_v15  ;;  %v11431_v36 = vor.u32 %v12997_v52, %v11428_v46  ;;  %v12994_v14 = vld [vmem:[%s18711_s8 + $0x13c] sm:$0xf]  ;;  %v12967_v58 = vld [vmem:[%s18711_s8 + $0x64] sm:$0xf] }
 0x6c5   : > { %18825 = vst [vmem:[#allocation15_spill] sm:$0xff] %v16054_v31  ;;  %v5014_v0 = vmul.f32 %v15695_v56, %v4959_v24  ;;  %v4772_v37 = vadd.f32 %v4771_v11, %v15647_v51  ;;  %6506 = vmatmul.bf16.gmra.mxu3 %v16054_v31  ;;  %6565 = vmatmul.bf16.gmra.mxu0 %v16056_v5 }
 0x6c6   : > { %18826 = vst [vmem:[#allocation16_spill] sm:$0xff] %v16056_v5  ;;  %v4704_v59 = vpop.f32.mrf.mxu1  ;;  %6764 = vmatpush.bf16.msra.mxu0 %v11431_v36  ;;  %v5070_v47 = vadd.f32 %v15700_v2, %v5015_v3  ;;  %v11311_v53 = vor.u32 %v12967_v58, %v11308_v61  ;;  %v11750_v36 = vld [vmem:[%s18711_s8 + $0x3d8] sm:$0xf]  ;;  %v13079_v3 = vld [vmem:[%s18711_s8 + $0x3e0] sm:$0xf0] }
 0x6c7   : > { %v5069_v23 = vadd.f32 %v15703_v28, %v5014_v0  ;;  %v4841_v44 = vadd.f32 %v16014_v49, %v4772_v37  ;;  %v11335_v49 = vor.u32 %v12973_v19, %v11332_v10  ;;  %v4705_v33 = vadd.f32 %v4704_v59, %v15553_v8  ;;  %v12961_v58 = vld [vmem:[%s18711_s8 + $0x34] sm:$0xf]  ;;  %v11284_v61 = vld [vmem:[%s18711_s8 + $0x3c] sm:$0xf0] }
 0x6c8   : > { %v11419_v37 = vor.u32 %v12994_v14, %v11416_v34 }
 0x6c9   : > { %v5099_v39 = vpack.c.bf16 %v5069_v23, %v5068_v30  ;;  %v4910_v6 = vadd.f32 %v16004_v32, %v4841_v44  ;;  %6705 = vmatpush.bf16.msra.mxu3 %v11335_v49  ;;  %v11320_v32 = vld [vmem:[%s18711_s8 + $0x84] sm:$0xf0]  ;;  %v4962_v50 = vmax.f32 %v4705_v33, 0.0  ;;  %v16127_v59 = vpop.f32.mrf.mxu0  ;;  %v11404_v44 = vld [vmem:[%s18711_s8 + $0x12c] sm:$0xf0] }
 0x6ca   : > { %v11323_v15 = vor.u32 %v12970_v55, %v11320_v32  ;;  %v12929_v52 = vld [vmem:[#allocation5 + $0x84] sm:$0xf]  ;;  %6765 = vmatpush.bf16.msra.mxu0 %v11419_v37  ;;  %v12964_v55 = vld [vmem:[%s18711_s8 + $0x4c] sm:$0xf] }
 0x6cb   : > { %5123 = vst [vmem:[#allocation5 + $0x88] sm:$0xff] %v5099_v39  ;;  %v4961_v24 = vmax.f32 %v4910_v6, 0.0  ;;  %v5017_v19 = vmul.f32 %v15675_v18, %v4962_v50  ;;  %v11407_v6 = vor.u32 %v12991_v42, %v11404_v44  ;;  %v12988_v32 = vld [vmem:[%s18711_s8 + $0x10c] sm:$0xf]  ;;  %v12985_v42 = vld [vmem:[%s18711_s8 + $0xf4] sm:$0xf] }
 0x6cc   : > { %v4773_v29 = vpop.f32.mrf.mxu2 }
 0x6cd   : > { %v5016_v8 = vmul.f32 %v15695_v56, %v4961_v24  ;;  %v4774_v11 = vadd.f32 %v4773_v29, %v15647_v51  ;;  %6706 = vmatpush.bf16.msra.mxu3 %v11323_v15  ;;  %v11751_v29 = vor.u32 %v13079_v3, %v11750_v36  ;;  %v16172_v15 = vpop.f32.mrf.mxu3  ;;  %v5072_v37 = vadd.f32 %v15700_v2, %v5017_v19  ;;  %v12982_v36 = vld [vmem:[%s18711_s8 + $0xdc] sm:$0xf] }
 0x6ce   : > { %v4707_v0 = vpop.f32.mrf.mxu1  ;;  %6766 = vmatpush.bf16.msra.mxu0 %v11407_v6 }
 0x6cf   : > { %v5071_v43 = vadd.f32 %v15703_v28, %v5016_v8  ;;  %v4843_v25 = vadd.f32 %v16040_v57, %v4774_v11  ;;  %v11154_v57 = vld [vmem:[#allocation5 + $0x80] sm:$0xf]  ;;  %v11392_v11 = vld [vmem:[%s18711_s8 + $0x114] sm:$0xf0]  ;;  %6651 = vmatpush.bf16.msrb.mxu2 %v11751_v29 }
 0x6d1   : > { %v5100_v30 = vpack.c.bf16 %v5071_v43, %v5070_v47  ;;  %v4912_v23 = vadd.f32 %v16032_v40, %v4843_v25  ;;  %6388 = vmatmul.bf16.gmra.mxu1 %v16018_v38  ;;  %6447 = vmatmul.bf16.gmra.mxu2 %v16020_v45  ;;  %v4708_v40 = vadd.f32 %v4707_v0, %v15568_v54  ;;  %v11296_v54 = vld [vmem:[%s18711_s8 + $0x54] sm:$0xf0] }
 0x6d2   : > { %v12930_v10 = vld [vmem:[#allocation5 + $0x84] sm:$0xf0]  ;;  %v11156_v39 = vld [vmem:[#allocation5 + $0x88] sm:$0xf0]  ;;  %6707 = vmatpush.bf16.msra.mxu3 %v11311_v53  ;;  %v11299_v50 = vor.u32 %v12964_v55, %v11296_v54  ;;  %v11395_v0 = vor.u32 %v12988_v32, %v11392_v11  ;;  %v16190_v53 = vpop.f32.mrf.mxu0 }
 0x6d3   : > { %5124 = vst [vmem:[#allocation5 + $0x90] sm:$0xff] %v5100_v30  ;;  %v4963_v49 = vmax.f32 %v4912_v23, 0.0  ;;  %v16146_v46 = vor.u32 %v12930_v10, %v11154_v57  ;;  %v16148_v33 = vor.u32 %v12929_v52, %v11156_v39  ;;  %v4964_v43 = vmax.f32 %v4708_v40, 0.0  ;;  %v11654_v39 = vld [vmem:[%s18711_s8 + $0x318] sm:$0xf] }
 0x6d4   : > { %v4776_v24 = vpop.f32.mrf.mxu2  ;;  %v11287_v57 = vor.u32 %v12961_v58, %v11284_v61  ;;  %6767 = vmatpush.bf16.msra.mxu0 %v11395_v0  ;;  %v11272_v40 = vld [vmem:[%s18711_s8 + $0x24] sm:$0xf0]  ;;  %v13076_v0 = vld [vmem:[%s18711_s8 + $0x3c8] sm:$0xf0]  ;;  %v12955_v58 = vld [vmem:[%s18711_s8 + $0x4] sm:$0xf] }
 0x6d5   : > { %18827 = vst [vmem:[#allocation17_spill] sm:$0xff] %v16146_v46  ;;  %v5018_v14 = vmul.f32 %v15695_v56, %v4963_v49  ;;  %v4777_v8 = vadd.f32 %v4776_v24, %v15647_v51  ;;  %6511 = vmatmul.bf16.gmra.mxu3 %v16146_v46  ;;  %6570 = vmatmul.bf16.gmra.mxu0 %v16148_v33  ;;  %v11368_v55 = vld [vmem:[%s18711_s8 + $0xe4] sm:$0xf0] }
 0x6d6   : > { %18828 = vst [vmem:[#allocation18_spill] sm:$0xff] %v16148_v33  ;;  %v4709_v34 = vpop.f32.mrf.mxu1  ;;  %6708 = vmatpush.bf16.msra.mxu3 %v11299_v50  ;;  %v5019_v10 = vmul.f32 %v15675_v18, %v4964_v43  ;;  %v11738_v50 = vld [vmem:[%s18711_s8 + $0x3c0] sm:$0xf] }
 0x6d7   : > { %v5073_v47 = vadd.f32 %v15703_v28, %v5018_v14  ;;  %v4846_v25 = vadd.f32 %v16064_v27, %v4777_v8  ;;  %v11380_v27 = vld [vmem:[%s18711_s8 + $0xfc] sm:$0xf0]  ;;  %v4710_v44 = vadd.f32 %v4709_v34, %v15575_v35  ;;  %v12958_v35 = vld [vmem:[%s18711_s8 + $0x1c] sm:$0xf]  ;;  %v11371_v14 = vor.u32 %v12982_v36, %v11368_v55 }
 0x6d8   : > { %v11383_v19 = vor.u32 %v12985_v42, %v11380_v27  ;;  %v11275_v29 = vor.u32 %v12958_v35, %v11272_v40  ;;  %v5074_v8 = vadd.f32 %v15700_v2, %v5019_v10  ;;  %v12979_v27 = vld [vmem:[%s18711_s8 + $0xc4] sm:$0xf] }
 0x6d9   : > { %v5101_v30 = vpack.c.bf16 %v5073_v47, %v5072_v37  ;;  %v4915_v23 = vadd.f32 %v16044_v17, %v4846_v25  ;;  %v13055_v17 = vld [vmem:[%s18711_s8 + $0x320] sm:$0xf0]  ;;  %v4966_v54 = vmax.f32 %v4710_v44, 0.0  ;;  %v4852_v37 = vpop.f32.mrf.mxu3  ;;  %v11739_v25 = vor.u32 %v13076_v0, %v11738_v50 }
 0x6da   : > { %v11655_v49 = vor.u32 %v13055_v17, %v11654_v39  ;;  %6709 = vmatpush.bf16.msra.mxu3 %v11287_v57  ;;  %6768 = vmatpush.bf16.msra.mxu0 %v11383_v19  ;;  %v11162_v47 = vld [vmem:[#allocation5 + $0x90] sm:$0xf]  ;;  %v12931_v43 = vld [vmem:[#allocation5 + $0x94] sm:$0xf] }
 0x6db   : > { %5125 = vst [vmem:[#allocation5 + $0x98] sm:$0xff] %v5101_v30  ;;  %v4965_v52 = vmax.f32 %v4915_v23, 0.0  ;;  %v11642_v30 = vld [vmem:[%s18711_s8 + $0x300] sm:$0xf]  ;;  %v13052_v23 = vld [vmem:[%s18711_s8 + $0x308] sm:$0xf0]  ;;  %v5021_v44 = vmul.f32 %v15675_v18, %v4966_v54  ;;  %6652 = vmatpush.bf16.msrb.mxu2 %v11739_v25 }
 0x6dc   : > { %v4778_v6 = vpop.f32.mrf.mxu2  ;;  %6592 = vmatpush.bf16.msrb.mxu1 %v11655_v49  ;;  %v11356_v39 = vld [vmem:[%s18711_s8 + $0xcc] sm:$0xf0]  ;;  %v16265_v25 = vld [vmem:[%s18712_s9] ss:$4 sm:$0x7] }
 0x6dd   : > { %v5020_v3 = vmul.f32 %v15695_v56, %v4965_v52  ;;  %v4779_v24 = vadd.f32 %v4778_v6, %v15647_v51  ;;  %v11643_v52 = vor.u32 %v13052_v23, %v11642_v30  ;;  %v11359_v36 = vor.u32 %v12979_v27, %v11356_v39 }
 0x6de   : > { %v4712_v32 = vpop.f32.mrf.mxu1  ;;  %6710 = vmatpush.bf16.msra.mxu3 %v11275_v29  ;;  %6769 = vmatpush.bf16.msra.mxu0 %v11371_v14  ;;  %v16272_v30 = vperm.slane %v16265_v25, 0 }
 0x6df   : > { %v5075_v11 = vadd.f32 %v15703_v28, %v5020_v3  ;;  %v4848_v34 = vadd.f32 %v16122_v26, %v4779_v24  ;;  %v11260_v26 = vld [vmem:[%s18711_s8 + $0xc] sm:$0xf0]  ;;  %v4713_v6 = vadd.f32 %v4712_v32, %v15593_v4  ;;  %v5076_v4 = vadd.f32 %v15700_v2, %v5021_v44 }
 0x6e0   : > { %v11263_v57 = vor.u32 %v12955_v58, %v11260_v26  ;;  %6593 = vmatpush.bf16.msrb.mxu1 %v11643_v52 }
 0x6e1   : > { %v5102_v61 = vpack.c.bf16 %v5075_v11, %v5074_v8  ;;  %v4917_v42 = vadd.f32 %v16091_v1, %v4848_v34  ;;  %6393 = vmatmul.bf16.gmra.mxu1 %v16054_v31  ;;  %6452 = vmatmul.bf16.gmra.mxu2 %v16056_v5  ;;  %v4968_v54 = vmax.f32 %v4713_v6, 0.0 }
 0x6e2   : > { %v16242_v1 = vpop.f32.mrf.mxu0  ;;  %v12932_v19 = vld [vmem:[#allocation5 + $0x94] sm:$0xf0]  ;;  %v11164_v10 = vld [vmem:[#allocation5 + $0x98] sm:$0xf0]  ;;  %6711 = vmatpush.bf16.msra.mxu3 %v11263_v57  ;;  %6770 = vmatpush.bf16.msra.mxu0 %v11359_v36 }
 0x6e3   : > { %5126 = vst [vmem:[#allocation5 + $0xa0] sm:$0xff] %v5102_v61  ;;  %v4967_v17 = vmax.f32 %v4917_v42, 0.0  ;;  %v16248_v49 = vor.u32 %v12932_v19, %v11162_v47  ;;  %v16250_v35 = vor.u32 %v12931_v43, %v11164_v10  ;;  %v5023_v0 = vmul.f32 %v15675_v18, %v4968_v54 }
 0x6e4   : > { %v4781_v40 = vpop.f32.mrf.mxu2 }
 0x6e5   : > { %18829 = vst [vmem:[#allocation19_spill] sm:$0xff] %v16248_v49  ;;  %v5022_v3 = vmul.f32 %v15695_v56, %v4967_v17  ;;  %v4782_v24 = vadd.f32 %v4781_v40, %v15647_v51  ;;  %6516 = vmatmul.bf16.gmra.mxu3 %v16248_v49  ;;  %6575 = vmatmul.bf16.gmra.mxu0 %v16250_v35 }
 0x6e6   : > { %18830 = vst [vmem:[#allocation20_spill] sm:$0xff] %v16250_v35  ;;  %v4714_v29 = vpop.f32.mrf.mxu1 }
 0x6e7   : > { %v5077_v55 = vadd.f32 %v15703_v28, %v5022_v3  ;;  %v4851_v32 = vadd.f32 %v16172_v15, %v4782_v24  ;;  %v4715_v34 = vadd.f32 %v4714_v29, %v15628_v16 }
 0x6e8   : > { %v6477_v14 = vpop.f32.mrf.mxu3 }
 0x6e9   : > { %v5103_v8 = vpack.c.bf16 %v5077_v55, %v5076_v4  ;;  %v4920_v11 = vadd.f32 %v16127_v59, %v4851_v32  ;;  %v4970_v26 = vmax.f32 %v4715_v34, 0.0  ;;  %v5078_v59 = vadd.f32 %v15700_v2, %v5023_v0 }
 0x6ea   : > { %v6538_v50 = vpop.f32.mrf.mxu0  ;;  %v11170_v44 = vld [vmem:[#allocation5 + $0xa0] sm:$0xf]  ;;  %v12933_v39 = vld [vmem:[#allocation5 + $0xa4] sm:$0xf] }
 0x6eb   : > { %5127 = vst [vmem:[#allocation5 + $0xa8] sm:$0xff] %v5103_v8  ;;  %v4969_v47 = vmax.f32 %v4920_v11, 0.0  ;;  %v5025_v19 = vmul.f32 %v15675_v18, %v4970_v26  ;;  %v13024_v8 = vld [vmem:[%s18711_s8 + $0x22c] sm:$0xf]  ;;  %v11536_v11 = vld [vmem:[%s18711_s8 + $0x234] sm:$0xf0] }
 0x6ec   : > { %v4783_v43 = vpop.f32.mrf.mxu2  ;;  %v11539_v34 = vor.u32 %v13024_v8, %v11536_v11 }
 0x6ed   : > { %v5024_v58 = vmul.f32 %v15695_v56, %v4969_v47  ;;  %v4784_v15 = vadd.f32 %v4783_v43, %v15647_v51  ;;  %v13048_v51 = vld [vmem:[%s18711_s8 + $0x2ec] sm:$0xf]  ;;  %v5080_v55 = vadd.f32 %v15700_v2, %v5025_v19  ;;  %v11524_v19 = vld [vmem:[%s18711_s8 + $0x21c] sm:$0xf0] }
 0x6ee   : > { %v6359_v61 = vpop.f32.mrf.mxu1  ;;  %6822 = vmatpush.bf16.msra.mxu1 %v11539_v34 }
 0x6ef   : > { %v5079_v16 = vadd.f32 %v15703_v28, %v5024_v58  ;;  %v4853_v42 = vadd.f32 %v4852_v37, %v4784_v15  ;;  %v11632_v37 = vld [vmem:[%s18711_s8 + $0x2f4] sm:$0xf0]  ;;  %v6360_v40 = vadd.f32 %v6359_v61, %v16272_v30 }
 0x6f0   : > { %v6479_v23 = vpop.f32.mrf.mxu3 }
 0x6f1   : > { %v5104_v57 = vpack.c.bf16 %v5079_v16, %v5078_v59  ;;  %v4922_v27 = vadd.f32 %v16190_v53, %v4853_v42  ;;  %6398 = vmatmul.bf16.gmra.mxu1 %v16146_v46  ;;  %6457 = vmatmul.bf16.gmra.mxu2 %v16148_v33  ;;  %v11635_v53 = vor.u32 %v13048_v51, %v11632_v37  ;;  %v13021_v37 = vld [vmem:[%s18711_s8 + $0x214] sm:$0xf] }
 0x6f2   : > { %v6541_v10 = vpop.f32.mrf.mxu0  ;;  %v12934_v52 = vld [vmem:[#allocation5 + $0xa4] sm:$0xf0]  ;;  %v11172_v17 = vld [vmem:[#allocation5 + $0xa8] sm:$0xf0] }
 0x6f3   : > { %5128 = vst [vmem:[#allocation5 + $0xb0] sm:$0xff] %v5104_v57  ;;  %v4971_v6 = vmax.f32 %v4922_v27, 0.0  ;;  %v16285_v36 = vor.u32 %v12934_v52, %v11170_v44  ;;  %v16287_v3 = vor.u32 %v12933_v39, %v11172_v17  ;;  %6881 = vmatpush.bf16.msra.mxu2 %v11635_v53  ;;  %v11527_v52 = vor.u32 %v13021_v37, %v11524_v19  ;;  %v12937_v37 = vld [vmem:[#allocation5 + $0x34] sm:$0xf] }
 0x6f4   : > { %v6418_v24 = vpop.f32.mrf.mxu2 }
 0x6f5   : > { %18831 = vst [vmem:[#allocation21_spill] sm:$0xff] %v16285_v36  ;;  %v5026_v29 = vmul.f32 %v15695_v56, %v4971_v6  ;;  %v6419_v4 = vadd.f32 %v6418_v24, %v6360_v40  ;;  %6521 = vmatmul.bf16.gmra.mxu3 %v16285_v36  ;;  %6580 = vmatmul.bf16.gmra.mxu0 %v16287_v3  ;;  %v12936_v40 = vld [vmem:[#allocation5 + $0x24] sm:$0xf0]  ;;  %v11180_v24 = vld [vmem:[#allocation5 + $0x28] sm:$0xf0] }
 0x6f6   : > { %18832 = vst [vmem:[#allocation22_spill] sm:$0xff] %v16287_v3  ;;  %v6361_v18 = vpop.f32.mrf.mxu1  ;;  %6823 = vmatpush.bf16.msra.mxu1 %v11527_v52  ;;  %v12945_v3 = vld [vmem:[#allocation5 + $0x74] sm:$0xf] }
 0x6f7   : > { %v5081_v54 = vadd.f32 %v15703_v28, %v5026_v29  ;;  %v6478_v32 = vadd.f32 %v6477_v14, %v6419_v4  ;;  %v6362_v2 = vadd.f32 %v6361_v18, %v16272_v30  ;;  %v11178_v18 = vld [vmem:[#allocation5 + $0x20] sm:$0xf] }
 0x6f8   : > { %v6482_v56 = vpop.f32.mrf.mxu3 }
 0x6f9   : > { %v5105_v0 = vpack.c.bf16 %v5081_v54, %v5080_v55  ;;  %v16301_v47 = vadd.f32 %v16242_v1, %v6478_v32  ;;  %v12935_v55 = vld [vmem:[#allocation5 + $0x24] sm:$0xf]  ;;  %v16326_v32 = vor.u32 %v12936_v40, %v11178_v18 }
 0x6fa   : > { %v6543_v43 = vpop.f32.mrf.mxu0  ;;  %v16328_v8 = vor.u32 %v12935_v55, %v11180_v24 }
 0x6fb   : > { %5129 = vst [vmem:[#allocation5 + $0xb8] sm:$0xff] %v5105_v0 }
 0x6fc   : > { %v6420_v28 = vpop.f32.mrf.mxu2  ;;  %18833 = vst [vmem:[#allocation23_spill] sm:$0xff] %v16326_v32 }
 0x6fd   : > { %v6421_v14 = vadd.f32 %v6420_v28, %v6362_v2  ;;  %18834 = vst [vmem:[#allocation24_spill] sm:$0xff] %v16328_v8 }
 0x6fe   : > { %v6364_v58 = vpop.f32.mrf.mxu1 }
 0x6ff   : > { %v6480_v15 = vadd.f32 %v6479_v23, %v6421_v14  ;;  %v6365_v1 = vadd.f32 %v6364_v58, %v16272_v30  ;;  %v13045_v23 = vld [vmem:[%s18711_s8 + $0x2d4] sm:$0xf] }
 0x700   : > { %v6484_v26 = vpop.f32.mrf.mxu3 }
 0x701   : > { %6403 = vmatmul.bf16.gmra.mxu1 %v16248_v49  ;;  %6462 = vmatmul.bf16.gmra.mxu2 %v16250_v35  ;;  %v16306_v61 = vadd.f32 %v6538_v50, %v6480_v15  ;;  %v11620_v50 = vld [vmem:[%s18711_s8 + $0x2dc] sm:$0xf0]  ;;  %v13042_v15 = vld [vmem:[%s18711_s8 + $0x2bc] sm:$0xf] }
 0x702   : > { %v6546_v59 = vpop.f32.mrf.mxu0  ;;  %v11623_v51 = vor.u32 %v13045_v23, %v11620_v50  ;;  %v11188_v23 = vld [vmem:[#allocation5 + $0x38] sm:$0xf0] }
 0x704   : > { %v6423_v16 = vpop.f32.mrf.mxu2  ;;  %6882 = vmatpush.bf16.msra.mxu2 %v11623_v51  ;;  %v11186_v51 = vld [vmem:[#allocation5 + $0x30] sm:$0xf] }
 0x705   : > { %v6424_v42 = vadd.f32 %v6423_v16, %v6365_v1  ;;  %6712 = vmatmul.bf16.vlgmr.msra.gmra.mxu3 %v15838_v7  ;;  %6771 = vmatmul.bf16.vlgmr.msra.gmra.mxu0 %v15843_v13 }
 0x706   : > { %v6366_v57 = vpop.f32.mrf.mxu1 }
 0x707   : > { %v6483_v27 = vadd.f32 %v6482_v56, %v6424_v42  ;;  %v6367_v53 = vadd.f32 %v6366_v57, %v16272_v30 }
 0x708   : > { %v6487_v44 = vpop.f32.mrf.mxu3 }
 0x709   : > { %v16323_v39 = vadd.f32 %v6541_v10, %v6483_v27  ;;  %v12938_v27 = vld [vmem:[#allocation5 + $0x34] sm:$0xf0] }
 0x70a   : > { %v6548_v17 = vpop.f32.mrf.mxu0  ;;  %v16346_v52 = vor.u32 %v12938_v27, %v11186_v51  ;;  %v12939_v27 = vld [vmem:[#allocation5 + $0x44] sm:$0xf] }
 0x70c   : > { %v6425_v6 = vpop.f32.mrf.mxu2  ;;  %18835 = vst [vmem:[#allocation25_spill] sm:$0xff] %v16346_v52 }
 0x70d   : > { %v6426_v29 = vadd.f32 %v6425_v6, %v6367_v53  ;;  %v16348_v53 = vor.u32 %v12937_v37, %v11188_v23  ;;  %v11512_v6 = vld [vmem:[%s18711_s8 + $0x204] sm:$0xf0] }
 0x70e   : > { %v6369_v4 = vpop.f32.mrf.mxu1 }
 0x70f   : > { %v6485_v54 = vadd.f32 %v6484_v26, %v6426_v29  ;;  %v6370_v34 = vadd.f32 %v6369_v4, %v16272_v30  ;;  %18836 = vst [vmem:[#allocation26_spill] sm:$0xff] %v16348_v53 }
 0x710   : > { %v6489_v11 = vpop.f32.mrf.mxu3 }
 0x711   : > { %6594 = vmatmul.bf16.vlgmr.msrb.gmra.mxu1 %v16326_v32  ;;  %6653 = vmatmul.bf16.vlgmr.msrb.gmra.mxu2 %v16328_v8  ;;  %v16332_v10 = vadd.f32 %v6543_v43, %v6485_v54  ;;  %v11608_v43 = vld [vmem:[%s18711_s8 + $0x2c4] sm:$0xf0] }
 0x712   : > { %v6551_v56 = vpop.f32.mrf.mxu0  ;;  %v11611_v26 = vor.u32 %v13042_v15, %v11608_v43  ;;  %v12940_v15 = vld [vmem:[#allocation5 + $0x44] sm:$0xf0]  ;;  %v11196_v43 = vld [vmem:[#allocation5 + $0x48] sm:$0xf0] }
 0x714   : > { %v6428_v0 = vpop.f32.mrf.mxu2  ;;  %6883 = vmatpush.bf16.msra.mxu2 %v11611_v26 }
 0x715   : > { %v6429_v2 = vadd.f32 %v6428_v0, %v6370_v34  ;;  %6717 = vmatmul.bf16.gmra.mxu3 %v15810_v12  ;;  %6776 = vmatmul.bf16.gmra.mxu0 %v15812_v20 }
 0x716   : > { %v6371_v28 = vpop.f32.mrf.mxu1 }
 0x717   : > { %v6488_v14 = vadd.f32 %v6487_v44, %v6429_v2  ;;  %v6372_v42 = vadd.f32 %v6371_v28, %v16272_v30 }
 0x718   : > { %v6492_v58 = vpop.f32.mrf.mxu3 }
 0x719   : > { %v16343_v1 = vadd.f32 %v6546_v59, %v6488_v14  ;;  %v13018_v59 = vld [vmem:[%s18711_s8 + $0x1fc] sm:$0xf] }
 0x71a   : > { %v6553_v16 = vpop.f32.mrf.mxu0  ;;  %v11515_v24 = vor.u32 %v13018_v59, %v11512_v6  ;;  %v11500_v59 = vld [vmem:[%s18711_s8 + $0x1ec] sm:$0xf0] }
 0x71c   : > { %v6430_v57 = vpop.f32.mrf.mxu2  ;;  %6824 = vmatpush.bf16.msra.mxu1 %v11515_v24 }
 0x71d   : > { %v6431_v50 = vadd.f32 %v6430_v57, %v6372_v42  ;;  %v11194_v57 = vld [vmem:[#allocation5 + $0x40] sm:$0xf] }
 0x71e   : > { %v6374_v44 = vpop.f32.mrf.mxu1 }
 0x71f   : > { %v6490_v19 = vadd.f32 %v6489_v11, %v6431_v50  ;;  %v6375_v18 = vadd.f32 %v6374_v44, %v16272_v30  ;;  %v16366_v50 = vor.u32 %v12940_v15, %v11194_v57  ;;  %v16368_v44 = vor.u32 %v12939_v27, %v11196_v43  ;;  %v11204_v57 = vld [vmem:[#allocation5 + $0x58] sm:$0xf0] }
 0x720   : > { %v6494_v40 = vpop.f32.mrf.mxu3 }
 0x721   : > { %6599 = vmatmul.bf16.gmra.mxu1 %v16346_v52  ;;  %6658 = vmatmul.bf16.gmra.mxu2 %v16348_v53  ;;  %v16358_v29 = vadd.f32 %v6548_v17, %v6490_v19  ;;  %18837 = vst [vmem:[#allocation27_spill] sm:$0xff] %v16366_v50  ;;  %v13015_v19 = vld [vmem:[%s18711_s8 + $0x1e4] sm:$0xf] }
 0x722   : > { %v6556_v4 = vpop.f32.mrf.mxu0  ;;  %18838 = vst [vmem:[#allocation28_spill] sm:$0xff] %v16368_v44  ;;  %v11503_v24 = vor.u32 %v13015_v19, %v11500_v59 }
 0x724   : > { %v6433_v55 = vpop.f32.mrf.mxu2  ;;  %6825 = vmatpush.bf16.msra.mxu1 %v11503_v24 }
 0x725   : > { %v6434_v54 = vadd.f32 %v6433_v55, %v6375_v18  ;;  %6722 = vmatmul.bf16.gmra.mxu3 %v15850_v48  ;;  %6781 = vmatmul.bf16.gmra.mxu0 %v15852_v22 }
 0x726   : > { %v6376_v11 = vpop.f32.mrf.mxu1 }
 0x727   : > { %v6493_v34 = vadd.f32 %v6492_v58, %v6434_v54  ;;  %v6377_v14 = vadd.f32 %v6376_v11, %v16272_v30  ;;  %v11596_v58 = vld [vmem:[%s18711_s8 + $0x2ac] sm:$0xf0] }
 0x728   : > { %v6497_v0 = vpop.f32.mrf.mxu3 }
 0x729   : > { %v16363_v2 = vadd.f32 %v6551_v56, %v6493_v34  ;;  %v13039_v56 = vld [vmem:[%s18711_s8 + $0x2a4] sm:$0xf] }
 0x72a   : > { %v6558_v28 = vpop.f32.mrf.mxu0  ;;  %v11599_v37 = vor.u32 %v13039_v56, %v11596_v58  ;;  %v12941_v56 = vld [vmem:[#allocation5 + $0x54] sm:$0xf] }
 0x72b   : > { %v16394_v19 = vor.u32 %v12941_v56, %v11204_v57 }
 0x72c   : > { %v6435_v17 = vpop.f32.mrf.mxu2  ;;  %6884 = vmatpush.bf16.msra.mxu2 %v11599_v37 }
 0x72d   : > { %v6436_v26 = vadd.f32 %v6435_v17, %v6377_v14  ;;  %18840 = vst [vmem:[#allocation30_spill] sm:$0xff] %v16394_v19 }
 0x72e   : > { %v6379_v42 = vpop.f32.mrf.mxu1 }
 0x72f   : > { %v6495_v23 = vadd.f32 %v6494_v40, %v6436_v26  ;;  %v6380_v18 = vadd.f32 %v6379_v42, %v16272_v30  ;;  %v12942_v26 = vld [vmem:[#allocation5 + $0x54] sm:$0xf0] }
 0x730   : > { %v6499_v51 = vpop.f32.mrf.mxu3 }
 0x731   : > { %6604 = vmatmul.bf16.gmra.mxu1 %v16366_v50  ;;  %6663 = vmatmul.bf16.gmra.mxu2 %v16368_v44  ;;  %v16384_v6 = vadd.f32 %v6553_v16, %v6495_v23  ;;  %v11202_v23 = vld [vmem:[#allocation5 + $0x50] sm:$0xf] }
 0x732   : > { %v6561_v40 = vpop.f32.mrf.mxu0  ;;  %v16392_v37 = vor.u32 %v12942_v26, %v11202_v23 }
 0x734   : > { %v6438_v55 = vpop.f32.mrf.mxu2  ;;  %18839 = vst [vmem:[#allocation29_spill] sm:$0xff] %v16392_v37 }
 0x735   : > { %v6439_v54 = vadd.f32 %v6438_v55, %v6380_v18  ;;  %6727 = vmatmul.bf16.gmra.mxu3 %v15894_v62  ;;  %6786 = vmatmul.bf16.gmra.mxu0 %v15896_v60 }
 0x736   : > { %v6381_v11 = vpop.f32.mrf.mxu1 }
 0x737   : > { %v6498_v34 = vadd.f32 %v6497_v0, %v6439_v54  ;;  %v6382_v16 = vadd.f32 %v6381_v11, %v16272_v30  ;;  %v11584_v0 = vld [vmem:[%s18711_s8 + $0x294] sm:$0xf0] }
 0x738   : > { %v6502_v14 = vpop.f32.mrf.mxu3 }
 0x739   : > { %v16389_v17 = vadd.f32 %v6556_v4, %v6498_v34  ;;  %v13036_v4 = vld [vmem:[%s18711_s8 + $0x28c] sm:$0xf] }
 0x73a   : > { %v6563_v15 = vpop.f32.mrf.mxu0  ;;  %v11587_v18 = vor.u32 %v13036_v4, %v11584_v0  ;;  %v11212_v4 = vld [vmem:[#allocation5 + $0x68] sm:$0xf0] }
 0x73c   : > { %v6440_v43 = vpop.f32.mrf.mxu2  ;;  %6885 = vmatpush.bf16.msra.mxu2 %v11587_v18  ;;  %v11210_v18 = vld [vmem:[#allocation5 + $0x60] sm:$0xf] }
 0x73d   : > { %v6441_v27 = vadd.f32 %v6440_v43, %v6382_v16  ;;  %v13012_v43 = vld [vmem:[%s18711_s8 + $0x1cc] sm:$0xf] }
 0x73e   : > { %v6384_v42 = vpop.f32.mrf.mxu1 }
 0x73f   : > { %v6500_v58 = vadd.f32 %v6499_v51, %v6441_v27  ;;  %v6385_v55 = vadd.f32 %v6384_v42, %v16272_v30 }
 0x740   : > { %v6504_v59 = vpop.f32.mrf.mxu3 }
 0x741   : > { %6609 = vmatmul.bf16.gmra.mxu1 %v16392_v37  ;;  %6668 = vmatmul.bf16.gmra.mxu2 %v16394_v19  ;;  %v16404_v24 = vadd.f32 %v6558_v28, %v6500_v58  ;;  %v11488_v28 = vld [vmem:[%s18711_s8 + $0x1d4] sm:$0xf0]  ;;  %v12944_v58 = vld [vmem:[#allocation5 + $0x64] sm:$0xf0] }
 0x742   : > { %v6566_v51 = vpop.f32.mrf.mxu0  ;;  %v11491_v57 = vor.u32 %v13012_v43, %v11488_v28 }
 0x744   : > { %v6443_v54 = vpop.f32.mrf.mxu2  ;;  %6826 = vmatpush.bf16.msra.mxu1 %v11491_v57 }
 0x745   : > { %v6444_v11 = vadd.f32 %v6443_v54, %v6385_v55  ;;  %6732 = vmatmul.bf16.gmra.mxu3 %v15938_v63  ;;  %6791 = vmatmul.bf16.gmra.mxu0 %v15940_v21  ;;  %v12943_v55 = vld [vmem:[#allocation5 + $0x64] sm:$0xf] }
 0x746   : > { %v6386_v34 = vpop.f32.mrf.mxu1  ;;  %v16420_v13 = vor.u32 %v12943_v55, %v11212_v4  ;;  %v13009_v4 = vld [vmem:[%s18711_s8 + $0x1b4] sm:$0xf] }
 0x747   : > { %v6503_v16 = vadd.f32 %v6502_v14, %v6444_v11  ;;  %v6387_v23 = vadd.f32 %v6386_v34, %v16272_v30  ;;  %v16418_v11 = vor.u32 %v12944_v58, %v11210_v18 }
 0x748   : > { %v6507_v26 = vpop.f32.mrf.mxu3  ;;  %18842 = vst [vmem:[#allocation32_spill] sm:$0xff] %v16420_v13 }
 0x749   : > { %v16415_v27 = vadd.f32 %v6561_v40, %v6503_v16  ;;  %18841 = vst [vmem:[#allocation31_spill] sm:$0xff] %v16418_v11 }
 0x74a   : > { %v6568_v42 = vpop.f32.mrf.mxu0 }
 0x74c   : > { %v6445_v56 = vpop.f32.mrf.mxu2 }
 0x74d   : > { %v6446_v14 = vadd.f32 %v6445_v56, %v6387_v23  ;;  %v13033_v23 = vld [vmem:[%s18711_s8 + $0x274] sm:$0xf] }
 0x74e   : > { %v6389_v0 = vpop.f32.mrf.mxu1 }
 0x74f   : > { %v6505_v54 = vadd.f32 %v6504_v59, %v6446_v14  ;;  %v6390_v16 = vadd.f32 %v6389_v0, %v16272_v30  ;;  %v11476_v14 = vld [vmem:[%s18711_s8 + $0x1bc] sm:$0xf0] }
 0x750   : > { %v6509_v7 = vpop.f32.mrf.mxu3  ;;  %v11479_v0 = vor.u32 %v13009_v4, %v11476_v14 }
 0x751   : > { %6614 = vmatmul.bf16.gmra.mxu1 %v16418_v11  ;;  %6673 = vmatmul.bf16.gmra.mxu2 %v16420_v13  ;;  %v16424_v40 = vadd.f32 %v6563_v15, %v6505_v54  ;;  %v11572_v15 = vld [vmem:[%s18711_s8 + $0x27c] sm:$0xf0] }
 0x752   : > { %v6571_v34 = vpop.f32.mrf.mxu0  ;;  %v11575_v58 = vor.u32 %v13033_v23, %v11572_v15  ;;  %6827 = vmatpush.bf16.msra.mxu1 %v11479_v0  ;;  %v11218_v15 = vld [vmem:[#allocation5 + $0x70] sm:$0xf]  ;;  %v13072_v0 = vld [vmem:[%s18711_s8 + $0x3ac] sm:$0xf] }
 0x754   : > { %v6448_v43 = vpop.f32.mrf.mxu2  ;;  %6886 = vmatpush.bf16.msra.mxu2 %v11575_v58 }
 0x755   : > { %v6449_v28 = vadd.f32 %v6448_v43, %v6390_v16  ;;  %6737 = vmatmul.bf16.gmra.mxu3 %v15980_v41  ;;  %6796 = vmatmul.bf16.gmra.mxu0 %v15982_v9  ;;  %v12946_v16 = vld [vmem:[#allocation5 + $0x74] sm:$0xf0]  ;;  %v11220_v43 = vld [vmem:[#allocation5 + $0x78] sm:$0xf0] }
 0x756   : > { %v6391_v59 = vpop.f32.mrf.mxu1  ;;  %v16446_v9 = vor.u32 %v12946_v16, %v11218_v15  ;;  %v16448_v41 = vor.u32 %v12945_v3, %v11220_v43  ;;  %v11824_v16 = vld [vmem:[%s18711_s8 + $0x474] sm:$0xf0] }
 0x757   : > { %v6508_v57 = vadd.f32 %v6507_v26, %v6449_v28  ;;  %v6392_v55 = vadd.f32 %v6391_v59, %v16272_v30 }
 0x758   : > { %v6512_v56 = vpop.f32.mrf.mxu3  ;;  %18843 = vst [vmem:[#allocation33_spill] sm:$0xff] %v16446_v9 }
 0x759   : > { %v16441_v26 = vadd.f32 %v6566_v51, %v6508_v57  ;;  %18844 = vst [vmem:[#allocation34_spill] sm:$0xff] %v16448_v41 }
 0x75a   : > { %v16443_v18 = vpop.f32.mrf.mxu0 }
 0x75c   : > { %v6450_v54 = vpop.f32.mrf.mxu2 }
 0x75d   : > { %v6451_v28 = vadd.f32 %v6450_v54, %v6392_v55 }
 0x75e   : > { %v6394_v23 = vpop.f32.mrf.mxu1 }
 0x75f   : > { %v6510_v36 = vadd.f32 %v6509_v7, %v6451_v28  ;;  %v6395_v58 = vadd.f32 %v6394_v23, %v16272_v30  ;;  %v11560_v28 = vld [vmem:[%s18711_s8 + $0x264] sm:$0xf0] }
 0x760   : > { %v6514_v51 = vpop.f32.mrf.mxu3 }
 0x761   : > { %6619 = vmatmul.bf16.gmra.mxu1 %v16446_v9  ;;  %6678 = vmatmul.bf16.gmra.mxu2 %v16448_v41  ;;  %v16452_v57 = vadd.f32 %v6568_v42, %v6510_v36  ;;  %v11728_v36 = vld [vmem:[%s18711_s8 + $0x3b4] sm:$0xf0]  ;;  %v13096_v42 = vld [vmem:[%s18711_s8 + $0x46c] sm:$0xf] }
 0x762   : > { %v16454_v59 = vpop.f32.mrf.mxu0  ;;  %v11731_v54 = vor.u32 %v13072_v0, %v11728_v36  ;;  %v11827_v43 = vor.u32 %v13096_v42, %v11824_v16  ;;  %v13093_v0 = vld [vmem:[%s18711_s8 + $0x454] sm:$0xf]  ;;  %v11228_v16 = vld [vmem:[#allocation5 + $0x88] sm:$0xf0] }
 0x763   : > { %18845 = vst [vmem:[#allocation35_spill] sm:$0xff] %v16452_v57 }
 0x764   : > { %v6453_v4 = vpop.f32.mrf.mxu2  ;;  %6940 = vmatpush.bf16.msrb.mxu3 %v11731_v54  ;;  %6999 = vmatpush.bf16.msrb.mxu0 %v11827_v43  ;;  %v12948_v54 = vld [vmem:[#allocation5 + $0x84] sm:$0xf0]  ;;  %v13006_v43 = vld [vmem:[%s18711_s8 + $0x19c] sm:$0xf] }
 0x765   : > { %v6454_v14 = vadd.f32 %v6453_v4, %v6395_v58  ;;  %6742 = vmatmul.bf16.gmra.mxu3 %v16018_v38  ;;  %6801 = vmatmul.bf16.gmra.mxu0 %v16020_v45  ;;  %v13069_v4 = vld [vmem:[%s18711_s8 + $0x394] sm:$0xf]  ;;  %v11226_v38 = vld [vmem:[#allocation5 + $0x80] sm:$0xf] }
 0x766   : > { %v6396_v7 = vpop.f32.mrf.mxu1  ;;  %v16494_v41 = vor.u32 %v12948_v54, %v11226_v38  ;;  %v11704_v38 = vld [vmem:[%s18711_s8 + $0x384] sm:$0xf0]  ;;  %v13063_v54 = vld [vmem:[%s18711_s8 + $0x364] sm:$0xf] }
 0x767   : > { %v6513_v3 = vadd.f32 %v6512_v56, %v6454_v14  ;;  %v13030_v56 = vld [vmem:[%s18711_s8 + $0x25c] sm:$0xf]  ;;  %v11716_v14 = vld [vmem:[%s18711_s8 + $0x39c] sm:$0xf0]  ;;  %v6397_v36 = vadd.f32 %v6396_v7, %v16272_v30 }
 0x768   : > { %v6517_v55 = vpop.f32.mrf.mxu3  ;;  %v11563_v58 = vor.u32 %v13030_v56, %v11560_v28  ;;  %18847 = vst [vmem:[#allocation37_spill] sm:$0xff] %v16494_v41 }
 0x769   : > { %v16477_v23 = vadd.f32 %v6571_v34, %v6513_v3  ;;  %v11719_v34 = vor.u32 %v13069_v4, %v11716_v14  ;;  %v11812_v3 = vld [vmem:[%s18711_s8 + $0x45c] sm:$0xf0]  ;;  %v13066_v4 = vld [vmem:[%s18711_s8 + $0x37c] sm:$0xf] }
 0x76a   : > { %v16479_v15 = vpop.f32.mrf.mxu0  ;;  %6887 = vmatpush.bf16.msra.mxu2 %v11563_v58  ;;  %v11815_v56 = vor.u32 %v13093_v0, %v11812_v3  ;;  %v11464_v58 = vld [vmem:[%s18711_s8 + $0x1a4] sm:$0xf0] }
 0x76b   : > { %18846 = vst [vmem:[#allocation36_spill] sm:$0xff] %v16477_v23  ;;  %v12947_v23 = vld [vmem:[#allocation5 + $0x84] sm:$0xf]  ;;  %6941 = vmatpush.bf16.msrb.mxu3 %v11719_v34  ;;  %v11467_v0 = vor.u32 %v13006_v43, %v11464_v58 }
 0x76c   : > { %v6455_v42 = vpop.f32.mrf.mxu2  ;;  %v16496_v7 = vor.u32 %v12947_v23, %v11228_v16  ;;  %7000 = vmatpush.bf16.msrb.mxu0 %v11815_v56  ;;  %v11800_v23 = vld [vmem:[%s18711_s8 + $0x444] sm:$0xf0]  ;;  %v11692_v16 = vld [vmem:[%s18711_s8 + $0x36c] sm:$0xf0]  ;;  %v13087_v56 = vld [vmem:[%s18711_s8 + $0x424] sm:$0xf] }
 0x76d   : > { %v6456_v28 = vadd.f32 %v6455_v42, %v6397_v36  ;;  %v11707_v36 = vor.u32 %v13066_v4, %v11704_v38  ;;  %6828 = vmatpush.bf16.msra.mxu1 %v11467_v0 }
 0x76e   : > { %v6399_v45 = vpop.f32.mrf.mxu1  ;;  %18848 = vst [vmem:[#allocation38_spill] sm:$0xff] %v16496_v7 }
 0x76f   : > { %v6515_v57 = vadd.f32 %v6514_v51, %v6456_v28  ;;  %v13090_v51 = vld [vmem:[%s18711_s8 + $0x43c] sm:$0xf]  ;;  %v6400_v28 = vadd.f32 %v6399_v45, %v16272_v30  ;;  %6942 = vmatpush.bf16.msrb.mxu3 %v11707_v36  ;;  %v13060_v45 = vld [vmem:[%s18711_s8 + $0x34c] sm:$0xf] }
 0x770   : > { %v6519_v14 = vpop.f32.mrf.mxu3  ;;  %v11803_v34 = vor.u32 %v13090_v51, %v11800_v23  ;;  %v11680_v23 = vld [vmem:[%s18711_s8 + $0x354] sm:$0xf0]  ;;  %v13084_v36 = vld [vmem:[%s18711_s8 + $0x40c] sm:$0xf] }
 0x771   : > { %6624 = vmatmul.bf16.gmra.mxu1 %v16494_v41  ;;  %6683 = vmatmul.bf16.gmra.mxu2 %v16496_v7  ;;  %v16519_v3 = vadd.f32 %v16443_v18, %v6515_v57  ;;  %v11695_v18 = vor.u32 %v13063_v54, %v11692_v16  ;;  %v11788_v57 = vld [vmem:[%s18711_s8 + $0x42c] sm:$0xf0] }
 0x772   : > { %v16521_v42 = vpop.f32.mrf.mxu0  ;;  %7001 = vmatpush.bf16.msrb.mxu0 %v11803_v34  ;;  %v11791_v58 = vor.u32 %v13087_v56, %v11788_v57  ;;  %v11683_v34 = vor.u32 %v13060_v45, %v11680_v23  ;;  %v11668_v57 = vld [vmem:[%s18711_s8 + $0x33c] sm:$0xf0] }
 0x773   : > { %6943 = vmatpush.bf16.msrb.mxu3 %v11695_v18  ;;  %v13057_v18 = vld [vmem:[%s18711_s8 + $0x334] sm:$0xf] }
 0x774   : > { %v6458_v43 = vpop.f32.mrf.mxu2 }
 0x775   : > { %v6459_v4 = vadd.f32 %v6458_v43, %v6400_v28  ;;  %6747 = vmatmul.bf16.gmra.mxu3 %v16054_v31  ;;  %6806 = vmatmul.bf16.gmra.mxu0 %v16056_v5  ;;  %v13081_v43 = vld [vmem:[%s18711_s8 + $0x3f4] sm:$0xf] }
 0x776   : > { %v6401_v0 = vpop.f32.mrf.mxu1  ;;  %7002 = vmatpush.bf16.msrb.mxu0 %v11791_v58  ;;  %v12950_v58 = vld [vmem:[#allocation5 + $0x94] sm:$0xf0] }
 0x777   : > { %v6518_v38 = vadd.f32 %v6517_v55, %v6459_v4  ;;  %v11776_v55 = vld [vmem:[%s18711_s8 + $0x414] sm:$0xf0]  ;;  %v6402_v28 = vadd.f32 %v6401_v0, %v16272_v30  ;;  %6944 = vmatpush.bf16.msrb.mxu3 %v11683_v34  ;;  %v11236_v4 = vld [vmem:[#allocation5 + $0x98] sm:$0xf0]  ;;  %v11764_v0 = vld [vmem:[%s18711_s8 + $0x3fc] sm:$0xf0] }
 0x778   : > { %v6522_v51 = vpop.f32.mrf.mxu3  ;;  %v11779_v56 = vor.u32 %v13084_v36, %v11776_v55  ;;  %v11767_v23 = vor.u32 %v13081_v43, %v11764_v0  ;;  %v11234_v34 = vld [vmem:[#allocation5 + $0x90] sm:$0xf]  ;;  %v12949_v55 = vld [vmem:[#allocation5 + $0x94] sm:$0xf]  ;;  %v11752_v43 = vld [vmem:[%s18711_s8 + $0x3e4] sm:$0xf0] }
 0x779   : > { %v16551_v54 = vadd.f32 %v16454_v59, %v6518_v38  ;;  %v11671_v38 = vor.u32 %v13057_v18, %v11668_v57  ;;  %v16568_v31 = vor.u32 %v12950_v58, %v11234_v34  ;;  %v11656_v18 = vld [vmem:[%s18711_s8 + $0x324] sm:$0xf0]  ;;  %v13027_v0 = vld [vmem:[%s18711_s8 + $0x244] sm:$0xf] }
 0x77a   : > { %v16553_v16 = vpop.f32.mrf.mxu0  ;;  %7003 = vmatpush.bf16.msrb.mxu0 %v11779_v56  ;;  %v13054_v56 = vld [vmem:[%s18711_s8 + $0x31c] sm:$0xf] }
 0x77b   : > { %18849 = vst [vmem:[#allocation39_spill] sm:$0xff] %v16551_v54  ;;  %v16570_v54 = vor.u32 %v12949_v55, %v11236_v4  ;;  %6945 = vmatpush.bf16.msrb.mxu3 %v11671_v38 }
 0x77c   : > { %v6460_v59 = vpop.f32.mrf.mxu2  ;;  %18850 = vst [vmem:[#allocation40_spill] sm:$0xff] %v16568_v31 }
 0x77d   : > { %v6461_v45 = vadd.f32 %v6460_v59, %v6402_v28  ;;  %18851 = vst [vmem:[#allocation41_spill] sm:$0xff] %v16570_v54  ;;  %v13078_v28 = vld [vmem:[%s18711_s8 + $0x3dc] sm:$0xf] }
 0x77e   : > { %v6404_v36 = vpop.f32.mrf.mxu1  ;;  %7004 = vmatpush.bf16.msrb.mxu0 %v11767_v23  ;;  %v11755_v59 = vor.u32 %v13078_v28, %v11752_v43  ;;  %v13003_v23 = vld [vmem:[%s18711_s8 + $0x184] sm:$0xf] }
 0x77f   : > { %v6520_v5 = vadd.f32 %v6519_v14, %v6461_v45  ;;  %v11659_v14 = vor.u32 %v13054_v56, %v11656_v18  ;;  %v6405_v38 = vadd.f32 %v6404_v36, %v16272_v30  ;;  %v11548_v45 = vld [vmem:[%s18711_s8 + $0x24c] sm:$0xf0]  ;;  %v16611_v18 = vperm.slane %v16265_v25, 1  ;;  %v13075_v43 = vld [vmem:[%s18711_s8 + $0x3c4] sm:$0xf] }
 0x780   : > { %v6524_v57 = vpop.f32.mrf.mxu3  ;;  %v11551_v55 = vor.u32 %v13027_v0, %v11548_v45  ;;  %v11644_v36 = vld [vmem:[%s18711_s8 + $0x30c] sm:$0xf0] }
 0x781   : > { %6629 = vmatmul.bf16.gmra.mxu1 %v16568_v31  ;;  %6688 = vmatmul.bf16.gmra.mxu2 %v16570_v54  ;;  %v16587_v58 = vadd.f32 %v16479_v15, %v6520_v5  ;;  %v11452_v5 = vld [vmem:[%s18711_s8 + $0x18c] sm:$0xf0]  ;;  %v13051_v15 = vld [vmem:[%s18711_s8 + $0x304] sm:$0xf] }
 0x782   : > { %v6772_v4 = vpop.f32.mrf.mxu0  ;;  %6946 = vmatpush.bf16.msrb.mxu3 %v11659_v14  ;;  %7005 = vmatpush.bf16.msrb.mxu0 %v11755_v59  ;;  %v11455_v28 = vor.u32 %v13003_v23, %v11452_v5  ;;  %v11647_v14 = vor.u32 %v13051_v15, %v11644_v36  ;;  %v11740_v59 = vld [vmem:[%s18711_s8 + $0x3cc] sm:$0xf0] }
 0x783   : > { %18852 = vst [vmem:[#allocation42_spill] sm:$0xff] %v16587_v58  ;;  %6888 = vmatpush.bf16.msra.mxu2 %v11551_v55  ;;  %v11244_v58 = vld [vmem:[#allocation5 + $0xa8] sm:$0xf0] }
 0x784   : > { %v6463_v34 = vpop.f32.mrf.mxu2  ;;  %6829 = vmatpush.bf16.msra.mxu1 %v11455_v28 }
 0x785   : > { %v6464_v56 = vadd.f32 %v6463_v34, %v6405_v38  ;;  %6752 = vmatmul.bf16.gmra.mxu3 %v16146_v46  ;;  %6811 = vmatmul.bf16.gmra.mxu0 %v16148_v33  ;;  %v11743_v38 = vor.u32 %v13075_v43, %v11740_v59  ;;  %v12952_v46 = vld [vmem:[#allocation5 + $0xa4] sm:$0xf0] }
 0x786   : > { %v6406_v0 = vpop.f32.mrf.mxu1  ;;  %6947 = vmatpush.bf16.msrb.mxu3 %v11647_v14 }
 0x787   : > { %v6523_v45 = vadd.f32 %v6522_v51, %v6464_v56  ;;  %7006 = vmatpush.bf16.msrb.mxu0 %v11743_v38  ;;  %v6407_v15 = vadd.f32 %v6406_v0, %v16272_v30  ;;  %v11242_v51 = vld [vmem:[#allocation5 + $0xa0] sm:$0xf]  ;;  %v12951_v56 = vld [vmem:[#allocation5 + $0xa4] sm:$0xf] }
 0x788   : > { %v6713_v34 = vpop.f32.mrf.mxu3  ;;  %v16627_v59 = vor.u32 %v12952_v46, %v11242_v51  ;;  %v16629_v38 = vor.u32 %v12951_v56, %v11244_v58  ;;  %v13002_v46 = vld [vmem:[%s18711_s8 + $0x178] sm:$0xf0] }
 0x789   : > { %v6714_v25 = vadd.f32 %v6713_v34, %v16611_v18  ;;  %v16621_v23 = vadd.f32 %v16521_v42, %v6523_v45 }
 0x78a   : > { %v6774_v5 = vpop.f32.mrf.mxu0  ;;  %18853 = vst [vmem:[#allocation43_spill] sm:$0xff] %v16627_v59 }
 0x78b   : > { %v16624_v36 = vadd.f32 %v6772_v4, %v6714_v25  ;;  %18854 = vst [vmem:[#allocation44_spill] sm:$0xff] %v16629_v38 }
 0x78c   : > { %v6465_v33 = vpop.f32.mrf.mxu2 }
 0x78d   : > { %v6466_v55 = vadd.f32 %v6465_v33, %v6407_v15 }
 0x78e   : > { %v6595_v43 = vpop.f32.mrf.mxu1 }
 0x78f   : > { %v6525_v28 = vadd.f32 %v6524_v57, %v6466_v55  ;;  %v6596_v14 = vadd.f32 %v6595_v43, %v16301_v47  ;;  %v11446_v57 = vld [vmem:[%s18711_s8 + $0x170] sm:$0xf]  ;;  %v12978_v43 = vld [vmem:[%s18711_s8 + $0xb8] sm:$0xf0] }
 0x790   : > { %v6715_v42 = vpop.f32.mrf.mxu3  ;;  %v11447_v4 = vor.u32 %v13002_v46, %v11446_v57  ;;  %v11250_v57 = vld [vmem:[#allocation5 + $0xb0] sm:$0xf]  ;;  %v12953_v46 = vld [vmem:[#allocation5 + $0xb4] sm:$0xf] }
 0x791   : > { %v6716_v45 = vadd.f32 %v6715_v42, %v16611_v18  ;;  %6634 = vmatmul.bf16.gmra.mxu1 %v16627_v59  ;;  %6693 = vmatmul.bf16.gmra.mxu2 %v16629_v38  ;;  %v16635_v30 = vadd.f32 %v16553_v16, %v6525_v28  ;;  %v12954_v28 = vld [vmem:[#allocation5 + $0xb4] sm:$0xf0] }
 0x792   : > { %v6777_v33 = vpop.f32.mrf.mxu0  ;;  %7117 = vmatpush.bf16.msrb.mxu2 %v11447_v4  ;;  %v16662_v4 = vor.u32 %v12954_v28, %v11250_v57  ;;  %v11338_v57 = vld [vmem:[%s18711_s8 + $0x98] sm:$0xf] }
 0x793   : > { %v16643_v47 = vadd.f32 %v6774_v5, %v6716_v45  ;;  %v11350_v5 = vld [vmem:[%s18711_s8 + $0xb0] sm:$0xf] }
 0x794   : > { %v6654_v58 = vpop.f32.mrf.mxu2  ;;  %v11351_v42 = vor.u32 %v12978_v43, %v11350_v5  ;;  %18855 = vst [vmem:[#allocation45_spill] sm:$0xff] %v16662_v4 }
 0x795   : > { %v16645_v0 = vadd.f32 %v6654_v58, %v6596_v14  ;;  %6757 = vmatmul.bf16.gmra.mxu3 %v16248_v49  ;;  %6816 = vmatmul.bf16.gmra.mxu0 %v16250_v35  ;;  %v11252_v14 = vld [vmem:[#allocation5 + $0xb8] sm:$0xf0] }
 0x796   : > { %v6597_v16 = vpop.f32.mrf.mxu1  ;;  %7058 = vmatpush.bf16.msrb.mxu1 %v11351_v42 }
 0x797   : > { %v6598_v34 = vadd.f32 %v6597_v16, %v16306_v61  ;;  %v16664_v16 = vor.u32 %v12953_v46, %v11252_v14 }
 0x798   : > { %v6718_v25 = vpop.f32.mrf.mxu3 }
 0x799   : > { %v6719_v15 = vadd.f32 %v6718_v25, %v16611_v18  ;;  %18856 = vst [vmem:[#allocation46_spill] sm:$0xff] %v16664_v16 }
 0x79a   : > { %v6779_v55 = vpop.f32.mrf.mxu0 }
 0x79b   : > { %v16657_v51 = vadd.f32 %v6777_v33, %v6719_v15 }
 0x79c   : > { %v6656_v56 = vpop.f32.mrf.mxu2 }
 0x79d   : > { %v16659_v45 = vadd.f32 %v6656_v56, %v6598_v34 }
 0x79e   : > { %v6600_v61 = vpop.f32.mrf.mxu1 }
 0x79f   : > { %v6601_v58 = vadd.f32 %v6600_v61, %v16323_v39  ;;  %v11434_v61 = vld [vmem:[%s18711_s8 + $0x158] sm:$0xf] }
 0x7a0   : > { %v6720_v25 = vpop.f32.mrf.mxu3 }
 0x7a1   : > { %v6721_v33 = vadd.f32 %v6720_v25, %v16611_v18  ;;  %6639 = vmatmul.bf16.gmra.mxu1 %v16662_v4  ;;  %6698 = vmatmul.bf16.gmra.mxu2 %v16664_v16  ;;  %v12975_v25 = vld [vmem:[%s18711_s8 + $0xa0] sm:$0xf0] }
 0x7a2   : > { %v6782_v15 = vpop.f32.mrf.mxu0 }
 0x7a3   : > { %v16669_v34 = vadd.f32 %v6779_v55, %v6721_v33  ;;  %v12999_v55 = vld [vmem:[%s18711_s8 + $0x160] sm:$0xf0] }
 0x7a4   : > { %v6659_v5 = vpop.f32.mrf.mxu2 }
 0x7a5   : > { %v16671_v43 = vadd.f32 %v6659_v5, %v6601_v58  ;;  %6948 = vmatmul.bf16.vlgmr.msrb.gmra.mxu3 %v16326_v32  ;;  %7007 = vmatmul.bf16.vlgmr.msrb.gmra.mxu0 %v16328_v8  ;;  %v11339_v5 = vor.u32 %v12975_v25, %v11338_v57 }
 0x7a6   : > { %v6602_v39 = vpop.f32.mrf.mxu1 }
 0x7a7   : > { %v6603_v56 = vadd.f32 %v6602_v39, %v16332_v10  ;;  %v11435_v10 = vor.u32 %v12999_v55, %v11434_v61  ;;  %7059 = vmatpush.bf16.msrb.mxu1 %v11339_v5 }
 0x7a8   : > { %v6723_v28 = vpop.f32.mrf.mxu3 }
 0x7a9   : > { %v6724_v14 = vadd.f32 %v6723_v28, %v16611_v18  ;;  %7118 = vmatpush.bf16.msrb.mxu2 %v11435_v10  ;;  %v11422_v10 = vld [vmem:[%s18711_s8 + $0x140] sm:$0xf] }
 0x7aa   : > { %v6784_v42 = vpop.f32.mrf.mxu0 }
 0x7ab   : > { %v16686_v46 = vadd.f32 %v6782_v15, %v6724_v14 }
 0x7ac   : > { %v6661_v58 = vpop.f32.mrf.mxu2 }
 0x7ad   : > { %v16691_v33 = vadd.f32 %v6661_v58, %v6603_v56 }
 0x7ae   : > { %v6605_v39 = vpop.f32.mrf.mxu1 }
 0x7af   : > { %v6606_v28 = vadd.f32 %v6605_v39, %v16343_v1 }
 0x7b0   : > { %v6725_v8 = vpop.f32.mrf.mxu3 }
 0x7b1   : > { %v6726_v32 = vadd.f32 %v6725_v8, %v16611_v18  ;;  %6830 = vmatmul.bf16.vlgmr.msra.gmra.mxu1 %v15810_v12  ;;  %6889 = vmatmul.bf16.vlgmr.msra.gmra.mxu2 %v15812_v20 }
 0x7b2   : > { %v6787_v15 = vpop.f32.mrf.mxu0 }
 0x7b3   : > { %v16697_v14 = vadd.f32 %v6784_v42, %v6726_v32  ;;  %v12996_v32 = vld [vmem:[%s18711_s8 + $0x148] sm:$0xf0] }
 0x7b4   : > { %v6664_v61 = vpop.f32.mrf.mxu2  ;;  %v11423_v5 = vor.u32 %v12996_v32, %v11422_v10 }
 0x7b5   : > { %v16699_v55 = vadd.f32 %v6664_v61, %v6606_v28  ;;  %6953 = vmatmul.bf16.gmra.mxu3 %v16346_v52  ;;  %7012 = vmatmul.bf16.gmra.mxu0 %v16348_v53 }
 0x7b6   : > { %v6607_v56 = vpop.f32.mrf.mxu1  ;;  %7119 = vmatpush.bf16.msrb.mxu2 %v11423_v5 }
 0x7b7   : > { %v6608_v1 = vadd.f32 %v6607_v56, %v16358_v29 }
 0x7b8   : > { %v6728_v57 = vpop.f32.mrf.mxu3 }
 0x7b9   : > { %v6729_v8 = vadd.f32 %v6728_v57, %v16611_v18 }
 0x7ba   : > { %v6789_v58 = vpop.f32.mrf.mxu0 }
 0x7bb   : > { %v16711_v42 = vadd.f32 %v6787_v15, %v6729_v8  ;;  %v11326_v15 = vld [vmem:[%s18711_s8 + $0x80] sm:$0xf] }
 0x7bc   : > { %v6666_v25 = vpop.f32.mrf.mxu2 }
 0x7bd   : > { %v16713_v39 = vadd.f32 %v6666_v25, %v6608_v1  ;;  %v12972_v1 = vld [vmem:[%s18711_s8 + $0x88] sm:$0xf0] }
 0x7be   : > { %v6610_v28 = vpop.f32.mrf.mxu1 }
 0x7bf   : > { %v6611_v29 = vadd.f32 %v6610_v28, %v16363_v2  ;;  %v11327_v2 = vor.u32 %v12972_v1, %v11326_v15 }
 0x7c0   : > { %v6730_v61 = vpop.f32.mrf.mxu3 }
 0x7c1   : > { %v6731_v56 = vadd.f32 %v6730_v61, %v16611_v18  ;;  %6835 = vmatmul.bf16.gmra.mxu1 %v15850_v48  ;;  %6894 = vmatmul.bf16.gmra.mxu2 %v15852_v22 }
 0x7c2   : > { %v6792_v57 = vpop.f32.mrf.mxu0  ;;  %7060 = vmatpush.bf16.msrb.mxu1 %v11327_v2  ;;  %v11410_v2 = vld [vmem:[%s18711_s8 + $0x128] sm:$0xf] }
 0x7c3   : > { %v16725_v8 = vadd.f32 %v6789_v58, %v6731_v56 }
 0x7c4   : > { %v6669_v10 = vpop.f32.mrf.mxu2 }
 0x7c5   : > { %v16727_v32 = vadd.f32 %v6669_v10, %v6611_v29  ;;  %6958 = vmatmul.bf16.gmra.mxu3 %v16366_v50  ;;  %7017 = vmatmul.bf16.gmra.mxu0 %v16368_v44 }
 0x7c6   : > { %v6612_v25 = vpop.f32.mrf.mxu1 }
 0x7c7   : > { %v6613_v5 = vadd.f32 %v6612_v25, %v16384_v6 }
 0x7c8   : > { %v6733_v28 = vpop.f32.mrf.mxu3 }
 0x7c9   : > { %v6734_v61 = vadd.f32 %v6733_v28, %v16611_v18 }
 0x7ca   : > { %v6794_v53 = vpop.f32.mrf.mxu0 }
 0x7cb   : > { %v16733_v52 = vadd.f32 %v6792_v57, %v6734_v61  ;;  %v12993_v57 = vld [vmem:[%s18711_s8 + $0x130] sm:$0xf0] }
 0x7cc   : > { %v6671_v58 = vpop.f32.mrf.mxu2  ;;  %v11411_v28 = vor.u32 %v12993_v57, %v11410_v2  ;;  %v12969_v61 = vld [vmem:[%s18711_s8 + $0x70] sm:$0xf0] }
 0x7cd   : > { %v16735_v56 = vadd.f32 %v6671_v58, %v6613_v5 }
 0x7ce   : > { %v6615_v15 = vpop.f32.mrf.mxu1  ;;  %7120 = vmatpush.bf16.msrb.mxu2 %v11411_v28  ;;  %v11398_v28 = vld [vmem:[%s18711_s8 + $0x110] sm:$0xf] }
 0x7cf   : > { %v6616_v29 = vadd.f32 %v6615_v15, %v16389_v17  ;;  %v11314_v17 = vld [vmem:[%s18711_s8 + $0x68] sm:$0xf] }
 0x7d0   : > { %v6735_v1 = vpop.f32.mrf.mxu3  ;;  %v11315_v15 = vor.u32 %v12969_v61, %v11314_v17 }
 0x7d1   : > { %v6736_v10 = vadd.f32 %v6735_v1, %v16611_v18  ;;  %6840 = vmatmul.bf16.gmra.mxu1 %v15894_v62  ;;  %6899 = vmatmul.bf16.gmra.mxu2 %v15896_v60 }
 0x7d2   : > { %v6797_v6 = vpop.f32.mrf.mxu0  ;;  %7061 = vmatpush.bf16.msrb.mxu1 %v11315_v15 }
 0x7d3   : > { %v16750_v25 = vadd.f32 %v6794_v53, %v6736_v10 }
 0x7d4   : > { %v6674_v5 = vpop.f32.mrf.mxu2 }
 0x7d5   : > { %18857 = vst [vmem:[#allocation47_spill] sm:$0xff] %v16750_v25  ;;  %v16755_v58 = vadd.f32 %v6674_v5, %v6616_v29  ;;  %6963 = vmatmul.bf16.gmra.mxu3 %v16392_v37  ;;  %7022 = vmatmul.bf16.gmra.mxu0 %v16394_v19 }
 0x7d6   : > { %v6617_v1 = vpop.f32.mrf.mxu1 }
 0x7d7   : > { %v6618_v44 = vadd.f32 %v6617_v1, %v16404_v24 }
 0x7d8   : > { %v6738_v53 = vpop.f32.mrf.mxu3 }
 0x7d9   : > { %v6739_v10 = vadd.f32 %v6738_v53, %v16611_v18 }
 0x7da   : > { %v6799_v2 = vpop.f32.mrf.mxu0 }
 0x7db   : > { %v16761_v57 = vadd.f32 %v6797_v6, %v6739_v10 }
 0x7dc   : > { %v6676_v50 = vpop.f32.mrf.mxu2 }
 0x7dd   : > { %v16763_v25 = vadd.f32 %v6676_v50, %v6618_v44  ;;  %v12990_v50 = vld [vmem:[%s18711_s8 + $0x118] sm:$0xf0] }
 0x7de   : > { %v6620_v29 = vpop.f32.mrf.mxu1 }
 0x7df   : > { %v6621_v5 = vadd.f32 %v6620_v29, %v16415_v27  ;;  %v11399_v27 = vor.u32 %v12990_v50, %v11398_v28  ;;  %v12966_v29 = vld [vmem:[%s18711_s8 + $0x58] sm:$0xf0] }
 0x7e0   : > { %v6740_v37 = vpop.f32.mrf.mxu3 }
 0x7e1   : > { %v6741_v17 = vadd.f32 %v6740_v37, %v16611_v18  ;;  %6845 = vmatmul.bf16.gmra.mxu1 %v15938_v63  ;;  %6904 = vmatmul.bf16.gmra.mxu2 %v15940_v21 }
 0x7e2   : > { %v6802_v24 = vpop.f32.mrf.mxu0  ;;  %7121 = vmatpush.bf16.msrb.mxu2 %v11399_v27 }
 0x7e3   : > { %v16775_v44 = vadd.f32 %v6799_v2, %v6741_v17  ;;  %v11302_v2 = vld [vmem:[%s18711_s8 + $0x50] sm:$0xf] }
 0x7e4   : > { %v6679_v6 = vpop.f32.mrf.mxu2  ;;  %v11303_v28 = vor.u32 %v12966_v29, %v11302_v2  ;;  %v18866_v29 = vld [vmem:[#allocation35_spill] sm:$0xff] }
 0x7e5   : > { %18858 = vst [vmem:[#allocation48_spill] sm:$0xff] %v16775_v44  ;;  %v16777_v61 = vadd.f32 %v6679_v6, %v6621_v5  ;;  %6968 = vmatmul.bf16.gmra.mxu3 %v16418_v11  ;;  %7027 = vmatmul.bf16.gmra.mxu0 %v16420_v13  ;;  %v18862_v13 = vld [vmem:[#allocation12_spill] sm:$0xff]  ;;  %v18869_v44 = vld [vmem:[#allocation13_spill] sm:$0xff] }
 0x7e6   : > { %v6622_v37 = vpop.f32.mrf.mxu1  ;;  %7062 = vmatpush.bf16.msrb.mxu1 %v11303_v28 }
 0x7e7   : > { %v6623_v15 = vadd.f32 %v6622_v37, %v16424_v40 }
 0x7e8   : > { %v6743_v1 = vpop.f32.mrf.mxu3 }
 0x7e9   : > { %v6744_v53 = vadd.f32 %v6743_v1, %v16611_v18  ;;  %v18861_v1 = vld [vmem:[#allocation11_spill] sm:$0xff] }
 0x7ea   : > { %v6804_v10 = vpop.f32.mrf.mxu0 }
 0x7eb   : > { %v16789_v5 = vadd.f32 %v6802_v24, %v6744_v53 }
 0x7ec   : > { %v6681_v17 = vpop.f32.mrf.mxu2 }
 0x7ed   : > { %18859 = vst [vmem:[#allocation49_spill] sm:$0xff] %v16789_v5  ;;  %v16791_v50 = vadd.f32 %v6681_v17, %v6623_v15  ;;  %v18865_v15 = vld [vmem:[#allocation34_spill] sm:$0xff] }
 0x7ee   : > { %v6625_v6 = vpop.f32.mrf.mxu1 }
 0x7ef   : > { %18860 = vst [vmem:[#allocation50_spill] sm:$0xff] %v16791_v50  ;;  %v6626_v40 = vadd.f32 %v6625_v6, %v16441_v26 }
 0x7f0   : > { %v6745_v27 = vpop.f32.mrf.mxu3 }
 0x7f1   : > { %v6746_v37 = vadd.f32 %v6745_v27, %v16611_v18  ;;  %6850 = vmatmul.bf16.gmra.mxu1 %v18861_v1  ;;  %6909 = vmatmul.bf16.gmra.mxu2 %v18862_v13  ;;  %v11386_v27 = vld [vmem:[%s18711_s8 + $0xf8] sm:$0xf] }
 0x7f2   : > { %v6807_v11 = vpop.f32.mrf.mxu0 }
 0x7f3   : > { %v16797_v19 = vadd.f32 %v6804_v10, %v6746_v37  ;;  %v12987_v10 = vld [vmem:[%s18711_s8 + $0x100] sm:$0xf0] }
 0x7f4   : > { %v6684_v24 = vpop.f32.mrf.mxu2 }
 0x7f5   : > { %18863 = vst [vmem:[#allocation11_spill] sm:$0xff] %v16797_v19  ;;  %v16799_v53 = vadd.f32 %v6684_v24, %v6626_v40  ;;  %6973 = vmatmul.bf16.gmra.mxu3 %v16446_v9  ;;  %7032 = vmatmul.bf16.gmra.mxu0 %v18865_v15  ;;  %v11290_v40 = vld [vmem:[%s18711_s8 + $0x38] sm:$0xf]  ;;  %v18868_v19 = vld [vmem:[#allocation36_spill] sm:$0xff] }
 0x7f6   : > { %v6627_v2 = vpop.f32.mrf.mxu1 }
 0x7f7   : > { %18864 = vst [vmem:[#allocation12_spill] sm:$0xff] %v16799_v53  ;;  %v6628_v26 = vadd.f32 %v6627_v2, %v18866_v29  ;;  %v11387_v2 = vor.u32 %v12987_v10, %v11386_v27  ;;  %v12963_v29 = vld [vmem:[%s18711_s8 + $0x40] sm:$0xf0] }
 0x7f8   : > { %v6748_v17 = vpop.f32.mrf.mxu3  ;;  %v11291_v15 = vor.u32 %v12963_v29, %v11290_v40  ;;  %v12984_v29 = vld [vmem:[%s18711_s8 + $0xe8] sm:$0xf0] }
 0x7f9   : > { %v6749_v28 = vadd.f32 %v6748_v17, %v16611_v18  ;;  %7122 = vmatpush.bf16.msrb.mxu2 %v11387_v2  ;;  %v11374_v2 = vld [vmem:[%s18711_s8 + $0xe0] sm:$0xf] }
 0x7fa   : > { %v6809_v6 = vpop.f32.mrf.mxu0  ;;  %7063 = vmatpush.bf16.msrb.mxu1 %v11291_v15 }
 0x7fb   : > { %v16814_v37 = vadd.f32 %v6807_v11, %v6749_v28  ;;  %v18870_v11 = vld [vmem:[#allocation14_spill] sm:$0xff] }
 0x7fc   : > { %v6686_v24 = vpop.f32.mrf.mxu2 }
 0x7fd   : > { %18867 = vst [vmem:[#allocation35_spill] sm:$0xff] %v16814_v37  ;;  %v16819_v17 = vadd.f32 %v6686_v24, %v6628_v26 }
 0x7fe   : > { %v6630_v9 = vpop.f32.mrf.mxu1 }
 0x7ff   : > { %v6631_v53 = vadd.f32 %v6630_v9, %v18868_v19  ;;  %v11542_v19 = vld [vmem:[%s18711_s8 + $0x230] sm:$0xf] }
 0x800   : > { %v6750_v5 = vpop.f32.mrf.mxu3 }
 0x801   : > { %v6751_v50 = vadd.f32 %v6750_v5, %v16611_v18  ;;  %6855 = vmatmul.bf16.gmra.mxu1 %v18869_v44  ;;  %6914 = vmatmul.bf16.gmra.mxu2 %v18870_v11  ;;  %v13026_v5 = vld [vmem:[%s18711_s8 + $0x238] sm:$0xf0] }
 0x802   : > { %v6812_v28 = vpop.f32.mrf.mxu0  ;;  %v11543_v15 = vor.u32 %v13026_v5, %v11542_v19  ;;  %v11375_v5 = vor.u32 %v12984_v29, %v11374_v2  ;;  %v11518_v29 = vld [vmem:[%s18711_s8 + $0x200] sm:$0xf] }
 0x803   : > { %v16825_v27 = vadd.f32 %v6809_v6, %v6751_v50  ;;  %v13050_v6 = vld [vmem:[%s18711_s8 + $0x2f8] sm:$0xf0] }
 0x804   : > { %v6689_v10 = vpop.f32.mrf.mxu2  ;;  %7176 = vmatpush.bf16.msra.mxu3 %v11543_v15  ;;  %v11626_v15 = vld [vmem:[%s18711_s8 + $0x2d8] sm:$0xf]  ;;  %7123 = vmatpush.bf16.msrb.mxu2 %v11375_v5  ;;  %v18875_v5 = vld [vmem:[#allocation16_spill] sm:$0xff] }
 0x805   : > { %18871 = vst [vmem:[#allocation36_spill] sm:$0xff] %v16825_v27  ;;  %v16827_v37 = vadd.f32 %v6689_v10, %v6631_v53  ;;  %6978 = vmatmul.bf16.gmra.mxu3 %v16494_v41  ;;  %7037 = vmatmul.bf16.gmra.mxu0 %v16496_v7  ;;  %v11638_v53 = vld [vmem:[%s18711_s8 + $0x2f0] sm:$0xf]  ;;  %v11530_v10 = vld [vmem:[%s18711_s8 + $0x218] sm:$0xf] }
 0x806   : > { %v6632_v26 = vpop.f32.mrf.mxu1  ;;  %v11639_v40 = vor.u32 %v13050_v6, %v11638_v53  ;;  %v13047_v53 = vld [vmem:[%s18711_s8 + $0x2e0] sm:$0xf0]  ;;  %v13020_v41 = vld [vmem:[%s18711_s8 + $0x208] sm:$0xf0] }
 0x807   : > { %v6633_v9 = vadd.f32 %v6632_v26, %v16519_v3  ;;  %v11627_v7 = vor.u32 %v13047_v53, %v11626_v15  ;;  %v11519_v27 = vor.u32 %v13020_v41, %v11518_v29  ;;  %v11278_v41 = vld [vmem:[%s18711_s8 + $0x20] sm:$0xf]  ;;  %v12960_v53 = vld [vmem:[%s18711_s8 + $0x28] sm:$0xf0]  ;;  %v13017_v29 = vld [vmem:[%s18711_s8 + $0x1f0] sm:$0xf0] }
 0x808   : > { %v6753_v50 = vpop.f32.mrf.mxu3  ;;  %7235 = vmatpush.bf16.msra.mxu0 %v11639_v40 }
 0x809   : > { %v6754_v3 = vadd.f32 %v6753_v50, %v16611_v18  ;;  %v13023_v50 = vld [vmem:[%s18711_s8 + $0x220] sm:$0xf0] }
 0x80a   : > { %v6814_v24 = vpop.f32.mrf.mxu0  ;;  %v11531_v40 = vor.u32 %v13023_v50, %v11530_v10  ;;  %v13044_v10 = vld [vmem:[%s18711_s8 + $0x2c8] sm:$0xf0] }
 0x80b   : > { %v16854_v26 = vadd.f32 %v6812_v28, %v6754_v3  ;;  %v18873_v3 = vld [vmem:[#allocation39_spill] sm:$0xff] }
 0x80c   : > { %v6691_v19 = vpop.f32.mrf.mxu2  ;;  %7177 = vmatpush.bf16.msra.mxu3 %v11531_v40  ;;  %7236 = vmatpush.bf16.msra.mxu0 %v11627_v7 }
 0x80d   : > { %18872 = vst [vmem:[#allocation13_spill] sm:$0xff] %v16854_v26  ;;  %v16865_v6 = vadd.f32 %v6691_v19, %v6633_v9  ;;  %v11614_v9 = vld [vmem:[%s18711_s8 + $0x2c0] sm:$0xf]  ;;  %v18874_v19 = vld [vmem:[#allocation15_spill] sm:$0xff] }
 0x80e   : > { %v6635_v28 = vpop.f32.mrf.mxu1  ;;  %v11615_v50 = vor.u32 %v13044_v10, %v11614_v9  ;;  %v11602_v9 = vld [vmem:[%s18711_s8 + $0x2a8] sm:$0xf] }
 0x80f   : > { %v6636_v2 = vadd.f32 %v6635_v28, %v18873_v3  ;;  %v11279_v3 = vor.u32 %v12960_v53, %v11278_v41  ;;  %v18878_v41 = vld [vmem:[#allocation42_spill] sm:$0xff] }
 0x810   : > { %v6755_v26 = vpop.f32.mrf.mxu3  ;;  %7178 = vmatpush.bf16.msra.mxu3 %v11519_v27  ;;  %7237 = vmatpush.bf16.msra.mxu0 %v11615_v50  ;;  %v13041_v27 = vld [vmem:[%s18711_s8 + $0x2b0] sm:$0xf0] }
 0x811   : > { %v6756_v7 = vadd.f32 %v6755_v26, %v16611_v18  ;;  %6860 = vmatmul.bf16.gmra.mxu1 %v18874_v19  ;;  %6919 = vmatmul.bf16.gmra.mxu2 %v18875_v5  ;;  %v11506_v26 = vld [vmem:[%s18711_s8 + $0x1e8] sm:$0xf] }
 0x812   : > { %v6817_v15 = vpop.f32.mrf.mxu0  ;;  %7064 = vmatpush.bf16.msrb.mxu1 %v11279_v3  ;;  %v13038_v3 = vld [vmem:[%s18711_s8 + $0x298] sm:$0xf0] }
 0x813   : > { %v16892_v40 = vadd.f32 %v6814_v24, %v6756_v7  ;;  %v11507_v24 = vor.u32 %v13017_v29, %v11506_v26  ;;  %v11603_v7 = vor.u32 %v13041_v27, %v11602_v9  ;;  %v11590_v26 = vld [vmem:[%s18711_s8 + $0x290] sm:$0xf] }
 0x814   : > { %v6694_v28 = vpop.f32.mrf.mxu2  ;;  %v11591_v9 = vor.u32 %v13038_v3, %v11590_v26 }
 0x815   : > { %18876 = vst [vmem:[#allocation14_spill] sm:$0xff] %v16892_v40  ;;  %v16903_v10 = vadd.f32 %v6694_v28, %v6636_v2  ;;  %6983 = vmatmul.bf16.gmra.mxu3 %v16568_v31  ;;  %7042 = vmatmul.bf16.gmra.mxu0 %v16570_v54  ;;  %v11494_v40 = vld [vmem:[%s18711_s8 + $0x1d0] sm:$0xf]  ;;  %v13014_v2 = vld [vmem:[%s18711_s8 + $0x1d8] sm:$0xf0] }
 0x816   : > { %v6637_v50 = vpop.f32.mrf.mxu1  ;;  %7179 = vmatpush.bf16.msra.mxu3 %v11507_v24  ;;  %7238 = vmatpush.bf16.msra.mxu0 %v11603_v7  ;;  %v11495_v31 = vor.u32 %v13014_v2, %v11494_v40  ;;  %v11482_v24 = vld [vmem:[%s18711_s8 + $0x1b8] sm:$0xf]  ;;  %v13011_v40 = vld [vmem:[%s18711_s8 + $0x1c0] sm:$0xf0] }
 0x817   : > { %18877 = vst [vmem:[#allocation39_spill] sm:$0xff] %v16903_v10  ;;  %v6638_v53 = vadd.f32 %v6637_v50, %v18878_v41  ;;  %v11483_v41 = vor.u32 %v13011_v40, %v11482_v24  ;;  %v11578_v2 = vld [vmem:[%s18711_s8 + $0x278] sm:$0xf]  ;;  %v18887_v10 = vld [vmem:[#allocation22_spill] sm:$0xff] }
 0x818   : > { %v6758_v28 = vpop.f32.mrf.mxu3 }
 0x819   : > { %v6759_v29 = vadd.f32 %v6758_v28, %v16611_v18 }
 0x81a   : > { %v6819_v27 = vpop.f32.mrf.mxu0  ;;  %7180 = vmatpush.bf16.msra.mxu3 %v11495_v31  ;;  %7239 = vmatpush.bf16.msra.mxu0 %v11591_v9  ;;  %v13035_v31 = vld [vmem:[%s18711_s8 + $0x280] sm:$0xf0] }
 0x81b   : > { %v16927_v7 = vadd.f32 %v6817_v15, %v6759_v29  ;;  %v11579_v26 = vor.u32 %v13035_v31, %v11578_v2  ;;  %v11470_v15 = vld [vmem:[%s18711_s8 + $0x1a0] sm:$0xf]  ;;  %v13008_v29 = vld [vmem:[%s18711_s8 + $0x1a8] sm:$0xf0] }
 0x81c   : > { %v6696_v50 = vpop.f32.mrf.mxu2  ;;  %v11471_v40 = vor.u32 %v13008_v29, %v11470_v15  ;;  %v18882_v2 = vld [vmem:[#allocation18_spill] sm:$0xff]  ;;  %v13005_v15 = vld [vmem:[%s18711_s8 + $0x190] sm:$0xf0] }
 0x81d   : > { %18879 = vst [vmem:[#allocation15_spill] sm:$0xff] %v16927_v7  ;;  %v16935_v28 = vadd.f32 %v6696_v50, %v6638_v53  ;;  %v11566_v53 = vld [vmem:[%s18711_s8 + $0x260] sm:$0xf] }
 0x81e   : > { %v6640_v3 = vpop.f32.mrf.mxu1  ;;  %7181 = vmatpush.bf16.msra.mxu3 %v11483_v41  ;;  %7240 = vmatpush.bf16.msra.mxu0 %v11579_v26  ;;  %v18881_v41 = vld [vmem:[#allocation17_spill] sm:$0xff] }
 0x81f   : > { %18880 = vst [vmem:[#allocation16_spill] sm:$0xff] %v16935_v28  ;;  %v6641_v9 = vadd.f32 %v6640_v3, %v16621_v23  ;;  %v13032_v23 = vld [vmem:[%s18711_s8 + $0x268] sm:$0xf0]  ;;  %v11458_v3 = vld [vmem:[%s18711_s8 + $0x188] sm:$0xf]  ;;  %v18886_v28 = vld [vmem:[#allocation21_spill] sm:$0xff] }
 0x820   : > { %v6760_v24 = vpop.f32.mrf.mxu3  ;;  %v11567_v31 = vor.u32 %v13032_v23, %v11566_v53  ;;  %v11459_v54 = vor.u32 %v13005_v15, %v11458_v3  ;;  %v11362_v3 = vld [vmem:[%s18711_s8 + $0xc8] sm:$0xf] }
 0x821   : > { %v6761_v50 = vadd.f32 %v6760_v24, %v16611_v18  ;;  %6865 = vmatmul.bf16.gmra.mxu1 %v18881_v41  ;;  %6924 = vmatmul.bf16.gmra.mxu2 %v18882_v2  ;;  %v11554_v18 = vld [vmem:[%s18711_s8 + $0x248] sm:$0xf] }
 0x822   : > { %v7008_v26 = vpop.f32.mrf.mxu0  ;;  %7182 = vmatpush.bf16.msra.mxu3 %v11471_v40  ;;  %7241 = vmatpush.bf16.msra.mxu0 %v11567_v31  ;;  %v13029_v40 = vld [vmem:[%s18711_s8 + $0x250] sm:$0xf0]  ;;  %v11266_v15 = vld [vmem:[%s18711_s8 + $0x8] sm:$0xf] }
 0x823   : > { %v16962_v29 = vadd.f32 %v6819_v27, %v6761_v50  ;;  %v11555_v23 = vor.u32 %v13029_v40, %v11554_v18 }
 0x824   : > { %v6699_v24 = vpop.f32.mrf.mxu2 }
 0x825   : > { %18883 = vst [vmem:[#allocation42_spill] sm:$0xff] %v16962_v29  ;;  %v16967_v53 = vadd.f32 %v6699_v24, %v6641_v9  ;;  %6988 = vmatmul.bf16.gmra.mxu3 %v16627_v59  ;;  %7047 = vmatmul.bf16.gmra.mxu0 %v16629_v38  ;;  %v12981_v9 = vld [vmem:[%s18711_s8 + $0xd0] sm:$0xf0] }
 0x826   : > { %v6642_v31 = vpop.f32.mrf.mxu1  ;;  %7183 = vmatpush.bf16.msra.mxu3 %v11459_v54  ;;  %7242 = vmatpush.bf16.msra.mxu0 %v11555_v23  ;;  %v11363_v24 = vor.u32 %v12981_v9, %v11362_v3  ;;  %v12957_v54 = vld [vmem:[%s18711_s8 + $0x10] sm:$0xf0]  ;;  %v11832_v3 = vld [vmem:[%s18712_s9 + $0x1] ss:$4 sm:$0x7] }
 0x827   : > { %18884 = vst [vmem:[#allocation17_spill] sm:$0xff] %v16967_v53  ;;  %v6643_v7 = vadd.f32 %v6642_v31, %v16635_v30  ;;  %v11267_v40 = vor.u32 %v12957_v54, %v11266_v15  ;;  %v7412_v15 = vmax.f32 %v16645_v0, 0.0  ;;  %v11830_v53 = vld [vmem:[%s18711_s8 + $0x470] sm:$0xf] }
 0x828   : > { %v6949_v27 = vpop.f32.mrf.mxu3  ;;  %7124 = vmatpush.bf16.msrb.mxu2 %v11363_v24  ;;  %v11833_v24 = vld [vmem:[%s18712_s9 + $0x2] ss:$4 sm:$0x7] }
 0x829   : > { %7065 = vmatpush.bf16.msrb.mxu1 %v11267_v40 }
 0x82a   : > { %v7010_v50 = vpop.f32.mrf.mxu0 }
 0x82c   : > { %v6701_v18 = vpop.f32.mrf.mxu2 }
 0x82d   : > { %v16984_v30 = vadd.f32 %v6701_v18, %v6643_v7  ;;  %v16995_v18 = vperm.slane %v11832_v3, 0 }
 0x82e   : > { %v6831_v23 = vpop.f32.mrf.mxu1 }
 0x82f   : > { %18885 = vst [vmem:[#allocation18_spill] sm:$0xff] %v16984_v30  ;;  %v6832_v59 = vadd.f32 %v6831_v23, %v16624_v36  ;;  %v17000_v23 = vperm.slane %v11832_v3, 1  ;;  %v17002_v30 = vperm.slane %v11833_v24, 0 }
 0x830   : > { %v6951_v31 = vpop.f32.mrf.mxu3 }
 0x831   : > { %6870 = vmatmul.bf16.gmra.mxu1 %v16248_v49  ;;  %6929 = vmatmul.bf16.gmra.mxu2 %v16250_v35 }
 0x832   : > { %v7013_v38 = vpop.f32.mrf.mxu0 }
 0x834   : > { %v6890_v9 = vpop.f32.mrf.mxu2 }
 0x835   : > { %v6891_v29 = vadd.f32 %v6890_v9, %v6832_v59  ;;  %6993 = vmatmul.bf16.gmra.mxu3 %v16662_v4  ;;  %7052 = vmatmul.bf16.gmra.mxu0 %v16664_v16  ;;  %v7481_v9 = vmul.f32 %v16995_v18, %v7412_v15  ;;  %v17005_v4 = vperm.slane %v11833_v24, 1 }
 0x836   : > { %v6833_v7 = vpop.f32.mrf.mxu1 }
 0x837   : > { %v6950_v36 = vadd.f32 %v6949_v27, %v6891_v29  ;;  %v6834_v0 = vadd.f32 %v6833_v7, %v16643_v47  ;;  %v17016_v15 = vadd.f32 %v17002_v30, %v7481_v9  ;;  %v7415_v47 = vmax.f32 %v16659_v45, 0.0  ;;  %v11734_v45 = vld [vmem:[%s18711_s8 + $0x3b0] sm:$0xf] }
 0x838   : > { %v6954_v54 = vpop.f32.mrf.mxu3 }
 0x839   : > { %v7009_v40 = vadd.f32 %v7008_v26, %v6950_v36  ;;  %v13098_v26 = vld [vmem:[%s18711_s8 + $0x478] sm:$0xf0] }
 0x83a   : > { %v7015_v59 = vpop.f32.mrf.mxu0  ;;  %v11831_v27 = vor.u32 %v13098_v26, %v11830_v53 }
 0x83b   : > { %v7413_v16 = vmax.f32 %v7009_v40, 0.0 }
 0x83c   : > { %v6892_v29 = vpop.f32.mrf.mxu2  ;;  %7353 = vmatpush.bf16.msra.mxu2 %v11831_v27 }
 0x83d   : > { %v7482_v3 = vmul.f32 %v17000_v23, %v7413_v16  ;;  %v6893_v36 = vadd.f32 %v6892_v29, %v6834_v0  ;;  %v7484_v16 = vmul.f32 %v16995_v18, %v7415_v47 }
 0x83e   : > { %v6836_v35 = vpop.f32.mrf.mxu1 }
 0x83f   : > { %v17020_v7 = vadd.f32 %v17005_v4, %v7482_v3  ;;  %v6952_v24 = vadd.f32 %v6951_v31, %v6893_v36  ;;  %v6837_v26 = vadd.f32 %v6836_v35, %v16657_v51  ;;  %v13074_v31 = vld [vmem:[%s18711_s8 + $0x3b8] sm:$0xf0]  ;;  %v17036_v35 = vadd.f32 %v17002_v30, %v7484_v16 }
 0x840   : > { %v6956_v40 = vpop.f32.mrf.mxu3  ;;  %v7418_v51 = vmax.f32 %v16671_v43, 0.0  ;;  %v7421_v16 = vmax.f32 %v16691_v33, 0.0  ;;  %v11818_v33 = vld [vmem:[%s18711_s8 + $0x458] sm:$0xf] }
 0x841   : > { %v7011_v49 = vadd.f32 %v7010_v50, %v6952_v24  ;;  %6875 = vmatmul.bf16.gmra.mxu1 %v18886_v28  ;;  %6934 = vmatmul.bf16.gmra.mxu2 %v18887_v10  ;;  %v11735_v50 = vor.u32 %v13074_v31, %v11734_v45 }
 0x842   : > { %v7018_v53 = vpop.f32.mrf.mxu0 }
 0x843   : > { %v7416_v0 = vmax.f32 %v7011_v49, 0.0  ;;  %7294 = vmatpush.bf16.msra.mxu1 %v11735_v50 }
 0x844   : > { %v6895_v9 = vpop.f32.mrf.mxu2 }
 0x845   : > { %v7485_v29 = vmul.f32 %v17000_v23, %v7416_v0  ;;  %v6896_v27 = vadd.f32 %v6895_v9, %v6837_v26  ;;  %7184 = vmatmul.bf16.vlgmr.msra.gmra.mxu3 %v15810_v12  ;;  %7243 = vmatmul.bf16.vlgmr.msra.gmra.mxu0 %v15812_v20  ;;  %v7487_v0 = vmul.f32 %v16995_v18, %v7418_v51  ;;  %v18889_v51 = vld [vmem:[#allocation10_spill] sm:$0xff] }
 0x846   : > { %v6838_v49 = vpop.f32.mrf.mxu1 }
 0x847   : > { %v7554_v3 = vadd.f32 %v17005_v4, %v7485_v29  ;;  %v6955_v36 = vadd.f32 %v6954_v54, %v6896_v27  ;;  %v6839_v31 = vadd.f32 %v6838_v49, %v16669_v34  ;;  %v7556_v43 = vadd.f32 %v17002_v30, %v7487_v0  ;;  %v11722_v0 = vld [vmem:[%s18711_s8 + $0x398] sm:$0xf] }
 0x848   : > { %v6959_v47 = vpop.f32.mrf.mxu3  ;;  %v7490_v34 = vmul.f32 %v16995_v18, %v7421_v16 }
 0x849   : > { %v7014_v24 = vadd.f32 %v7013_v38, %v6955_v36  ;;  %v18888_v36 = vld [vmem:[#allocation9_spill] sm:$0xff] }
 0x84a   : > { %v7020_v45 = vpop.f32.mrf.mxu0 }
 0x84b   : > { %v7419_v26 = vmax.f32 %v7014_v24, 0.0 }
 0x84c   : > { %v6897_v9 = vpop.f32.mrf.mxu2 }
 0x84d   : > { %v7488_v10 = vmul.f32 %v17000_v23, %v7419_v26  ;;  %v6898_v50 = vadd.f32 %v6897_v9, %v6839_v31  ;;  %v13071_v31 = vld [vmem:[%s18711_s8 + $0x3a0] sm:$0xf0] }
 0x84e   : > { %v6841_v28 = vpop.f32.mrf.mxu1  ;;  %v11723_v9 = vor.u32 %v13071_v31, %v11722_v0 }
 0x84f   : > { %v7557_v29 = vadd.f32 %v17005_v4, %v7488_v10  ;;  %v6957_v54 = vadd.f32 %v6956_v40, %v6898_v50  ;;  %v6842_v26 = vadd.f32 %v6841_v28, %v16686_v46  ;;  %v13095_v10 = vld [vmem:[%s18711_s8 + $0x460] sm:$0xf0]  ;;  %v7424_v50 = vmax.f32 %v16699_v55, 0.0 }
 0x850   : > { %v6961_v27 = vpop.f32.mrf.mxu3  ;;  %v11819_v40 = vor.u32 %v13095_v10, %v11818_v33  ;;  %7295 = vmatpush.bf16.msra.mxu1 %v11723_v9 }
 0x851   : > { %v7016_v38 = vadd.f32 %v7015_v59, %v6957_v54  ;;  %7066 = vmatmul.bf16.vlgmr.msrb.gmra.mxu1 %v18888_v36  ;;  %7125 = vmatmul.bf16.vlgmr.msrb.gmra.mxu2 %v18889_v51  ;;  %v7710_v54 = vmax.f32 %v17016_v15, %v7556_v43  ;;  %v7559_v36 = vadd.f32 %v17002_v30, %v7490_v34  ;;  %v7427_v34 = vmax.f32 %v16713_v39, 0.0 }
 0x852   : > { %v17049_v49 = vpop.f32.mrf.mxu0  ;;  %7354 = vmatpush.bf16.msra.mxu2 %v11819_v40 }
 0x853   : > { %v7422_v24 = vmax.f32 %v7016_v38, 0.0  ;;  %v7711_v38 = vmax.f32 %v17020_v7, %v7557_v29  ;;  %v7713_v7 = vmax.f32 %v17036_v35, %v7559_v36  ;;  %v7496_v39 = vmul.f32 %v16995_v18, %v7427_v34 }
 0x854   : > { %v6900_v59 = vpop.f32.mrf.mxu2 }
 0x855   : > { %v7491_v46 = vmul.f32 %v17000_v23, %v7422_v24  ;;  %v6901_v28 = vadd.f32 %v6900_v59, %v6842_v26  ;;  %7189 = vmatmul.bf16.gmra.mxu3 %v15850_v48  ;;  %7248 = vmatmul.bf16.gmra.mxu0 %v15852_v22  ;;  %v7716_v26 = vpack.c.bf16 %v7711_v38, %v7710_v54 }
 0x856   : > { %v6843_v16 = vpop.f32.mrf.mxu1  ;;  %v7493_v59 = vmul.f32 %v16995_v18, %v7424_v50 }
 0x857   : > { %v7560_v51 = vadd.f32 %v17005_v4, %v7491_v46  ;;  %v6960_v33 = vadd.f32 %v6959_v47, %v6901_v28  ;;  %v6844_v55 = vadd.f32 %v6843_v16, %v16697_v14  ;;  %v7844_v14 = vunpack.c.l.b16 %v7716_v26 }
 0x858   : > { %v6964_v24 = vpop.f32.mrf.mxu3  ;;  %v17078_v46 = vadd.f32 %v17002_v30, %v7493_v59  ;;  %v7845_v16 = vunpack.c.h.b16 %v7716_v26 }
 0x859   : > { %v7019_v10 = vadd.f32 %v7018_v53, %v6960_v33  ;;  %v7714_v29 = vmax.f32 %v7554_v3, %v7560_v51 }
 0x85a   : > { %v7025_v0 = vpop.f32.mrf.mxu0 }
 0x85b   : > { %v7425_v31 = vmax.f32 %v7019_v10, 0.0  ;;  %v7718_v9 = vpack.c.bf16 %v7714_v29, %v7713_v7 }
 0x85c   : > { %v6902_v40 = vpop.f32.mrf.mxu2 }
 0x85d   : > { %v7494_v15 = vmul.f32 %v17000_v23, %v7425_v31  ;;  %v6903_v43 = vadd.f32 %v6902_v40, %v6844_v55  ;;  %v7847_v35 = vunpack.c.l.b16 %v7718_v9  ;;  %v7848_v3 = vunpack.c.h.b16 %v7718_v9  ;;  %v11710_v9 = vld [vmem:[%s18711_s8 + $0x380] sm:$0xf] }
 0x85e   : > { %v6846_v47 = vpop.f32.mrf.mxu1  ;;  %v17101_v31 = vadd.f32 %v17002_v30, %v7496_v39  ;;  %v7430_v55 = vmax.f32 %v16727_v32, 0.0  ;;  %v13068_v32 = vld [vmem:[%s18711_s8 + $0x388] sm:$0xf0] }
 0x85f   : > { %v17081_v53 = vadd.f32 %v17005_v4, %v7494_v15  ;;  %v6962_v28 = vadd.f32 %v6961_v27, %v6903_v43  ;;  %v6847_v51 = vadd.f32 %v6846_v47, %v16711_v42  ;;  %v11806_v27 = vld [vmem:[%s18711_s8 + $0x440] sm:$0xf]  ;;  %v17093_v33 = vpack.c.b16 %v7847_v35, %v7844_v14 }
 0x860   : > { %v6966_v50 = vpop.f32.mrf.mxu3  ;;  %v7499_v34 = vmul.f32 %v16995_v18, %v7430_v55 }
 0x861   : > { %v7021_v54 = vadd.f32 %v7020_v45, %v6962_v28  ;;  %7071 = vmatmul.bf16.gmra.mxu1 %v15810_v12  ;;  %7130 = vmatmul.bf16.gmra.mxu2 %v15812_v20  ;;  %v13092_v45 = vld [vmem:[%s18711_s8 + $0x448] sm:$0xf0]  ;;  %v17095_v12 = vpack.c.b16 %v7848_v3, %v7845_v16 }
 0x862   : > { %v7028_v38 = vpop.f32.mrf.mxu0  ;;  %v11807_v26 = vor.u32 %v13092_v45, %v11806_v27  ;;  %v7568_v3 = vadd.f32 %v17002_v30, %v7499_v34 }
 0x863   : > { %v7428_v36 = vmax.f32 %v7021_v54, 0.0  ;;  %v7433_v54 = vmax.f32 %v16735_v56, 0.0 }
 0x864   : > { %v6905_v20 = vpop.f32.mrf.mxu2  ;;  %7355 = vmatpush.bf16.msra.mxu2 %v11807_v26 }
 0x865   : > { %v7497_v10 = vmul.f32 %v17000_v23, %v7428_v36  ;;  %v6906_v59 = vadd.f32 %v6905_v20, %v6847_v51  ;;  %7194 = vmatmul.bf16.gmra.mxu3 %v15894_v62  ;;  %7253 = vmatmul.bf16.gmra.mxu0 %v15896_v60  ;;  %v7502_v27 = vmul.f32 %v16995_v18, %v7433_v54 }
 0x866   : > { %v6848_v42 = vpop.f32.mrf.mxu1 }
 0x867   : > { %v17105_v40 = vadd.f32 %v17005_v4, %v7497_v10  ;;  %v6965_v15 = vadd.f32 %v6964_v24, %v6906_v59  ;;  %v6849_v28 = vadd.f32 %v6848_v42, %v16725_v8  ;;  %v11711_v24 = vor.u32 %v13068_v32, %v11710_v9  ;;  %v18890_v32 = vld [vmem:[#allocation47_spill] sm:$0xff] }
 0x868   : > { %v6969_v43 = vpop.f32.mrf.mxu3  ;;  %v7571_v42 = vadd.f32 %v17002_v30, %v7502_v27 }
 0x869   : > { %v7024_v7 = vadd.f32 %v17049_v49, %v6965_v15  ;;  %7296 = vmatpush.bf16.msra.mxu1 %v11711_v24  ;;  %v13065_v24 = vld [vmem:[%s18711_s8 + $0x370] sm:$0xf0] }
 0x86a   : > { %v17108_v29 = vpop.f32.mrf.mxu0 }
 0x86b   : > { %v7431_v47 = vmax.f32 %v7024_v7, 0.0 }
 0x86c   : > { %v6907_v14 = vpop.f32.mrf.mxu2 }
 0x86d   : > { %v7500_v16 = vmul.f32 %v17000_v23, %v7431_v47  ;;  %v6908_v49 = vadd.f32 %v6907_v14, %v6849_v28 }
 0x86e   : > { %v6851_v35 = vpop.f32.mrf.mxu1 }
 0x86f   : > { %v7569_v8 = vadd.f32 %v17005_v4, %v7500_v16  ;;  %v6967_v39 = vadd.f32 %v6966_v50, %v6908_v49  ;;  %v6852_v56 = vadd.f32 %v6851_v35, %v16733_v52  ;;  %v7743_v35 = vmax.f32 %v17101_v31, %v7571_v42 }
 0x870   : > { %v6971_v36 = vpop.f32.mrf.mxu3 }
 0x871   : > { %v7026_v51 = vadd.f32 %v7025_v0, %v6967_v39  ;;  %7076 = vmatmul.bf16.gmra.mxu1 %v15850_v48  ;;  %7135 = vmatmul.bf16.gmra.mxu2 %v15852_v22  ;;  %v7740_v0 = vmax.f32 %v17078_v46, %v7568_v3  ;;  %v7436_v48 = vmax.f32 %v16755_v58, 0.0  ;;  %v7741_v50 = vmax.f32 %v17081_v53, %v7569_v8  ;;  %v11794_v58 = vld [vmem:[%s18711_s8 + $0x428] sm:$0xf]  ;;  %v13089_v53 = vld [vmem:[%s18711_s8 + $0x430] sm:$0xf0] }
 0x872   : > { %v17125_v45 = vpop.f32.mrf.mxu0 }
 0x873   : > { %v7434_v20 = vmax.f32 %v7026_v51, 0.0  ;;  %v7746_v7 = vpack.c.bf16 %v7741_v50, %v7740_v0  ;;  %v7505_v47 = vmul.f32 %v16995_v18, %v7436_v48  ;;  %v7439_v51 = vmax.f32 %v16763_v25, 0.0 }
 0x874   : > { %v6910_v26 = vpop.f32.mrf.mxu2 }
 0x875   : > { %v7503_v10 = vmul.f32 %v17000_v23, %v7434_v20  ;;  %v6911_v59 = vadd.f32 %v6910_v26, %v6852_v56  ;;  %7199 = vmatmul.bf16.gmra.mxu3 %v15938_v63  ;;  %7258 = vmatmul.bf16.gmra.mxu0 %v15940_v21  ;;  %v17156_v39 = vadd.f32 %v17002_v30, %v7505_v47  ;;  %v7861_v0 = vunpack.c.h.b16 %v7746_v7 }
 0x876   : > { %v6853_v22 = vpop.f32.mrf.mxu1  ;;  %v7508_v25 = vmul.f32 %v16995_v18, %v7439_v51 }
 0x877   : > { %v7572_v55 = vadd.f32 %v17005_v4, %v7503_v10  ;;  %v6970_v52 = vadd.f32 %v6969_v43, %v6911_v59  ;;  %v6854_v46 = vadd.f32 %v6853_v22, %v18890_v32  ;;  %v11795_v43 = vor.u32 %v13089_v53, %v11794_v58  ;;  %v18891_v53 = vld [vmem:[#allocation48_spill] sm:$0xff] }
 0x878   : > { %v6974_v15 = vpop.f32.mrf.mxu3 }
 0x879   : > { %v7029_v34 = vadd.f32 %v7028_v38, %v6970_v52  ;;  %v11698_v38 = vld [vmem:[%s18711_s8 + $0x368] sm:$0xf]  ;;  %7356 = vmatpush.bf16.msra.mxu2 %v11795_v43  ;;  %v7744_v8 = vmax.f32 %v17105_v40, %v7572_v55  ;;  %v7860_v40 = vunpack.c.l.b16 %v7746_v7  ;;  %v17177_v52 = vadd.f32 %v17002_v30, %v7508_v25  ;;  %v11782_v43 = vld [vmem:[%s18711_s8 + $0x410] sm:$0xf] }
 0x87a   : > { %v17137_v28 = vpop.f32.mrf.mxu0  ;;  %v11699_v54 = vor.u32 %v13065_v24, %v11698_v38  ;;  %v7442_v7 = vmax.f32 %v16777_v61, 0.0  ;;  %v13086_v61 = vld [vmem:[%s18711_s8 + $0x418] sm:$0xf0] }
 0x87b   : > { %v7437_v9 = vmax.f32 %v7029_v34, 0.0  ;;  %v7748_v26 = vpack.c.bf16 %v7744_v8, %v7743_v35  ;;  %v11783_v24 = vor.u32 %v13086_v61, %v11782_v43  ;;  %v18895_v43 = vld [vmem:[#allocation11_spill] sm:$0xff] }
 0x87c   : > { %v6912_v14 = vpop.f32.mrf.mxu2  ;;  %7297 = vmatpush.bf16.msra.mxu1 %v11699_v54 }
 0x87d   : > { %v7506_v16 = vmul.f32 %v17000_v23, %v7437_v9  ;;  %v6913_v49 = vadd.f32 %v6912_v14, %v6854_v46  ;;  %v7863_v59 = vunpack.c.l.b16 %v7748_v26  ;;  %v7864_v48 = vunpack.c.h.b16 %v7748_v26  ;;  %7357 = vmatpush.bf16.msra.mxu2 %v11783_v24 }
 0x87e   : > { %v6856_v3 = vpop.f32.mrf.mxu1  ;;  %v7511_v46 = vmul.f32 %v16995_v18, %v7442_v7 }
 0x87f   : > { %v17160_v27 = vadd.f32 %v17005_v4, %v7506_v16  ;;  %v6972_v20 = vadd.f32 %v6971_v36, %v6913_v49  ;;  %v6857_v36 = vadd.f32 %v6856_v3, %v16761_v57  ;;  %v17169_v42 = vpack.c.b16 %v7863_v59, %v7860_v40  ;;  %v18893_v59 = vld [vmem:[#allocation49_spill] sm:$0xff] }
 0x880   : > { %v6976_v56 = vpop.f32.mrf.mxu3  ;;  %v17171_v55 = vpack.c.b16 %v7864_v48, %v7861_v0  ;;  %v7580_v35 = vadd.f32 %v17002_v30, %v7511_v46  ;;  %v11686_v48 = vld [vmem:[%s18711_s8 + $0x350] sm:$0xf] }
 0x881   : > { %v7031_v10 = vadd.f32 %v17108_v29, %v6972_v20  ;;  %7081 = vmatmul.bf16.gmra.mxu1 %v15894_v62  ;;  %7140 = vmatmul.bf16.gmra.mxu2 %v15896_v60 }
 0x882   : > { %v17165_v31 = vpop.f32.mrf.mxu0 }
 0x883   : > { %v7440_v22 = vmax.f32 %v7031_v10, 0.0 }
 0x884   : > { %v6915_v50 = vpop.f32.mrf.mxu2 }
 0x885   : > { %v7509_v62 = vmul.f32 %v17000_v23, %v7440_v22  ;;  %v6916_v29 = vadd.f32 %v6915_v50, %v6857_v36  ;;  %7204 = vmatmul.bf16.gmra.mxu3 %v18861_v1  ;;  %7263 = vmatmul.bf16.gmra.mxu0 %v18862_v13  ;;  %v7770_v22 = vmax.f32 %v17156_v39, %v7580_v35  ;;  %v18894_v36 = vld [vmem:[#allocation12_spill] sm:$0xff] }
 0x886   : > { %v6858_v60 = vpop.f32.mrf.mxu1  ;;  %v7448_v50 = vmax.f32 %v18894_v36, 0.0 }
 0x887   : > { %v7578_v57 = vadd.f32 %v17005_v4, %v7509_v62  ;;  %v6975_v34 = vadd.f32 %v6974_v15, %v6916_v29  ;;  %v6859_v14 = vadd.f32 %v6858_v60, %v18891_v53 }
 0x888   : > { %v6979_v47 = vpop.f32.mrf.mxu3  ;;  %v7517_v53 = vmul.f32 %v16995_v18, %v7448_v50  ;;  %v7454_v50 = vmax.f32 %v16827_v37, 0.0  ;;  %v11956_v37 = vld [vmem:[%s18713_s10 + $0xf0] sm:$0xf] }
 0x889   : > { %v7034_v9 = vadd.f32 %v17125_v45, %v6975_v34  ;;  %v18892_v45 = vld [vmem:[#allocation50_spill] sm:$0xff] }
 0x88a   : > { %v7040_v32 = vpop.f32.mrf.mxu0  ;;  %v7445_v49 = vmax.f32 %v18892_v45, 0.0 }
 0x88b   : > { %v7443_v58 = vmax.f32 %v7034_v9, 0.0 }
 0x88c   : > { %v6917_v38 = vpop.f32.mrf.mxu2  ;;  %v7514_v26 = vmul.f32 %v16995_v18, %v7445_v49  ;;  %v17224_v49 = vadd.f32 %v17002_v30, %v7517_v53 }
 0x88d   : > { %v7512_v15 = vmul.f32 %v17000_v23, %v7443_v58  ;;  %v6918_v16 = vadd.f32 %v6917_v38, %v6859_v14 }
 0x88e   : > { %v6861_v54 = vpop.f32.mrf.mxu1  ;;  %v7583_v60 = vadd.f32 %v17002_v30, %v7514_v26 }
 0x88f   : > { %v7581_v3 = vadd.f32 %v17005_v4, %v7512_v15  ;;  %v6977_v8 = vadd.f32 %v6976_v56, %v6918_v16  ;;  %v6862_v0 = vadd.f32 %v6861_v54, %v18893_v59  ;;  %v13062_v56 = vld [vmem:[%s18711_s8 + $0x358] sm:$0xf0] }
 0x890   : > { %v6981_v51 = vpop.f32.mrf.mxu3  ;;  %v11687_v25 = vor.u32 %v13062_v56, %v11686_v48  ;;  %v7773_v15 = vmax.f32 %v17177_v52, %v7583_v60 }
 0x891   : > { %v7036_v20 = vadd.f32 %v17137_v28, %v6977_v8  ;;  %7086 = vmatmul.bf16.gmra.mxu1 %v15938_v63  ;;  %7145 = vmatmul.bf16.gmra.mxu2 %v15940_v21  ;;  %v7771_v29 = vmax.f32 %v17160_v27, %v7581_v3 }
 0x892   : > { %v17198_v10 = vpop.f32.mrf.mxu0  ;;  %7298 = vmatpush.bf16.msra.mxu1 %v11687_v25  ;;  %v11674_v25 = vld [vmem:[%s18711_s8 + $0x338] sm:$0xf] }
 0x893   : > { %v7446_v40 = vmax.f32 %v7036_v20, 0.0  ;;  %v7776_v46 = vpack.c.bf16 %v7771_v29, %v7770_v22 }
 0x894   : > { %v6920_v28 = vpop.f32.mrf.mxu2 }
 0x895   : > { %v7515_v63 = vmul.f32 %v17000_v23, %v7446_v40  ;;  %v6921_v21 = vadd.f32 %v6920_v28, %v6862_v0  ;;  %7209 = vmatmul.bf16.gmra.mxu3 %v18869_v44  ;;  %7268 = vmatmul.bf16.gmra.mxu0 %v18870_v11  ;;  %v7876_v8 = vunpack.c.l.b16 %v7776_v46  ;;  %v7877_v20 = vunpack.c.h.b16 %v7776_v46  ;;  %v18896_v0 = vld [vmem:[#allocation35_spill] sm:$0xff]  ;;  %v13114_v46 = vld [vmem:[%s18713_s10 + $0x74] sm:$0xf0] }
 0x896   : > { %v6863_v62 = vpop.f32.mrf.mxu1 }
 0x897   : > { %v7584_v7 = vadd.f32 %v17005_v4, %v7515_v63  ;;  %v6980_v34 = vadd.f32 %v6979_v47, %v6921_v21  ;;  %v6864_v61 = vadd.f32 %v6863_v62, %v18895_v43  ;;  %v7451_v47 = vmax.f32 %v16819_v17, 0.0  ;;  %v13059_v63 = vld [vmem:[%s18711_s8 + $0x340] sm:$0xf0] }
 0x898   : > { %v6984_v9 = vpop.f32.mrf.mxu3  ;;  %v11675_v36 = vor.u32 %v13059_v63, %v11674_v25 }
 0x899   : > { %v7039_v58 = vadd.f32 %v17165_v31, %v6980_v34  ;;  %v7774_v16 = vmax.f32 %v7578_v57, %v7584_v7  ;;  %v7520_v17 = vmul.f32 %v16995_v18, %v7451_v47  ;;  %v11892_v34 = vld [vmem:[%s18713_s10 + $0x70] sm:$0xf]  ;;  %v13112_v47 = vld [vmem:[%s18713_s10 + $0x64] sm:$0xf0] }
 0x89a   : > { %v17217_v14 = vpop.f32.mrf.mxu0  ;;  %7299 = vmatpush.bf16.msra.mxu1 %v11675_v36  ;;  %v11893_v53 = vor.u32 %v13114_v46, %v11892_v34  ;;  %v18898_v36 = vld [vmem:[#allocation13_spill] sm:$0xff]  ;;  %v13108_v34 = vld [vmem:[%s18713_s10 + $0x44] sm:$0xf0]  ;;  %v11932_v46 = vld [vmem:[%s18713_s10 + $0xc0] sm:$0xf] }
 0x89b   : > { %v7449_v39 = vmax.f32 %v7039_v58, 0.0  ;;  %v7778_v35 = vpack.c.bf16 %v7774_v16, %v7773_v15  ;;  %v17256_v29 = vadd.f32 %v17002_v30, %v7520_v17  ;;  %v11884_v16 = vld [vmem:[%s18713_s10 + $0x60] sm:$0xf] }
 0x89c   : > { %v6922_v38 = vpop.f32.mrf.mxu2  ;;  %8208 = vmatpush.bf16.msrb.mxu3 %v11893_v53 }
 0x89d   : > { %v7518_v24 = vmul.f32 %v17000_v23, %v7449_v39  ;;  %v6923_v27 = vadd.f32 %v6922_v38, %v6864_v61  ;;  %v7879_v52 = vunpack.c.l.b16 %v7778_v35  ;;  %v7880_v57 = vunpack.c.h.b16 %v7778_v35  ;;  %v13128_v35 = vld [vmem:[%s18713_s10 + $0xe4] sm:$0xf0] }
 0x89e   : > { %v6866_v45 = vpop.f32.mrf.mxu1  ;;  %v7523_v38 = vmul.f32 %v16995_v18, %v7454_v50 }
 0x89f   : > { %v17227_v31 = vadd.f32 %v17005_v4, %v7518_v24  ;;  %v6982_v54 = vadd.f32 %v6981_v51, %v6923_v27  ;;  %v6867_v48 = vadd.f32 %v6866_v45, %v18896_v0  ;;  %v11770_v51 = vld [vmem:[%s18711_s8 + $0x3f8] sm:$0xf]  ;;  %v18897_v27 = vld [vmem:[#allocation36_spill] sm:$0xff] }
 0x8a0   : > { %v6986_v3 = vpop.f32.mrf.mxu3  ;;  %v7592_v17 = vadd.f32 %v17002_v30, %v7523_v38 }
 0x8a1   : > { %v7041_v26 = vadd.f32 %v7040_v32, %v6982_v54  ;;  %7091 = vmatmul.bf16.gmra.mxu1 %v18861_v1  ;;  %7150 = vmatmul.bf16.gmra.mxu2 %v18862_v13  ;;  %v13083_v32 = vld [vmem:[%s18711_s8 + $0x400] sm:$0xf0]  ;;  %v17241_v1 = vpack.c.b16 %v7879_v52, %v7876_v8  ;;  %v17243_v13 = vpack.c.b16 %v7880_v57, %v7877_v20  ;;  %v11948_v54 = vld [vmem:[%s18713_s10 + $0xe0] sm:$0xf]  ;;  %v7457_v52 = vmax.f32 %v16865_v6, 0.0 }
 0x8a2   : > { %v17232_v40 = vpop.f32.mrf.mxu0  ;;  %v11771_v28 = vor.u32 %v13083_v32, %v11770_v51  ;;  %v13110_v51 = vld [vmem:[%s18713_s10 + $0x54] sm:$0xf0]  ;;  %v11940_v6 = vld [vmem:[%s18713_s10 + $0xd0] sm:$0xf] }
 0x8a3   : > { %v7452_v59 = vmax.f32 %v7041_v26, 0.0  ;;  %v11949_v26 = vor.u32 %v13128_v35, %v11948_v54  ;;  %v7526_v63 = vmul.f32 %v16995_v18, %v7457_v52  ;;  %v11860_v54 = vld [vmem:[%s18713_s10 + $0x30] sm:$0xf]  ;;  %v13106_v35 = vld [vmem:[%s18713_s10 + $0x34] sm:$0xf0] }
 0x8a4   : > { %v6925_v56 = vpop.f32.mrf.mxu2  ;;  %7358 = vmatpush.bf16.msra.mxu2 %v11771_v28 }
 0x8a5   : > { %v7521_v21 = vmul.f32 %v17000_v23, %v7452_v59  ;;  %v6926_v22 = vadd.f32 %v6925_v56, %v6867_v48  ;;  %7214 = vmatmul.bf16.gmra.mxu3 %v18874_v19  ;;  %7273 = vmatmul.bf16.gmra.mxu0 %v18875_v5  ;;  %v11876_v48 = vld [vmem:[%s18713_s10 + $0x50] sm:$0xf] }
 0x8a6   : > { %v6868_v62 = vpop.f32.mrf.mxu1  ;;  %v11877_v56 = vor.u32 %v13110_v51, %v11876_v48  ;;  %v11662_v51 = vld [vmem:[%s18711_s8 + $0x320] sm:$0xf] }
 0x8a7   : > { %v17259_v60 = vadd.f32 %v17005_v4, %v7521_v21  ;;  %v6985_v7 = vadd.f32 %v6984_v9, %v6926_v22  ;;  %v13130_v9 = vld [vmem:[%s18713_s10 + $0xf4] sm:$0xf0]  ;;  %v6869_v15 = vadd.f32 %v6868_v62, %v18897_v27  ;;  %v11758_v62 = vld [vmem:[%s18711_s8 + $0x3e0] sm:$0xf] }
 0x8a8   : > { %v17270_v58 = vpop.f32.mrf.mxu3  ;;  %v11957_v43 = vor.u32 %v13130_v9, %v11956_v37 }
 0x8a9   : > { %v7044_v39 = vadd.f32 %v17198_v10, %v6985_v7  ;;  %v11885_v10 = vor.u32 %v13112_v47, %v11884_v16  ;;  %v11868_v7 = vld [vmem:[%s18713_s10 + $0x40] sm:$0xf]  ;;  %v7595_v47 = vadd.f32 %v17002_v30, %v7526_v63 }
 0x8aa   : > { %v17276_v61 = vpop.f32.mrf.mxu0  ;;  %8242 = vmatpush.bf16.msrb.mxu0 %v11957_v43  ;;  %v11869_v9 = vor.u32 %v13108_v34, %v11868_v7  ;;  %v18899_v43 = vld [vmem:[#allocation39_spill] sm:$0xff] }
 0x8ab   : > { %v7455_v24 = vmax.f32 %v7044_v39, 0.0  ;;  %8209 = vmatpush.bf16.msrb.mxu3 %v11885_v10  ;;  %v13124_v39 = vld [vmem:[%s18713_s10 + $0xc4] sm:$0xf0]  ;;  %v7460_v38 = vmax.f32 %v18899_v43, 0.0 }
 0x8ac   : > { %v6927_v45 = vpop.f32.mrf.mxu2  ;;  %v11933_v27 = vor.u32 %v13124_v39, %v11932_v46 }
 0x8ad   : > { %v7524_v8 = vmul.f32 %v17000_v23, %v7455_v24  ;;  %v6928_v20 = vadd.f32 %v6927_v45, %v6869_v15  ;;  %v7800_v15 = vmax.f32 %v17224_v49, %v7592_v17  ;;  %v11924_v49 = vld [vmem:[%s18713_s10 + $0xb0] sm:$0xf] }
 0x8ae   : > { %v6871_v57 = vpop.f32.mrf.mxu1  ;;  %8243 = vmatpush.bf16.msrb.mxu0 %v11949_v26 }
 0x8af   : > { %v7593_v59 = vadd.f32 %v17005_v4, %v7524_v8  ;;  %v6987_v0 = vadd.f32 %v6986_v3, %v6928_v20  ;;  %v13126_v3 = vld [vmem:[%s18713_s10 + $0xd4] sm:$0xf0]  ;;  %8210 = vmatpush.bf16.msrb.mxu3 %v11877_v56  ;;  %v6872_v50 = vadd.f32 %v6871_v57, %v18898_v36  ;;  %v11861_v8 = vor.u32 %v13106_v35, %v11860_v54 }
 0x8b0   : > { %v17305_v32 = vpop.f32.mrf.mxu3  ;;  %v11941_v25 = vor.u32 %v13126_v3, %v11940_v6  ;;  %v7529_v57 = vmul.f32 %v16995_v18, %v7460_v38  ;;  %v13056_v6 = vld [vmem:[%s18711_s8 + $0x328] sm:$0xf0]  ;;  %v11908_v38 = vld [vmem:[%s18713_s10 + $0x90] sm:$0xf] }
 0x8b1   : > { %v7046_v28 = vadd.f32 %v17217_v14, %v6987_v0  ;;  %7096 = vmatmul.bf16.gmra.mxu1 %v18869_v44  ;;  %7155 = vmatmul.bf16.gmra.mxu2 %v18870_v11  ;;  %v13080_v14 = vld [vmem:[%s18711_s8 + $0x3e8] sm:$0xf0]  ;;  %v7801_v16 = vmax.f32 %v17227_v31, %v7593_v59  ;;  %v18900_v0 = vld [vmem:[#allocation14_spill] sm:$0xff]  ;;  %v11663_v3 = vor.u32 %v13056_v6, %v11662_v51 }
 0x8b2   : > { %v17314_v21 = vpop.f32.mrf.mxu0  ;;  %8244 = vmatpush.bf16.msrb.mxu0 %v11941_v25  ;;  %v11759_v11 = vor.u32 %v13080_v14, %v11758_v62  ;;  %v11916_v25 = vld [vmem:[%s18713_s10 + $0xa0] sm:$0xf]  ;;  %v7803_v62 = vmax.f32 %v17256_v29, %v7595_v47  ;;  %v18901_v14 = vld [vmem:[#allocation16_spill] sm:$0xff]  ;;  %v17388_v46 = vadd.f32 %v17002_v30, %v7529_v57  ;;  %v11746_v29 = vld [vmem:[%s18711_s8 + $0x3c8] sm:$0xf] }
 0x8b3   : > { %v7458_v22 = vmax.f32 %v7046_v28, 0.0  ;;  %8211 = vmatpush.bf16.msrb.mxu3 %v11869_v9  ;;  %v17358_v20 = vpack.c.bf16 %v7801_v16, %v7800_v15  ;;  %v13104_v28 = vld [vmem:[%s18713_s10 + $0x24] sm:$0xf0]  ;;  %7300 = vmatpush.bf16.msra.mxu1 %v11663_v3  ;;  %v13077_v9 = vld [vmem:[%s18711_s8 + $0x3d0] sm:$0xf0] }
 0x8b4   : > { %v6930_v44 = vpop.f32.mrf.mxu2  ;;  %7359 = vmatpush.bf16.msra.mxu2 %v11759_v11  ;;  %v11747_v43 = vor.u32 %v13077_v9, %v11746_v29  ;;  %v18902_v57 = vld [vmem:[#allocation15_spill] sm:$0xff]  ;;  %v18906_v9 = vld [vmem:[#allocation42_spill] sm:$0xff] }
 0x8b5   : > { %v7527_v37 = vmul.f32 %v17000_v23, %v7458_v22  ;;  %v6931_v53 = vadd.f32 %v6930_v44, %v6872_v50  ;;  %7219 = vmatmul.bf16.gmra.mxu3 %v18881_v41  ;;  %7278 = vmatmul.bf16.gmra.mxu0 %v18882_v2  ;;  %v13120_v50 = vld [vmem:[%s18713_s10 + $0xa4] sm:$0xf0]  ;;  %v7463_v44 = vmax.f32 %v18901_v14, 0.0  ;;  %v7892_v15 = vunpack.c.l.b16 %v17358_v20 }
 0x8b6   : > { %v6873_v24 = vpop.f32.mrf.mxu1  ;;  %8245 = vmatpush.bf16.msrb.mxu0 %v11933_v27  ;;  %v11917_v7 = vor.u32 %v13120_v50, %v11916_v25  ;;  %v7893_v54 = vunpack.c.h.b16 %v17358_v20  ;;  %v18903_v25 = vld [vmem:[#allocation19_spill] sm:$0xff]  ;;  %v18905_v50 = vld [vmem:[#allocation17_spill] sm:$0xff] }
 0x8b7   : > { %v7596_v45 = vadd.f32 %v17005_v4, %v7527_v37  ;;  %v6990_v10 = vadd.f32 %v17270_v58, %v6931_v53  ;;  %v13122_v58 = vld [vmem:[%s18713_s10 + $0xb4] sm:$0xf0]  ;;  %v6874_v48 = vadd.f32 %v6873_v24, %v18900_v0  ;;  %8212 = vmatpush.bf16.msrb.mxu3 %v11861_v8  ;;  %v11900_v8 = vld [vmem:[%s18713_s10 + $0x80] sm:$0xf]  ;;  %v7532_v20 = vmul.f32 %v16995_v18, %v7463_v44 }
 0x8b8   : > { %v17353_v31 = vpop.f32.mrf.mxu3  ;;  %v11925_v52 = vor.u32 %v13122_v58, %v11924_v49  ;;  %v13118_v24 = vld [vmem:[%s18713_s10 + $0x94] sm:$0xf0]  ;;  %7360 = vmatpush.bf16.msra.mxu2 %v11747_v43 }
 0x8b9   : > { %v7049_v26 = vadd.f32 %v17232_v40, %v6990_v10  ;;  %v11852_v40 = vld [vmem:[%s18713_s10 + $0x20] sm:$0xf]  ;;  %v7804_v34 = vmax.f32 %v17259_v60, %v7596_v45  ;;  %v11844_v60 = vld [vmem:[%s18713_s10 + $0x10] sm:$0xf]  ;;  %v11650_v45 = vld [vmem:[%s18711_s8 + $0x308] sm:$0xf]  ;;  %v11909_v49 = vor.u32 %v13118_v24, %v11908_v38 }
 0x8ba   : > { %v17362_v17 = vpop.f32.mrf.mxu0  ;;  %8246 = vmatpush.bf16.msrb.mxu0 %v11925_v52  ;;  %v11853_v36 = vor.u32 %v13104_v28, %v11852_v40  ;;  %v13053_v10 = vld [vmem:[%s18711_s8 + $0x310] sm:$0xf0]  ;;  %v18907_v24 = vld [vmem:[#allocation18_spill] sm:$0xff] }
 0x8bb   : > { %v7461_v59 = vmax.f32 %v7049_v26, 0.0  ;;  %v7808_v27 = vpack.c.bf16 %v7804_v34, %v7803_v62  ;;  %v7466_v62 = vmax.f32 %v18905_v50, 0.0 }
 0x8bc   : > { %v6932_v56 = vpop.f32.mrf.mxu2  ;;  %8213 = vmatpush.bf16.msrb.mxu3 %v11853_v36  ;;  %v7601_v36 = vadd.f32 %v17002_v30, %v7532_v20  ;;  %v18909_v20 = vld [vmem:[#allocation22_spill] sm:$0xff] }
 0x8bd   : > { %v7530_v63 = vmul.f32 %v17000_v23, %v7461_v59  ;;  %v6933_v22 = vadd.f32 %v6932_v56, %v6874_v48  ;;  %v7895_v58 = vunpack.c.l.b16 %v7808_v27  ;;  %v7896_v26 = vunpack.c.h.b16 %v7808_v27  ;;  %v13116_v48 = vld [vmem:[%s18713_s10 + $0x84] sm:$0xf0] }
 0x8be   : > { %v6876_v11 = vpop.f32.mrf.mxu1  ;;  %8247 = vmatpush.bf16.msrb.mxu0 %v11917_v7  ;;  %v11901_v6 = vor.u32 %v13116_v48, %v11900_v8  ;;  %v7469_v27 = vmax.f32 %v18907_v24, 0.0 }
 0x8bf   : > { %v17391_v37 = vadd.f32 %v17005_v4, %v7530_v63  ;;  %v6992_v53 = vadd.f32 %v17305_v32, %v6933_v22  ;;  %v13102_v32 = vld [vmem:[%s18713_s10 + $0x14] sm:$0xf0]  ;;  %v6877_v59 = vadd.f32 %v6876_v11, %v18902_v57  ;;  %v17439_v56 = vpack.c.b16 %v7895_v58, %v7892_v15  ;;  %v18904_v63 = vld [vmem:[#allocation20_spill] sm:$0xff] }
 0x8c0   : > { %v6996_v39 = vpop.f32.mrf.mxu3  ;;  %v11845_v47 = vor.u32 %v13102_v32, %v11844_v60  ;;  %v17441_v3 = vpack.c.b16 %v7896_v26, %v7893_v54  ;;  %v18908_v26 = vld [vmem:[#allocation21_spill] sm:$0xff] }
 0x8c1   : > { %v7051_v16 = vadd.f32 %v17276_v61, %v6992_v53  ;;  %7101 = vmatmul.bf16.gmra.mxu1 %v18874_v19  ;;  %7160 = vmatmul.bf16.gmra.mxu2 %v18875_v5  ;;  %v11651_v61 = vor.u32 %v13053_v10, %v11650_v45  ;;  %v11836_v19 = vld [vmem:[%s18713_s10] sm:$0xf]  ;;  %v13100_v5 = vld [vmem:[%s18713_s10 + $0x4] sm:$0xf0]  ;;  %v7535_v53 = vmul.f32 %v16995_v18, %v7466_v62 }
 0x8c2   : > { %v17423_v35 = vpop.f32.mrf.mxu0  ;;  %8214 = vmatpush.bf16.msrb.mxu3 %v11845_v47  ;;  %v11837_v0 = vor.u32 %v13100_v5, %v11836_v19  ;;  %8248 = vmatpush.bf16.msrb.mxu0 %v11909_v49  ;;  %v7538_v49 = vmul.f32 %v16995_v18, %v7469_v27 }
 0x8c3   : > { %v7464_v52 = vmax.f32 %v7051_v16, 0.0  ;;  %7301 = vmatpush.bf16.msra.mxu1 %v11651_v61 }
 0x8c4   : > { %v6935_v51 = vpop.f32.mrf.mxu2 }
 0x8c5   : > { %v7533_v40 = vmul.f32 %v17000_v23, %v7464_v52  ;;  %v6936_v28 = vadd.f32 %v6935_v51, %v6877_v59  ;;  %7224 = vmatmul.bf16.gmra.mxu3 %v18903_v25  ;;  %7283 = vmatmul.bf16.gmra.mxu0 %v18904_v63 }
 0x8c6   : > { %v6878_v22 = vpop.f32.mrf.mxu1  ;;  %8215 = vmatpush.bf16.msrb.mxu3 %v11837_v0  ;;  %8249 = vmatpush.bf16.msrb.mxu0 %v11901_v6 }
 0x8c7   : > { %v7602_v14 = vadd.f32 %v17005_v4, %v7533_v40  ;;  %v6995_v44 = vadd.f32 %v17353_v31, %v6936_v28  ;;  %v6879_v60 = vadd.f32 %v6878_v22, %v18906_v9  ;;  %v7604_v31 = vadd.f32 %v17002_v30, %v7535_v53 }
 0x8c8   : > { %v7185_v11 = vpop.f32.mrf.mxu3 }
 0x8c9   : > { %v7054_v7 = vadd.f32 %v17314_v21, %v6995_v44  ;;  %v13939_v21 = vld [vmem:[%s18712_s9] ss:$4 sm:$0x7] }
 0x8ca   : > { %v7246_v34 = vpop.f32.mrf.mxu0  ;;  %v17460_v45 = vperm.slane %v13939_v21, 2 }
 0x8cb   : > { %v7467_v29 = vmax.f32 %v7054_v7, 0.0 }
 0x8cc   : > { %v6937_v43 = vpop.f32.mrf.mxu2 }
 0x8cd   : > { %v7536_v32 = vmul.f32 %v17000_v23, %v7467_v29  ;;  %v6938_v38 = vadd.f32 %v6937_v43, %v6879_v60 }
 0x8ce   : > { %v7067_v15 = vpop.f32.mrf.mxu1 }
 0x8cf   : > { %v7605_v16 = vadd.f32 %v17005_v4, %v7536_v32  ;;  %v6997_v47 = vadd.f32 %v6996_v39, %v6938_v38  ;;  %v7068_v5 = vadd.f32 %v7067_v15, %v17460_v45 }
 0x8d0   : > { %v7187_v10 = vpop.f32.mrf.mxu3 }
 0x8d1   : > { %v7056_v54 = vadd.f32 %v17362_v17, %v6997_v47  ;;  %7106 = vmatmul.bf16.gmra.mxu1 %v18881_v41  ;;  %7165 = vmatmul.bf16.gmra.mxu2 %v18882_v2  ;;  %v7830_v17 = vmax.f32 %v17388_v46, %v7604_v31  ;;  %v7831_v41 = vmax.f32 %v17391_v37, %v7605_v16  ;;  %v18910_v16 = vld [vmem:[#allocation23_spill] sm:$0xff]  ;;  %v18911_v47 = vld [vmem:[#allocation24_spill] sm:$0xff] }
 0x8d2   : > { %v7249_v61 = vpop.f32.mrf.mxu0  ;;  %v7607_v2 = vadd.f32 %v17002_v30, %v7538_v49 }
 0x8d3   : > { %v7470_v19 = vmax.f32 %v7056_v54, 0.0  ;;  %v7836_v0 = vpack.c.bf16 %v7831_v41, %v7830_v17  ;;  %v11886_v41 = vld [vmem:[%s18713_s10 + $0x68] sm:$0xf0] }
 0x8d4   : > { %v7126_v39 = vpop.f32.mrf.mxu2  ;;  %v7833_v28 = vmax.f32 %v7601_v36, %v7607_v2 }
 0x8d5   : > { %v7539_v8 = vmul.f32 %v17000_v23, %v7470_v19  ;;  %v7127_v58 = vadd.f32 %v7126_v39, %v7068_v5  ;;  %7229 = vmatmul.bf16.gmra.mxu3 %v18908_v26  ;;  %7288 = vmatmul.bf16.gmra.mxu0 %v18909_v20  ;;  %v7908_v30 = vunpack.c.l.b16 %v7836_v0  ;;  %v7909_v44 = vunpack.c.h.b16 %v7836_v0  ;;  %v13113_v39 = vld [vmem:[%s18713_s10 + $0x74] sm:$0xf] }
 0x8d6   : > { %v7069_v52 = vpop.f32.mrf.mxu1 }
 0x8d7   : > { %v7608_v18 = vadd.f32 %v17005_v4, %v7539_v8  ;;  %v7186_v57 = vadd.f32 %v7185_v11, %v7127_v58  ;;  %v7070_v51 = vadd.f32 %v7069_v52, %v17460_v45  ;;  %v11894_v8 = vld [vmem:[%s18713_s10 + $0x78] sm:$0xf0]  ;;  %v13111_v52 = vld [vmem:[%s18713_s10 + $0x64] sm:$0xf] }
 0x8d8   : > { %v7190_v59 = vpop.f32.mrf.mxu3  ;;  %v11897_v26 = vor.u32 %v13113_v39, %v11894_v8  ;;  %v18915_v39 = vld [vmem:[#allocation28_spill] sm:$0xff] }
 0x8d9   : > { %v17475_v48 = vadd.f32 %v17423_v35, %v7186_v57  ;;  %v7834_v46 = vmax.f32 %v7602_v14, %v7608_v18  ;;  %v11889_v18 = vor.u32 %v13111_v52, %v11886_v41  ;;  %v11838_v52 = vld [vmem:[%s18713_s10 + $0x8] sm:$0xf0] }
 0x8da   : > { %v7251_v23 = vpop.f32.mrf.mxu0  ;;  %8310 = vmatpush.bf16.msra.mxu0 %v11897_v26  ;;  %v13099_v26 = vld [vmem:[%s18713_s10 + $0x4] sm:$0xf] }
 0x8db   : > { %v7838_v37 = vpack.c.bf16 %v7834_v46, %v7833_v28  ;;  %v18912_v46 = vld [vmem:[#allocation25_spill] sm:$0xff] }
 0x8dc   : > { %v7128_v6 = vpop.f32.mrf.mxu2 }
 0x8dd   : > { %v7129_v40 = vadd.f32 %v7128_v6, %v7070_v51  ;;  %v7911_v4 = vunpack.c.l.b16 %v7838_v37  ;;  %v7912_v35 = vunpack.c.h.b16 %v7838_v37  ;;  %v13109_v51 = vld [vmem:[%s18713_s10 + $0x54] sm:$0xf]  ;;  %v11878_v6 = vld [vmem:[%s18713_s10 + $0x58] sm:$0xf0] }
 0x8de   : > { %v7072_v22 = vpop.f32.mrf.mxu1  ;;  %8311 = vmatpush.bf16.msra.mxu0 %v11889_v18  ;;  %v11881_v28 = vor.u32 %v13109_v51, %v11878_v6 }
 0x8df   : > { %v7188_v50 = vadd.f32 %v7187_v10, %v7129_v40  ;;  %v7073_v53 = vadd.f32 %v7072_v22, %v17460_v45  ;;  %v17483_v29 = vpack.c.b16 %v7911_v4, %v7908_v30  ;;  %v17485_v36 = vpack.c.b16 %v7912_v35, %v7909_v44  ;;  %v18913_v22 = vld [vmem:[#allocation26_spill] sm:$0xff]  ;;  %v11870_v30 = vld [vmem:[%s18713_s10 + $0x48] sm:$0xf0] }
 0x8e0   : > { %v7192_v62 = vpop.f32.mrf.mxu3 }
 0x8e1   : > { %7111 = vmatmul.bf16.gmra.mxu1 %v18903_v25  ;;  %7170 = vmatmul.bf16.gmra.mxu2 %v18904_v63  ;;  %v17480_v11 = vadd.f32 %v7246_v34, %v7188_v50 }
 0x8e2   : > { %v7254_v7 = vpop.f32.mrf.mxu0  ;;  %8312 = vmatpush.bf16.msra.mxu0 %v11881_v28 }
 0x8e4   : > { %v7131_v14 = vpop.f32.mrf.mxu2 }
 0x8e5   : > { %v7132_v9 = vadd.f32 %v7131_v14, %v7073_v53  ;;  %8216 = vmatmul.bf16.vlgmr.msrb.gmra.mxu3 %v17093_v33  ;;  %8250 = vmatmul.bf16.vlgmr.msrb.gmra.mxu0 %v17095_v12 }
 0x8e6   : > { %v7074_v25 = vpop.f32.mrf.mxu1 }
 0x8e7   : > { %v7191_v63 = vadd.f32 %v7190_v59, %v7132_v9  ;;  %v7075_v32 = vadd.f32 %v7074_v25, %v17460_v45  ;;  %v13105_v9 = vld [vmem:[%s18713_s10 + $0x34] sm:$0xf]  ;;  %v11862_v25 = vld [vmem:[%s18713_s10 + $0x38] sm:$0xf0] }
 0x8e8   : > { %v7195_v60 = vpop.f32.mrf.mxu3 }
 0x8e9   : > { %v17489_v43 = vadd.f32 %v7249_v61, %v7191_v63 }
 0x8ea   : > { %v7256_v34 = vpop.f32.mrf.mxu0 }
 0x8ec   : > { %v7133_v38 = vpop.f32.mrf.mxu2 }
 0x8ed   : > { %v7134_v24 = vadd.f32 %v7133_v38, %v7075_v32  ;;  %v13103_v38 = vld [vmem:[%s18713_s10 + $0x24] sm:$0xf] }
 0x8ee   : > { %v7077_v27 = vpop.f32.mrf.mxu1 }
 0x8ef   : > { %v7193_v15 = vadd.f32 %v7192_v62, %v7134_v24  ;;  %v7078_v54 = vadd.f32 %v7077_v27, %v17460_v45  ;;  %v13107_v62 = vld [vmem:[%s18713_s10 + $0x44] sm:$0xf]  ;;  %v11854_v24 = vld [vmem:[%s18713_s10 + $0x28] sm:$0xf0] }
 0x8f0   : > { %v7197_v31 = vpop.f32.mrf.mxu3  ;;  %v11873_v44 = vor.u32 %v13107_v62, %v11870_v30  ;;  %v18916_v30 = vld [vmem:[#allocation29_spill] sm:$0xff] }
 0x8f1   : > { %7302 = vmatmul.bf16.vlgmr.msra.gmra.mxu1 %v18910_v16  ;;  %7361 = vmatmul.bf16.vlgmr.msra.gmra.mxu2 %v18911_v47  ;;  %v17494_v21 = vadd.f32 %v7251_v23, %v7193_v15  ;;  %v11857_v15 = vor.u32 %v13103_v38, %v11854_v24 }
 0x8f2   : > { %v7259_v10 = vpop.f32.mrf.mxu0  ;;  %8313 = vmatpush.bf16.msra.mxu0 %v11873_v44 }
 0x8f4   : > { %v7136_v49 = vpop.f32.mrf.mxu2 }
 0x8f5   : > { %v7137_v61 = vadd.f32 %v7136_v49, %v7078_v54  ;;  %8221 = vmatmul.bf16.gmra.mxu3 %v17169_v42  ;;  %8255 = vmatmul.bf16.gmra.mxu0 %v17171_v55  ;;  %v11846_v49 = vld [vmem:[%s18713_s10 + $0x18] sm:$0xf0] }
 0x8f6   : > { %v7079_v19 = vpop.f32.mrf.mxu1 }
 0x8f7   : > { %v7196_v5 = vadd.f32 %v7195_v60, %v7137_v61  ;;  %v7080_v2 = vadd.f32 %v7079_v19, %v17460_v45  ;;  %v11865_v60 = vor.u32 %v13105_v9, %v11862_v25 }
 0x8f8   : > { %v7200_v58 = vpop.f32.mrf.mxu3 }
 0x8f9   : > { %v17505_v20 = vadd.f32 %v7254_v7, %v7196_v5  ;;  %8314 = vmatpush.bf16.msra.mxu0 %v11865_v60  ;;  %v18914_v5 = vld [vmem:[#allocation27_spill] sm:$0xff] }
 0x8fa   : > { %v7261_v17 = vpop.f32.mrf.mxu0 }
 0x8fc   : > { %v7138_v57 = vpop.f32.mrf.mxu2 }
 0x8fd   : > { %v7139_v59 = vadd.f32 %v7138_v57, %v7080_v2  ;;  %8315 = vmatpush.bf16.msra.mxu0 %v11857_v15  ;;  %v11841_v2 = vor.u32 %v13099_v26, %v11838_v52 }
 0x8fe   : > { %v7082_v0 = vpop.f32.mrf.mxu1 }
 0x8ff   : > { %v7198_v23 = vadd.f32 %v7197_v31, %v7139_v59  ;;  %v7083_v4 = vadd.f32 %v7082_v0, %v17460_v45 }
 0x900   : > { %v7202_v40 = vpop.f32.mrf.mxu3 }
 0x901   : > { %7307 = vmatmul.bf16.gmra.mxu1 %v18912_v46  ;;  %7366 = vmatmul.bf16.gmra.mxu2 %v18913_v22  ;;  %v17522_v50 = vadd.f32 %v7256_v34, %v7198_v23 }
 0x902   : > { %v7264_v37 = vpop.f32.mrf.mxu0 }
 0x904   : > { %v7141_v35 = vpop.f32.mrf.mxu2 }
 0x905   : > { %v7142_v7 = vadd.f32 %v7141_v35, %v7083_v4  ;;  %8226 = vmatmul.bf16.gmra.mxu3 %v17241_v1  ;;  %8260 = vmatmul.bf16.gmra.mxu0 %v17243_v13  ;;  %v18917_v4 = vld [vmem:[#allocation30_spill] sm:$0xff] }
 0x906   : > { %v7084_v53 = vpop.f32.mrf.mxu1 }
 0x907   : > { %v7201_v14 = vadd.f32 %v7200_v58, %v7142_v7  ;;  %v7085_v27 = vadd.f32 %v7084_v53, %v17460_v45 }
 0x908   : > { %v7205_v63 = vpop.f32.mrf.mxu3 }
 0x909   : > { %v17539_v34 = vadd.f32 %v7259_v10, %v7201_v14  ;;  %v13101_v10 = vld [vmem:[%s18713_s10 + $0x14] sm:$0xf] }
 0x90a   : > { %v7266_v32 = vpop.f32.mrf.mxu0  ;;  %v11849_v19 = vor.u32 %v13101_v10, %v11846_v49 }
 0x90c   : > { %v7143_v31 = vpop.f32.mrf.mxu2  ;;  %8316 = vmatpush.bf16.msra.mxu0 %v11849_v19 }
 0x90d   : > { %v7144_v16 = vadd.f32 %v7143_v31, %v7085_v27 }
 0x90e   : > { %v7087_v47 = vpop.f32.mrf.mxu1 }
 0x90f   : > { %v7203_v54 = vadd.f32 %v7202_v40, %v7144_v16  ;;  %v7088_v41 = vadd.f32 %v7087_v47, %v17460_v45  ;;  %v18918_v16 = vld [vmem:[#allocation31_spill] sm:$0xff]  ;;  %v18919_v47 = vld [vmem:[#allocation32_spill] sm:$0xff] }
 0x910   : > { %v7207_v61 = vpop.f32.mrf.mxu3  ;;  %8317 = vmatpush.bf16.msra.mxu0 %v11841_v2 }
 0x911   : > { %7312 = vmatmul.bf16.gmra.mxu1 %v18914_v5  ;;  %7371 = vmatmul.bf16.gmra.mxu2 %v18915_v39  ;;  %v17556_v8 = vadd.f32 %v7261_v17, %v7203_v54 }
 0x912   : > { %v7269_v58 = vpop.f32.mrf.mxu0 }
 0x914   : > { %v7146_v18 = vpop.f32.mrf.mxu2 }
 0x915   : > { %v7147_v57 = vadd.f32 %v7146_v18, %v7088_v41  ;;  %8231 = vmatmul.bf16.gmra.mxu3 %v17439_v56  ;;  %8265 = vmatmul.bf16.gmra.mxu0 %v17441_v3 }
 0x916   : > { %v7089_v17 = vpop.f32.mrf.mxu1 }
 0x917   : > { %v7206_v59 = vadd.f32 %v7205_v63, %v7147_v57  ;;  %v7090_v6 = vadd.f32 %v7089_v17, %v17460_v45 }
 0x918   : > { %v7210_v0 = vpop.f32.mrf.mxu3 }
 0x919   : > { %v17567_v23 = vadd.f32 %v7264_v37, %v7206_v59 }
 0x91a   : > { %v7271_v51 = vpop.f32.mrf.mxu0 }
 0x91c   : > { %v7148_v40 = vpop.f32.mrf.mxu2 }
 0x91d   : > { %v7149_v28 = vadd.f32 %v7148_v40, %v7090_v6 }
 0x91e   : > { %v7092_v46 = vpop.f32.mrf.mxu1 }
 0x91f   : > { %v7208_v22 = vadd.f32 %v7207_v61, %v7149_v28  ;;  %v7093_v7 = vadd.f32 %v7092_v46, %v17460_v45 }
 0x920   : > { %v7212_v62 = vpop.f32.mrf.mxu3 }
 0x921   : > { %7317 = vmatmul.bf16.gmra.mxu1 %v18916_v30  ;;  %7376 = vmatmul.bf16.gmra.mxu2 %v18917_v4  ;;  %v17572_v44 = vadd.f32 %v7266_v32, %v7208_v22  ;;  %v12196_v4 = vld [vmem:[%s18713_s10 + $0x270] sm:$0xf] }
 0x922   : > { %v7274_v35 = vpop.f32.mrf.mxu0 }
 0x924   : > { %v7151_v53 = vpop.f32.mrf.mxu2 }
 0x925   : > { %v7152_v37 = vadd.f32 %v7151_v53, %v7093_v7  ;;  %8236 = vmatmul.bf16.gmra.mxu3 %v17483_v29  ;;  %8270 = vmatmul.bf16.gmra.mxu0 %v17485_v36 }
 0x926   : > { %v7094_v14 = vpop.f32.mrf.mxu1 }
 0x927   : > { %v7211_v9 = vadd.f32 %v7210_v0, %v7152_v37  ;;  %v7095_v38 = vadd.f32 %v7094_v14, %v17460_v45  ;;  %v18920_v0 = vld [vmem:[#allocation33_spill] sm:$0xff] }
 0x928   : > { %v7215_v25 = vpop.f32.mrf.mxu3 }
 0x929   : > { %v17577_v63 = vadd.f32 %v7269_v58, %v7211_v9  ;;  %v12188_v9 = vld [vmem:[%s18713_s10 + $0x260] sm:$0xf] }
 0x92a   : > { %v7276_v60 = vpop.f32.mrf.mxu0 }
 0x92c   : > { %v7153_v24 = vpop.f32.mrf.mxu2 }
 0x92d   : > { %v7154_v32 = vadd.f32 %v7153_v24, %v7095_v38 }
 0x92e   : > { %v7097_v27 = vpop.f32.mrf.mxu1 }
 0x92f   : > { %v7213_v15 = vadd.f32 %v7212_v62, %v7154_v32  ;;  %v7098_v49 = vadd.f32 %v7097_v27, %v17460_v45 }
 0x930   : > { %v7217_v31 = vpop.f32.mrf.mxu3 }
 0x931   : > { %7322 = vmatmul.bf16.gmra.mxu1 %v18918_v16  ;;  %7381 = vmatmul.bf16.gmra.mxu2 %v18919_v47  ;;  %v17582_v54 = vadd.f32 %v7271_v51, %v7213_v15  ;;  %v18921_v51 = vld [vmem:[#allocation34_spill] sm:$0xff]  ;;  %v13174_v16 = vld [vmem:[%s18713_s10 + $0x254] sm:$0xf0] }
 0x932   : > { %v7279_v10 = vpop.f32.mrf.mxu0 }
 0x934   : > { %v7156_v61 = vpop.f32.mrf.mxu2 }
 0x935   : > { %v7157_v19 = vadd.f32 %v7156_v61, %v7098_v49  ;;  %8318 = vmatmul.bf16.vlgmr.msra.gmra.mxu0 %v17093_v33  ;;  %v18922_v49 = vld [vmem:[#allocation37_spill] sm:$0xff]  ;;  %v18923_v61 = vld [vmem:[#allocation38_spill] sm:$0xff] }
 0x936   : > { %v7099_v5 = vpop.f32.mrf.mxu1 }
 0x937   : > { %v7216_v39 = vadd.f32 %v7215_v25, %v7157_v19  ;;  %v7100_v41 = vadd.f32 %v7099_v5, %v17460_v45  ;;  %v13176_v25 = vld [vmem:[%s18713_s10 + $0x264] sm:$0xf0] }
 0x938   : > { %v7220_v58 = vpop.f32.mrf.mxu3  ;;  %v12189_v38 = vor.u32 %v13176_v25, %v12188_v9  ;;  %v13125_v25 = vld [vmem:[%s18713_s10 + $0xd4] sm:$0xf] }
 0x939   : > { %v17586_v26 = vadd.f32 %v7274_v35, %v7216_v39  ;;  %v13178_v35 = vld [vmem:[%s18713_s10 + $0x274] sm:$0xf0]  ;;  %v13129_v39 = vld [vmem:[%s18713_s10 + $0xf4] sm:$0xf] }
 0x93a   : > { %v7281_v52 = vpop.f32.mrf.mxu0  ;;  %v12197_v53 = vor.u32 %v13178_v35, %v12196_v4  ;;  %v13170_v4 = vld [vmem:[%s18713_s10 + $0x234] sm:$0xf0] }
 0x93c   : > { %v7158_v2 = vpop.f32.mrf.mxu2  ;;  %8735 = vmatpush.bf16.msrb.mxu0 %v12197_v53 }
 0x93d   : > { %v7159_v18 = vadd.f32 %v7158_v2, %v7100_v41  ;;  %v12172_v41 = vld [vmem:[%s18713_s10 + $0x240] sm:$0xf] }
 0x93e   : > { %v7102_v57 = vpop.f32.mrf.mxu1 }
 0x93f   : > { %v7218_v17 = vadd.f32 %v7217_v31, %v7159_v18  ;;  %v7103_v28 = vadd.f32 %v7102_v57, %v17460_v45  ;;  %v12180_v31 = vld [vmem:[%s18713_s10 + $0x250] sm:$0xf] }
 0x940   : > { %v7222_v59 = vpop.f32.mrf.mxu3  ;;  %8736 = vmatpush.bf16.msrb.mxu0 %v12189_v38  ;;  %v12156_v38 = vld [vmem:[%s18713_s10 + $0x220] sm:$0xf] }
 0x941   : > { %7327 = vmatmul.bf16.gmra.mxu1 %v18920_v0  ;;  %7386 = vmatmul.bf16.gmra.mxu2 %v18921_v51  ;;  %v17591_v6 = vadd.f32 %v7276_v60, %v7218_v17 }
 0x942   : > { %v7284_v40 = vpop.f32.mrf.mxu0 }
 0x944   : > { %v7161_v46 = vpop.f32.mrf.mxu2 }
 0x945   : > { %v7162_v22 = vadd.f32 %v7161_v46, %v7103_v28  ;;  %8323 = vmatmul.bf16.gmra.mxu0 %v17169_v42  ;;  %v13127_v28 = vld [vmem:[%s18713_s10 + $0xe4] sm:$0xf]  ;;  %v11950_v46 = vld [vmem:[%s18713_s10 + $0xe8] sm:$0xf0] }
 0x946   : > { %v7104_v62 = vpop.f32.mrf.mxu1 }
 0x947   : > { %v7221_v30 = vadd.f32 %v7220_v58, %v7162_v22  ;;  %v7105_v60 = vadd.f32 %v7104_v62, %v17460_v45  ;;  %v11958_v58 = vld [vmem:[%s18713_s10 + $0xf8] sm:$0xf0]  ;;  %v11953_v62 = vor.u32 %v13127_v28, %v11950_v46  ;;  %v13164_v46 = vld [vmem:[%s18713_s10 + $0x204] sm:$0xf0] }
 0x948   : > { %v7225_v7 = vpop.f32.mrf.mxu3  ;;  %v11961_v18 = vor.u32 %v13129_v39, %v11958_v58 }
 0x949   : > { %v17601_v37 = vadd.f32 %v7279_v10, %v7221_v30  ;;  %v12181_v10 = vor.u32 %v13174_v16, %v12180_v31  ;;  %v12164_v30 = vld [vmem:[%s18713_s10 + $0x230] sm:$0xf] }
 0x94a   : > { %v17603_v14 = vpop.f32.mrf.mxu0  ;;  %8344 = vmatpush.bf16.msrb.mxu1 %v11961_v18  ;;  %v12165_v35 = vor.u32 %v13170_v4, %v12164_v30 }
 0x94b   : > { %8737 = vmatpush.bf16.msrb.mxu0 %v12181_v10  ;;  %v13123_v10 = vld [vmem:[%s18713_s10 + $0xc4] sm:$0xf] }
 0x94c   : > { %v7163_v24 = vpop.f32.mrf.mxu2 }
 0x94d   : > { %v7164_v32 = vadd.f32 %v7163_v24, %v7105_v60  ;;  %v11942_v60 = vld [vmem:[%s18713_s10 + $0xd8] sm:$0xf0] }
 0x94e   : > { %v7107_v27 = vpop.f32.mrf.mxu1  ;;  %8345 = vmatpush.bf16.msrb.mxu1 %v11953_v62  ;;  %v11945_v24 = vor.u32 %v13125_v25, %v11942_v60  ;;  %v11918_v25 = vld [vmem:[%s18713_s10 + $0xa8] sm:$0xf0] }
 0x94f   : > { %v7223_v15 = vadd.f32 %v7222_v59, %v7164_v32  ;;  %v7108_v2 = vadd.f32 %v7107_v27, %v17460_v45  ;;  %v13168_v32 = vld [vmem:[%s18713_s10 + $0x224] sm:$0xf0] }
 0x950   : > { %v7227_v47 = vpop.f32.mrf.mxu3 }
 0x951   : > { %7332 = vmatmul.bf16.gmra.mxu1 %v18922_v49  ;;  %7391 = vmatmul.bf16.gmra.mxu2 %v18923_v61  ;;  %v17620_v19 = vadd.f32 %v7281_v52, %v7223_v15  ;;  %v13172_v52 = vld [vmem:[%s18713_s10 + $0x244] sm:$0xf0]  ;;  %v12157_v15 = vor.u32 %v13168_v32, %v12156_v38  ;;  %v11934_v49 = vld [vmem:[%s18713_s10 + $0xc8] sm:$0xf0]  ;;  %v12148_v61 = vld [vmem:[%s18713_s10 + $0x210] sm:$0xf] }
 0x952   : > { %v17622_v5 = vpop.f32.mrf.mxu0  ;;  %v12173_v17 = vor.u32 %v13172_v52, %v12172_v41  ;;  %8346 = vmatpush.bf16.msrb.mxu1 %v11945_v24  ;;  %v11937_v58 = vor.u32 %v13123_v10, %v11934_v49  ;;  %v13166_v41 = vld [vmem:[%s18713_s10 + $0x214] sm:$0xf0]  ;;  %v11910_v10 = vld [vmem:[%s18713_s10 + $0x98] sm:$0xf0] }
 0x953   : > { %v12149_v18 = vor.u32 %v13166_v41, %v12148_v61  ;;  %v12022_v49 = vld [vmem:[%s18713_s10 + $0x178] sm:$0xf0] }
 0x954   : > { %v7166_v57 = vpop.f32.mrf.mxu2  ;;  %8738 = vmatpush.bf16.msrb.mxu0 %v12173_v17 }
 0x955   : > { %v7167_v59 = vadd.f32 %v7166_v57, %v7108_v2  ;;  %8328 = vmatmul.bf16.gmra.mxu0 %v17241_v1  ;;  %v18925_v2 = vld [vmem:[#allocation41_spill] sm:$0xff] }
 0x956   : > { %v7109_v0 = vpop.f32.mrf.mxu1  ;;  %8347 = vmatpush.bf16.msrb.mxu1 %v11937_v58 }
 0x957   : > { %v7226_v51 = vadd.f32 %v7225_v7, %v7167_v59  ;;  %v7110_v9 = vadd.f32 %v7109_v0, %v17460_v45  ;;  %v13121_v59 = vld [vmem:[%s18713_s10 + $0xb4] sm:$0xf]  ;;  %v11926_v0 = vld [vmem:[%s18713_s10 + $0xb8] sm:$0xf0] }
 0x958   : > { %v7230_v22 = vpop.f32.mrf.mxu3  ;;  %8739 = vmatpush.bf16.msrb.mxu0 %v12165_v35 }
 0x959   : > { %v17650_v7 = vadd.f32 %v7284_v40, %v7226_v51  ;;  %v12140_v51 = vld [vmem:[%s18713_s10 + $0x200] sm:$0xf] }
 0x95a   : > { %v17652_v53 = vpop.f32.mrf.mxu0  ;;  %v12141_v30 = vor.u32 %v13164_v46, %v12140_v51  ;;  %v13143_v51 = vld [vmem:[%s18713_s10 + $0x164] sm:$0xf]  ;;  %v18927_v46 = vld [vmem:[#allocation44_spill] sm:$0xff] }
 0x95c   : > { %v7168_v40 = vpop.f32.mrf.mxu2  ;;  %8740 = vmatpush.bf16.msrb.mxu0 %v12157_v15  ;;  %v13146_v15 = vld [vmem:[%s18713_s10 + $0x174] sm:$0xf0] }
 0x95d   : > { %v7169_v27 = vadd.f32 %v7168_v40, %v7110_v9  ;;  %v13119_v9 = vld [vmem:[%s18713_s10 + $0xa4] sm:$0xf] }
 0x95e   : > { %v7112_v31 = vpop.f32.mrf.mxu1  ;;  %v11921_v38 = vor.u32 %v13119_v9, %v11918_v25  ;;  %v12004_v25 = vld [vmem:[%s18713_s10 + $0x150] sm:$0xf] }
 0x95f   : > { %v7228_v16 = vadd.f32 %v7227_v47, %v7169_v27  ;;  %v18924_v47 = vld [vmem:[#allocation40_spill] sm:$0xff]  ;;  %v7113_v17 = vadd.f32 %v7112_v31, %v17460_v45 }
 0x960   : > { %v7232_v39 = vpop.f32.mrf.mxu3  ;;  %8741 = vmatpush.bf16.msrb.mxu0 %v12149_v18  ;;  %v12020_v27 = vld [vmem:[%s18713_s10 + $0x170] sm:$0xf]  ;;  %v13117_v31 = vld [vmem:[%s18713_s10 + $0x94] sm:$0xf]  ;;  %v12012_v18 = vld [vmem:[%s18713_s10 + $0x160] sm:$0xf] }
 0x961   : > { %7337 = vmatmul.bf16.gmra.mxu1 %v18924_v47  ;;  %7396 = vmatmul.bf16.gmra.mxu2 %v18925_v2  ;;  %v17682_v52 = vadd.f32 %v17603_v14, %v7228_v16  ;;  %v11929_v14 = vor.u32 %v13121_v59, %v11926_v0  ;;  %v11913_v58 = vor.u32 %v13117_v31, %v11910_v10 }
 0x962   : > { %v8251_v57 = vpop.f32.mrf.mxu0 }
 0x963   : > { %8348 = vmatpush.bf16.msrb.mxu1 %v11929_v14  ;;  %v18926_v14 = vld [vmem:[#allocation43_spill] sm:$0xff] }
 0x964   : > { %v7171_v28 = vpop.f32.mrf.mxu2  ;;  %8742 = vmatpush.bf16.msrb.mxu0 %v12141_v30 }
 0x965   : > { %v7172_v62 = vadd.f32 %v7171_v28, %v7113_v17  ;;  %8333 = vmatmul.bf16.gmra.mxu0 %v17439_v56  ;;  %v13115_v17 = vld [vmem:[%s18713_s10 + $0x84] sm:$0xf]  ;;  %v12014_v28 = vld [vmem:[%s18713_s10 + $0x168] sm:$0xf0] }
 0x966   : > { %v7114_v4 = vpop.f32.mrf.mxu1  ;;  %v12017_v30 = vor.u32 %v13143_v51, %v12014_v28 }
 0x967   : > { %v7231_v35 = vadd.f32 %v7230_v22, %v7172_v62  ;;  %8349 = vmatpush.bf16.msrb.mxu1 %v11921_v38  ;;  %v7115_v22 = vadd.f32 %v7114_v4, %v17460_v45  ;;  %v13145_v45 = vld [vmem:[%s18713_s10 + $0x174] sm:$0xf] }
 0x968   : > { %v8217_v60 = vpop.f32.mrf.mxu3  ;;  %v12025_v41 = vor.u32 %v13145_v45, %v12022_v49  ;;  %v13141_v38 = vld [vmem:[%s18713_s10 + $0x154] sm:$0xf]  ;;  %v13941_v45 = vld [vmem:[%s18712_s9 + $0x2] ss:$4 sm:$0x7] }
 0x969   : > { %v17704_v40 = vadd.f32 %v8251_v57, %v8217_v60  ;;  %v17707_v24 = vadd.f32 %v17622_v5, %v7231_v35  ;;  %v12021_v5 = vor.u32 %v13146_v15, %v12020_v27  ;;  %v13144_v57 = vld [vmem:[%s18713_s10 + $0x164] sm:$0xf0]  ;;  %v13142_v60 = vld [vmem:[%s18713_s10 + $0x154] sm:$0xf0]  ;;  %v17777_v49 = vperm.slane %v13941_v45, 2  ;;  %v18929_v45 = vld [vmem:[#allocation46_spill] sm:$0xff] }
 0x96a   : > { %v17709_v32 = vpop.f32.mrf.mxu0  ;;  %8378 = vmatpush.bf16.msrb.mxu2 %v12025_v41  ;;  %v12013_v0 = vor.u32 %v13144_v57, %v12012_v18  ;;  %v12005_v27 = vor.u32 %v13142_v60, %v12004_v25  ;;  %v13940_v15 = vld [vmem:[%s18712_s9 + $0x1] ss:$4 sm:$0x7]  ;;  %v11998_v18 = vld [vmem:[%s18713_s10 + $0x148] sm:$0xf0] }
 0x96b   : > { %8276 = vmatpush.bf16.msra.mxu3 %v12021_v5  ;;  %8350 = vmatpush.bf16.msrb.mxu1 %v11913_v58  ;;  %v17771_v31 = vperm.slane %v13940_v15, 2  ;;  %v13140_v58 = vld [vmem:[%s18713_s10 + $0x144] sm:$0xf0]  ;;  %v13135_v15 = vld [vmem:[%s18713_s10 + $0x124] sm:$0xf] }
 0x96c   : > { %v7173_v16 = vpop.f32.mrf.mxu2 }
 0x96d   : > { %v7174_v61 = vadd.f32 %v7173_v16, %v7115_v22 }
 0x96e   : > { %v7303_v47 = vpop.f32.mrf.mxu1  ;;  %8379 = vmatpush.bf16.msrb.mxu2 %v12017_v30 }
 0x96f   : > { %v7233_v2 = vadd.f32 %v7232_v39, %v7174_v61  ;;  %v11902_v39 = vld [vmem:[%s18713_s10 + $0x88] sm:$0xf0]  ;;  %8277 = vmatpush.bf16.msra.mxu3 %v12013_v0  ;;  %v7304_v9 = vadd.f32 %v7303_v47, %v17475_v48  ;;  %v12006_v48 = vld [vmem:[%s18713_s10 + $0x158] sm:$0xf0]  ;;  %v11996_v61 = vld [vmem:[%s18713_s10 + $0x140] sm:$0xf] }
 0x970   : > { %v17739_v59 = vpop.f32.mrf.mxu3  ;;  %v11905_v62 = vor.u32 %v13115_v17, %v11902_v39  ;;  %v12009_v16 = vor.u32 %v13141_v38, %v12006_v48  ;;  %v11997_v47 = vor.u32 %v13140_v58, %v11996_v61 }
 0x971   : > { %7342 = vmatmul.bf16.gmra.mxu1 %v18926_v14  ;;  %7401 = vmatmul.bf16.gmra.mxu2 %v18927_v46  ;;  %v17753_v35 = vadd.f32 %v17652_v53, %v7233_v2  ;;  %v13139_v2 = vld [vmem:[%s18713_s10 + $0x144] sm:$0xf]  ;;  %v11988_v14 = vld [vmem:[%s18713_s10 + $0x130] sm:$0xf]  ;;  %v13138_v46 = vld [vmem:[%s18713_s10 + $0x134] sm:$0xf0] }
 0x972   : > { %v8256_v4 = vpop.f32.mrf.mxu0  ;;  %8351 = vmatpush.bf16.msrb.mxu1 %v11905_v62  ;;  %8380 = vmatpush.bf16.msrb.mxu2 %v12009_v16  ;;  %v12001_v0 = vor.u32 %v13139_v2, %v11998_v18  ;;  %v13137_v62 = vld [vmem:[%s18713_s10 + $0x134] sm:$0xf]  ;;  %v11982_v16 = vld [vmem:[%s18713_s10 + $0x128] sm:$0xf0]  ;;  %v11972_v18 = vld [vmem:[%s18713_s10 + $0x110] sm:$0xf] }
 0x973   : > { %8278 = vmatpush.bf16.msra.mxu3 %v12005_v27  ;;  %v11980_v27 = vld [vmem:[%s18713_s10 + $0x120] sm:$0xf] }
 0x974   : > { %v7362_v22 = vpop.f32.mrf.mxu2 }
 0x975   : > { %v7363_v53 = vadd.f32 %v7362_v22, %v7304_v9  ;;  %8338 = vmatmul.bf16.gmra.mxu0 %v17483_v29  ;;  %v11990_v9 = vld [vmem:[%s18713_s10 + $0x138] sm:$0xf0] }
 0x976   : > { %v7305_v5 = vpop.f32.mrf.mxu1  ;;  %8381 = vmatpush.bf16.msrb.mxu2 %v12001_v0  ;;  %v11993_v60 = vor.u32 %v13137_v62, %v11990_v9  ;;  %v13133_v0 = vld [vmem:[%s18713_s10 + $0x114] sm:$0xf]  ;;  %v11964_v9 = vld [vmem:[%s18713_s10 + $0x100] sm:$0xf] }
 0x977   : > { %v7414_v10 = vmax.f32 %v7363_v53, 0.0  ;;  %8279 = vmatpush.bf16.msra.mxu3 %v11997_v47  ;;  %v7306_v28 = vadd.f32 %v7305_v5, %v17480_v11  ;;  %v13136_v53 = vld [vmem:[%s18713_s10 + $0x124] sm:$0xf0] }
 0x978   : > { %v8222_v41 = vpop.f32.mrf.mxu3  ;;  %v11981_v61 = vor.u32 %v13136_v53, %v11980_v27 }
 0x979   : > { %v7483_v57 = vmul.f32 %v17771_v31, %v7414_v10  ;;  %v17792_v17 = vadd.f32 %v8256_v4, %v8222_v41  ;;  %v11989_v4 = vor.u32 %v13138_v46, %v11988_v14  ;;  %v18928_v10 = vld [vmem:[#allocation45_spill] sm:$0xff]  ;;  %v11985_v41 = vor.u32 %v13135_v15, %v11982_v16 }
 0x97a   : > { %v17794_v39 = vpop.f32.mrf.mxu0  ;;  %8382 = vmatpush.bf16.msrb.mxu2 %v11993_v60  ;;  %v13131_v60 = vld [vmem:[%s18713_s10 + $0x104] sm:$0xf] }
 0x97b   : > { %v7552_v51 = vadd.f32 %v17777_v49, %v7483_v57  ;;  %8280 = vmatpush.bf16.msra.mxu3 %v11989_v4  ;;  %v13134_v57 = vld [vmem:[%s18713_s10 + $0x114] sm:$0xf0] }
 0x97c   : > { %v7364_v30 = vpop.f32.mrf.mxu2 }
 0x97d   : > { %v7611_v11 = vpack.c.bf16 %v7552_v51, %v7552_v51  ;;  %v7365_v25 = vadd.f32 %v7364_v30, %v7306_v28  ;;  %v11973_v28 = vor.u32 %v13134_v57, %v11972_v18 }
 0x97e   : > { %v7308_v38 = vpop.f32.mrf.mxu1  ;;  %8383 = vmatpush.bf16.msrb.mxu2 %v11985_v41 }
 0x97f   : > { %7651 = vst [vmem:[#allocation6 + $0x8] sm:$0xf] %v7611_v11  ;;  %v7417_v22 = vmax.f32 %v7365_v25, 0.0  ;;  %v7309_v2 = vadd.f32 %v7308_v38, %v17489_v43  ;;  %8281 = vmatpush.bf16.msra.mxu3 %v11981_v61  ;;  %v11974_v43 = vld [vmem:[%s18713_s10 + $0x118] sm:$0xf0] }
 0x980   : > { %v17813_v48 = vpop.f32.mrf.mxu3  ;;  %v11977_v62 = vor.u32 %v13133_v0, %v11974_v43  ;;  %v13132_v25 = vld [vmem:[%s18713_s10 + $0x104] sm:$0xf0]  ;;  %v11966_v38 = vld [vmem:[%s18713_s10 + $0x108] sm:$0xf0] }
 0x981   : > { %v7486_v5 = vmul.f32 %v17771_v31, %v7417_v22  ;;  %7347 = vmatmul.bf16.gmra.mxu1 %v18928_v10  ;;  %7406 = vmatmul.bf16.gmra.mxu2 %v18929_v45  ;;  %v11965_v53 = vor.u32 %v13132_v25, %v11964_v9  ;;  %v11969_v15 = vor.u32 %v13131_v60, %v11966_v38 }
 0x982   : > { %v8261_v58 = vpop.f32.mrf.mxu0  ;;  %8384 = vmatpush.bf16.msrb.mxu2 %v11977_v62 }
 0x983   : > { %v7555_v47 = vadd.f32 %v17777_v49, %v7486_v5  ;;  %8282 = vmatpush.bf16.msra.mxu3 %v11973_v28 }
 0x984   : > { %v7367_v51 = vpop.f32.mrf.mxu2 }
 0x985   : > { %v7613_v14 = vpack.c.bf16 %v7555_v47, %v7555_v47  ;;  %v7368_v46 = vadd.f32 %v7367_v51, %v7309_v2  ;;  %8743 = vmatmul.bf16.vlgmr.msrb.gmra.mxu0 %v17095_v12 }
 0x986   : > { %v7310_v30 = vpop.f32.mrf.mxu1  ;;  %8385 = vmatpush.bf16.msrb.mxu2 %v11969_v15 }
 0x987   : > { %7653 = vst [vmem:[#allocation6 + $0x14] sm:$0xf] %v7613_v14  ;;  %v7420_v4 = vmax.f32 %v7368_v46, 0.0  ;;  %v7311_v10 = vadd.f32 %v7310_v30, %v17494_v21  ;;  %8283 = vmatpush.bf16.msra.mxu3 %v11965_v53  ;;  %v7691_v46 = vld [vmem:[#allocation6 + $0x8] sm:$0xf] }
 0x988   : > { %v8227_v11 = vpop.f32.mrf.mxu3 }
 0x989   : > { %v7489_v22 = vmul.f32 %v17771_v31, %v7420_v4  ;;  %v17855_v27 = vadd.f32 %v8261_v58, %v8227_v11  ;;  %v13193_v4 = vld [vmem:[%s18713_s10 + $0x2f4] sm:$0xf] }
 0x98a   : > { %v17857_v16 = vpop.f32.mrf.mxu0 }
 0x98b   : > { %v7558_v5 = vadd.f32 %v17777_v49, %v7489_v22  ;;  %v7700_v22 = vunpack.c.l.bf16 %v7691_v46 }
 0x98c   : > { %v7369_v45 = vpop.f32.mrf.mxu2 }
 0x98d   : > { %v7615_v61 = vpack.c.bf16 %v7558_v5, %v7558_v5  ;;  %v7370_v41 = vadd.f32 %v7369_v45, %v7311_v10  ;;  %v13191_v5 = vld [vmem:[%s18713_s10 + $0x2e4] sm:$0xf]  ;;  %v12254_v10 = vld [vmem:[%s18713_s10 + $0x2e8] sm:$0xf0] }
 0x98e   : > { %v7313_v47 = vpop.f32.mrf.mxu1 }
 0x98f   : > { %7655 = vst [vmem:[#allocation6 + $0x20] sm:$0xf] %v7615_v61  ;;  %v7423_v2 = vmax.f32 %v7370_v41, 0.0  ;;  %v7314_v0 = vadd.f32 %v7313_v47, %v17505_v20  ;;  %v12262_v20 = vld [vmem:[%s18713_s10 + $0x2f8] sm:$0xf0]  ;;  %v12257_v47 = vor.u32 %v13191_v5, %v12254_v10 }
 0x990   : > { %v17861_v18 = vpop.f32.mrf.mxu3  ;;  %v12265_v38 = vor.u32 %v13193_v4, %v12262_v20  ;;  %v7693_v61 = vld [vmem:[#allocation6 + $0x14] sm:$0xf] }
 0x991   : > { %v7492_v58 = vmul.f32 %v17771_v31, %v7423_v2  ;;  %8352 = vmatmul.bf16.vlgmr.msrb.gmra.mxu1 %v17095_v12 }
 0x992   : > { %v8266_v51 = vpop.f32.mrf.mxu0  ;;  %8871 = vmatpush.bf16.msra.mxu0 %v12265_v38  ;;  %v12260_v38 = vld [vmem:[%s18713_s10 + $0x2f0] sm:$0xf] }
 0x993   : > { %v7561_v57 = vadd.f32 %v17777_v49, %v7492_v58 }
 0x994   : > { %v7372_v21 = vpop.f32.mrf.mxu2 }
 0x995   : > { %v7617_v28 = vpack.c.bf16 %v7561_v57, %v7561_v57  ;;  %v7373_v43 = vadd.f32 %v7372_v21, %v7314_v0  ;;  %8748 = vmatmul.bf16.gmra.mxu0 %v17171_v55  ;;  %v7703_v21 = vunpack.c.l.bf16 %v7693_v61 }
 0x996   : > { %v7315_v14 = vpop.f32.mrf.mxu1  ;;  %v7695_v62 = vld [vmem:[#allocation6 + $0x20] sm:$0xf]  ;;  %8872 = vmatpush.bf16.msra.mxu0 %v12257_v47 }
 0x997   : > { %7657 = vst [vmem:[#allocation6 + $0x2c] sm:$0xf] %v7617_v28  ;;  %v7426_v30 = vmax.f32 %v7373_v43, 0.0  ;;  %v7706_v11 = vunpack.c.l.bf16 %v7695_v62  ;;  %v7316_v15 = vadd.f32 %v7315_v14, %v17522_v50  ;;  %v13189_v43 = vld [vmem:[%s18713_s10 + $0x2d4] sm:$0xf] }
 0x998   : > { %v8232_v9 = vpop.f32.mrf.mxu3  ;;  %v12246_v62 = vld [vmem:[%s18713_s10 + $0x2d8] sm:$0xf0] }
 0x999   : > { %v7495_v25 = vmul.f32 %v17771_v31, %v7426_v30  ;;  %v17875_v60 = vadd.f32 %v8266_v51, %v8232_v9  ;;  %v7712_v41 = vmax.f32 %v7700_v22, %v7706_v11  ;;  %v12249_v9 = vor.u32 %v13189_v43, %v12246_v62  ;;  %v13194_v22 = vld [vmem:[%s18713_s10 + $0x2f4] sm:$0xf0]  ;;  %v13185_v43 = vld [vmem:[%s18713_s10 + $0x2b4] sm:$0xf] }
 0x99a   : > { %v17885_v57 = vpop.f32.mrf.mxu0  ;;  %v12261_v10 = vor.u32 %v13194_v22, %v12260_v38  ;;  %v13190_v38 = vld [vmem:[%s18713_s10 + $0x2d4] sm:$0xf0]  ;;  %v13183_v22 = vld [vmem:[%s18713_s10 + $0x2a4] sm:$0xf] }
 0x99b   : > { %v7564_v53 = vadd.f32 %v17777_v49, %v7495_v25  ;;  %v7717_v46 = vpack.c.bf16 %v7712_v41, %v7712_v41  ;;  %8873 = vmatpush.bf16.msra.mxu0 %v12249_v9 }
 0x99c   : > { %v7374_v45 = vpop.f32.mrf.mxu2  ;;  %8769 = vmatpush.bf16.msra.mxu1 %v12261_v10 }
 0x99d   : > { %v7619_v2 = vpack.c.bf16 %v7564_v53, %v7564_v53  ;;  %v7375_v58 = vadd.f32 %v7374_v45, %v7316_v15  ;;  %v13187_v53 = vld [vmem:[%s18713_s10 + $0x2c4] sm:$0xf]  ;;  %v7846_v5 = vunpack.c.l.b16 %v7717_v46  ;;  %v12230_v46 = vld [vmem:[%s18713_s10 + $0x2b8] sm:$0xf0] }
 0x99e   : > { %v7318_v0 = vpop.f32.mrf.mxu1  ;;  %v7697_v51 = vld [vmem:[#allocation6 + $0x2c] sm:$0xf]  ;;  %v12233_v9 = vor.u32 %v13185_v43, %v12230_v46  ;;  %v12228_v46 = vld [vmem:[%s18713_s10 + $0x2b0] sm:$0xf] }
 0x99f   : > { %7659 = vst [vmem:[#allocation6 + $0x38] sm:$0xf] %v7619_v2  ;;  %v7429_v50 = vmax.f32 %v7375_v58, 0.0  ;;  %v7709_v28 = vunpack.c.l.bf16 %v7697_v51  ;;  %v7319_v20 = vadd.f32 %v7318_v0, %v17539_v34  ;;  %v12238_v34 = vld [vmem:[%s18713_s10 + $0x2c8] sm:$0xf0] }
 0x9a0   : > { %v17890_v14 = vpop.f32.mrf.mxu3  ;;  %v12241_v47 = vor.u32 %v13187_v53, %v12238_v34  ;;  %v12252_v51 = vld [vmem:[%s18713_s10 + $0x2e0] sm:$0xf] }
 0x9a1   : > { %v7498_v30 = vmul.f32 %v17771_v31, %v7429_v50  ;;  %8357 = vmatmul.bf16.gmra.mxu1 %v17171_v55  ;;  %v7715_v4 = vmax.f32 %v7703_v21, %v7709_v28  ;;  %v13192_v28 = vld [vmem:[%s18713_s10 + $0x2e4] sm:$0xf0] }
 0x9a2   : > { %8874 = vmatpush.bf16.msra.mxu0 %v12241_v47  ;;  %v8271_v50 = vpop.f32.mrf.mxu0  ;;  %v13188_v47 = vld [vmem:[%s18713_s10 + $0x2c4] sm:$0xf0] }
 0x9a3   : > { %v7567_v11 = vadd.f32 %v17777_v49, %v7498_v30  ;;  %v7719_v25 = vpack.c.bf16 %v7715_v4, %v7715_v4  ;;  %v12253_v4 = vor.u32 %v13192_v28, %v12252_v51 }
 0x9a4   : > { %v7377_v15 = vpop.f32.mrf.mxu2 }
 0x9a5   : > { %v7621_v45 = vpack.c.bf16 %v7567_v11, %v7567_v11  ;;  %v7378_v61 = vadd.f32 %v7377_v15, %v7319_v20  ;;  %8753 = vmatmul.bf16.gmra.mxu0 %v17243_v13  ;;  %v7849_v41 = vunpack.c.l.b16 %v7719_v25  ;;  %8770 = vmatpush.bf16.msra.mxu1 %v12253_v4  ;;  %v12244_v25 = vld [vmem:[%s18713_s10 + $0x2d0] sm:$0xf]  ;;  %v13179_v4 = vld [vmem:[%s18713_s10 + $0x284] sm:$0xf] }
 0x9a6   : > { %v7320_v2 = vpop.f32.mrf.mxu1  ;;  %8875 = vmatpush.bf16.msra.mxu0 %v12233_v9  ;;  %v12245_v15 = vor.u32 %v13190_v38, %v12244_v25 }
 0x9a7   : > { %7661 = vst [vmem:[#allocation6 + $0x44] sm:$0xf] %v7621_v45  ;;  %v7432_v58 = vmax.f32 %v7378_v61, 0.0  ;;  %v17912_v0 = vpack.c.b16 %v7849_v41, %v7846_v5  ;;  %v7321_v20 = vadd.f32 %v7320_v2, %v17556_v8  ;;  %v12222_v8 = vld [vmem:[%s18713_s10 + $0x2a8] sm:$0xf0] }
 0x9a8   : > { %v8237_v21 = vpop.f32.mrf.mxu3  ;;  %v12225_v34 = vor.u32 %v13183_v22, %v12222_v8  ;;  %v12236_v41 = vld [vmem:[%s18713_s10 + $0x2c0] sm:$0xf]  ;;  %v13181_v2 = vld [vmem:[%s18713_s10 + $0x294] sm:$0xf] }
 0x9a9   : > { %v7501_v62 = vmul.f32 %v17771_v31, %v7432_v58  ;;  %v17927_v30 = vadd.f32 %v8271_v50, %v8237_v21  ;;  %8284 = vmatmul.bf16.vlgmr.msra.gmra.mxu3 %v17912_v0  ;;  %8386 = vmatmul.bf16.vlgmr.msrb.gmra.mxu2 %v17912_v0  ;;  %v12214_v58 = vld [vmem:[%s18713_s10 + $0x298] sm:$0xf0]  ;;  %v12237_v50 = vor.u32 %v13188_v47, %v12236_v41  ;;  %v12220_v8 = vld [vmem:[%s18713_s10 + $0x2a0] sm:$0xf] }
 0x9aa   : > { %8771 = vmatpush.bf16.msra.mxu1 %v12245_v15  ;;  %8876 = vmatpush.bf16.msra.mxu0 %v12225_v34  ;;  %v12217_v21 = vor.u32 %v13181_v2, %v12214_v58  ;;  %v12212_v58 = vld [vmem:[%s18713_s10 + $0x290] sm:$0xf] }
 0x9ab   : > { %v7570_v11 = vadd.f32 %v17777_v49, %v7501_v62  ;;  %v13186_v62 = vld [vmem:[%s18713_s10 + $0x2b4] sm:$0xf0] }
 0x9ac   : > { %v7379_v53 = vpop.f32.mrf.mxu2 }
 0x9ad   : > { %v7623_v5 = vpack.c.bf16 %v7570_v11, %v7570_v11  ;;  %v7380_v10 = vadd.f32 %v7379_v53, %v7321_v20  ;;  %v12229_v11 = vor.u32 %v13186_v62, %v12228_v46 }
 0x9ae   : > { %v7323_v45 = vpop.f32.mrf.mxu1  ;;  %8772 = vmatpush.bf16.msra.mxu1 %v12237_v50  ;;  %8877 = vmatpush.bf16.msra.mxu0 %v12217_v21  ;;  %v7723_v21 = vld [vmem:[#allocation6 + $0x44] sm:$0xf] }
 0x9af   : > { %7663 = vst [vmem:[#allocation6 + $0x50] sm:$0xf] %v7623_v5  ;;  %v7435_v61 = vmax.f32 %v7380_v10, 0.0  ;;  %v7324_v43 = vadd.f32 %v7323_v45, %v17567_v23  ;;  %v12206_v23 = vld [vmem:[%s18713_s10 + $0x288] sm:$0xf0] }
 0x9b0   : > { %v12209_v38 = vor.u32 %v13179_v4, %v12206_v23  ;;  %v7721_v5 = vld [vmem:[#allocation6 + $0x38] sm:$0xf]  ;;  %v13184_v10 = vld [vmem:[%s18713_s10 + $0x2a4] sm:$0xf0] }
 0x9b1   : > { %v7504_v51 = vmul.f32 %v17771_v31, %v7435_v61  ;;  %8362 = vmatmul.bf16.gmra.mxu1 %v17243_v13  ;;  %v12221_v61 = vor.u32 %v13184_v10, %v12220_v8  ;;  %v7730_v2 = vunpack.c.l.bf16 %v7721_v5 }
 0x9b2   : > { %8773 = vmatpush.bf16.msra.mxu1 %v12229_v11  ;;  %8878 = vmatpush.bf16.msra.mxu0 %v12209_v38  ;;  %v7733_v11 = vunpack.c.l.bf16 %v7723_v21 }
 0x9b3   : > { %v7573_v28 = vadd.f32 %v17777_v49, %v7504_v51  ;;  %v13182_v51 = vld [vmem:[%s18713_s10 + $0x294] sm:$0xf0] }
 0x9b4   : > { %v7382_v9 = vpop.f32.mrf.mxu2 }
 0x9b5   : > { %v7625_v20 = vpack.c.bf16 %v7573_v28, %v7573_v28  ;;  %v7383_v25 = vadd.f32 %v7382_v9, %v7324_v43  ;;  %8758 = vmatmul.bf16.gmra.mxu0 %v17441_v3  ;;  %v12213_v28 = vor.u32 %v13182_v51, %v12212_v58 }
 0x9b6   : > { %v7325_v22 = vpop.f32.mrf.mxu1  ;;  %v7725_v53 = vld [vmem:[#allocation6 + $0x50] sm:$0xf]  ;;  %8774 = vmatpush.bf16.msra.mxu1 %v12221_v61 }
 0x9b7   : > { %7665 = vst [vmem:[#allocation6 + $0x5c] sm:$0xf] %v7625_v20  ;;  %v7438_v15 = vmax.f32 %v7383_v25, 0.0  ;;  %v7736_v45 = vunpack.c.l.bf16 %v7725_v53  ;;  %v7326_v47 = vadd.f32 %v7325_v22, %v17572_v44  ;;  %v12204_v20 = vld [vmem:[%s18713_s10 + $0x280] sm:$0xf] }
 0x9b8   : > { %v13180_v25 = vld [vmem:[%s18713_s10 + $0x284] sm:$0xf0] }
 0x9b9   : > { %v7507_v34 = vmul.f32 %v17771_v31, %v7438_v15  ;;  %v7742_v62 = vmax.f32 %v7730_v2, %v7736_v45  ;;  %v12205_v15 = vor.u32 %v13180_v25, %v12204_v20 }
 0x9ba   : > { %8775 = vmatpush.bf16.msra.mxu1 %v12213_v28 }
 0x9bb   : > { %v7576_v41 = vadd.f32 %v17777_v49, %v7507_v34  ;;  %v7747_v53 = vpack.c.bf16 %v7742_v62, %v7742_v62 }
 0x9bc   : > { %v7384_v50 = vpop.f32.mrf.mxu2 }
 0x9bd   : > { %v7627_v43 = vpack.c.bf16 %v7576_v41, %v7576_v41  ;;  %v7385_v46 = vadd.f32 %v7384_v50, %v7326_v47  ;;  %v7862_v41 = vunpack.c.l.b16 %v7747_v53 }
 0x9be   : > { %v7328_v4 = vpop.f32.mrf.mxu1  ;;  %v7727_v9 = vld [vmem:[#allocation6 + $0x5c] sm:$0xf]  ;;  %8776 = vmatpush.bf16.msra.mxu1 %v12205_v15 }
 0x9bf   : > { %7667 = vst [vmem:[#allocation6 + $0x68] sm:$0xf] %v7627_v43  ;;  %v7441_v44 = vmax.f32 %v7385_v46, 0.0  ;;  %v7739_v23 = vunpack.c.l.bf16 %v7727_v9  ;;  %v7329_v5 = vadd.f32 %v7328_v4, %v17577_v63  ;;  %v12132_v9 = vld [vmem:[%s18713_s10 + $0x1f0] sm:$0xf] }
 0x9c1   : > { %v7510_v38 = vmul.f32 %v17771_v31, %v7441_v44  ;;  %8367 = vmatmul.bf16.gmra.mxu1 %v17441_v3  ;;  %v7745_v22 = vmax.f32 %v7733_v11, %v7739_v23  ;;  %v13162_v44 = vld [vmem:[%s18713_s10 + $0x1f4] sm:$0xf0] }
 0x9c2   : > { %v12133_v23 = vor.u32 %v13162_v44, %v12132_v9  ;;  %v18027_v44 = vpop.f32.mrf.mxu0 }
 0x9c3   : > { %v7579_v8 = vadd.f32 %v17777_v49, %v7510_v38  ;;  %v7749_v10 = vpack.c.bf16 %v7745_v22, %v7745_v22 }
 0x9c4   : > { %v7387_v34 = vpop.f32.mrf.mxu2  ;;  %8701 = vmatpush.bf16.msrb.mxu3 %v12133_v23 }
 0x9c5   : > { %v7629_v45 = vpack.c.bf16 %v7579_v8, %v7579_v8  ;;  %v7388_v61 = vadd.f32 %v7387_v34, %v7329_v5  ;;  %8763 = vmatmul.bf16.gmra.mxu0 %v17485_v36  ;;  %v7865_v47 = vunpack.c.l.b16 %v7749_v10  ;;  %v12124_v5 = vld [vmem:[%s18713_s10 + $0x1e0] sm:$0xf]  ;;  %v13160_v34 = vld [vmem:[%s18713_s10 + $0x1e4] sm:$0xf0] }
 0x9c6   : > { %v7330_v2 = vpop.f32.mrf.mxu1  ;;  %v7751_v10 = vld [vmem:[#allocation6 + $0x68] sm:$0xf] }
 0x9c7   : > { %7669 = vst [vmem:[#allocation6 + $0x74] sm:$0xf] %v7629_v45  ;;  %v7444_v58 = vmax.f32 %v7388_v61, 0.0  ;;  %v18000_v51 = vpack.c.b16 %v7865_v47, %v7862_v41  ;;  %v7331_v21 = vadd.f32 %v7330_v2, %v17582_v54  ;;  %v12125_v61 = vor.u32 %v13160_v34, %v12124_v5 }
 0x9c8   : > { %v7760_v2 = vunpack.c.l.bf16 %v7751_v10 }
 0x9c9   : > { %v7513_v50 = vmul.f32 %v17771_v31, %v7444_v58  ;;  %8289 = vmatmul.bf16.gmra.mxu3 %v18000_v51  ;;  %8391 = vmatmul.bf16.gmra.mxu2 %v18000_v51 }
 0x9ca   : > { %8702 = vmatpush.bf16.msrb.mxu3 %v12125_v61  ;;  %v18045_v61 = vpop.f32.mrf.mxu0 }
 0x9cb   : > { %v7582_v63 = vadd.f32 %v17777_v49, %v7513_v50 }
 0x9cc   : > { %v7389_v28 = vpop.f32.mrf.mxu2 }
 0x9cd   : > { %v7631_v43 = vpack.c.bf16 %v7582_v63, %v7582_v63  ;;  %v7390_v46 = vadd.f32 %v7389_v28, %v7331_v21 }
 0x9ce   : > { %v7333_v62 = vpop.f32.mrf.mxu1  ;;  %v7753_v50 = vld [vmem:[#allocation6 + $0x74] sm:$0xf] }
 0x9cf   : > { %7671 = vst [vmem:[#allocation6 + $0x80] sm:$0xf] %v7631_v43  ;;  %v7447_v4 = vmax.f32 %v7390_v46, 0.0  ;;  %v7334_v20 = vadd.f32 %v7333_v62, %v17586_v26 }
 0x9d1   : > { %v7516_v11 = vmul.f32 %v17771_v31, %v7447_v4  ;;  %8372 = vmatmul.bf16.gmra.mxu1 %v17485_v36  ;;  %v7763_v4 = vunpack.c.l.bf16 %v7753_v50 }
 0x9d3   : > { %v7585_v54 = vadd.f32 %v17777_v49, %v7516_v11 }
 0x9d4   : > { %v7392_v25 = vpop.f32.mrf.mxu2 }
 0x9d5   : > { %v7633_v38 = vpack.c.bf16 %v7585_v54, %v7585_v54  ;;  %v7393_v22 = vadd.f32 %v7392_v25, %v7334_v20  ;;  %8879 = vmatmul.bf16.vlgmr.msra.gmra.mxu0 %v17912_v0 }
 0x9d6   : > { %v7335_v53 = vpop.f32.mrf.mxu1  ;;  %v7755_v15 = vld [vmem:[#allocation6 + $0x80] sm:$0xf] }
 0x9d7   : > { %7673 = vst [vmem:[#allocation6 + $0x8c] sm:$0xf] %v7633_v38  ;;  %v7450_v8 = vmax.f32 %v7393_v22, 0.0  ;;  %v7766_v45 = vunpack.c.l.bf16 %v7755_v15  ;;  %v7336_v47 = vadd.f32 %v7335_v53, %v17591_v6 }
 0x9d9   : > { %v7519_v26 = vmul.f32 %v17771_v31, %v7450_v8  ;;  %v7772_v28 = vmax.f32 %v7760_v2, %v7766_v45 }
 0x9db   : > { %v7588_v41 = vadd.f32 %v17777_v49, %v7519_v26  ;;  %v7777_v23 = vpack.c.bf16 %v7772_v28, %v7772_v28  ;;  %v12108_v28 = vld [vmem:[%s18713_s10 + $0x1c0] sm:$0xf] }
 0x9dc   : > { %v7394_v58 = vpop.f32.mrf.mxu2 }
 0x9dd   : > { %v7635_v63 = vpack.c.bf16 %v7588_v41, %v7588_v41  ;;  %v7395_v21 = vadd.f32 %v7394_v58, %v7336_v47  ;;  %v7878_v15 = vunpack.c.l.b16 %v7777_v23 }
 0x9de   : > { %v7338_v43 = vpop.f32.mrf.mxu1  ;;  %v7757_v46 = vld [vmem:[#allocation6 + $0x8c] sm:$0xf] }
 0x9df   : > { %7675 = vst [vmem:[#allocation6 + $0x98] sm:$0xf] %v7635_v63  ;;  %v7453_v62 = vmax.f32 %v7395_v21, 0.0  ;;  %v7769_v9 = vunpack.c.l.bf16 %v7757_v46  ;;  %v7339_v20 = vadd.f32 %v7338_v43, %v17601_v37  ;;  %v13158_v37 = vld [vmem:[%s18713_s10 + $0x1d4] sm:$0xf0] }
 0x9e0   : > { %v13156_v43 = vld [vmem:[%s18713_s10 + $0x1c4] sm:$0xf0] }
 0x9e1   : > { %v7522_v11 = vmul.f32 %v17771_v31, %v7453_v62  ;;  %8777 = vmatmul.bf16.vlgmr.msra.gmra.mxu1 %v17912_v0  ;;  %v7775_v6 = vmax.f32 %v7763_v4, %v7769_v9  ;;  %v12116_v0 = vld [vmem:[%s18713_s10 + $0x1d0] sm:$0xf] }
 0x9e2   : > { %v12117_v45 = vor.u32 %v13158_v37, %v12116_v0 }
 0x9e3   : > { %v7591_v54 = vadd.f32 %v17777_v49, %v7522_v11  ;;  %v7779_v25 = vpack.c.bf16 %v7775_v6, %v7775_v6  ;;  %v18059_v11 = vpop.f32.mrf.mxu0 }
 0x9e4   : > { %v7397_v38 = vpop.f32.mrf.mxu2  ;;  %8703 = vmatpush.bf16.msrb.mxu3 %v12117_v45 }
 0x9e5   : > { %v7637_v22 = vpack.c.bf16 %v7591_v54, %v7591_v54  ;;  %v7398_v53 = vadd.f32 %v7397_v38, %v7339_v20  ;;  %8884 = vmatmul.bf16.gmra.mxu0 %v18000_v51  ;;  %v7881_v8 = vunpack.c.l.b16 %v7779_v25 }
 0x9e6   : > { %v7340_v5 = vpop.f32.mrf.mxu1  ;;  %v7781_v38 = vld [vmem:[#allocation6 + $0x98] sm:$0xf] }
 0x9e7   : > { %7677 = vst [vmem:[#allocation6 + $0xa4] sm:$0xf] %v7637_v22  ;;  %v7456_v10 = vmax.f32 %v7398_v53, 0.0  ;;  %v18034_v34 = vpack.c.b16 %v7881_v8, %v7878_v15  ;;  %v7341_v47 = vadd.f32 %v7340_v5, %v17620_v19  ;;  %v12109_v19 = vor.u32 %v13156_v43, %v12108_v28  ;;  %v13161_v8 = vld [vmem:[%s18713_s10 + $0x1f4] sm:$0xf] }
 0x9e8   : > { %v12134_v5 = vld [vmem:[%s18713_s10 + $0x1f8] sm:$0xf0] }
 0x9e9   : > { %v7525_v26 = vmul.f32 %v17771_v31, %v7456_v10  ;;  %8294 = vmatmul.bf16.gmra.mxu3 %v18034_v34  ;;  %8396 = vmatmul.bf16.gmra.mxu2 %v18034_v34  ;;  %v12092_v10 = vld [vmem:[%s18713_s10 + $0x1a0] sm:$0xf]  ;;  %v12137_v45 = vor.u32 %v13161_v8, %v12134_v5 }
 0x9ea   : > { %8704 = vmatpush.bf16.msrb.mxu3 %v12109_v19 }
 0x9eb   : > { %v7594_v41 = vadd.f32 %v17777_v49, %v7525_v26  ;;  %v7790_v26 = vunpack.c.l.bf16 %v7781_v38  ;;  %8803 = vmatpush.bf16.msra.mxu2 %v12137_v45  ;;  %v12084_v38 = vld [vmem:[%s18713_s10 + $0x190] sm:$0xf] }
 0x9ec   : > { %v7399_v2 = vpop.f32.mrf.mxu2 }
 0x9ed   : > { %v7639_v58 = vpack.c.bf16 %v7594_v41, %v7594_v41  ;;  %v7400_v50 = vadd.f32 %v7399_v2, %v7341_v47  ;;  %v13152_v41 = vld [vmem:[%s18713_s10 + $0x1a4] sm:$0xf0] }
 0x9ee   : > { %v7343_v63 = vpop.f32.mrf.mxu1  ;;  %v7783_v2 = vld [vmem:[#allocation6 + $0xa4] sm:$0xf] }
 0x9ef   : > { %7679 = vst [vmem:[#allocation6 + $0xb0] sm:$0xf] %v7639_v58  ;;  %v7459_v21 = vmax.f32 %v7400_v50, 0.0  ;;  %v7344_v4 = vadd.f32 %v7343_v63, %v17650_v7  ;;  %v13154_v7 = vld [vmem:[%s18713_s10 + $0x1b4] sm:$0xf0]  ;;  %v12093_v58 = vor.u32 %v13152_v41, %v12092_v10  ;;  %v7793_v19 = vunpack.c.l.bf16 %v7783_v2 }
 0x9f0   : > { %v12110_v2 = vld [vmem:[%s18713_s10 + $0x1c8] sm:$0xf0] }
 0x9f1   : > { %v7528_v46 = vmul.f32 %v17771_v31, %v7459_v21  ;;  %8782 = vmatmul.bf16.gmra.mxu1 %v18000_v51  ;;  %v12100_v51 = vld [vmem:[%s18713_s10 + $0x1b0] sm:$0xf] }
 0x9f2   : > { %v12101_v15 = vor.u32 %v13154_v7, %v12100_v51  ;;  %v12118_v51 = vld [vmem:[%s18713_s10 + $0x1d8] sm:$0xf0] }
 0x9f3   : > { %v7597_v62 = vadd.f32 %v17777_v49, %v7528_v46 }
 0x9f4   : > { %v7402_v9 = vpop.f32.mrf.mxu2  ;;  %8705 = vmatpush.bf16.msrb.mxu3 %v12101_v15  ;;  %v13150_v15 = vld [vmem:[%s18713_s10 + $0x194] sm:$0xf0] }
 0x9f5   : > { %v7641_v6 = vpack.c.bf16 %v7597_v62, %v7597_v62  ;;  %v7403_v23 = vadd.f32 %v7402_v9, %v7344_v4  ;;  %8889 = vmatmul.bf16.gmra.mxu0 %v18034_v34  ;;  %v13159_v62 = vld [vmem:[%s18713_s10 + $0x1e4] sm:$0xf]  ;;  %v18086_v4 = vpop.f32.mrf.mxu0  ;;  %v12126_v9 = vld [vmem:[%s18713_s10 + $0x1e8] sm:$0xf0]  ;;  %v12085_v5 = vor.u32 %v13150_v15, %v12084_v38 }
 0x9f6   : > { %v7345_v54 = vpop.f32.mrf.mxu1  ;;  %v7785_v20 = vld [vmem:[#allocation6 + $0xb0] sm:$0xf] }
 0x9f7   : > { %7681 = vst [vmem:[#allocation6 + $0xbc] sm:$0xf] %v7641_v6  ;;  %v7462_v25 = vmax.f32 %v7403_v23, 0.0  ;;  %v7796_v53 = vunpack.c.l.bf16 %v7785_v20  ;;  %v7346_v37 = vadd.f32 %v7345_v54, %v17682_v52  ;;  %v12129_v20 = vor.u32 %v13159_v62, %v12126_v9 }
 0x9f8   : > { %8706 = vmatpush.bf16.msrb.mxu3 %v12093_v58 }
 0x9f9   : > { %v7531_v22 = vmul.f32 %v17771_v31, %v7462_v25  ;;  %v7802_v21 = vmax.f32 %v7790_v26, %v7796_v53  ;;  %v13157_v25 = vld [vmem:[%s18713_s10 + $0x1d4] sm:$0xf]  ;;  %8804 = vmatpush.bf16.msra.mxu2 %v12129_v20  ;;  %v13148_v20 = vld [vmem:[%s18713_s10 + $0x184] sm:$0xf0] }
 0x9fa   : > { %v12121_v53 = vor.u32 %v13157_v25, %v12118_v51 }
 0x9fb   : > { %v7600_v0 = vadd.f32 %v17777_v49, %v7531_v22  ;;  %v7807_v54 = vpack.c.bf16 %v7802_v21, %v7802_v21  ;;  %v13153_v21 = vld [vmem:[%s18713_s10 + $0x1b4] sm:$0xf] }
 0x9fc   : > { %v7404_v47 = vpop.f32.mrf.mxu2  ;;  %8707 = vmatpush.bf16.msrb.mxu3 %v12085_v5  ;;  %v12078_v5 = vld [vmem:[%s18713_s10 + $0x188] sm:$0xf0] }
 0x9fd   : > { %v7643_v50 = vpack.c.bf16 %v7600_v0, %v7600_v0  ;;  %v7405_v63 = vadd.f32 %v7404_v47, %v7346_v37  ;;  %v7894_v37 = vunpack.c.l.b16 %v7807_v54  ;;  %8805 = vmatpush.bf16.msra.mxu2 %v12121_v53  ;;  %v12094_v54 = vld [vmem:[%s18713_s10 + $0x1a8] sm:$0xf0] }
 0x9fe   : > { %v7348_v28 = vpop.f32.mrf.mxu1  ;;  %v7787_v43 = vld [vmem:[#allocation6 + $0xbc] sm:$0xf] }
 0x9ff   : > { %7683 = vst [vmem:[#allocation6 + $0xc8] sm:$0xf] %v7643_v50  ;;  %v7465_v46 = vmax.f32 %v7405_v63, 0.0  ;;  %v7799_v52 = vunpack.c.l.bf16 %v7787_v43  ;;  %v7349_v22 = vadd.f32 %v7348_v28, %v17707_v24  ;;  %v13155_v24 = vld [vmem:[%s18713_s10 + $0x1c4] sm:$0xf]  ;;  %v18114_v63 = vpop.f32.mrf.mxu0 }
 0xa00   : > { %v12113_v50 = vor.u32 %v13155_v24, %v12110_v2  ;;  %v12102_v28 = vld [vmem:[%s18713_s10 + $0x1b8] sm:$0xf0] }
 0xa01   : > { %v7534_v6 = vmul.f32 %v17771_v31, %v7465_v46  ;;  %8787 = vmatmul.bf16.gmra.mxu1 %v18034_v34  ;;  %v7805_v23 = vmax.f32 %v7793_v19, %v7799_v52  ;;  %v12105_v19 = vor.u32 %v13153_v21, %v12102_v28 }
 0xa02   : > { %8806 = vmatpush.bf16.msra.mxu2 %v12113_v50 }
 0xa03   : > { %v7603_v7 = vadd.f32 %v17777_v49, %v7534_v6  ;;  %v7809_v34 = vpack.c.bf16 %v7805_v23, %v7805_v23  ;;  %v13151_v23 = vld [vmem:[%s18713_s10 + $0x1a4] sm:$0xf] }
 0xa04   : > { %v7407_v8 = vpop.f32.mrf.mxu2  ;;  %v12097_v51 = vor.u32 %v13151_v23, %v12094_v54 }
 0xa05   : > { %v7645_v10 = vpack.c.bf16 %v7603_v7, %v7603_v7  ;;  %v7408_v0 = vadd.f32 %v7407_v8, %v7349_v22  ;;  %v7897_v26 = vunpack.c.l.b16 %v7809_v34  ;;  %v13149_v7 = vld [vmem:[%s18713_s10 + $0x194] sm:$0xf]  ;;  %v12086_v22 = vld [vmem:[%s18713_s10 + $0x198] sm:$0xf0] }
 0xa06   : > { %v7350_v47 = vpop.f32.mrf.mxu1  ;;  %8807 = vmatpush.bf16.msra.mxu2 %v12105_v19  ;;  %v12089_v53 = vor.u32 %v13149_v7, %v12086_v22  ;;  %v12190_v19 = vld [vmem:[%s18713_s10 + $0x268] sm:$0xf0] }
 0xa07   : > { %7685 = vst [vmem:[#allocation6 + $0xd4] sm:$0xf] %v7645_v10  ;;  %v7468_v45 = vmax.f32 %v7408_v0, 0.0  ;;  %v7900_v41 = vpack.c.b16 %v7897_v26, %v7894_v37  ;;  %v7351_v46 = vadd.f32 %v7350_v47, %v17753_v35  ;;  %v12076_v35 = vld [vmem:[%s18713_s10 + $0x180] sm:$0xf]  ;;  %v18156_v21 = vpop.f32.mrf.mxu0 }
 0xa08   : > { %v12077_v38 = vor.u32 %v13148_v20, %v12076_v35  ;;  %v7811_v10 = vld [vmem:[#allocation6 + $0xc8] sm:$0xf]  ;;  %v12198_v26 = vld [vmem:[%s18713_s10 + $0x278] sm:$0xf0] }
 0xa09   : > { %v7537_v58 = vmul.f32 %v17771_v31, %v7468_v45  ;;  %8299 = vmatmul.bf16.gmra.mxu3 %v7900_v41  ;;  %8401 = vmatmul.bf16.gmra.mxu2 %v7900_v41 }
 0xa0a   : > { %8894 = vmatmul.bf16.gmra.mxu0 %v7900_v41  ;;  %8808 = vmatpush.bf16.msra.mxu2 %v12097_v51 }
 0xa0b   : > { %v7606_v43 = vadd.f32 %v17777_v49, %v7537_v58  ;;  %8708 = vmatpush.bf16.msrb.mxu3 %v12077_v38 }
 0xa0c   : > { %v7409_v52 = vpop.f32.mrf.mxu2 }
 0xa0d   : > { %v7647_v62 = vpack.c.bf16 %v7606_v43, %v7606_v43  ;;  %v7410_v9 = vadd.f32 %v7409_v52, %v7351_v46  ;;  %v13175_v46 = vld [vmem:[%s18713_s10 + $0x264] sm:$0xf] }
 0xa0e   : > { %8809 = vmatpush.bf16.msra.mxu2 %v12089_v53  ;;  %v7813_v24 = vld [vmem:[#allocation6 + $0xd4] sm:$0xf]  ;;  %v8353_v35 = vpop.f32.mrf.mxu1  ;;  %v12182_v53 = vld [vmem:[%s18713_s10 + $0x258] sm:$0xf0] }
 0xa0f   : > { %7687 = vst [vmem:[#allocation6 + $0xe0] sm:$0xf] %v7647_v62  ;;  %v7471_v6 = vmax.f32 %v7410_v9, 0.0  ;;  %v7823_v58 = vunpack.c.l.bf16 %v7813_v24  ;;  %v12193_v62 = vor.u32 %v13175_v46, %v12190_v19  ;;  %v18164_v9 = vpop.f32.mrf.mxu3  ;;  %v18166_v20 = vpop.f32.mrf.mxu0  ;;  %v12142_v46 = vld [vmem:[%s18713_s10 + $0x208] sm:$0xf0] }
 0xa11   : > { %v7540_v25 = vmul.f32 %v17771_v31, %v7471_v6  ;;  %8792 = vmatmul.bf16.gmra.mxu1 %v7900_v41  ;;  %v13147_v31 = vld [vmem:[%s18713_s10 + $0x184] sm:$0xf]  ;;  %v7820_v41 = vunpack.c.l.bf16 %v7811_v10  ;;  %v12166_v10 = vld [vmem:[%s18713_s10 + $0x238] sm:$0xf0] }
 0xa12   : > { %v12081_v0 = vor.u32 %v13147_v31, %v12078_v5  ;;  %v13169_v5 = vld [vmem:[%s18713_s10 + $0x234] sm:$0xf] }
 0xa13   : > { %v7609_v34 = vadd.f32 %v17777_v49, %v7540_v25  ;;  %v13177_v49 = vld [vmem:[%s18713_s10 + $0x274] sm:$0xf]  ;;  %v8354_v25 = vadd.f32 %v8353_v35, %v18045_v61  ;;  %v13171_v61 = vld [vmem:[%s18713_s10 + $0x244] sm:$0xf] }
 0xa14   : > { %v12201_v45 = vor.u32 %v13177_v49, %v12198_v26  ;;  %8810 = vmatpush.bf16.msra.mxu2 %v12081_v0  ;;  %v12169_v0 = vor.u32 %v13169_v5, %v12166_v10 }
 0xa15   : > { %v7649_v15 = vpack.c.bf16 %v7609_v34, %v7609_v34  ;;  %v13173_v34 = vld [vmem:[%s18713_s10 + $0x254] sm:$0xf] }
 0xa16   : > { %v7815_v8 = vld [vmem:[#allocation6 + $0xe0] sm:$0xf]  ;;  %8837 = vmatpush.bf16.msra.mxu3 %v12201_v45  ;;  %v18188_v31 = vpop.f32.mrf.mxu1  ;;  %v12158_v45 = vld [vmem:[%s18713_s10 + $0x228] sm:$0xf0] }
 0xa17   : > { %7689 = vst [vmem:[#allocation6 + $0xec] sm:$0xf] %v7649_v15  ;;  %v7826_v37 = vunpack.c.l.bf16 %v7815_v8  ;;  %v12185_v15 = vor.u32 %v13173_v34, %v12182_v53 }
 0xa19   : > { %v7832_v47 = vmax.f32 %v7820_v41, %v7826_v37 }
 0xa1a   : > { %8838 = vmatpush.bf16.msra.mxu3 %v12193_v62 }
 0xa1b   : > { %v7837_v43 = vpack.c.bf16 %v7832_v47, %v7832_v47 }
 0xa1d   : > { %v7910_v6 = vunpack.c.l.b16 %v7837_v43 }
 0xa1e   : > { %v7817_v2 = vld [vmem:[#allocation6 + $0xec] sm:$0xf]  ;;  %8839 = vmatpush.bf16.msra.mxu3 %v12185_v15  ;;  %v8358_v26 = vpop.f32.mrf.mxu1 }
 0xa1f   : > { %v7829_v50 = vunpack.c.l.bf16 %v7817_v2  ;;  %v8359_v41 = vadd.f32 %v8358_v26, %v18086_v4 }
 0xa21   : > { %v7835_v28 = vmax.f32 %v7823_v58, %v7829_v50 }
 0xa23   : > { %v7839_v52 = vpack.c.bf16 %v7835_v28, %v7835_v28  ;;  %v12150_v28 = vld [vmem:[%s18713_s10 + $0x218] sm:$0xf0] }
 0xa25   : > { %v7913_v23 = vunpack.c.l.b16 %v7839_v52 }
 0xa26   : > { %v18222_v4 = vpop.f32.mrf.mxu1 }
 0xa27   : > { %v7916_v54 = vpack.c.b16 %v7913_v23, %v7910_v6 }
 0xa29   : > { %8304 = vmatmul.bf16.gmra.mxu3 %v7916_v54  ;;  %8406 = vmatmul.bf16.gmra.mxu2 %v7916_v54 }
 0xa2a   : > { %8797 = vmatmul.bf16.gmra.mxu1 %v7916_v54  ;;  %8899 = vmatmul.bf16.gmra.mxu0 %v7916_v54 }
 0xa2c   : > { %v8285_v51 = vpop.f32.mrf.mxu3  ;;  %v8387_v38 = vpop.f32.mrf.mxu2 }
 0xa2d   : > { %v18170_v7 = vadd.f32 %v8285_v51, %v17704_v40  ;;  %v18172_v22 = vadd.f32 %v8387_v38, %v8354_v25  ;;  %v12174_v40 = vld [vmem:[%s18713_s10 + $0x248] sm:$0xf0]  ;;  %v8334_v51 = vpop.f32.mrf.mxu0 }
 0xa2e   : > { %v12177_v8 = vor.u32 %v13171_v61, %v12174_v40  ;;  %v8363_v6 = vpop.f32.mrf.mxu1 }
 0xa30   : > { %8840 = vmatpush.bf16.msra.mxu3 %v12177_v8 }
 0xa34   : > { %8841 = vmatpush.bf16.msra.mxu3 %v12169_v0  ;;  %v18196_v37 = vpop.f32.mrf.mxu3  ;;  %v18198_v49 = vpop.f32.mrf.mxu2 }
 0xa35   : > { %v18246_v34 = vpop.f32.mrf.mxu0 }
 0xa36   : > { %v18244_v38 = vpop.f32.mrf.mxu1 }
 0xa39   : > { %8709 = vmatmul.bf16.vlgmr.msrb.gmra.mxu3 %v17093_v33  ;;  %8811 = vmatmul.bf16.vlgmr.msra.gmra.mxu2 %v17093_v33  ;;  %v13167_v33 = vld [vmem:[%s18713_s10 + $0x224] sm:$0xf] }
 0xa3a   : > { %v12161_v24 = vor.u32 %v13167_v33, %v12158_v45 }
 0xa3c   : > { %8842 = vmatpush.bf16.msra.mxu3 %v12161_v24 }
 0xa3d   : > { %v8339_v15 = vpop.f32.mrf.mxu0 }
 0xa45   : > { %v18260_v10 = vpop.f32.mrf.mxu0 }
 0xa46   : > { %18930 = vst [vmem:[#allocation9_spill] sm:$0xff] %v18260_v10  ;;  %v8269_v10 = vadd.f32 %v17885_v57, %v17890_v14  ;;  %v13236_v57 = vld [vmem:[%s18714_s11 + $0xd8] sm:$0xff] }
 0xa49   : > { %8714 = vmatmul.bf16.gmra.mxu3 %v17169_v42  ;;  %8816 = vmatmul.bf16.gmra.mxu2 %v17169_v42  ;;  %v13165_v42 = vld [vmem:[%s18713_s10 + $0x214] sm:$0xf] }
 0xa4a   : > { %v12153_v43 = vor.u32 %v13165_v42, %v12150_v28 }
 0xa4c   : > { %v8290_v47 = vpop.f32.mrf.mxu3  ;;  %v8392_v2 = vpop.f32.mrf.mxu2  ;;  %8843 = vmatpush.bf16.msra.mxu3 %v12153_v43 }
 0xa4d   : > { %v18210_v58 = vadd.f32 %v8290_v47, %v17792_v17  ;;  %v18212_v50 = vadd.f32 %v8392_v2, %v8359_v41  ;;  %v13163_v17 = vld [vmem:[%s18713_s10 + $0x204] sm:$0xf]  ;;  %v8744_v26 = vpop.f32.mrf.mxu0 }
 0xa4e   : > { %v12145_v19 = vor.u32 %v13163_v17, %v12142_v46  ;;  %v13216_v46 = vld [vmem:[%s18714_s11 + $0x38] sm:$0xff] }
 0xa4f   : > { %9415 = vmatpush.bf16.msrb.mxu1 %v13216_v46  ;;  %v13213_v46 = vld [vmem:[%s18714_s11 + $0x20] sm:$0xff] }
 0xa50   : > { %8844 = vmatpush.bf16.msra.mxu3 %v12145_v19 }
 0xa54   : > { %v18230_v52 = vpop.f32.mrf.mxu3  ;;  %v18232_v62 = vpop.f32.mrf.mxu2 }
 0xa55   : > { %v18269_v41 = vpop.f32.mrf.mxu0 }
 0xa59   : > { %8719 = vmatmul.bf16.gmra.mxu3 %v17241_v1  ;;  %8821 = vmatmul.bf16.gmra.mxu2 %v17241_v1  ;;  %v8364_v1 = vadd.f32 %v8363_v6, %v18156_v21  ;;  %v8368_v21 = vpop.f32.mrf.mxu1 }
 0xa5d   : > { %v8749_v28 = vpop.f32.mrf.mxu0 }
 0xa69   : > { %8724 = vmatmul.bf16.gmra.mxu3 %v17439_v56  ;;  %8826 = vmatmul.bf16.gmra.mxu2 %v17439_v56 }
 0xa6c   : > { %v8295_v23 = vpop.f32.mrf.mxu3  ;;  %v8397_v54 = vpop.f32.mrf.mxu2 }
 0xa6d   : > { %v18238_v35 = vadd.f32 %v8295_v23, %v17855_v27  ;;  %v18240_v25 = vadd.f32 %v8397_v54, %v8364_v1  ;;  %v8369_v27 = vadd.f32 %v8368_v21, %v8334_v51 }
 0xa74   : > { %v18248_v53 = vpop.f32.mrf.mxu3  ;;  %v18250_v56 = vpop.f32.mrf.mxu2 }
 0xa79   : > { %8729 = vmatmul.bf16.gmra.mxu3 %v17483_v29  ;;  %8831 = vmatmul.bf16.gmra.mxu2 %v17483_v29  ;;  %v18258_v29 = vpop.f32.mrf.mxu1 }
 0xa81   : > { %v8373_v0 = vpop.f32.mrf.mxu1 }
 0xa89   : > { %8845 = vmatmul.bf16.vlgmr.msra.gmra.mxu3 %v17095_v12  ;;  %v18263_v33 = vpop.f32.mrf.mxu1 }
 0xa8a   : > { %18931 = vst [vmem:[#allocation10_spill] sm:$0xff] %v18263_v33 }
 0xa8c   : > { %v8300_v61 = vpop.f32.mrf.mxu3  ;;  %v8402_v40 = vpop.f32.mrf.mxu2 }
 0xa8d   : > { %v18254_v8 = vadd.f32 %v8300_v61, %v17875_v60  ;;  %v18256_v5 = vadd.f32 %v8402_v40, %v8369_v27  ;;  %v8374_v60 = vadd.f32 %v8373_v0, %v8339_v15  ;;  %v13215_v15 = vld [vmem:[%s18714_s11 + $0x30] sm:$0xff]  ;;  %v13222_v27 = vld [vmem:[%s18714_s11 + $0x68] sm:$0xff] }
 0xa8e   : > { %9416 = vmatpush.bf16.msrb.mxu1 %v13215_v15 }
 0xa94   : > { %v18265_v45 = vpop.f32.mrf.mxu3  ;;  %v18267_v12 = vpop.f32.mrf.mxu2 }
 0xa99   : > { %8850 = vmatmul.bf16.gmra.mxu3 %v17171_v55  ;;  %v8778_v55 = vpop.f32.mrf.mxu1 }
 0xaa1   : > { %v18279_v17 = vpop.f32.mrf.mxu1 }
 0xaa9   : > { %8855 = vmatmul.bf16.gmra.mxu3 %v17243_v13  ;;  %v13224_v13 = vld [vmem:[%s18714_s11 + $0x78] sm:$0xff]  ;;  %v8783_v54 = vpop.f32.mrf.mxu1 }
 0xaaa   : > { %9439 = vmatpush.bf16.msrb.mxu2 %v13224_v13 }
 0xaac   : > { %v8305_v24 = vpop.f32.mrf.mxu3  ;;  %v8407_v47 = vpop.f32.mrf.mxu2 }
 0xaad   : > { %v18273_v2 = vadd.f32 %v8305_v24, %v17927_v30  ;;  %v18275_v42 = vadd.f32 %v8407_v47, %v8374_v60  ;;  %v18288_v30 = vpop.f32.mrf.mxu0  ;;  %v13214_v24 = vld [vmem:[%s18714_s11 + $0x28] sm:$0xff] }
 0xaae   : > { %9417 = vmatpush.bf16.msrb.mxu1 %v13214_v24 }
 0xaaf   : > { %18932 = vst [vmem:[#allocation47_spill] sm:$0xff] %v18275_v42 }
 0xab1   : > { %v18306_v61 = vpop.f32.mrf.mxu1 }
 0xab2   : > { %9418 = vmatpush.bf16.msrb.mxu1 %v13213_v46  ;;  %v13231_v46 = vld [vmem:[%s18714_s11 + $0xb0] sm:$0xff] }
 0xab4   : > { %v18277_v43 = vpop.f32.mrf.mxu3  ;;  %v18353_v15 = vpop.f32.mrf.mxu2 }
 0xab5   : > { %v8754_v51 = vpop.f32.mrf.mxu0 }
 0xab9   : > { %8860 = vmatmul.bf16.gmra.mxu3 %v17441_v3  ;;  %v13223_v3 = vld [vmem:[%s18714_s11 + $0x70] sm:$0xff] }
 0xaba   : > { %9440 = vmatpush.bf16.msrb.mxu2 %v13223_v3 }
 0xabc   : > { %v8710_v19 = vpop.f32.mrf.mxu3  ;;  %v8812_v14 = vpop.f32.mrf.mxu2 }
 0xabd   : > { %v8745_v6 = vadd.f32 %v8744_v26, %v8710_v19  ;;  %v18308_v26 = vpop.f32.mrf.mxu0 }
 0xabe   : > { %9441 = vmatpush.bf16.msrb.mxu2 %v13222_v27  ;;  %v13220_v27 = vld [vmem:[%s18714_s11 + $0x58] sm:$0xff] }
 0xabf   : > { %v18290_v1 = vadd.f32 %v8778_v55, %v8745_v6  ;;  %v8788_v55 = vpop.f32.mrf.mxu1 }
 0xac4   : > { %v18297_v21 = vpop.f32.mrf.mxu3 }
 0xac5   : > { %v8759_v13 = vpop.f32.mrf.mxu0 }
 0xac9   : > { %8865 = vmatmul.bf16.gmra.mxu3 %v17485_v36  ;;  %v13230_v36 = vld [vmem:[%s18714_s11 + $0xa8] sm:$0xff] }
 0xacc   : > { %v8715_v40 = vpop.f32.mrf.mxu3 }
 0xacd   : > { %v8750_v0 = vadd.f32 %v8749_v28, %v8715_v40  ;;  %v13221_v28 = vld [vmem:[%s18714_s11 + $0x60] sm:$0xff]  ;;  %v13232_v40 = vld [vmem:[%s18714_s11 + $0xb8] sm:$0xff] }
 0xace   : > { %9442 = vmatpush.bf16.msrb.mxu2 %v13221_v28  ;;  %9463 = vmatpush.bf16.msrb.mxu3 %v13232_v40  ;;  %v13240_v28 = vld [vmem:[%s18714_s11 + $0xf8] sm:$0xff] }
 0xacf   : > { %v18310_v60 = vadd.f32 %v8783_v54, %v8750_v0  ;;  %v18327_v54 = vpop.f32.mrf.mxu1  ;;  %v13212_v0 = vld [vmem:[%s18714_s11 + $0x18] sm:$0xff]  ;;  %9487 = vmatpush.bf16.msrb.mxu0 %v13240_v28  ;;  %v13239_v28 = vld [vmem:[%s18714_s11 + $0xf0] sm:$0xff] }
 0xad0   : > { %9419 = vmatpush.bf16.msrb.mxu1 %v13212_v0 }
 0xad2   : > { %9443 = vmatpush.bf16.msrb.mxu2 %v13220_v27  ;;  %9464 = vmatpush.bf16.msrb.mxu3 %v13231_v46 }
 0xad3   : > { %9488 = vmatpush.bf16.msrb.mxu0 %v13239_v28  ;;  %v8274_v28 = vadd.f32 %v18027_v44, %v18164_v9 }
 0xad4   : > { %v18317_v47 = vpop.f32.mrf.mxu3 }
 0xad5   : > { %v18403_v44 = vadd.f32 %v18277_v43, %v8274_v28 }
 0xad6   : > { %9465 = vmatpush.bf16.msrb.mxu3 %v13230_v36  ;;  %v13217_v36 = vld [vmem:[%s18714_s11 + $0x40] sm:$0xff] }
 0xadc   : > { %v8720_v19 = vpop.f32.mrf.mxu3 }
 0xadd   : > { %v8755_v6 = vadd.f32 %v8754_v51, %v8720_v19  ;;  %v8761_v51 = vpop.f32.mrf.mxu0  ;;  %v8793_v19 = vpop.f32.mrf.mxu1 }
 0xadf   : > { %v18325_v3 = vadd.f32 %v8788_v55, %v8755_v6  ;;  %v13219_v55 = vld [vmem:[%s18714_s11 + $0x50] sm:$0xff] }
 0xae0   : > { %9444 = vmatpush.bf16.msrb.mxu2 %v13219_v55  ;;  %v13211_v55 = vld [vmem:[%s18714_s11 + $0x10] sm:$0xff] }
 0xae1   : > { %9420 = vmatpush.bf16.msrb.mxu1 %v13211_v55  ;;  %v8814_v55 = vpop.f32.mrf.mxu2 }
 0xae4   : > { %v18340_v24 = vpop.f32.mrf.mxu3 }
 0xae5   : > { %v8764_v6 = vpop.f32.mrf.mxu0  ;;  %v8795_v23 = vpop.f32.mrf.mxu1 }
 0xaec   : > { %v8725_v27 = vpop.f32.mrf.mxu3 }
 0xaed   : > { %v8760_v40 = vadd.f32 %v8759_v13, %v8725_v27  ;;  %v13218_v13 = vld [vmem:[%s18714_s11 + $0x48] sm:$0xff]  ;;  %v8766_v46 = vpop.f32.mrf.mxu0 }
 0xaee   : > { %9445 = vmatpush.bf16.msrb.mxu2 %v13218_v13 }
 0xaef   : > { %v18351_v0 = vadd.f32 %v8793_v19, %v8760_v40  ;;  %v18369_v19 = vadd.f32 %v18265_v45, %v8269_v10  ;;  %v13210_v10 = vld [vmem:[%s18714_s11 + $0x8] sm:$0xff] }
 0xaf0   : > { %9421 = vmatpush.bf16.msrb.mxu1 %v13210_v10 }
 0xaf2   : > { %9446 = vmatpush.bf16.msrb.mxu2 %v13217_v36  ;;  %v13248_v36 = vld [vmem:[%s18714_s11 + $0x138] sm:$0xff] }
 0xaf4   : > { %v8727_v33 = vpop.f32.mrf.mxu3 }
 0xaf5   : > { %v8762_v42 = vadd.f32 %v8761_v51, %v8727_v33  ;;  %v8798_v33 = vpop.f32.mrf.mxu1 }
 0xaf7   : > { %v18371_v27 = vadd.f32 %v8795_v23, %v8762_v42  ;;  %v8880_v42 = vpop.f32.mrf.mxu0  ;;  %v13228_v23 = vld [vmem:[%s18714_s11 + $0x98] sm:$0xff] }
 0xafc   : > { %v8730_v51 = vpop.f32.mrf.mxu3 }
 0xafd   : > { %v8765_v40 = vadd.f32 %v8764_v6, %v8730_v51  ;;  %v13238_v6 = vld [vmem:[%s18714_s11 + $0xe8] sm:$0xff]  ;;  %v8800_v10 = vpop.f32.mrf.mxu1 }
 0xafe   : > { %9489 = vmatpush.bf16.msrb.mxu0 %v13238_v6  ;;  %v13237_v6 = vld [vmem:[%s18714_s11 + $0xe0] sm:$0xff] }
 0xaff   : > { %v18381_v45 = vadd.f32 %v8798_v33, %v8765_v40  ;;  %v13229_v33 = vld [vmem:[%s18714_s11 + $0xa0] sm:$0xff] }
 0xb00   : > { %v13209_v40 = vld [vmem:[%s18714_s11] sm:$0xff]  ;;  %9466 = vmatpush.bf16.msrb.mxu3 %v13229_v33  ;;  %v8817_v33 = vpop.f32.mrf.mxu2 }
 0xb01   : > { %9422 = vmatpush.bf16.msrb.mxu1 %v13209_v40  ;;  %v13227_v40 = vld [vmem:[%s18714_s11 + $0x90] sm:$0xff] }
 0xb02   : > { %9490 = vmatpush.bf16.msrb.mxu0 %v13237_v6  ;;  %v13226_v6 = vld [vmem:[%s18714_s11 + $0x88] sm:$0xff] }
 0xb04   : > { %v8732_v13 = vpop.f32.mrf.mxu3  ;;  %9467 = vmatpush.bf16.msrb.mxu3 %v13228_v23 }
 0xb05   : > { %v8767_v51 = vadd.f32 %v8766_v46, %v8732_v13  ;;  %v8882_v13 = vpop.f32.mrf.mxu0  ;;  %9511 = vmatpush.bf16.msra.mxu1 %v13248_v36 }
 0xb06   : > { %9491 = vmatpush.bf16.msrb.mxu0 %v13236_v57  ;;  %v8747_v57 = vadd.f32 %v18269_v41, %v18297_v21  ;;  %v8254_v41 = vadd.f32 %v17709_v32, %v17739_v59  ;;  %v13233_v32 = vld [vmem:[%s18714_s11 + $0xc0] sm:$0xff] }
 0xb07   : > { %v18405_v9 = vadd.f32 %v8800_v10, %v8767_v51  ;;  %v13256_v51 = vld [vmem:[%s18714_s11 + $0x178] sm:$0xff]  ;;  %v13235_v10 = vld [vmem:[%s18714_s11 + $0xd0] sm:$0xff] }
 0xb08   : > { %9535 = vmatpush.bf16.msra.mxu2 %v13256_v51  ;;  %9468 = vmatpush.bf16.msrb.mxu3 %v13227_v40  ;;  %v8781_v21 = vadd.f32 %v18279_v17, %v8747_v57  ;;  %v8288_v59 = vadd.f32 %v18196_v37, %v8254_v41  ;;  %v13254_v17 = vld [vmem:[%s18714_s11 + $0x168] sm:$0xff] }
 0xb09   : > { %v8923_v46 = vmax.f32 %v18403_v44, %v18405_v9  ;;  %v13246_v37 = vld [vmem:[%s18714_s11 + $0x128] sm:$0xff] }
 0xb0a   : > { %9492 = vmatpush.bf16.msrb.mxu0 %v13235_v10  ;;  %v13255_v10 = vld [vmem:[%s18714_s11 + $0x170] sm:$0xff] }
 0xb0c   : > { %v8846_v43 = vpop.f32.mrf.mxu3  ;;  %9469 = vmatpush.bf16.msrb.mxu3 %v13226_v6  ;;  %9536 = vmatpush.bf16.msra.mxu2 %v13255_v10  ;;  %v8361_v10 = vadd.f32 %v18222_v4, %v18114_v63 }
 0xb0d   : > { %v8847_v28 = vadd.f32 %v8846_v43, %v8812_v14  ;;  %v13234_v43 = vld [vmem:[%s18714_s11 + $0xc8] sm:$0xff]  ;;  %v8885_v51 = vpop.f32.mrf.mxu0 }
 0xb0e   : > { %9493 = vmatpush.bf16.msrb.mxu0 %v13234_v43  ;;  %v8395_v63 = vadd.f32 %v18232_v62, %v8361_v10  ;;  %v13251_v62 = vld [vmem:[%s18714_s11 + $0x150] sm:$0xff] }
 0xb0f   : > { %v8881_v23 = vadd.f32 %v8880_v42, %v8847_v28  ;;  %v18933_v42 = vmax.f32 %v18170_v7, %v18290_v1  ;;  %v13247_v7 = vld [vmem:[%s18714_s11 + $0x130] sm:$0xff]  ;;  %v13225_v1 = vld [vmem:[%s18714_s11 + $0x80] sm:$0xff] }
 0xb10   : > { %9512 = vmatpush.bf16.msra.mxu1 %v13247_v7  ;;  %9470 = vmatpush.bf16.msrb.mxu3 %v13225_v1 }
 0xb11   : > { %v8906_v14 = vmax.f32 %v18172_v22, %v8881_v23  ;;  %v8356_v22 = vadd.f32 %v18188_v31, %v18059_v11  ;;  %v8907_v23 = vmax.f32 %v8288_v59, %v8781_v21  ;;  %9537 = vmatpush.bf16.msra.mxu2 %v13254_v17 }
 0xb12   : > { %9494 = vmatpush.bf16.msrb.mxu0 %v13233_v32 }
 0xb13   : > { %v8925_v28 = vpack.c.bf16 %v8906_v14, %v18933_v42  ;;  %v8390_v11 = vadd.f32 %v18198_v49, %v8356_v22  ;;  %v13253_v49 = vld [vmem:[%s18714_s11 + $0x160] sm:$0xff] }
 0xb14   : > { %v8848_v36 = vpop.f32.mrf.mxu3  ;;  %9513 = vmatpush.bf16.msra.mxu1 %v13246_v37 }
 0xb15   : > { %8935 = vst [vmem:[#allocation7] sm:$0xff] %v8925_v28  ;;  %v8849_v40 = vadd.f32 %v8848_v36, %v8814_v55  ;;  %v8819_v55 = vpop.f32.mrf.mxu2  ;;  %9538 = vmatpush.bf16.msra.mxu2 %v13253_v49  ;;  %v8752_v28 = vadd.f32 %v18288_v30, %v18317_v47 }
 0xb17   : > { %v8883_v31 = vadd.f32 %v8882_v13, %v8849_v40  ;;  %v8887_v13 = vpop.f32.mrf.mxu0  ;;  %v8259_v40 = vadd.f32 %v17794_v39, %v17813_v48  ;;  %v8786_v30 = vadd.f32 %v18306_v61, %v8752_v28  ;;  %v13252_v39 = vld [vmem:[%s18714_s11 + $0x158] sm:$0xff] }
 0xb19   : > { %v8908_v57 = vmax.f32 %v8390_v11, %v8883_v31  ;;  %v8293_v48 = vadd.f32 %v18230_v52, %v8259_v40  ;;  %9539 = vmatpush.bf16.msra.mxu2 %v13252_v39 }
 0xb1b   : > { %v8926_v14 = vpack.c.bf16 %v8908_v57, %v8907_v23  ;;  %v8911_v11 = vmax.f32 %v8293_v48, %v8786_v30  ;;  %v13243_v57 = vld [vmem:[%s18714_s11 + $0x110] sm:$0xff] }
 0xb1c   : > { %v8851_v6 = vpop.f32.mrf.mxu3  ;;  %v12268_v21 = vld [vmem:[#allocation7] sm:$0xf]  ;;  %v13195_v1 = vld [vmem:[#allocation7 + $0x4] sm:$0xf] }
 0xb1d   : > { %8936 = vst [vmem:[#allocation7 + $0x8] sm:$0xff] %v8926_v14  ;;  %v8852_v43 = vadd.f32 %v8851_v6, %v8817_v33  ;;  %v8822_v41 = vpop.f32.mrf.mxu2  ;;  %v18934_v33 = vmax.f32 %v18210_v58, %v18310_v60  ;;  %v13245_v58 = vld [vmem:[%s18714_s11 + $0x120] sm:$0xff]  ;;  %v13244_v60 = vld [vmem:[%s18714_s11 + $0x118] sm:$0xff]  ;;  %9540 = vmatpush.bf16.msra.mxu2 %v13251_v62  ;;  %v13250_v6 = vld [vmem:[%s18714_s11 + $0x148] sm:$0xff] }
 0xb1e   : > { %9514 = vmatpush.bf16.msra.mxu1 %v13245_v58 }
 0xb1f   : > { %v8886_v42 = vadd.f32 %v8885_v51, %v8852_v43  ;;  %v8890_v61 = vpop.f32.mrf.mxu0  ;;  %v8757_v43 = vadd.f32 %v18308_v26, %v18340_v24 }
 0xb21   : > { %v8910_v36 = vmax.f32 %v18212_v50, %v8886_v42  ;;  %v18935_v42 = vmax.f32 %v18238_v35, %v18325_v3  ;;  %9541 = vmatpush.bf16.msra.mxu2 %v13250_v6  ;;  %v13249_v3 = vld [vmem:[%s18714_s11 + $0x140] sm:$0xff]  ;;  %v18938_v6 = vld [vmem:[#allocation47_spill] sm:$0xff] }
 0xb22   : > { %9515 = vmatpush.bf16.msra.mxu1 %v13244_v60 }
 0xb23   : > { %v8927_v22 = vpack.c.bf16 %v8910_v36, %v18934_v33  ;;  %v8366_v33 = vadd.f32 %v18244_v38, %v18166_v20 }
 0xb24   : > { %v8853_v51 = vpop.f32.mrf.mxu3  ;;  %v13196_v7 = vld [vmem:[#allocation7 + $0x4] sm:$0xf0]  ;;  %v12270_v32 = vld [vmem:[#allocation7 + $0x8] sm:$0xf0] }
 0xb25   : > { %8937 = vst [vmem:[#allocation7 + $0x10] sm:$0xff] %v8927_v22  ;;  %v8854_v50 = vadd.f32 %v8853_v51, %v8819_v55  ;;  %v12269_v47 = vor.u32 %v13196_v7, %v12268_v21  ;;  %v12273_v59 = vor.u32 %v13195_v1, %v12270_v32  ;;  %v8824_v55 = vpop.f32.mrf.mxu2  ;;  %v8791_v21 = vadd.f32 %v18327_v54, %v8757_v43 }
 0xb26   : > { %9516 = vmatpush.bf16.msra.mxu1 %v13243_v57  ;;  %v8400_v20 = vadd.f32 %v18250_v56, %v8366_v33  ;;  %9542 = vmatpush.bf16.msra.mxu2 %v13249_v3  ;;  %v18936_v56 = vmax.f32 %v18254_v8, %v18351_v0  ;;  %v18941_v33 = vld [vmem:[#allocation10_spill] sm:$0xff] }
 0xb27   : > { %v8888_v4 = vadd.f32 %v8887_v13, %v8854_v50  ;;  %9423 = vmatmul.bf16.vlgmr.msrb.gmra.mxu1 %v12269_v47  ;;  %9447 = vmatmul.bf16.vlgmr.msrb.gmra.mxu2 %v12273_v59  ;;  %v8892_v49 = vpop.f32.mrf.mxu0  ;;  %v13242_v13 = vld [vmem:[%s18714_s11 + $0x108] sm:$0xff] }
 0xb29   : > { %v8912_v31 = vmax.f32 %v8395_v63, %v8888_v4 }
 0xb2a   : > { %9517 = vmatpush.bf16.msra.mxu1 %v13242_v13 }
 0xb2b   : > { %v8928_v17 = vpack.c.bf16 %v8912_v31, %v8911_v11  ;;  %v8371_v11 = vadd.f32 %v18258_v29, %v18246_v34 }
 0xb2c   : > { %v8856_v23 = vpop.f32.mrf.mxu3  ;;  %v12276_v36 = vld [vmem:[#allocation7 + $0x10] sm:$0xf] }
 0xb2d   : > { %8938 = vst [vmem:[#allocation7 + $0x18] sm:$0xff] %v8928_v17  ;;  %v8857_v52 = vadd.f32 %v8856_v23, %v8822_v41  ;;  %v8264_v41 = vadd.f32 %v17857_v16, %v17861_v18  ;;  %v8827_v51 = vpop.f32.mrf.mxu2  ;;  %v13241_v16 = vld [vmem:[%s18714_s11 + $0x100] sm:$0xff]  ;;  %v8405_v23 = vadd.f32 %v18267_v12, %v8371_v11 }
 0xb2e   : > { %9518 = vmatpush.bf16.msra.mxu1 %v13241_v16 }
 0xb2f   : > { %v8891_v14 = vadd.f32 %v8890_v61, %v8857_v52  ;;  %v8298_v18 = vadd.f32 %v18248_v53, %v8264_v41  ;;  %v8895_v1 = vpop.f32.mrf.mxu0  ;;  %v18937_v52 = vmax.f32 %v18369_v19, %v18371_v27  ;;  %v18940_v41 = vld [vmem:[#allocation9_spill] sm:$0xff] }
 0xb30   : > { %v8376_v19 = vadd.f32 %v18941_v33, %v18940_v41 }
 0xb31   : > { %v8914_v37 = vmax.f32 %v18240_v25, %v8891_v14  ;;  %v13197_v25 = vld [vmem:[#allocation7 + $0x14] sm:$0xf]  ;;  %v8915_v54 = vmax.f32 %v8298_v18, %v8791_v21 }
 0xb33   : > { %v8929_v28 = vpack.c.bf16 %v8914_v37, %v18935_v42 }
 0xb34   : > { %v8858_v26 = vpop.f32.mrf.mxu3  ;;  %v13198_v24 = vld [vmem:[#allocation7 + $0x14] sm:$0xf0]  ;;  %v12278_v22 = vld [vmem:[#allocation7 + $0x18] sm:$0xf0] }
 0xb35   : > { %8939 = vst [vmem:[#allocation7 + $0x20] sm:$0xff] %v8929_v28  ;;  %v8859_v40 = vadd.f32 %v8858_v26, %v8824_v55  ;;  %v12277_v10 = vor.u32 %v13198_v24, %v12276_v36  ;;  %v12281_v35 = vor.u32 %v13197_v25, %v12278_v22  ;;  %v8829_v59 = vpop.f32.mrf.mxu2 }
 0xb37   : > { %v8893_v38 = vadd.f32 %v8892_v49, %v8859_v40  ;;  %9428 = vmatmul.bf16.gmra.mxu1 %v12277_v10  ;;  %9452 = vmatmul.bf16.gmra.mxu2 %v12281_v35  ;;  %v8897_v48 = vpop.f32.mrf.mxu0  ;;  %v18939_v49 = vmax.f32 %v18273_v2, %v18381_v45  ;;  %v8410_v2 = vadd.f32 %v18353_v15, %v8376_v19  ;;  %v13271_v19 = vld [vmem:[%s18716_s13 + $0x58] sm:$0xff] }
 0xb38   : > { %9471 = vmatmul.bf16.vlgmr.msrb.gmra.mxu3 %v12277_v10  ;;  %9495 = vmatmul.bf16.vlgmr.msrb.gmra.mxu0 %v12281_v35 }
 0xb39   : > { %v8916_v7 = vmax.f32 %v8400_v20, %v8893_v38 }
 0xb3b   : > { %v8930_v32 = vpack.c.bf16 %v8916_v7, %v8915_v54 }
 0xb3c   : > { %v8861_v30 = vpop.f32.mrf.mxu3  ;;  %v12284_v39 = vld [vmem:[#allocation7 + $0x20] sm:$0xf]  ;;  %v13199_v61 = vld [vmem:[#allocation7 + $0x24] sm:$0xf] }
 0xb3d   : > { %8940 = vst [vmem:[#allocation7 + $0x28] sm:$0xff] %v8930_v32  ;;  %v8862_v50 = vadd.f32 %v8861_v30, %v8827_v51  ;;  %v8832_v0 = vpop.f32.mrf.mxu2  ;;  %v12300_v28 = vld [vmem:[#allocation7 + $0x20] sm:$0xf]  ;;  %v13203_v36 = vld [vmem:[#allocation7 + $0x24] sm:$0xf] }
 0xb3f   : > { %v8896_v47 = vadd.f32 %v8895_v1, %v8862_v50  ;;  %v8900_v57 = vpop.f32.mrf.mxu0 }
 0xb41   : > { %v8918_v53 = vmax.f32 %v18256_v5, %v8896_v47 }
 0xb43   : > { %v8931_v58 = vpack.c.bf16 %v8918_v53, %v18936_v56 }
 0xb44   : > { %v8863_v63 = vpop.f32.mrf.mxu3  ;;  %v13200_v4 = vld [vmem:[#allocation7 + $0x24] sm:$0xf0]  ;;  %v12286_v60 = vld [vmem:[#allocation7 + $0x28] sm:$0xf0] }
 0xb45   : > { %8941 = vst [vmem:[#allocation7 + $0x30] sm:$0xff] %v8931_v58  ;;  %v8864_v31 = vadd.f32 %v8863_v63, %v8829_v59  ;;  %v12285_v17 = vor.u32 %v13200_v4, %v12284_v39  ;;  %v12289_v55 = vor.u32 %v13199_v61, %v12286_v60  ;;  %v13204_v37 = vld [vmem:[#allocation7 + $0x24] sm:$0xf0]  ;;  %v12302_v12 = vld [vmem:[#allocation7 + $0x28] sm:$0xf0]  ;;  %v8834_v27 = vpop.f32.mrf.mxu2  ;;  %v13266_v4 = vld [vmem:[%s18716_s13 + $0x30] sm:$0xff] }
 0xb46   : > { %v12301_v21 = vor.u32 %v13204_v37, %v12300_v28  ;;  %v12305_v3 = vor.u32 %v13203_v36, %v12302_v12  ;;  %v13267_v39 = vld [vmem:[%s18716_s13 + $0x38] sm:$0xff]  ;;  %v13265_v61 = vld [vmem:[%s18716_s13 + $0x28] sm:$0xff] }
 0xb47   : > { %v8898_v5 = vadd.f32 %v8897_v48, %v8864_v31  ;;  %9433 = vmatmul.bf16.gmra.mxu1 %v12285_v17  ;;  %9457 = vmatmul.bf16.gmra.mxu2 %v12289_v55  ;;  %v8902_v51 = vpop.f32.mrf.mxu0  ;;  %v13264_v31 = vld [vmem:[%s18716_s13 + $0x20] sm:$0xff] }
 0xb48   : > { %9476 = vmatmul.bf16.gmra.mxu3 %v12285_v17  ;;  %9500 = vmatmul.bf16.gmra.mxu0 %v12289_v55  ;;  %v13263_v55 = vld [vmem:[%s18716_s13 + $0x18] sm:$0xff] }
 0xb49   : > { %v8920_v8 = vmax.f32 %v8405_v23, %v8898_v5  ;;  %9813 = vmatpush.bf16.msra.mxu3 %v13267_v39  ;;  %v13275_v23 = vld [vmem:[%s18716_s13 + $0x78] sm:$0xff] }
 0xb4a   : > { %9827 = vmatpush.bf16.msra.mxu0 %v13275_v23 }
 0xb4b   : > { %v8932_v62 = vpack.c.bf16 %v8920_v8, %v18937_v52  ;;  %v18573_v52 = vld [vmem:[%s18715_s12] ss:$0 sm:$0xff] }
 0xb4c   : > { %v8866_v14 = vpop.f32.mrf.mxu3  ;;  %v12292_v42 = vld [vmem:[#allocation7 + $0x30] sm:$0xf]  ;;  %v13201_v25 = vld [vmem:[#allocation7 + $0x34] sm:$0xf] }
 0xb4d   : > { %8942 = vst [vmem:[#allocation7 + $0x38] sm:$0xff] %v8932_v62  ;;  %v8867_v34 = vadd.f32 %v8866_v14, %v8832_v0  ;;  %v12308_v54 = vld [vmem:[#allocation7 + $0x30] sm:$0xf]  ;;  %v13205_v7 = vld [vmem:[#allocation7 + $0x34] sm:$0xf]  ;;  %9814 = vmatpush.bf16.msra.mxu3 %v13266_v4  ;;  %v13262_v62 = vld [vmem:[%s18716_s13 + $0x10] sm:$0xff] }
 0xb4e   : > { %v13279_v4 = vld [vmem:[%s18716_s13 + $0x98] sm:$0xff] }
 0xb4f   : > { %v8901_v29 = vadd.f32 %v8900_v57, %v8867_v34  ;;  %v13274_v57 = vld [vmem:[%s18716_s13 + $0x70] sm:$0xff] }
 0xb50   : > { %9828 = vmatpush.bf16.msra.mxu0 %v13274_v57 }
 0xb51   : > { %v8922_v43 = vmax.f32 %v18938_v6, %v8901_v29  ;;  %9815 = vmatpush.bf16.msra.mxu3 %v13265_v61  ;;  %v13261_v29 = vld [vmem:[%s18716_s13 + $0x8] sm:$0xff] }
 0xb52   : > { %v13273_v6 = vld [vmem:[%s18716_s13 + $0x68] sm:$0xff] }
 0xb53   : > { %v8933_v13 = vpack.c.bf16 %v8922_v43, %v18939_v49 }
 0xb54   : > { %v8868_v26 = vpop.f32.mrf.mxu3  ;;  %v13202_v24 = vld [vmem:[#allocation7 + $0x34] sm:$0xf0]  ;;  %v12294_v22 = vld [vmem:[#allocation7 + $0x38] sm:$0xf0]  ;;  %9829 = vmatpush.bf16.msra.mxu0 %v13273_v6 }
 0xb55   : > { %8943 = vst [vmem:[#allocation7 + $0x40] sm:$0xff] %v8933_v13  ;;  %v8869_v40 = vadd.f32 %v8868_v26, %v8834_v27  ;;  %v12293_v10 = vor.u32 %v13202_v24, %v12292_v42  ;;  %v12297_v35 = vor.u32 %v13201_v25, %v12294_v22  ;;  %v13206_v20 = vld [vmem:[#allocation7 + $0x34] sm:$0xf0]  ;;  %v12310_v38 = vld [vmem:[#allocation7 + $0x38] sm:$0xf0]  ;;  %9816 = vmatpush.bf16.msra.mxu3 %v13264_v31  ;;  %v13260_v13 = vld [vmem:[%s18716_s13] sm:$0xff] }
 0xb56   : > { %v12309_v1 = vor.u32 %v13206_v20, %v12308_v54  ;;  %v12313_v32 = vor.u32 %v13205_v7, %v12310_v38  ;;  %v13272_v42 = vld [vmem:[%s18716_s13 + $0x60] sm:$0xff]  ;;  %v13283_v27 = vld [vmem:[%s18716_s13 + $0xb8] sm:$0xff]  ;;  %v13269_v20 = vld [vmem:[%s18716_s13 + $0x48] sm:$0xff] }
 0xb57   : > { %v8903_v45 = vadd.f32 %v8902_v51, %v8869_v40  ;;  %9519 = vmatmul.bf16.vlgmr.msra.gmra.mxu1 %v12301_v21  ;;  %9543 = vmatmul.bf16.vlgmr.msra.gmra.mxu2 %v12305_v3  ;;  %v13281_v38 = vld [vmem:[%s18716_s13 + $0xa8] sm:$0xff] }
 0xb58   : > { %9481 = vmatmul.bf16.gmra.mxu3 %v12293_v10  ;;  %9505 = vmatmul.bf16.gmra.mxu0 %v12297_v35  ;;  %v13270_v10 = vld [vmem:[%s18716_s13 + $0x50] sm:$0xff] }
 0xb59   : > { %v8924_v16 = vmax.f32 %v8410_v2, %v8903_v45  ;;  %9817 = vmatpush.bf16.msra.mxu3 %v13263_v55  ;;  %9830 = vmatpush.bf16.msra.mxu0 %v13272_v42  ;;  %v13282_v35 = vld [vmem:[%s18716_s13 + $0xb0] sm:$0xff] }
 0xb5b   : > { %v8934_v18 = vpack.c.bf16 %v8924_v16, %v8923_v46  ;;  %v18613_v16 = vld [vmem:[%s18715_s12 + $0x1] ss:$0 sm:$0xff] }
 0xb5c   : > { %v12316_v50 = vld [vmem:[#allocation7 + $0x40] sm:$0xf]  ;;  %v13207_v47 = vld [vmem:[#allocation7 + $0x44] sm:$0xf] }
 0xb5d   : > { %8944 = vst [vmem:[#allocation7 + $0x48] sm:$0xff] %v8934_v18  ;;  %9818 = vmatpush.bf16.msra.mxu3 %v13262_v62  ;;  %9831 = vmatpush.bf16.msra.mxu0 %v13271_v19 }
 0xb61   : > { %9819 = vmatpush.bf16.msra.mxu3 %v13261_v29  ;;  %9832 = vmatpush.bf16.msra.mxu0 %v13270_v10 }
 0xb64   : > { %v13208_v15 = vld [vmem:[#allocation7 + $0x44] sm:$0xf0]  ;;  %v12318_v30 = vld [vmem:[#allocation7 + $0x48] sm:$0xf0] }
 0xb65   : > { %v12317_v59 = vor.u32 %v13208_v15, %v12316_v50  ;;  %v12321_v53 = vor.u32 %v13207_v47, %v12318_v30  ;;  %9820 = vmatpush.bf16.msra.mxu3 %v13260_v13  ;;  %9833 = vmatpush.bf16.msra.mxu0 %v13269_v20  ;;  %v18626_v47 = vld [vmem:[%s18715_s12 + $0x2] ss:$0 sm:$0xff] }
 0xb66   : > { %v13276_v13 = vld [vmem:[%s18716_s13 + $0x80] sm:$0xff] }
 0xb67   : > { %9524 = vmatmul.bf16.gmra.mxu1 %v12309_v1  ;;  %9548 = vmatmul.bf16.gmra.mxu2 %v12313_v32 }
 0xb69   : > { %9841 = vmatpush.bf16.msrb.mxu3 %v13283_v27 }
 0xb6d   : > { %9842 = vmatpush.bf16.msrb.mxu3 %v13282_v35 }
 0xb71   : > { %9843 = vmatpush.bf16.msrb.mxu3 %v13281_v38 }
 0xb77   : > { %9529 = vmatmul.bf16.gmra.mxu1 %v12317_v59  ;;  %9553 = vmatmul.bf16.gmra.mxu2 %v12321_v53  ;;  %v13268_v53 = vld [vmem:[%s18716_s13 + $0x40] sm:$0xff] }
 0xb78   : > { %9834 = vmatpush.bf16.msra.mxu0 %v13268_v53  ;;  %v13289_v53 = vld [vmem:[%s18718_s15 + $0x28] sm:$0xff] }
 0xba4   : > { %v9424_v56 = vpop.f32.mrf.mxu1 }
 0xba5   : > { %v9425_v34 = vadd.f32 %v18573_v52, %v9424_v56  ;;  %v13280_v56 = vld [vmem:[%s18716_s13 + $0xa0] sm:$0xff] }
 0xba6   : > { %9844 = vmatpush.bf16.msrb.mxu3 %v13280_v56  ;;  %v13286_v56 = vld [vmem:[%s18718_s15 + $0x10] sm:$0xff] }
 0xbaa   : > { %v9448_v44 = vpop.f32.mrf.mxu2  ;;  %9845 = vmatpush.bf16.msrb.mxu3 %v13279_v4 }
 0xbab   : > { %v9449_v37 = vadd.f32 %v9448_v44, %v9425_v34 }
 0xbac   : > { %v9426_v9 = vpop.f32.mrf.mxu1 }
 0xbad   : > { %v9427_v36 = vadd.f32 %v18573_v52, %v9426_v9 }
 0xbb2   : > { %v9450_v46 = vpop.f32.mrf.mxu2 }
 0xbb3   : > { %v9451_v41 = vadd.f32 %v9450_v46, %v9427_v36 }
 0xbb4   : > { %v9429_v58 = vpop.f32.mrf.mxu1 }
 0xbb5   : > { %v9496_v8 = vpop.f32.mrf.mxu0  ;;  %v9430_v2 = vadd.f32 %v18573_v52, %v9429_v58 }
 0xbba   : > { %v18543_v48 = vpop.f32.mrf.mxu2 }
 0xbbb   : > { %v9472_v17 = vpop.f32.mrf.mxu3  ;;  %v9454_v7 = vadd.f32 %v18543_v48, %v9430_v2 }
 0xbbc   : > { %v18545_v63 = vpop.f32.mrf.mxu1  ;;  %v9473_v49 = vadd.f32 %v9472_v17, %v9449_v37 }
 0xbbd   : > { %v9498_v28 = vpop.f32.mrf.mxu0  ;;  %v9432_v44 = vadd.f32 %v18573_v52, %v18545_v63 }
 0xbbe   : > { %v9497_v33 = vadd.f32 %v9496_v8, %v9473_v49 }
 0xbc2   : > { %v18553_v60 = vpop.f32.mrf.mxu2 }
 0xbc3   : > { %v9474_v14 = vpop.f32.mrf.mxu3  ;;  %v9456_v46 = vadd.f32 %v18553_v60, %v9432_v44  ;;  %v13278_v60 = vld [vmem:[%s18716_s13 + $0x90] sm:$0xff]  ;;  %v13285_v44 = vld [vmem:[%s18718_s15 + $0x8] sm:$0xff] }
 0xbc4   : > { %v18555_v11 = vpop.f32.mrf.mxu1  ;;  %v9475_v25 = vadd.f32 %v9474_v14, %v9451_v41  ;;  %9846 = vmatpush.bf16.msrb.mxu3 %v13278_v60  ;;  %v13277_v14 = vld [vmem:[%s18716_s13 + $0x88] sm:$0xff] }
 0xbc5   : > { %v9501_v51 = vpop.f32.mrf.mxu0  ;;  %v9435_v34 = vadd.f32 %v18573_v52, %v18555_v11  ;;  %v13291_v11 = vld [vmem:[%s18718_s15 + $0x38] sm:$0xff] }
 0xbc6   : > { %v9499_v3 = vadd.f32 %v9498_v28, %v9475_v25  ;;  %9926 = vmatpush.bf16.msrb.mxu1 %v13291_v11 }
 0xbc8   : > { %9847 = vmatpush.bf16.msrb.mxu3 %v13277_v14 }
 0xbca   : > { %v18566_v5 = vpop.f32.mrf.mxu2 }
 0xbcb   : > { %v9477_v26 = vpop.f32.mrf.mxu3 }
 0xbcc   : > { %v18568_v0 = vpop.f32.mrf.mxu1  ;;  %v9478_v30 = vadd.f32 %v9477_v26, %v9454_v7  ;;  %9848 = vmatpush.bf16.msrb.mxu3 %v13276_v13 }
 0xbcd   : > { %v9503_v61 = vpop.f32.mrf.mxu0 }
 0xbce   : > { %v9502_v48 = vadd.f32 %v9501_v51, %v9478_v30 }
 0xbd2   : > { %v18588_v43 = vpop.f32.mrf.mxu2 }
 0xbd3   : > { %v9479_v32 = vpop.f32.mrf.mxu3 }
 0xbd4   : > { %v9520_v12 = vpop.f32.mrf.mxu1  ;;  %v9480_v17 = vadd.f32 %v9479_v32, %v9456_v46 }
 0xbd5   : > { %v9521_v22 = vadd.f32 %v9520_v12, %v9497_v33  ;;  %v9459_v12 = vadd.f32 %v18566_v5, %v9435_v34  ;;  %v9506_v42 = vpop.f32.mrf.mxu0  ;;  %v9437_v5 = vadd.f32 %v18573_v52, %v18568_v0  ;;  %v13895_v34 = vld [vmem:[%s18719_s16] ss:$0 sm:$0xff] }
 0xbd6   : > { %v9504_v57 = vadd.f32 %v9503_v61, %v9480_v17 }
 0xbda   : > { %v9544_v24 = vpop.f32.mrf.mxu2 }
 0xbdb   : > { %v9545_v40 = vadd.f32 %v9544_v24, %v9521_v22  ;;  %v9482_v62 = vpop.f32.mrf.mxu3  ;;  %v9461_v24 = vadd.f32 %v18588_v43, %v9437_v5 }
 0xbdc   : > { %v9522_v21 = vpop.f32.mrf.mxu1  ;;  %v9483_v41 = vadd.f32 %v9482_v62, %v9459_v12 }
 0xbdd   : > { %v9559_v45 = vmax.f32 %v9545_v40, 0.0  ;;  %v9523_v18 = vadd.f32 %v9522_v21, %v9499_v3  ;;  %v9508_v2 = vpop.f32.mrf.mxu0 }
 0xbde   : > { %v9507_v21 = vadd.f32 %v9506_v42, %v9483_v41 }
 0xbdf   : > { %v9567_v50 = vmul.f32 %v18613_v16, %v9559_v45 }
 0xbe1   : > { %v9575_v58 = vadd.f32 %v18626_v47, %v9567_v50 }
 0xbe2   : > { %v9546_v54 = vpop.f32.mrf.mxu2 }
 0xbe3   : > { %v9547_v1 = vadd.f32 %v9546_v54, %v9523_v18  ;;  %v9484_v26 = vpop.f32.mrf.mxu3 }
 0xbe4   : > { %v9525_v15 = vpop.f32.mrf.mxu1  ;;  %v9485_v10 = vadd.f32 %v9484_v26, %v9461_v24 }
 0xbe5   : > { %v9560_v59 = vmax.f32 %v9547_v1, 0.0  ;;  %v9526_v63 = vadd.f32 %v9525_v15, %v9502_v48  ;;  %v13894_v48 = vld [vmem:[%s18717_s14] ss:$0 sm:$0xff] }
 0xbe6   : > { %v9509_v52 = vadd.f32 %v9508_v2, %v9485_v10 }
 0xbe7   : > { %v9568_v9 = vmul.f32 %v18613_v16, %v9560_v59  ;;  %v13290_v59 = vld [vmem:[%s18718_s15 + $0x30] sm:$0xff] }
 0xbe8   : > { %9927 = vmatpush.bf16.msrb.mxu1 %v13290_v59 }
 0xbe9   : > { %v9576_v39 = vadd.f32 %v18626_v47, %v9568_v9  ;;  %v13284_v9 = vld [vmem:[%s18718_s15] sm:$0xff] }
 0xbea   : > { %v9549_v31 = vpop.f32.mrf.mxu2 }
 0xbeb   : > { %v13767_v55 = vpack.c.bf16 %v9576_v39, %v9575_v58  ;;  %v9550_v8 = vadd.f32 %v9549_v31, %v9526_v63 }
 0xbec   : > { %v9527_v23 = vpop.f32.mrf.mxu1  ;;  %9928 = vmatpush.bf16.msrb.mxu1 %v13289_v53 }
 0xbed   : > { %13768 = vst [vmem:[#allocation8 + $0x10] sm:$0xff] %v13767_v55   ;;  %v9561_v29 = vmax.f32 %v9550_v8, 0.0  ;;  %v9528_v6 = vadd.f32 %v9527_v23, %v9504_v57 }
 0xbef   : > { %v9569_v33 = vmul.f32 %v18613_v16, %v9561_v29 }
 0xbf1   : > { %v9577_v25 = vadd.f32 %v18626_v47, %v9569_v33 }
 0xbf2   : > { %v9551_v37 = vpop.f32.mrf.mxu2 }
 0xbf3   : > { %v9552_v49 = vadd.f32 %v9551_v37, %v9528_v6 }
 0xbf4   : > { %v9530_v28 = vpop.f32.mrf.mxu1  ;;  %v13257_v36 = vld [vmem:[#allocation8 + $0x10] sm:$0xff] }
 0xbf5   : > { %v9562_v19 = vmax.f32 %v9552_v49, 0.0  ;;  %9821 = vmatmul.bf16.vlgmr.msra.gmra.mxu3 %v13257_v36  ;;  %v9531_v3 = vadd.f32 %v9530_v28, %v9507_v21 }
 0xbf7   : > { %v9570_v27 = vmul.f32 %v18613_v16, %v9562_v19 }
 0xbf9   : > { %v9578_v22 = vadd.f32 %v18626_v47, %v9570_v27 }
 0xbfa   : > { %v9554_v40 = vpop.f32.mrf.mxu2 }
 0xbfb   : > { %v13772_v35 = vpack.c.bf16 %v9578_v22, %v9577_v25  ;;  %v9555_v51 = vadd.f32 %v9554_v40, %v9531_v3 }
 0xbfc   : > { %v9532_v0 = vpop.f32.mrf.mxu1 }
 0xbfd   : > { %13875 = vst [vmem:[#allocation8] sm:$0xff] %v13772_v35   ;;  %v9563_v45 = vmax.f32 %v9555_v51, 0.0  ;;  %v9533_v18 = vadd.f32 %v9532_v0, %v9509_v52 }
 0xbff   : > { %v9571_v43 = vmul.f32 %v18613_v16, %v9563_v45 }
 0xc01   : > { %v9579_v32 = vadd.f32 %v18626_v47, %v9571_v43 }
 0xc02   : > { %v9556_v20 = vpop.f32.mrf.mxu2 }
 0xc03   : > { %v9557_v38 = vadd.f32 %v9556_v20, %v9533_v18 }
 0xc04   : > { %v13258_v54 = vld [vmem:[#allocation8] sm:$0xff] }
 0xc05   : > { %v9564_v7 = vmax.f32 %v9557_v38, 0.0  ;;  %9835 = vmatmul.bf16.vlgmr.msra.gmra.mxu0 %v13258_v54 }
 0xc07   : > { %v9572_v1 = vmul.f32 %v18613_v16, %v9564_v7  ;;  %v13288_v16 = vld [vmem:[%s18718_s15 + $0x20] sm:$0xff] }
 0xc08   : > { %9929 = vmatpush.bf16.msrb.mxu1 %v13288_v16 }
 0xc09   : > { %v9580_v15 = vadd.f32 %v18626_v47, %v9572_v1  ;;  %v13287_v47 = vld [vmem:[%s18718_s15 + $0x18] sm:$0xff] }
 0xc0b   : > { %v13777_v30 = vpack.c.bf16 %v9580_v15, %v9579_v32 }
 0xc0c   : > { %9930 = vmatpush.bf16.msrb.mxu1 %v13287_v47 }
 0xc0d   : > { %13876 = vst [vmem:[#allocation8 + $0x8] sm:$0xff] %v13777_v30  }
 0xc10   : > { %9931 = vmatpush.bf16.msrb.mxu1 %v13286_v56 }
 0xc14   : > { %v13259_v50 = vld [vmem:[#allocation8 + $0x8] sm:$0xff]  ;;  %9932 = vmatpush.bf16.msrb.mxu1 %v13285_v44 }
 0xc15   : > { %9849 = vmatmul.bf16.vlgmr.msrb.gmra.mxu3 %v13259_v50 }
 0xc18   : > { %9933 = vmatpush.bf16.msrb.mxu1 %v13284_v9 }
 0xc78   : > { %v9822_v46 = vpop.f32.mrf.mxu3 }
 0xc79   : > { %v9823_v61 = vadd.f32 %v13894_v48, %v9822_v46 }
 0xc80   : > { %v9824_v58 = vpop.f32.mrf.mxu3 }
 0xc81   : > { %v9825_v17 = vadd.f32 %v13894_v48, %v9824_v58 }
 0xc82   : > { %v9836_v39 = vpop.f32.mrf.mxu0 }
 0xc83   : > { %v9837_v55 = vadd.f32 %v9836_v39, %v9823_v61 }
 0xc8a   : > { %v9838_v31 = vpop.f32.mrf.mxu0 }
 0xc8b   : > { %v9839_v63 = vadd.f32 %v9838_v31, %v9825_v17 }
 0xc98   : > { %v9850_v4 = vpop.f32.mrf.mxu3 }
 0xc99   : > { %v9851_v23 = vadd.f32 %v9850_v4, %v9837_v55 }
 0xc9b   : > { %v9855_v62 = vmax.f32 %v9851_v23, 0.0 }
 0xca0   : > { %v9852_v8 = vpop.f32.mrf.mxu3 }
 0xca1   : > { %v9853_v60 = vadd.f32 %v9852_v8, %v9839_v63 }
 0xca3   : > { %v9856_v57 = vmax.f32 %v9853_v60, 0.0 }
 0xca5   : > { %v9857_v14 = vpack.c.bf16 %v9856_v57, %v9855_v62 }
 0xca7   : > { %9934 = vmatmul.bf16.vlgmr.msrb.gmra.mxu1 %v9857_v14 }
 0xd24   : > { %v9935_v29 = vpop.f32.mrf.mxu1 }
 0xd25   : > { %v9936_v6 = vadd.f32 %v13895_v34, %v9935_v29 }
 0xd27   : > { %9940 = vmax.xlane.f32.xlu0 %v9936_v6 }
 0xd2c   : > { %v9937_v37 = vpop.f32.mrf.mxu1 }
 0xd2d   : > { %v9938_v12 = vadd.f32 %v13895_v34, %v9937_v37 }
 0xd2f   : > { %9942 = vmax.xlane.f32.xlu0 %v9938_v12 }
 0xd9a   : > { %v9941_v49 = vpop.xlane.xlu0 %9940 }
 0xd9b   : > { %v9944_v13 = vsub.f32 %v9936_v6, %v9941_v49 }
 0xd9d   : > { %v9946_v42 = vmul.f32 1.442695, %v9944_v13 }
 0xd9f   : > { %13896 = vpow2.f32 %v9946_v42 }
 0xda2   : > { %v9943_v28 = vpop.xlane.xlu0 %9942 }
 0xda3   : > { %v9945_v36 = vsub.f32 %v9938_v12, %v9943_v28 }
 0xda5   : > { %v13897_v41 = vpop.eup %13896  ;;  %v9948_v33 = vmul.f32 1.442695, %v9945_v36 }
 0xda6   : > { %9950 = vadd.xlane.f32.xlu1 %v13897_v41 }
 0xda7   : > { %13898 = vpow2.f32 %v9948_v33 }
 0xdad   : > { %v13899_v19 = vpop.eup %13898 }
 0xdae   : > { %9952 = vadd.xlane.f32.xlu1 %v13899_v19 }
 0xe19   : > { %v9951_v11 = vpop.xlane.xlu1 %9950 }
 0xe1a   : > { %13900 = vrcp.f32 %v9951_v11  ;;  %v9965_v25 = vand.u32 2147483648, %v9951_v11  ;;  %v9963_v21 = vand.u32 2147483647, %v9951_v11  ;;  %vm9959_vm1 = vweird.f32 %v9951_v11 }
 0xe1c   : > { %v9966_v35 = vor.u32 1.1754944e-38, %v9965_v25  ;;  %vm9964_vm3 = vcmp.eq.f32.partialorder %v9963_v21, 8.507059e+37 }
 0xe20   : > { %v13901_v5 = vpop.eup %13900 }
 0xe21   : > { %v9955_v27 = vmul.f32 %v13901_v5, %v9951_v11  ;;  %v9953_v26 = vpop.xlane.xlu1 %9952  ;;  %vm9960_vm0 = vweird.f32 %v13901_v5 }
 0xe22   : > { %13902 = vrcp.f32 %v9953_v26  ;;  %vm9961_vm2 = vmor %vm9959_vm1, %vm9960_vm0  ;;  %v9980_v45 = vand.u32 2147483648, %v9953_v26  ;;  %v9978_v20 = vand.u32 2147483647, %v9953_v26  ;;  %vm9974_vm5 = vweird.f32 %v9953_v26 }
 0xe23   : > { %v9956_v24 = vsub.f32 1.0, %v9955_v27 }
 0xe24   : > { %v9981_v54 = vor.u32 1.1754944e-38, %v9980_v45  ;;  %vm9979_vm7 = vcmp.eq.f32.partialorder %v9978_v20, 8.507059e+37 }
 0xe25   : > { %v9957_v22 = vmul.f32 %v13901_v5, %v9956_v24 }
 0xe27   : > { %v9958_v40 = vadd.f32 %v13901_v5, %v9957_v22 }
 0xe28   : > { %v13903_v10 = vpop.eup %13902 }
 0xe29   : > { %v9962_v3 = vsel %vm9961_vm2, %v13901_v5, %v9958_v40  ;;  %v9970_v51 = vmul.f32 %v13903_v10, %v9953_v26  ;;  %vm9975_vm4 = vweird.f32 %v13903_v10 }
 0xe2a   : > { %v9967_v2 = vsel %vm9964_vm3, %v9966_v35, %v9962_v3  ;;  %vm9976_vm6 = vmor %vm9974_vm5, %vm9975_vm4 }
 0xe2b   : > { %v9968_v0 = vmul.f32 %v13897_v41, %v9967_v2  ;;  %v9971_v52 = vsub.f32 1.0, %v9970_v51 }
 0xe2d   : > { %9984 = vst [vmem:[%s548_s19] sm:$0xff] %v9968_v0  ;;  %v9972_v18 = vmul.f32 %v13903_v10, %v9971_v52 }
 0xe2f   : > { %v9973_v38 = vadd.f32 %v13903_v10, %v9972_v18 }
 0xe31   : > { %v9977_v43 = vsel %vm9976_vm6, %v13903_v10, %v9973_v38 }
 0xe32   : > { %v9982_v7 = vsel %vm9979_vm7, %v9981_v54, %v9977_v43 }
 0xe33   : > { %v9983_v1 = vmul.f32 %v13899_v19, %v9982_v7 }
 0xe35   : > { %9985 = vst [vmem:[%s548_s19 + $0x8] sm:$0xff] %v9983_v1 }
 0xe36 PF: > { %s27_s24 = sadd.s32 1, %s13948_s24  }
 0xe37   : > { %p24_p4 = scmp.ge.s32.totalorder %s27_s24, 4  }
 0xe39   :  { %26 = sbr.rel (!%p24_p4) target bundleno = 3 (0x3), region = 124 }

</bundles_post_ra>
